<compile_context>
chip_gen: v6e
topology: v6e:2x2x1
jax: 0.10.0
libtpu: 0.0.40
codegen_flags: <defaults>
</compile_context>

<pallas_src>
import jax
import jax.numpy as jnp
from jax import lax
from jax.experimental import pallas as pl
from jax.experimental.pallas import tpu as pltpu

NUM_INPUTS = 28 * 28      # 784
NUM_HIDDEN = 1000
NUM_OUTPUTS = 10
NUM_STEPS = 25
BETA = 1.0
THRESHOLD = 1.0           # snn.Leaky default

# Lane/sublane-aligned padded sizes used inside the kernel.
HIDDEN_PAD = 1024          # 8 * 128 -> lane-full hidden vregs, MXU-aligned K
OUT_PAD = 128              # lane-dense output dim (sliced back to 10 outside)


def _leaky_update(mem_prev, cur):
    """snn.Leaky step (reset computed from mem_prev, strict '>' threshold)."""
    reset = (mem_prev > THRESHOLD).astype(jnp.float32)
    decayed = mem_prev if BETA == 1.0 else BETA * mem_prev
    sub = reset if THRESHOLD == 1.0 else reset * THRESHOLD
    mem = decayed + cur - sub
    spk = (mem > THRESHOLD).astype(jnp.float32)
    return spk, mem


def snn_kernel(x_ref, w1_ref, b1_ref, w2_ref, b2_ref,
               spk_out_ref, mem_out_ref,
               spk1_rec_ref, cur2_ref):
    b_pad = x_ref.shape[0]
    h_pad = w1_ref.shape[1]
    o_pad = w2_ref.shape[1]

    # fc1 is loop-invariant (x constant across time steps): one MXU matmul,
    # bias added once (no repeated broadcast inside the loop).
    cur1 = jnp.dot(x_ref[...], w1_ref[...],
                   preferred_element_type=jnp.float32) + b1_ref[...]

    # ---- Phase 1: lif1 recurrence (pure VPU); record spk1 for every step. ----
    def lif1_step(step, mem1):
        spk1, mem1_new = _leaky_update(mem1, cur1)
        row = pl.multiple_of(step * b_pad, b_pad)
        spk1_rec_ref[pl.ds(row, b_pad), :] = spk1
        return mem1_new

    lax.fori_loop(0, NUM_STEPS, lif1_step,
                  jnp.zeros((b_pad, h_pad), jnp.float32), unroll=True)

    # ---- Phase 2: ONE batched fc2 matmul over all time steps. ----
    # (NUM_STEPS*b_pad, h_pad) @ (h_pad, o_pad) -> lane-dense cur2 slab in VMEM.
    cur2_ref[...] = jnp.dot(spk1_rec_ref[...], w2_ref[...],
                            preferred_element_type=jnp.float32) + b2_ref[...]

    # ---- Phase 3: lif2 recurrence (pure VPU); lane-dense 128-wide stores. ----
    def lif2_step(step, mem2):
        row = pl.multiple_of(step * b_pad, b_pad)
        cur2 = cur2_ref[pl.ds(row, b_pad), :]
        spk2, mem2_new = _leaky_update(mem2, cur2)
        spk_out_ref[pl.ds(row, b_pad), :] = spk2
        mem_out_ref[pl.ds(row, b_pad), :] = mem2_new
        return mem2_new

    lax.fori_loop(0, NUM_STEPS, lif2_step,
                  jnp.zeros((b_pad, o_pad), jnp.float32), unroll=True)


def net1_forward(x, w1, b1, w2, b2):
    """x:[B,784], w1:[784,1000], b1:[1,1000]/[1000], w2:[1000,10], b2:[1,10]/[10]."""
    f32 = jnp.float32
    B = x.shape[0]
    b_pad = ((B + 7) // 8) * 8          # sublane multiple (f32 -> 8)

    # Zero-pad to lane/sublane-aligned shapes. Zero padding keeps the padded
    # hidden units / output columns / batch rows silent (they never spike).
    x_p = jnp.zeros((b_pad, NUM_INPUTS), f32).at[:B, :].set(x.astype(f32))
    w1_p = jnp.zeros((NUM_INPUTS, HIDDEN_PAD), f32).at[:, :NUM_HIDDEN].set(w1.astype(f32))
    b1_p = jnp.zeros((1, HIDDEN_PAD), f32).at[:, :NUM_HIDDEN].set(
        jnp.reshape(b1, (1, -1)).astype(f32))
    w2_p = jnp.zeros((HIDDEN_PAD, OUT_PAD), f32).at[:NUM_HIDDEN, :NUM_OUTPUTS].set(
        w2.astype(f32))
    b2_p = jnp.zeros((1, OUT_PAD), f32).at[:, :NUM_OUTPUTS].set(
        jnp.reshape(b2, (1, -1)).astype(f32))

    M = NUM_STEPS * b_pad
    vmem = pltpu.MemorySpace.VMEM
    out_shape = (
        jax.ShapeDtypeStruct((M, OUT_PAD), f32),   # spk2 record (step-major rows)
        jax.ShapeDtypeStruct((M, OUT_PAD), f32),   # mem2 record
    )
    spk_flat, mem_flat = pl.pallas_call(
        snn_kernel,
        out_shape=out_shape,
        in_specs=[pl.BlockSpec(memory_space=vmem)] * 5,
        out_specs=(pl.BlockSpec(memory_space=vmem),
                   pl.BlockSpec(memory_space=vmem)),
        scratch_shapes=[
            pltpu.VMEM((M, HIDDEN_PAD), f32),   # spk1 record -> batched fc2 LHS
            pltpu.VMEM((M, OUT_PAD), f32),      # cur2 slab for the lif2 loop
        ],
    )(x_p, w1_p, b1_p, w2_p, b2_p)
    # TODO(synk): for large B (>=128), tile the spk1 record / batched fc2 over a
    # "parallel" batch grid axis and size the scratch against v7x's 64 MiB VMEM.

    spk = spk_flat.reshape(NUM_STEPS, b_pad, OUT_PAD)[:, :B, :NUM_OUTPUTS]
    mem = mem_flat.reshape(NUM_STEPS, b_pad, OUT_PAD)[:, :B, :NUM_OUTPUTS]
    return spk, mem


def net1_reference(x, w1, b1, w2, b2):
    """Pure-JAX reference of the PyTorch forward pass."""
    B = x.shape[0]
    mem1 = jnp.zeros((B, NUM_HIDDEN), jnp.float32)
    mem2 = jnp.zeros((B, NUM_OUTPUTS), jnp.float32)
    spk_rec, mem_rec = [], []
    for _ in range(NUM_STEPS):
        cur1 = x @ w1 + b1
        reset1 = (mem1 > THRESHOLD).astype(jnp.float32)
        mem1 = BETA * mem1 + cur1 - reset1 * THRESHOLD
        spk1 = (mem1 > THRESHOLD).astype(jnp.float32)
        cur2 = spk1 @ w2 + b2
        reset2 = (mem2 > THRESHOLD).astype(jnp.float32)
        mem2 = BETA * mem2 + cur2 - reset2 * THRESHOLD
        spk2 = (mem2 > THRESHOLD).astype(jnp.float32)
        spk_rec.append(spk2)
        mem_rec.append(mem2)
    return jnp.stack(spk_rec, 0), jnp.stack(mem_rec, 0)


if __name__ == "__main__":
    B = 2
    key = jax.random.PRNGKey(0)
    kx, kw1, kb1, kw2, kb2 = jax.random.split(key, 5)

    # Deterministic PyTorch-style init: U(-1/sqrt(fan_in), +1/sqrt(fan_in)).
    lim1 = 1.0 / (NUM_INPUTS ** 0.5)
    lim2 = 1.0 / (NUM_HIDDEN ** 0.5)
    w1 = jax.random.uniform(kw1, (NUM_INPUTS, NUM_HIDDEN), jnp.float32, -lim1, lim1)
    b1 = jax.random.uniform(kb1, (1, NUM_HIDDEN), jnp.float32, -lim1, lim1)
    w2 = jax.random.uniform(kw2, (NUM_HIDDEN, NUM_OUTPUTS), jnp.float32, -lim2, lim2)
    b2 = jax.random.uniform(kb2, (1, NUM_OUTPUTS), jnp.float32, -lim2, lim2)

    x = jax.random.normal(kx, (B, NUM_INPUTS), jnp.float32)

    spk2_rec, mem2_rec = net1_forward(x, w1, b1, w2, b2)
    jax.block_until_ready((spk2_rec, mem2_rec))

    # Correctness check vs. pure-JAX reference.
    spk_ref, mem_ref = net1_reference(x, w1, b1, w2, b2)
    assert spk2_rec.shape == (NUM_STEPS, B, NUM_OUTPUTS)
    assert mem2_rec.shape == (NUM_STEPS, B, NUM_OUTPUTS)
    assert jnp.allclose(mem2_rec, mem_ref, atol=1e-3, rtol=1e-3)
    assert jnp.allclose(spk2_rec, spk_ref, atol=1e-3)

    print("KERNEL_OK")
</pallas_src>

<mosaic_0001>
module attributes {stable_mosaic.version = 11 : i64} {
  func.func @snn_kernel(%arg0: memref<8x784xf32, #tpu.memory_space<vmem>>, %arg1: memref<784x1024xf32, #tpu.memory_space<vmem>>, %arg2: memref<1x1024xf32, #tpu.memory_space<vmem>>, %arg3: memref<1024x128xf32, #tpu.memory_space<vmem>>, %arg4: memref<1x128xf32, #tpu.memory_space<vmem>>, %arg5: memref<200x128xf32, #tpu.memory_space<vmem>>, %arg6: memref<200x128xf32, #tpu.memory_space<vmem>>, %arg7: memref<200x1024xf32, #tpu.memory_space<vmem>>, %arg8: memref<200x128xf32, #tpu.memory_space<vmem>>) attributes {dimension_semantics = [], scalar_prefetch = 0 : i64, scratch_operands = 2 : i64, tpu.core_type = #tpu.core_type<tc>} {
    %c0 = arith.constant 0 : index
    %c0_0 = arith.constant 0 : index
    %0 = vector.load %arg0[%c0, %c0_0] : memref<8x784xf32, #tpu.memory_space<vmem>>, vector<8x784xf32>
    %c0_1 = arith.constant 0 : index
    %c0_2 = arith.constant 0 : index
    %1 = vector.load %arg1[%c0_1, %c0_2] : memref<784x1024xf32, #tpu.memory_space<vmem>>, vector<784x1024xf32>
    %cst = arith.constant dense<0.000000e+00> : vector<8x1024xf32>
    %2 = tpu.matmul %0, %1, %cst {dimension_numbers = #tpu.dot_dimension_numbers<[1], [0], [0], [1], [0, 0, 1, 1], [], []>} : vector<8x784xf32>, vector<784x1024xf32>, vector<8x1024xf32> -> vector<8x1024xf32>
    %c0_3 = arith.constant 0 : index
    %c0_4 = arith.constant 0 : index
    %3 = vector.load %arg2[%c0_3, %c0_4] : memref<1x1024xf32, #tpu.memory_space<vmem>>, vector<1x1024xf32>
    %4 = vector.broadcast %3 : vector<1x1024xf32> to vector<8x1024xf32>
    %5 = arith.addf %2, %4 : vector<8x1024xf32>
    %cst_5 = arith.constant 0.000000e+00 : f32
    %6 = vector.broadcast %cst_5 : f32 to vector<8x1024xf32>
    %c0_i32 = arith.constant 0 : i32
    %cst_6 = arith.constant 1.000000e+00 : f32
    %7 = vector.broadcast %cst_6 : f32 to vector<8x1024xf32>
    %8 = arith.cmpf ogt, %6, %7 : vector<8x1024xf32>
    %9 = arith.extui %8 : vector<8x1024xi1> to vector<8x1024xi32>
    %10 = arith.sitofp %9 : vector<8x1024xi32> to vector<8x1024xf32>
    %11 = arith.addf %6, %5 : vector<8x1024xf32>
    %12 = arith.subf %11, %10 : vector<8x1024xf32>
    %cst_7 = arith.constant 1.000000e+00 : f32
    %13 = vector.broadcast %cst_7 : f32 to vector<8x1024xf32>
    %14 = arith.cmpf ogt, %12, %13 : vector<8x1024xf32>
    %15 = arith.extui %14 : vector<8x1024xi1> to vector<8x1024xi32>
    %16 = arith.sitofp %15 : vector<8x1024xi32> to vector<8x1024xf32>
    %c8_i32 = arith.constant 8 : i32
    %17 = arith.muli %c0_i32, %c8_i32 : i32
    %18 = tpu.assume_multiple %17, 8 : i32
    %19 = arith.index_cast %18 : i32 to index
    %c0_8 = arith.constant 0 : index
    %20 = vector.load %arg7[%19, %c0_8] : memref<200x1024xf32, #tpu.memory_space<vmem>>, vector<8x1024xf32>
    tpu.vector_store %arg7[%19, %c0_8], %16 {strides = array<i32>} : memref<200x1024xf32, #tpu.memory_space<vmem>>, vector<8x1024xf32>,
    %c1_i32 = arith.constant 1 : i32
    %cst_9 = arith.constant 1.000000e+00 : f32
    %21 = vector.broadcast %cst_9 : f32 to vector<8x1024xf32>
    %22 = arith.cmpf ogt, %12, %21 : vector<8x1024xf32>
    %23 = arith.extui %22 : vector<8x1024xi1> to vector<8x1024xi32>
    %24 = arith.sitofp %23 : vector<8x1024xi32> to vector<8x1024xf32>
    %25 = arith.addf %12, %5 : vector<8x1024xf32>
    %26 = arith.subf %25, %24 : vector<8x1024xf32>
    %cst_10 = arith.constant 1.000000e+00 : f32
    %27 = vector.broadcast %cst_10 : f32 to vector<8x1024xf32>
    %28 = arith.cmpf ogt, %26, %27 : vector<8x1024xf32>
    %29 = arith.extui %28 : vector<8x1024xi1> to vector<8x1024xi32>
    %30 = arith.sitofp %29 : vector<8x1024xi32> to vector<8x1024xf32>
    %c8_i32_11 = arith.constant 8 : i32
    %31 = arith.muli %c1_i32, %c8_i32_11 : i32
    %32 = tpu.assume_multiple %31, 8 : i32
    %33 = arith.index_cast %32 : i32 to index
    %c0_12 = arith.constant 0 : index
    %34 = vector.load %arg7[%33, %c0_12] : memref<200x1024xf32, #tpu.memory_space<vmem>>, vector<8x1024xf32>
    tpu.vector_store %arg7[%33, %c0_12], %30 {strides = array<i32>} : memref<200x1024xf32, #tpu.memory_space<vmem>>, vector<8x1024xf32>,
    %c2_i32 = arith.constant 2 : i32
    %cst_13 = arith.constant 1.000000e+00 : f32
    %35 = vector.broadcast %cst_13 : f32 to vector<8x1024xf32>
    %36 = arith.cmpf ogt, %26, %35 : vector<8x1024xf32>
    %37 = arith.extui %36 : vector<8x1024xi1> to vector<8x1024xi32>
    %38 = arith.sitofp %37 : vector<8x1024xi32> to vector<8x1024xf32>
    %39 = arith.addf %26, %5 : vector<8x1024xf32>
    %40 = arith.subf %39, %38 : vector<8x1024xf32>
    %cst_14 = arith.constant 1.000000e+00 : f32
    %41 = vector.broadcast %cst_14 : f32 to vector<8x1024xf32>
    %42 = arith.cmpf ogt, %40, %41 : vector<8x1024xf32>
    %43 = arith.extui %42 : vector<8x1024xi1> to vector<8x1024xi32>
    %44 = arith.sitofp %43 : vector<8x1024xi32> to vector<8x1024xf32>
    %c8_i32_15 = arith.constant 8 : i32
    %45 = arith.muli %c2_i32, %c8_i32_15 : i32
    %46 = tpu.assume_multiple %45, 8 : i32
    %47 = arith.index_cast %46 : i32 to index
    %c0_16 = arith.constant 0 : index
    %48 = vector.load %arg7[%47, %c0_16] : memref<200x1024xf32, #tpu.memory_space<vmem>>, vector<8x1024xf32>
    tpu.vector_store %arg7[%47, %c0_16], %44 {strides = array<i32>} : memref<200x1024xf32, #tpu.memory_space<vmem>>, vector<8x1024xf32>,
    %c3_i32 = arith.constant 3 : i32
    %cst_17 = arith.constant 1.000000e+00 : f32
    %49 = vector.broadcast %cst_17 : f32 to vector<8x1024xf32>
    %50 = arith.cmpf ogt, %40, %49 : vector<8x1024xf32>
    %51 = arith.extui %50 : vector<8x1024xi1> to vector<8x1024xi32>
    %52 = arith.sitofp %51 : vector<8x1024xi32> to vector<8x1024xf32>
    %53 = arith.addf %40, %5 : vector<8x1024xf32>
    %54 = arith.subf %53, %52 : vector<8x1024xf32>
    %cst_18 = arith.constant 1.000000e+00 : f32
    %55 = vector.broadcast %cst_18 : f32 to vector<8x1024xf32>
    %56 = arith.cmpf ogt, %54, %55 : vector<8x1024xf32>
    %57 = arith.extui %56 : vector<8x1024xi1> to vector<8x1024xi32>
    %58 = arith.sitofp %57 : vector<8x1024xi32> to vector<8x1024xf32>
    %c8_i32_19 = arith.constant 8 : i32
    %59 = arith.muli %c3_i32, %c8_i32_19 : i32
    %60 = tpu.assume_multiple %59, 8 : i32
    %61 = arith.index_cast %60 : i32 to index
    %c0_20 = arith.constant 0 : index
    %62 = vector.load %arg7[%61, %c0_20] : memref<200x1024xf32, #tpu.memory_space<vmem>>, vector<8x1024xf32>
    tpu.vector_store %arg7[%61, %c0_20], %58 {strides = array<i32>} : memref<200x1024xf32, #tpu.memory_space<vmem>>, vector<8x1024xf32>,
    %c4_i32 = arith.constant 4 : i32
    %cst_21 = arith.constant 1.000000e+00 : f32
    %63 = vector.broadcast %cst_21 : f32 to vector<8x1024xf32>
    %64 = arith.cmpf ogt, %54, %63 : vector<8x1024xf32>
    %65 = arith.extui %64 : vector<8x1024xi1> to vector<8x1024xi32>
    %66 = arith.sitofp %65 : vector<8x1024xi32> to vector<8x1024xf32>
    %67 = arith.addf %54, %5 : vector<8x1024xf32>
    %68 = arith.subf %67, %66 : vector<8x1024xf32>
    %cst_22 = arith.constant 1.000000e+00 : f32
    %69 = vector.broadcast %cst_22 : f32 to vector<8x1024xf32>
    %70 = arith.cmpf ogt, %68, %69 : vector<8x1024xf32>
    %71 = arith.extui %70 : vector<8x1024xi1> to vector<8x1024xi32>
    %72 = arith.sitofp %71 : vector<8x1024xi32> to vector<8x1024xf32>
    %c8_i32_23 = arith.constant 8 : i32
    %73 = arith.muli %c4_i32, %c8_i32_23 : i32
    %74 = tpu.assume_multiple %73, 8 : i32
    %75 = arith.index_cast %74 : i32 to index
    %c0_24 = arith.constant 0 : index
    %76 = vector.load %arg7[%75, %c0_24] : memref<200x1024xf32, #tpu.memory_space<vmem>>, vector<8x1024xf32>
    tpu.vector_store %arg7[%75, %c0_24], %72 {strides = array<i32>} : memref<200x1024xf32, #tpu.memory_space<vmem>>, vector<8x1024xf32>,
    %c5_i32 = arith.constant 5 : i32
    %cst_25 = arith.constant 1.000000e+00 : f32
    %77 = vector.broadcast %cst_25 : f32 to vector<8x1024xf32>
    %78 = arith.cmpf ogt, %68, %77 : vector<8x1024xf32>
    %79 = arith.extui %78 : vector<8x1024xi1> to vector<8x1024xi32>
    %80 = arith.sitofp %79 : vector<8x1024xi32> to vector<8x1024xf32>
    %81 = arith.addf %68, %5 : vector<8x1024xf32>
    %82 = arith.subf %81, %80 : vector<8x1024xf32>
    %cst_26 = arith.constant 1.000000e+00 : f32
    %83 = vector.broadcast %cst_26 : f32 to vector<8x1024xf32>
    %84 = arith.cmpf ogt, %82, %83 : vector<8x1024xf32>
    %85 = arith.extui %84 : vector<8x1024xi1> to vector<8x1024xi32>
    %86 = arith.sitofp %85 : vector<8x1024xi32> to vector<8x1024xf32>
    %c8_i32_27 = arith.constant 8 : i32
    %87 = arith.muli %c5_i32, %c8_i32_27 : i32
    %88 = tpu.assume_multiple %87, 8 : i32
    %89 = arith.index_cast %88 : i32 to index
    %c0_28 = arith.constant 0 : index
    %90 = vector.load %arg7[%89, %c0_28] : memref<200x1024xf32, #tpu.memory_space<vmem>>, vector<8x1024xf32>
    tpu.vector_store %arg7[%89, %c0_28], %86 {strides = array<i32>} : memref<200x1024xf32, #tpu.memory_space<vmem>>, vector<8x1024xf32>,
    %c6_i32 = arith.constant 6 : i32
    %cst_29 = arith.constant 1.000000e+00 : f32
    %91 = vector.broadcast %cst_29 : f32 to vector<8x1024xf32>
    %92 = arith.cmpf ogt, %82, %91 : vector<8x1024xf32>
    %93 = arith.extui %92 : vector<8x1024xi1> to vector<8x1024xi32>
    %94 = arith.sitofp %93 : vector<8x1024xi32> to vector<8x1024xf32>
    %95 = arith.addf %82, %5 : vector<8x1024xf32>
    %96 = arith.subf %95, %94 : vector<8x1024xf32>
    %cst_30 = arith.constant 1.000000e+00 : f32
    %97 = vector.broadcast %cst_30 : f32 to vector<8x1024xf32>
    %98 = arith.cmpf ogt, %96, %97 : vector<8x1024xf32>
    %99 = arith.extui %98 : vector<8x1024xi1> to vector<8x1024xi32>
    %100 = arith.sitofp %99 : vector<8x1024xi32> to vector<8x1024xf32>
    %c8_i32_31 = arith.constant 8 : i32
    %101 = arith.muli %c6_i32, %c8_i32_31 : i32
    %102 = tpu.assume_multiple %101, 8 : i32
    %103 = arith.index_cast %102 : i32 to index
    %c0_32 = arith.constant 0 : index
    %104 = vector.load %arg7[%103, %c0_32] : memref<200x1024xf32, #tpu.memory_space<vmem>>, vector<8x1024xf32>
    tpu.vector_store %arg7[%103, %c0_32], %100 {strides = array<i32>} : memref<200x1024xf32, #tpu.memory_space<vmem>>, vector<8x1024xf32>,
    %c7_i32 = arith.constant 7 : i32
    %cst_33 = arith.constant 1.000000e+00 : f32
    %105 = vector.broadcast %cst_33 : f32 to vector<8x1024xf32>
    %106 = arith.cmpf ogt, %96, %105 : vector<8x1024xf32>
    %107 = arith.extui %106 : vector<8x1024xi1> to vector<8x1024xi32>
    %108 = arith.sitofp %107 : vector<8x1024xi32> to vector<8x1024xf32>
    %109 = arith.addf %96, %5 : vector<8x1024xf32>
    %110 = arith.subf %109, %108 : vector<8x1024xf32>
    %cst_34 = arith.constant 1.000000e+00 : f32
    %111 = vector.broadcast %cst_34 : f32 to vector<8x1024xf32>
    %112 = arith.cmpf ogt, %110, %111 : vector<8x1024xf32>
    %113 = arith.extui %112 : vector<8x1024xi1> to vector<8x1024xi32>
    %114 = arith.sitofp %113 : vector<8x1024xi32> to vector<8x1024xf32>
    %c8_i32_35 = arith.constant 8 : i32
    %115 = arith.muli %c7_i32, %c8_i32_35 : i32
    %116 = tpu.assume_multiple %115, 8 : i32
    %117 = arith.index_cast %116 : i32 to index
    %c0_36 = arith.constant 0 : index
    %118 = vector.load %arg7[%117, %c0_36] : memref<200x1024xf32, #tpu.memory_space<vmem>>, vector<8x1024xf32>
    tpu.vector_store %arg7[%117, %c0_36], %114 {strides = array<i32>} : memref<200x1024xf32, #tpu.memory_space<vmem>>, vector<8x1024xf32>,
    %c8_i32_37 = arith.constant 8 : i32
    %cst_38 = arith.constant 1.000000e+00 : f32
    %119 = vector.broadcast %cst_38 : f32 to vector<8x1024xf32>
    %120 = arith.cmpf ogt, %110, %119 : vector<8x1024xf32>
    %121 = arith.extui %120 : vector<8x1024xi1> to vector<8x1024xi32>
    %122 = arith.sitofp %121 : vector<8x1024xi32> to vector<8x1024xf32>
    %123 = arith.addf %110, %5 : vector<8x1024xf32>
    %124 = arith.subf %123, %122 : vector<8x1024xf32>
    %cst_39 = arith.constant 1.000000e+00 : f32
    %125 = vector.broadcast %cst_39 : f32 to vector<8x1024xf32>
    %126 = arith.cmpf ogt, %124, %125 : vector<8x1024xf32>
    %127 = arith.extui %126 : vector<8x1024xi1> to vector<8x1024xi32>
    %128 = arith.sitofp %127 : vector<8x1024xi32> to vector<8x1024xf32>
    %c8_i32_40 = arith.constant 8 : i32
    %129 = arith.muli %c8_i32_37, %c8_i32_40 : i32
    %130 = tpu.assume_multiple %129, 8 : i32
    %131 = arith.index_cast %130 : i32 to index
    %c0_41 = arith.constant 0 : index
    %132 = vector.load %arg7[%131, %c0_41] : memref<200x1024xf32, #tpu.memory_space<vmem>>, vector<8x1024xf32>
    tpu.vector_store %arg7[%131, %c0_41], %128 {strides = array<i32>} : memref<200x1024xf32, #tpu.memory_space<vmem>>, vector<8x1024xf32>,
    %c9_i32 = arith.constant 9 : i32
    %cst_42 = arith.constant 1.000000e+00 : f32
    %133 = vector.broadcast %cst_42 : f32 to vector<8x1024xf32>
    %134 = arith.cmpf ogt, %124, %133 : vector<8x1024xf32>
    %135 = arith.extui %134 : vector<8x1024xi1> to vector<8x1024xi32>
    %136 = arith.sitofp %135 : vector<8x1024xi32> to vector<8x1024xf32>
    %137 = arith.addf %124, %5 : vector<8x1024xf32>
    %138 = arith.subf %137, %136 : vector<8x1024xf32>
    %cst_43 = arith.constant 1.000000e+00 : f32
    %139 = vector.broadcast %cst_43 : f32 to vector<8x1024xf32>
    %140 = arith.cmpf ogt, %138, %139 : vector<8x1024xf32>
    %141 = arith.extui %140 : vector<8x1024xi1> to vector<8x1024xi32>
    %142 = arith.sitofp %141 : vector<8x1024xi32> to vector<8x1024xf32>
    %c8_i32_44 = arith.constant 8 : i32
    %143 = arith.muli %c9_i32, %c8_i32_44 : i32
    %144 = tpu.assume_multiple %143, 8 : i32
    %145 = arith.index_cast %144 : i32 to index
    %c0_45 = arith.constant 0 : index
    %146 = vector.load %arg7[%145, %c0_45] : memref<200x1024xf32, #tpu.memory_space<vmem>>, vector<8x1024xf32>
    tpu.vector_store %arg7[%145, %c0_45], %142 {strides = array<i32>} : memref<200x1024xf32, #tpu.memory_space<vmem>>, vector<8x1024xf32>,
    %c10_i32 = arith.constant 10 : i32
    %cst_46 = arith.constant 1.000000e+00 : f32
    %147 = vector.broadcast %cst_46 : f32 to vector<8x1024xf32>
    %148 = arith.cmpf ogt, %138, %147 : vector<8x1024xf32>
    %149 = arith.extui %148 : vector<8x1024xi1> to vector<8x1024xi32>
    %150 = arith.sitofp %149 : vector<8x1024xi32> to vector<8x1024xf32>
    %151 = arith.addf %138, %5 : vector<8x1024xf32>
    %152 = arith.subf %151, %150 : vector<8x1024xf32>
    %cst_47 = arith.constant 1.000000e+00 : f32
    %153 = vector.broadcast %cst_47 : f32 to vector<8x1024xf32>
    %154 = arith.cmpf ogt, %152, %153 : vector<8x1024xf32>
    %155 = arith.extui %154 : vector<8x1024xi1> to vector<8x1024xi32>
    %156 = arith.sitofp %155 : vector<8x1024xi32> to vector<8x1024xf32>
    %c8_i32_48 = arith.constant 8 : i32
    %157 = arith.muli %c10_i32, %c8_i32_48 : i32
    %158 = tpu.assume_multiple %157, 8 : i32
    %159 = arith.index_cast %158 : i32 to index
    %c0_49 = arith.constant 0 : index
    %160 = vector.load %arg7[%159, %c0_49] : memref<200x1024xf32, #tpu.memory_space<vmem>>, vector<8x1024xf32>
    tpu.vector_store %arg7[%159, %c0_49], %156 {strides = array<i32>} : memref<200x1024xf32, #tpu.memory_space<vmem>>, vector<8x1024xf32>,
    %c11_i32 = arith.constant 11 : i32
    %cst_50 = arith.constant 1.000000e+00 : f32
    %161 = vector.broadcast %cst_50 : f32 to vector<8x1024xf32>
    %162 = arith.cmpf ogt, %152, %161 : vector<8x1024xf32>
    %163 = arith.extui %162 : vector<8x1024xi1> to vector<8x1024xi32>
    %164 = arith.sitofp %163 : vector<8x1024xi32> to vector<8x1024xf32>
    %165 = arith.addf %152, %5 : vector<8x1024xf32>
    %166 = arith.subf %165, %164 : vector<8x1024xf32>
    %cst_51 = arith.constant 1.000000e+00 : f32
    %167 = vector.broadcast %cst_51 : f32 to vector<8x1024xf32>
    %168 = arith.cmpf ogt, %166, %167 : vector<8x1024xf32>
    %169 = arith.extui %168 : vector<8x1024xi1> to vector<8x1024xi32>
    %170 = arith.sitofp %169 : vector<8x1024xi32> to vector<8x1024xf32>
    %c8_i32_52 = arith.constant 8 : i32
    %171 = arith.muli %c11_i32, %c8_i32_52 : i32
    %172 = tpu.assume_multiple %171, 8 : i32
    %173 = arith.index_cast %172 : i32 to index
    %c0_53 = arith.constant 0 : index
    %174 = vector.load %arg7[%173, %c0_53] : memref<200x1024xf32, #tpu.memory_space<vmem>>, vector<8x1024xf32>
    tpu.vector_store %arg7[%173, %c0_53], %170 {strides = array<i32>} : memref<200x1024xf32, #tpu.memory_space<vmem>>, vector<8x1024xf32>,
    %c12_i32 = arith.constant 12 : i32
    %cst_54 = arith.constant 1.000000e+00 : f32
    %175 = vector.broadcast %cst_54 : f32 to vector<8x1024xf32>
    %176 = arith.cmpf ogt, %166, %175 : vector<8x1024xf32>
    %177 = arith.extui %176 : vector<8x1024xi1> to vector<8x1024xi32>
    %178 = arith.sitofp %177 : vector<8x1024xi32> to vector<8x1024xf32>
    %179 = arith.addf %166, %5 : vector<8x1024xf32>
    %180 = arith.subf %179, %178 : vector<8x1024xf32>
    %cst_55 = arith.constant 1.000000e+00 : f32
    %181 = vector.broadcast %cst_55 : f32 to vector<8x1024xf32>
    %182 = arith.cmpf ogt, %180, %181 : vector<8x1024xf32>
    %183 = arith.extui %182 : vector<8x1024xi1> to vector<8x1024xi32>
    %184 = arith.sitofp %183 : vector<8x1024xi32> to vector<8x1024xf32>
    %c8_i32_56 = arith.constant 8 : i32
    %185 = arith.muli %c12_i32, %c8_i32_56 : i32
    %186 = tpu.assume_multiple %185, 8 : i32
    %187 = arith.index_cast %186 : i32 to index
    %c0_57 = arith.constant 0 : index
    %188 = vector.load %arg7[%187, %c0_57] : memref<200x1024xf32, #tpu.memory_space<vmem>>, vector<8x1024xf32>
    tpu.vector_store %arg7[%187, %c0_57], %184 {strides = array<i32>} : memref<200x1024xf32, #tpu.memory_space<vmem>>, vector<8x1024xf32>,
    %c13_i32 = arith.constant 13 : i32
    %cst_58 = arith.constant 1.000000e+00 : f32
    %189 = vector.broadcast %cst_58 : f32 to vector<8x1024xf32>
    %190 = arith.cmpf ogt, %180, %189 : vector<8x1024xf32>
    %191 = arith.extui %190 : vector<8x1024xi1> to vector<8x1024xi32>
    %192 = arith.sitofp %191 : vector<8x1024xi32> to vector<8x1024xf32>
    %193 = arith.addf %180, %5 : vector<8x1024xf32>
    %194 = arith.subf %193, %192 : vector<8x1024xf32>
    %cst_59 = arith.constant 1.000000e+00 : f32
    %195 = vector.broadcast %cst_59 : f32 to vector<8x1024xf32>
    %196 = arith.cmpf ogt, %194, %195 : vector<8x1024xf32>
    %197 = arith.extui %196 : vector<8x1024xi1> to vector<8x1024xi32>
    %198 = arith.sitofp %197 : vector<8x1024xi32> to vector<8x1024xf32>
    %c8_i32_60 = arith.constant 8 : i32
    %199 = arith.muli %c13_i32, %c8_i32_60 : i32
    %200 = tpu.assume_multiple %199, 8 : i32
    %201 = arith.index_cast %200 : i32 to index
    %c0_61 = arith.constant 0 : index
    %202 = vector.load %arg7[%201, %c0_61] : memref<200x1024xf32, #tpu.memory_space<vmem>>, vector<8x1024xf32>
    tpu.vector_store %arg7[%201, %c0_61], %198 {strides = array<i32>} : memref<200x1024xf32, #tpu.memory_space<vmem>>, vector<8x1024xf32>,
    %c14_i32 = arith.constant 14 : i32
    %cst_62 = arith.constant 1.000000e+00 : f32
    %203 = vector.broadcast %cst_62 : f32 to vector<8x1024xf32>
    %204 = arith.cmpf ogt, %194, %203 : vector<8x1024xf32>
    %205 = arith.extui %204 : vector<8x1024xi1> to vector<8x1024xi32>
    %206 = arith.sitofp %205 : vector<8x1024xi32> to vector<8x1024xf32>
    %207 = arith.addf %194, %5 : vector<8x1024xf32>
    %208 = arith.subf %207, %206 : vector<8x1024xf32>
    %cst_63 = arith.constant 1.000000e+00 : f32
    %209 = vector.broadcast %cst_63 : f32 to vector<8x1024xf32>
    %210 = arith.cmpf ogt, %208, %209 : vector<8x1024xf32>
    %211 = arith.extui %210 : vector<8x1024xi1> to vector<8x1024xi32>
    %212 = arith.sitofp %211 : vector<8x1024xi32> to vector<8x1024xf32>
    %c8_i32_64 = arith.constant 8 : i32
    %213 = arith.muli %c14_i32, %c8_i32_64 : i32
    %214 = tpu.assume_multiple %213, 8 : i32
    %215 = arith.index_cast %214 : i32 to index
    %c0_65 = arith.constant 0 : index
    %216 = vector.load %arg7[%215, %c0_65] : memref<200x1024xf32, #tpu.memory_space<vmem>>, vector<8x1024xf32>
    tpu.vector_store %arg7[%215, %c0_65], %212 {strides = array<i32>} : memref<200x1024xf32, #tpu.memory_space<vmem>>, vector<8x1024xf32>,
    %c15_i32 = arith.constant 15 : i32
    %cst_66 = arith.constant 1.000000e+00 : f32
    %217 = vector.broadcast %cst_66 : f32 to vector<8x1024xf32>
    %218 = arith.cmpf ogt, %208, %217 : vector<8x1024xf32>
    %219 = arith.extui %218 : vector<8x1024xi1> to vector<8x1024xi32>
    %220 = arith.sitofp %219 : vector<8x1024xi32> to vector<8x1024xf32>
    %221 = arith.addf %208, %5 : vector<8x1024xf32>
    %222 = arith.subf %221, %220 : vector<8x1024xf32>
    %cst_67 = arith.constant 1.000000e+00 : f32
    %223 = vector.broadcast %cst_67 : f32 to vector<8x1024xf32>
    %224 = arith.cmpf ogt, %222, %223 : vector<8x1024xf32>
    %225 = arith.extui %224 : vector<8x1024xi1> to vector<8x1024xi32>
    %226 = arith.sitofp %225 : vector<8x1024xi32> to vector<8x1024xf32>
    %c8_i32_68 = arith.constant 8 : i32
    %227 = arith.muli %c15_i32, %c8_i32_68 : i32
    %228 = tpu.assume_multiple %227, 8 : i32
    %229 = arith.index_cast %228 : i32 to index
    %c0_69 = arith.constant 0 : index
    %230 = vector.load %arg7[%229, %c0_69] : memref<200x1024xf32, #tpu.memory_space<vmem>>, vector<8x1024xf32>
    tpu.vector_store %arg7[%229, %c0_69], %226 {strides = array<i32>} : memref<200x1024xf32, #tpu.memory_space<vmem>>, vector<8x1024xf32>,
    %c16_i32 = arith.constant 16 : i32
    %cst_70 = arith.constant 1.000000e+00 : f32
    %231 = vector.broadcast %cst_70 : f32 to vector<8x1024xf32>
    %232 = arith.cmpf ogt, %222, %231 : vector<8x1024xf32>
    %233 = arith.extui %232 : vector<8x1024xi1> to vector<8x1024xi32>
    %234 = arith.sitofp %233 : vector<8x1024xi32> to vector<8x1024xf32>
    %235 = arith.addf %222, %5 : vector<8x1024xf32>
    %236 = arith.subf %235, %234 : vector<8x1024xf32>
    %cst_71 = arith.constant 1.000000e+00 : f32
    %237 = vector.broadcast %cst_71 : f32 to vector<8x1024xf32>
    %238 = arith.cmpf ogt, %236, %237 : vector<8x1024xf32>
    %239 = arith.extui %238 : vector<8x1024xi1> to vector<8x1024xi32>
    %240 = arith.sitofp %239 : vector<8x1024xi32> to vector<8x1024xf32>
    %c8_i32_72 = arith.constant 8 : i32
    %241 = arith.muli %c16_i32, %c8_i32_72 : i32
    %242 = tpu.assume_multiple %241, 8 : i32
    %243 = arith.index_cast %242 : i32 to index
    %c0_73 = arith.constant 0 : index
    %244 = vector.load %arg7[%243, %c0_73] : memref<200x1024xf32, #tpu.memory_space<vmem>>, vector<8x1024xf32>
    tpu.vector_store %arg7[%243, %c0_73], %240 {strides = array<i32>} : memref<200x1024xf32, #tpu.memory_space<vmem>>, vector<8x1024xf32>,
    %c17_i32 = arith.constant 17 : i32
    %cst_74 = arith.constant 1.000000e+00 : f32
    %245 = vector.broadcast %cst_74 : f32 to vector<8x1024xf32>
    %246 = arith.cmpf ogt, %236, %245 : vector<8x1024xf32>
    %247 = arith.extui %246 : vector<8x1024xi1> to vector<8x1024xi32>
    %248 = arith.sitofp %247 : vector<8x1024xi32> to vector<8x1024xf32>
    %249 = arith.addf %236, %5 : vector<8x1024xf32>
    %250 = arith.subf %249, %248 : vector<8x1024xf32>
    %cst_75 = arith.constant 1.000000e+00 : f32
    %251 = vector.broadcast %cst_75 : f32 to vector<8x1024xf32>
    %252 = arith.cmpf ogt, %250, %251 : vector<8x1024xf32>
    %253 = arith.extui %252 : vector<8x1024xi1> to vector<8x1024xi32>
    %254 = arith.sitofp %253 : vector<8x1024xi32> to vector<8x1024xf32>
    %c8_i32_76 = arith.constant 8 : i32
    %255 = arith.muli %c17_i32, %c8_i32_76 : i32
    %256 = tpu.assume_multiple %255, 8 : i32
    %257 = arith.index_cast %256 : i32 to index
    %c0_77 = arith.constant 0 : index
    %258 = vector.load %arg7[%257, %c0_77] : memref<200x1024xf32, #tpu.memory_space<vmem>>, vector<8x1024xf32>
    tpu.vector_store %arg7[%257, %c0_77], %254 {strides = array<i32>} : memref<200x1024xf32, #tpu.memory_space<vmem>>, vector<8x1024xf32>,
    %c18_i32 = arith.constant 18 : i32
    %cst_78 = arith.constant 1.000000e+00 : f32
    %259 = vector.broadcast %cst_78 : f32 to vector<8x1024xf32>
    %260 = arith.cmpf ogt, %250, %259 : vector<8x1024xf32>
    %261 = arith.extui %260 : vector<8x1024xi1> to vector<8x1024xi32>
    %262 = arith.sitofp %261 : vector<8x1024xi32> to vector<8x1024xf32>
    %263 = arith.addf %250, %5 : vector<8x1024xf32>
    %264 = arith.subf %263, %262 : vector<8x1024xf32>
    %cst_79 = arith.constant 1.000000e+00 : f32
    %265 = vector.broadcast %cst_79 : f32 to vector<8x1024xf32>
    %266 = arith.cmpf ogt, %264, %265 : vector<8x1024xf32>
    %267 = arith.extui %266 : vector<8x1024xi1> to vector<8x1024xi32>
    %268 = arith.sitofp %267 : vector<8x1024xi32> to vector<8x1024xf32>
    %c8_i32_80 = arith.constant 8 : i32
    %269 = arith.muli %c18_i32, %c8_i32_80 : i32
    %270 = tpu.assume_multiple %269, 8 : i32
    %271 = arith.index_cast %270 : i32 to index
    %c0_81 = arith.constant 0 : index
    %272 = vector.load %arg7[%271, %c0_81] : memref<200x1024xf32, #tpu.memory_space<vmem>>, vector<8x1024xf32>
    tpu.vector_store %arg7[%271, %c0_81], %268 {strides = array<i32>} : memref<200x1024xf32, #tpu.memory_space<vmem>>, vector<8x1024xf32>,
    %c19_i32 = arith.constant 19 : i32
    %cst_82 = arith.constant 1.000000e+00 : f32
    %273 = vector.broadcast %cst_82 : f32 to vector<8x1024xf32>
    %274 = arith.cmpf ogt, %264, %273 : vector<8x1024xf32>
    %275 = arith.extui %274 : vector<8x1024xi1> to vector<8x1024xi32>
    %276 = arith.sitofp %275 : vector<8x1024xi32> to vector<8x1024xf32>
    %277 = arith.addf %264, %5 : vector<8x1024xf32>
    %278 = arith.subf %277, %276 : vector<8x1024xf32>
    %cst_83 = arith.constant 1.000000e+00 : f32
    %279 = vector.broadcast %cst_83 : f32 to vector<8x1024xf32>
    %280 = arith.cmpf ogt, %278, %279 : vector<8x1024xf32>
    %281 = arith.extui %280 : vector<8x1024xi1> to vector<8x1024xi32>
    %282 = arith.sitofp %281 : vector<8x1024xi32> to vector<8x1024xf32>
    %c8_i32_84 = arith.constant 8 : i32
    %283 = arith.muli %c19_i32, %c8_i32_84 : i32
    %284 = tpu.assume_multiple %283, 8 : i32
    %285 = arith.index_cast %284 : i32 to index
    %c0_85 = arith.constant 0 : index
    %286 = vector.load %arg7[%285, %c0_85] : memref<200x1024xf32, #tpu.memory_space<vmem>>, vector<8x1024xf32>
    tpu.vector_store %arg7[%285, %c0_85], %282 {strides = array<i32>} : memref<200x1024xf32, #tpu.memory_space<vmem>>, vector<8x1024xf32>,
    %c20_i32 = arith.constant 20 : i32
    %cst_86 = arith.constant 1.000000e+00 : f32
    %287 = vector.broadcast %cst_86 : f32 to vector<8x1024xf32>
    %288 = arith.cmpf ogt, %278, %287 : vector<8x1024xf32>
    %289 = arith.extui %288 : vector<8x1024xi1> to vector<8x1024xi32>
    %290 = arith.sitofp %289 : vector<8x1024xi32> to vector<8x1024xf32>
    %291 = arith.addf %278, %5 : vector<8x1024xf32>
    %292 = arith.subf %291, %290 : vector<8x1024xf32>
    %cst_87 = arith.constant 1.000000e+00 : f32
    %293 = vector.broadcast %cst_87 : f32 to vector<8x1024xf32>
    %294 = arith.cmpf ogt, %292, %293 : vector<8x1024xf32>
    %295 = arith.extui %294 : vector<8x1024xi1> to vector<8x1024xi32>
    %296 = arith.sitofp %295 : vector<8x1024xi32> to vector<8x1024xf32>
    %c8_i32_88 = arith.constant 8 : i32
    %297 = arith.muli %c20_i32, %c8_i32_88 : i32
    %298 = tpu.assume_multiple %297, 8 : i32
    %299 = arith.index_cast %298 : i32 to index
    %c0_89 = arith.constant 0 : index
    %300 = vector.load %arg7[%299, %c0_89] : memref<200x1024xf32, #tpu.memory_space<vmem>>, vector<8x1024xf32>
    tpu.vector_store %arg7[%299, %c0_89], %296 {strides = array<i32>} : memref<200x1024xf32, #tpu.memory_space<vmem>>, vector<8x1024xf32>,
    %c21_i32 = arith.constant 21 : i32
    %cst_90 = arith.constant 1.000000e+00 : f32
    %301 = vector.broadcast %cst_90 : f32 to vector<8x1024xf32>
    %302 = arith.cmpf ogt, %292, %301 : vector<8x1024xf32>
    %303 = arith.extui %302 : vector<8x1024xi1> to vector<8x1024xi32>
    %304 = arith.sitofp %303 : vector<8x1024xi32> to vector<8x1024xf32>
    %305 = arith.addf %292, %5 : vector<8x1024xf32>
    %306 = arith.subf %305, %304 : vector<8x1024xf32>
    %cst_91 = arith.constant 1.000000e+00 : f32
    %307 = vector.broadcast %cst_91 : f32 to vector<8x1024xf32>
    %308 = arith.cmpf ogt, %306, %307 : vector<8x1024xf32>
    %309 = arith.extui %308 : vector<8x1024xi1> to vector<8x1024xi32>
    %310 = arith.sitofp %309 : vector<8x1024xi32> to vector<8x1024xf32>
    %c8_i32_92 = arith.constant 8 : i32
    %311 = arith.muli %c21_i32, %c8_i32_92 : i32
    %312 = tpu.assume_multiple %311, 8 : i32
    %313 = arith.index_cast %312 : i32 to index
    %c0_93 = arith.constant 0 : index
    %314 = vector.load %arg7[%313, %c0_93] : memref<200x1024xf32, #tpu.memory_space<vmem>>, vector<8x1024xf32>
    tpu.vector_store %arg7[%313, %c0_93], %310 {strides = array<i32>} : memref<200x1024xf32, #tpu.memory_space<vmem>>, vector<8x1024xf32>,
    %c22_i32 = arith.constant 22 : i32
    %cst_94 = arith.constant 1.000000e+00 : f32
    %315 = vector.broadcast %cst_94 : f32 to vector<8x1024xf32>
    %316 = arith.cmpf ogt, %306, %315 : vector<8x1024xf32>
    %317 = arith.extui %316 : vector<8x1024xi1> to vector<8x1024xi32>
    %318 = arith.sitofp %317 : vector<8x1024xi32> to vector<8x1024xf32>
    %319 = arith.addf %306, %5 : vector<8x1024xf32>
    %320 = arith.subf %319, %318 : vector<8x1024xf32>
    %cst_95 = arith.constant 1.000000e+00 : f32
    %321 = vector.broadcast %cst_95 : f32 to vector<8x1024xf32>
    %322 = arith.cmpf ogt, %320, %321 : vector<8x1024xf32>
    %323 = arith.extui %322 : vector<8x1024xi1> to vector<8x1024xi32>
    %324 = arith.sitofp %323 : vector<8x1024xi32> to vector<8x1024xf32>
    %c8_i32_96 = arith.constant 8 : i32
    %325 = arith.muli %c22_i32, %c8_i32_96 : i32
    %326 = tpu.assume_multiple %325, 8 : i32
    %327 = arith.index_cast %326 : i32 to index
    %c0_97 = arith.constant 0 : index
    %328 = vector.load %arg7[%327, %c0_97] : memref<200x1024xf32, #tpu.memory_space<vmem>>, vector<8x1024xf32>
    tpu.vector_store %arg7[%327, %c0_97], %324 {strides = array<i32>} : memref<200x1024xf32, #tpu.memory_space<vmem>>, vector<8x1024xf32>,
    %c23_i32 = arith.constant 23 : i32
    %cst_98 = arith.constant 1.000000e+00 : f32
    %329 = vector.broadcast %cst_98 : f32 to vector<8x1024xf32>
    %330 = arith.cmpf ogt, %320, %329 : vector<8x1024xf32>
    %331 = arith.extui %330 : vector<8x1024xi1> to vector<8x1024xi32>
    %332 = arith.sitofp %331 : vector<8x1024xi32> to vector<8x1024xf32>
    %333 = arith.addf %320, %5 : vector<8x1024xf32>
    %334 = arith.subf %333, %332 : vector<8x1024xf32>
    %cst_99 = arith.constant 1.000000e+00 : f32
    %335 = vector.broadcast %cst_99 : f32 to vector<8x1024xf32>
    %336 = arith.cmpf ogt, %334, %335 : vector<8x1024xf32>
    %337 = arith.extui %336 : vector<8x1024xi1> to vector<8x1024xi32>
    %338 = arith.sitofp %337 : vector<8x1024xi32> to vector<8x1024xf32>
    %c8_i32_100 = arith.constant 8 : i32
    %339 = arith.muli %c23_i32, %c8_i32_100 : i32
    %340 = tpu.assume_multiple %339, 8 : i32
    %341 = arith.index_cast %340 : i32 to index
    %c0_101 = arith.constant 0 : index
    %342 = vector.load %arg7[%341, %c0_101] : memref<200x1024xf32, #tpu.memory_space<vmem>>, vector<8x1024xf32>
    tpu.vector_store %arg7[%341, %c0_101], %338 {strides = array<i32>} : memref<200x1024xf32, #tpu.memory_space<vmem>>, vector<8x1024xf32>,
    %c24_i32 = arith.constant 24 : i32
    %cst_102 = arith.constant 1.000000e+00 : f32
    %343 = vector.broadcast %cst_102 : f32 to vector<8x1024xf32>
    %344 = arith.cmpf ogt, %334, %343 : vector<8x1024xf32>
    %345 = arith.extui %344 : vector<8x1024xi1> to vector<8x1024xi32>
    %346 = arith.sitofp %345 : vector<8x1024xi32> to vector<8x1024xf32>
    %347 = arith.addf %334, %5 : vector<8x1024xf32>
    %348 = arith.subf %347, %346 : vector<8x1024xf32>
    %cst_103 = arith.constant 1.000000e+00 : f32
    %349 = vector.broadcast %cst_103 : f32 to vector<8x1024xf32>
    %350 = arith.cmpf ogt, %348, %349 : vector<8x1024xf32>
    %351 = arith.extui %350 : vector<8x1024xi1> to vector<8x1024xi32>
    %352 = arith.sitofp %351 : vector<8x1024xi32> to vector<8x1024xf32>
    %c8_i32_104 = arith.constant 8 : i32
    %353 = arith.muli %c24_i32, %c8_i32_104 : i32
    %354 = tpu.assume_multiple %353, 8 : i32
    %355 = arith.index_cast %354 : i32 to index
    %c0_105 = arith.constant 0 : index
    %356 = vector.load %arg7[%355, %c0_105] : memref<200x1024xf32, #tpu.memory_space<vmem>>, vector<8x1024xf32>
    tpu.vector_store %arg7[%355, %c0_105], %352 {strides = array<i32>} : memref<200x1024xf32, #tpu.memory_space<vmem>>, vector<8x1024xf32>,
    %c25_i32 = arith.constant 25 : i32
    %c0_106 = arith.constant 0 : index
    %c0_107 = arith.constant 0 : index
    %357 = vector.load %arg7[%c0_106, %c0_107] : memref<200x1024xf32, #tpu.memory_space<vmem>>, vector<200x1024xf32>
    %c0_108 = arith.constant 0 : index
    %c0_109 = arith.constant 0 : index
    %358 = vector.load %arg3[%c0_108, %c0_109] : memref<1024x128xf32, #tpu.memory_space<vmem>>, vector<1024x128xf32>
    %cst_110 = arith.constant dense<0.000000e+00> : vector<200x128xf32>
    %359 = tpu.matmul %357, %358, %cst_110 {dimension_numbers = #tpu.dot_dimension_numbers<[1], [0], [0], [1], [0, 0, 1, 1], [], []>} : vector<200x1024xf32>, vector<1024x128xf32>, vector<200x128xf32> -> vector<200x128xf32>
    %c0_111 = arith.constant 0 : index
    %c0_112 = arith.constant 0 : index
    %360 = vector.load %arg4[%c0_111, %c0_112] : memref<1x128xf32, #tpu.memory_space<vmem>>, vector<1x128xf32>
    %361 = vector.broadcast %360 : vector<1x128xf32> to vector<200x128xf32>
    %362 = arith.addf %359, %361 : vector<200x128xf32>
    %c0_113 = arith.constant 0 : index
    %c0_114 = arith.constant 0 : index
    %363 = vector.load %arg8[%c0_113, %c0_114] : memref<200x128xf32, #tpu.memory_space<vmem>>, vector<200x128xf32>
    tpu.vector_store %arg8[%c0_113, %c0_114], %362 {strides = array<i32>} : memref<200x128xf32, #tpu.memory_space<vmem>>, vector<200x128xf32>,
    %cst_115 = arith.constant 0.000000e+00 : f32
    %364 = vector.broadcast %cst_115 : f32 to vector<8x128xf32>
    %c0_i32_116 = arith.constant 0 : i32
    %c8_i32_117 = arith.constant 8 : i32
    %365 = arith.muli %c0_i32_116, %c8_i32_117 : i32
    %366 = tpu.assume_multiple %365, 8 : i32
    %367 = arith.index_cast %366 : i32 to index
    %c0_118 = arith.constant 0 : index
    %368 = vector.load %arg8[%367, %c0_118] : memref<200x128xf32, #tpu.memory_space<vmem>>, vector<8x128xf32>
    %cst_119 = arith.constant 1.000000e+00 : f32
    %369 = vector.broadcast %cst_119 : f32 to vector<8x128xf32>
    %370 = arith.cmpf ogt, %364, %369 : vector<8x128xf32>
    %371 = arith.extui %370 : vector<8x128xi1> to vector<8x128xi32>
    %372 = arith.sitofp %371 : vector<8x128xi32> to vector<8x128xf32>
    %373 = arith.addf %364, %368 : vector<8x128xf32>
    %374 = arith.subf %373, %372 : vector<8x128xf32>
    %cst_120 = arith.constant 1.000000e+00 : f32
    %375 = vector.broadcast %cst_120 : f32 to vector<8x128xf32>
    %376 = arith.cmpf ogt, %374, %375 : vector<8x128xf32>
    %377 = arith.extui %376 : vector<8x128xi1> to vector<8x128xi32>
    %378 = arith.sitofp %377 : vector<8x128xi32> to vector<8x128xf32>
    %379 = arith.index_cast %366 : i32 to index
    %c0_121 = arith.constant 0 : index
    %380 = vector.load %arg5[%379, %c0_121] : memref<200x128xf32, #tpu.memory_space<vmem>>, vector<8x128xf32>
    tpu.vector_store %arg5[%379, %c0_121], %378 {strides = array<i32>} : memref<200x128xf32, #tpu.memory_space<vmem>>, vector<8x128xf32>,
    %381 = arith.index_cast %366 : i32 to index
    %c0_122 = arith.constant 0 : index
    %382 = vector.load %arg6[%381, %c0_122] : memref<200x128xf32, #tpu.memory_space<vmem>>, vector<8x128xf32>
    tpu.vector_store %arg6[%381, %c0_122], %374 {strides = array<i32>} : memref<200x128xf32, #tpu.memory_space<vmem>>, vector<8x128xf32>,
    %c1_i32_123 = arith.constant 1 : i32
    %c8_i32_124 = arith.constant 8 : i32
    %383 = arith.muli %c1_i32_123, %c8_i32_124 : i32
    %384 = tpu.assume_multiple %383, 8 : i32
    %385 = arith.index_cast %384 : i32 to index
    %c0_125 = arith.constant 0 : index
    %386 = vector.load %arg8[%385, %c0_125] : memref<200x128xf32, #tpu.memory_space<vmem>>, vector<8x128xf32>
    %cst_126 = arith.constant 1.000000e+00 : f32
    %387 = vector.broadcast %cst_126 : f32 to vector<8x128xf32>
    %388 = arith.cmpf ogt, %374, %387 : vector<8x128xf32>
    %389 = arith.extui %388 : vector<8x128xi1> to vector<8x128xi32>
    %390 = arith.sitofp %389 : vector<8x128xi32> to vector<8x128xf32>
    %391 = arith.addf %374, %386 : vector<8x128xf32>
    %392 = arith.subf %391, %390 : vector<8x128xf32>
    %cst_127 = arith.constant 1.000000e+00 : f32
    %393 = vector.broadcast %cst_127 : f32 to vector<8x128xf32>
    %394 = arith.cmpf ogt, %392, %393 : vector<8x128xf32>
    %395 = arith.extui %394 : vector<8x128xi1> to vector<8x128xi32>
    %396 = arith.sitofp %395 : vector<8x128xi32> to vector<8x128xf32>
    %397 = arith.index_cast %384 : i32 to index
    %c0_128 = arith.constant 0 : index
    %398 = vector.load %arg5[%397, %c0_128] : memref<200x128xf32, #tpu.memory_space<vmem>>, vector<8x128xf32>
    tpu.vector_store %arg5[%397, %c0_128], %396 {strides = array<i32>} : memref<200x128xf32, #tpu.memory_space<vmem>>, vector<8x128xf32>,
    %399 = arith.index_cast %384 : i32 to index
    %c0_129 = arith.constant 0 : index
    %400 = vector.load %arg6[%399, %c0_129] : memref<200x128xf32, #tpu.memory_space<vmem>>, vector<8x128xf32>
    tpu.vector_store %arg6[%399, %c0_129], %392 {strides = array<i32>} : memref<200x128xf32, #tpu.memory_space<vmem>>, vector<8x128xf32>,
    %c2_i32_130 = arith.constant 2 : i32
    %c8_i32_131 = arith.constant 8 : i32
    %401 = arith.muli %c2_i32_130, %c8_i32_131 : i32
    %402 = tpu.assume_multiple %401, 8 : i32
    %403 = arith.index_cast %402 : i32 to index
    %c0_132 = arith.constant 0 : index
    %404 = vector.load %arg8[%403, %c0_132] : memref<200x128xf32, #tpu.memory_space<vmem>>, vector<8x128xf32>
    %cst_133 = arith.constant 1.000000e+00 : f32
    %405 = vector.broadcast %cst_133 : f32 to vector<8x128xf32>
    %406 = arith.cmpf ogt, %392, %405 : vector<8x128xf32>
    %407 = arith.extui %406 : vector<8x128xi1> to vector<8x128xi32>
    %408 = arith.sitofp %407 : vector<8x128xi32> to vector<8x128xf32>
    %409 = arith.addf %392, %404 : vector<8x128xf32>
    %410 = arith.subf %409, %408 : vector<8x128xf32>
    %cst_134 = arith.constant 1.000000e+00 : f32
    %411 = vector.broadcast %cst_134 : f32 to vector<8x128xf32>
    %412 = arith.cmpf ogt, %410, %411 : vector<8x128xf32>
    %413 = arith.extui %412 : vector<8x128xi1> to vector<8x128xi32>
    %414 = arith.sitofp %413 : vector<8x128xi32> to vector<8x128xf32>
    %415 = arith.index_cast %402 : i32 to index
    %c0_135 = arith.constant 0 : index
    %416 = vector.load %arg5[%415, %c0_135] : memref<200x128xf32, #tpu.memory_space<vmem>>, vector<8x128xf32>
    tpu.vector_store %arg5[%415, %c0_135], %414 {strides = array<i32>} : memref<200x128xf32, #tpu.memory_space<vmem>>, vector<8x128xf32>,
    %417 = arith.index_cast %402 : i32 to index
    %c0_136 = arith.constant 0 : index
    %418 = vector.load %arg6[%417, %c0_136] : memref<200x128xf32, #tpu.memory_space<vmem>>, vector<8x128xf32>
    tpu.vector_store %arg6[%417, %c0_136], %410 {strides = array<i32>} : memref<200x128xf32, #tpu.memory_space<vmem>>, vector<8x128xf32>,
    %c3_i32_137 = arith.constant 3 : i32
    %c8_i32_138 = arith.constant 8 : i32
    %419 = arith.muli %c3_i32_137, %c8_i32_138 : i32
    %420 = tpu.assume_multiple %419, 8 : i32
    %421 = arith.index_cast %420 : i32 to index
    %c0_139 = arith.constant 0 : index
    %422 = vector.load %arg8[%421, %c0_139] : memref<200x128xf32, #tpu.memory_space<vmem>>, vector<8x128xf32>
    %cst_140 = arith.constant 1.000000e+00 : f32
    %423 = vector.broadcast %cst_140 : f32 to vector<8x128xf32>
    %424 = arith.cmpf ogt, %410, %423 : vector<8x128xf32>
    %425 = arith.extui %424 : vector<8x128xi1> to vector<8x128xi32>
    %426 = arith.sitofp %425 : vector<8x128xi32> to vector<8x128xf32>
    %427 = arith.addf %410, %422 : vector<8x128xf32>
    %428 = arith.subf %427, %426 : vector<8x128xf32>
    %cst_141 = arith.constant 1.000000e+00 : f32
    %429 = vector.broadcast %cst_141 : f32 to vector<8x128xf32>
    %430 = arith.cmpf ogt, %428, %429 : vector<8x128xf32>
    %431 = arith.extui %430 : vector<8x128xi1> to vector<8x128xi32>
    %432 = arith.sitofp %431 : vector<8x128xi32> to vector<8x128xf32>
    %433 = arith.index_cast %420 : i32 to index
    %c0_142 = arith.constant 0 : index
    %434 = vector.load %arg5[%433, %c0_142] : memref<200x128xf32, #tpu.memory_space<vmem>>, vector<8x128xf32>
    tpu.vector_store %arg5[%433, %c0_142], %432 {strides = array<i32>} : memref<200x128xf32, #tpu.memory_space<vmem>>, vector<8x128xf32>,
    %435 = arith.index_cast %420 : i32 to index
    %c0_143 = arith.constant 0 : index
    %436 = vector.load %arg6[%435, %c0_143] : memref<200x128xf32, #tpu.memory_space<vmem>>, vector<8x128xf32>
    tpu.vector_store %arg6[%435, %c0_143], %428 {strides = array<i32>} : memref<200x128xf32, #tpu.memory_space<vmem>>, vector<8x128xf32>,
    %c4_i32_144 = arith.constant 4 : i32
    %c8_i32_145 = arith.constant 8 : i32
    %437 = arith.muli %c4_i32_144, %c8_i32_145 : i32
    %438 = tpu.assume_multiple %437, 8 : i32
    %439 = arith.index_cast %438 : i32 to index
    %c0_146 = arith.constant 0 : index
    %440 = vector.load %arg8[%439, %c0_146] : memref<200x128xf32, #tpu.memory_space<vmem>>, vector<8x128xf32>
    %cst_147 = arith.constant 1.000000e+00 : f32
    %441 = vector.broadcast %cst_147 : f32 to vector<8x128xf32>
    %442 = arith.cmpf ogt, %428, %441 : vector<8x128xf32>
    %443 = arith.extui %442 : vector<8x128xi1> to vector<8x128xi32>
    %444 = arith.sitofp %443 : vector<8x128xi32> to vector<8x128xf32>
    %445 = arith.addf %428, %440 : vector<8x128xf32>
    %446 = arith.subf %445, %444 : vector<8x128xf32>
    %cst_148 = arith.constant 1.000000e+00 : f32
    %447 = vector.broadcast %cst_148 : f32 to vector<8x128xf32>
    %448 = arith.cmpf ogt, %446, %447 : vector<8x128xf32>
    %449 = arith.extui %448 : vector<8x128xi1> to vector<8x128xi32>
    %450 = arith.sitofp %449 : vector<8x128xi32> to vector<8x128xf32>
    %451 = arith.index_cast %438 : i32 to index
    %c0_149 = arith.constant 0 : index
    %452 = vector.load %arg5[%451, %c0_149] : memref<200x128xf32, #tpu.memory_space<vmem>>, vector<8x128xf32>
    tpu.vector_store %arg5[%451, %c0_149], %450 {strides = array<i32>} : memref<200x128xf32, #tpu.memory_space<vmem>>, vector<8x128xf32>,
    %453 = arith.index_cast %438 : i32 to index
    %c0_150 = arith.constant 0 : index
    %454 = vector.load %arg6[%453, %c0_150] : memref<200x128xf32, #tpu.memory_space<vmem>>, vector<8x128xf32>
    tpu.vector_store %arg6[%453, %c0_150], %446 {strides = array<i32>} : memref<200x128xf32, #tpu.memory_space<vmem>>, vector<8x128xf32>,
    %c5_i32_151 = arith.constant 5 : i32
    %c8_i32_152 = arith.constant 8 : i32
    %455 = arith.muli %c5_i32_151, %c8_i32_152 : i32
    %456 = tpu.assume_multiple %455, 8 : i32
    %457 = arith.index_cast %456 : i32 to index
    %c0_153 = arith.constant 0 : index
    %458 = vector.load %arg8[%457, %c0_153] : memref<200x128xf32, #tpu.memory_space<vmem>>, vector<8x128xf32>
    %cst_154 = arith.constant 1.000000e+00 : f32
    %459 = vector.broadcast %cst_154 : f32 to vector<8x128xf32>
    %460 = arith.cmpf ogt, %446, %459 : vector<8x128xf32>
    %461 = arith.extui %460 : vector<8x128xi1> to vector<8x128xi32>
    %462 = arith.sitofp %461 : vector<8x128xi32> to vector<8x128xf32>
    %463 = arith.addf %446, %458 : vector<8x128xf32>
    %464 = arith.subf %463, %462 : vector<8x128xf32>
    %cst_155 = arith.constant 1.000000e+00 : f32
    %465 = vector.broadcast %cst_155 : f32 to vector<8x128xf32>
    %466 = arith.cmpf ogt, %464, %465 : vector<8x128xf32>
    %467 = arith.extui %466 : vector<8x128xi1> to vector<8x128xi32>
    %468 = arith.sitofp %467 : vector<8x128xi32> to vector<8x128xf32>
    %469 = arith.index_cast %456 : i32 to index
    %c0_156 = arith.constant 0 : index
    %470 = vector.load %arg5[%469, %c0_156] : memref<200x128xf32, #tpu.memory_space<vmem>>, vector<8x128xf32>
    tpu.vector_store %arg5[%469, %c0_156], %468 {strides = array<i32>} : memref<200x128xf32, #tpu.memory_space<vmem>>, vector<8x128xf32>,
    %471 = arith.index_cast %456 : i32 to index
    %c0_157 = arith.constant 0 : index
    %472 = vector.load %arg6[%471, %c0_157] : memref<200x128xf32, #tpu.memory_space<vmem>>, vector<8x128xf32>
    tpu.vector_store %arg6[%471, %c0_157], %464 {strides = array<i32>} : memref<200x128xf32, #tpu.memory_space<vmem>>, vector<8x128xf32>,
    %c6_i32_158 = arith.constant 6 : i32
    %c8_i32_159 = arith.constant 8 : i32
    %473 = arith.muli %c6_i32_158, %c8_i32_159 : i32
    %474 = tpu.assume_multiple %473, 8 : i32
    %475 = arith.index_cast %474 : i32 to index
    %c0_160 = arith.constant 0 : index
    %476 = vector.load %arg8[%475, %c0_160] : memref<200x128xf32, #tpu.memory_space<vmem>>, vector<8x128xf32>
    %cst_161 = arith.constant 1.000000e+00 : f32
    %477 = vector.broadcast %cst_161 : f32 to vector<8x128xf32>
    %478 = arith.cmpf ogt, %464, %477 : vector<8x128xf32>
    %479 = arith.extui %478 : vector<8x128xi1> to vector<8x128xi32>
    %480 = arith.sitofp %479 : vector<8x128xi32> to vector<8x128xf32>
    %481 = arith.addf %464, %476 : vector<8x128xf32>
    %482 = arith.subf %481, %480 : vector<8x128xf32>
    %cst_162 = arith.constant 1.000000e+00 : f32
    %483 = vector.broadcast %cst_162 : f32 to vector<8x128xf32>
    %484 = arith.cmpf ogt, %482, %483 : vector<8x128xf32>
    %485 = arith.extui %484 : vector<8x128xi1> to vector<8x128xi32>
    %486 = arith.sitofp %485 : vector<8x128xi32> to vector<8x128xf32>
    %487 = arith.index_cast %474 : i32 to index
    %c0_163 = arith.constant 0 : index
    %488 = vector.load %arg5[%487, %c0_163] : memref<200x128xf32, #tpu.memory_space<vmem>>, vector<8x128xf32>
    tpu.vector_store %arg5[%487, %c0_163], %486 {strides = array<i32>} : memref<200x128xf32, #tpu.memory_space<vmem>>, vector<8x128xf32>,
    %489 = arith.index_cast %474 : i32 to index
    %c0_164 = arith.constant 0 : index
    %490 = vector.load %arg6[%489, %c0_164] : memref<200x128xf32, #tpu.memory_space<vmem>>, vector<8x128xf32>
    tpu.vector_store %arg6[%489, %c0_164], %482 {strides = array<i32>} : memref<200x128xf32, #tpu.memory_space<vmem>>, vector<8x128xf32>,
    %c7_i32_165 = arith.constant 7 : i32
    %c8_i32_166 = arith.constant 8 : i32
    %491 = arith.muli %c7_i32_165, %c8_i32_166 : i32
    %492 = tpu.assume_multiple %491, 8 : i32
    %493 = arith.index_cast %492 : i32 to index
    %c0_167 = arith.constant 0 : index
    %494 = vector.load %arg8[%493, %c0_167] : memref<200x128xf32, #tpu.memory_space<vmem>>, vector<8x128xf32>
    %cst_168 = arith.constant 1.000000e+00 : f32
    %495 = vector.broadcast %cst_168 : f32 to vector<8x128xf32>
    %496 = arith.cmpf ogt, %482, %495 : vector<8x128xf32>
    %497 = arith.extui %496 : vector<8x128xi1> to vector<8x128xi32>
    %498 = arith.sitofp %497 : vector<8x128xi32> to vector<8x128xf32>
    %499 = arith.addf %482, %494 : vector<8x128xf32>
    %500 = arith.subf %499, %498 : vector<8x128xf32>
    %cst_169 = arith.constant 1.000000e+00 : f32
    %501 = vector.broadcast %cst_169 : f32 to vector<8x128xf32>
    %502 = arith.cmpf ogt, %500, %501 : vector<8x128xf32>
    %503 = arith.extui %502 : vector<8x128xi1> to vector<8x128xi32>
    %504 = arith.sitofp %503 : vector<8x128xi32> to vector<8x128xf32>
    %505 = arith.index_cast %492 : i32 to index
    %c0_170 = arith.constant 0 : index
    %506 = vector.load %arg5[%505, %c0_170] : memref<200x128xf32, #tpu.memory_space<vmem>>, vector<8x128xf32>
    tpu.vector_store %arg5[%505, %c0_170], %504 {strides = array<i32>} : memref<200x128xf32, #tpu.memory_space<vmem>>, vector<8x128xf32>,
    %507 = arith.index_cast %492 : i32 to index
    %c0_171 = arith.constant 0 : index
    %508 = vector.load %arg6[%507, %c0_171] : memref<200x128xf32, #tpu.memory_space<vmem>>, vector<8x128xf32>
    tpu.vector_store %arg6[%507, %c0_171], %500 {strides = array<i32>} : memref<200x128xf32, #tpu.memory_space<vmem>>, vector<8x128xf32>,
    %c8_i32_172 = arith.constant 8 : i32
    %c8_i32_173 = arith.constant 8 : i32
    %509 = arith.muli %c8_i32_172, %c8_i32_173 : i32
    %510 = tpu.assume_multiple %509, 8 : i32
    %511 = arith.index_cast %510 : i32 to index
    %c0_174 = arith.constant 0 : index
    %512 = vector.load %arg8[%511, %c0_174] : memref<200x128xf32, #tpu.memory_space<vmem>>, vector<8x128xf32>
    %cst_175 = arith.constant 1.000000e+00 : f32
    %513 = vector.broadcast %cst_175 : f32 to vector<8x128xf32>
    %514 = arith.cmpf ogt, %500, %513 : vector<8x128xf32>
    %515 = arith.extui %514 : vector<8x128xi1> to vector<8x128xi32>
    %516 = arith.sitofp %515 : vector<8x128xi32> to vector<8x128xf32>
    %517 = arith.addf %500, %512 : vector<8x128xf32>
    %518 = arith.subf %517, %516 : vector<8x128xf32>
    %cst_176 = arith.constant 1.000000e+00 : f32
    %519 = vector.broadcast %cst_176 : f32 to vector<8x128xf32>
    %520 = arith.cmpf ogt, %518, %519 : vector<8x128xf32>
    %521 = arith.extui %520 : vector<8x128xi1> to vector<8x128xi32>
    %522 = arith.sitofp %521 : vector<8x128xi32> to vector<8x128xf32>
    %523 = arith.index_cast %510 : i32 to index
    %c0_177 = arith.constant 0 : index
    %524 = vector.load %arg5[%523, %c0_177] : memref<200x128xf32, #tpu.memory_space<vmem>>, vector<8x128xf32>
    tpu.vector_store %arg5[%523, %c0_177], %522 {strides = array<i32>} : memref<200x128xf32, #tpu.memory_space<vmem>>, vector<8x128xf32>,
    %525 = arith.index_cast %510 : i32 to index
    %c0_178 = arith.constant 0 : index
    %526 = vector.load %arg6[%525, %c0_178] : memref<200x128xf32, #tpu.memory_space<vmem>>, vector<8x128xf32>
    tpu.vector_store %arg6[%525, %c0_178], %518 {strides = array<i32>} : memref<200x128xf32, #tpu.memory_space<vmem>>, vector<8x128xf32>,
    %c9_i32_179 = arith.constant 9 : i32
    %c8_i32_180 = arith.constant 8 : i32
    %527 = arith.muli %c9_i32_179, %c8_i32_180 : i32
    %528 = tpu.assume_multiple %527, 8 : i32
    %529 = arith.index_cast %528 : i32 to index
    %c0_181 = arith.constant 0 : index
    %530 = vector.load %arg8[%529, %c0_181] : memref<200x128xf32, #tpu.memory_space<vmem>>, vector<8x128xf32>
    %cst_182 = arith.constant 1.000000e+00 : f32
    %531 = vector.broadcast %cst_182 : f32 to vector<8x128xf32>
    %532 = arith.cmpf ogt, %518, %531 : vector<8x128xf32>
    %533 = arith.extui %532 : vector<8x128xi1> to vector<8x128xi32>
    %534 = arith.sitofp %533 : vector<8x128xi32> to vector<8x128xf32>
    %535 = arith.addf %518, %530 : vector<8x128xf32>
    %536 = arith.subf %535, %534 : vector<8x128xf32>
    %cst_183 = arith.constant 1.000000e+00 : f32
    %537 = vector.broadcast %cst_183 : f32 to vector<8x128xf32>
    %538 = arith.cmpf ogt, %536, %537 : vector<8x128xf32>
    %539 = arith.extui %538 : vector<8x128xi1> to vector<8x128xi32>
    %540 = arith.sitofp %539 : vector<8x128xi32> to vector<8x128xf32>
    %541 = arith.index_cast %528 : i32 to index
    %c0_184 = arith.constant 0 : index
    %542 = vector.load %arg5[%541, %c0_184] : memref<200x128xf32, #tpu.memory_space<vmem>>, vector<8x128xf32>
    tpu.vector_store %arg5[%541, %c0_184], %540 {strides = array<i32>} : memref<200x128xf32, #tpu.memory_space<vmem>>, vector<8x128xf32>,
    %543 = arith.index_cast %528 : i32 to index
    %c0_185 = arith.constant 0 : index
    %544 = vector.load %arg6[%543, %c0_185] : memref<200x128xf32, #tpu.memory_space<vmem>>, vector<8x128xf32>
    tpu.vector_store %arg6[%543, %c0_185], %536 {strides = array<i32>} : memref<200x128xf32, #tpu.memory_space<vmem>>, vector<8x128xf32>,
    %c10_i32_186 = arith.constant 10 : i32
    %c8_i32_187 = arith.constant 8 : i32
    %545 = arith.muli %c10_i32_186, %c8_i32_187 : i32
    %546 = tpu.assume_multiple %545, 8 : i32
    %547 = arith.index_cast %546 : i32 to index
    %c0_188 = arith.constant 0 : index
    %548 = vector.load %arg8[%547, %c0_188] : memref<200x128xf32, #tpu.memory_space<vmem>>, vector<8x128xf32>
    %cst_189 = arith.constant 1.000000e+00 : f32
    %549 = vector.broadcast %cst_189 : f32 to vector<8x128xf32>
    %550 = arith.cmpf ogt, %536, %549 : vector<8x128xf32>
    %551 = arith.extui %550 : vector<8x128xi1> to vector<8x128xi32>
    %552 = arith.sitofp %551 : vector<8x128xi32> to vector<8x128xf32>
    %553 = arith.addf %536, %548 : vector<8x128xf32>
    %554 = arith.subf %553, %552 : vector<8x128xf32>
    %cst_190 = arith.constant 1.000000e+00 : f32
    %555 = vector.broadcast %cst_190 : f32 to vector<8x128xf32>
    %556 = arith.cmpf ogt, %554, %555 : vector<8x128xf32>
    %557 = arith.extui %556 : vector<8x128xi1> to vector<8x128xi32>
    %558 = arith.sitofp %557 : vector<8x128xi32> to vector<8x128xf32>
    %559 = arith.index_cast %546 : i32 to index
    %c0_191 = arith.constant 0 : index
    %560 = vector.load %arg5[%559, %c0_191] : memref<200x128xf32, #tpu.memory_space<vmem>>, vector<8x128xf32>
    tpu.vector_store %arg5[%559, %c0_191], %558 {strides = array<i32>} : memref<200x128xf32, #tpu.memory_space<vmem>>, vector<8x128xf32>,
    %561 = arith.index_cast %546 : i32 to index
    %c0_192 = arith.constant 0 : index
    %562 = vector.load %arg6[%561, %c0_192] : memref<200x128xf32, #tpu.memory_space<vmem>>, vector<8x128xf32>
    tpu.vector_store %arg6[%561, %c0_192], %554 {strides = array<i32>} : memref<200x128xf32, #tpu.memory_space<vmem>>, vector<8x128xf32>,
    %c11_i32_193 = arith.constant 11 : i32
    %c8_i32_194 = arith.constant 8 : i32
    %563 = arith.muli %c11_i32_193, %c8_i32_194 : i32
    %564 = tpu.assume_multiple %563, 8 : i32
    %565 = arith.index_cast %564 : i32 to index
    %c0_195 = arith.constant 0 : index
    %566 = vector.load %arg8[%565, %c0_195] : memref<200x128xf32, #tpu.memory_space<vmem>>, vector<8x128xf32>
    %cst_196 = arith.constant 1.000000e+00 : f32
    %567 = vector.broadcast %cst_196 : f32 to vector<8x128xf32>
    %568 = arith.cmpf ogt, %554, %567 : vector<8x128xf32>
    %569 = arith.extui %568 : vector<8x128xi1> to vector<8x128xi32>
    %570 = arith.sitofp %569 : vector<8x128xi32> to vector<8x128xf32>
    %571 = arith.addf %554, %566 : vector<8x128xf32>
    %572 = arith.subf %571, %570 : vector<8x128xf32>
    %cst_197 = arith.constant 1.000000e+00 : f32
    %573 = vector.broadcast %cst_197 : f32 to vector<8x128xf32>
    %574 = arith.cmpf ogt, %572, %573 : vector<8x128xf32>
    %575 = arith.extui %574 : vector<8x128xi1> to vector<8x128xi32>
    %576 = arith.sitofp %575 : vector<8x128xi32> to vector<8x128xf32>
    %577 = arith.index_cast %564 : i32 to index
    %c0_198 = arith.constant 0 : index
    %578 = vector.load %arg5[%577, %c0_198] : memref<200x128xf32, #tpu.memory_space<vmem>>, vector<8x128xf32>
    tpu.vector_store %arg5[%577, %c0_198], %576 {strides = array<i32>} : memref<200x128xf32, #tpu.memory_space<vmem>>, vector<8x128xf32>,
    %579 = arith.index_cast %564 : i32 to index
    %c0_199 = arith.constant 0 : index
    %580 = vector.load %arg6[%579, %c0_199] : memref<200x128xf32, #tpu.memory_space<vmem>>, vector<8x128xf32>
    tpu.vector_store %arg6[%579, %c0_199], %572 {strides = array<i32>} : memref<200x128xf32, #tpu.memory_space<vmem>>, vector<8x128xf32>,
    %c12_i32_200 = arith.constant 12 : i32
    %c8_i32_201 = arith.constant 8 : i32
    %581 = arith.muli %c12_i32_200, %c8_i32_201 : i32
    %582 = tpu.assume_multiple %581, 8 : i32
    %583 = arith.index_cast %582 : i32 to index
    %c0_202 = arith.constant 0 : index
    %584 = vector.load %arg8[%583, %c0_202] : memref<200x128xf32, #tpu.memory_space<vmem>>, vector<8x128xf32>
    %cst_203 = arith.constant 1.000000e+00 : f32
    %585 = vector.broadcast %cst_203 : f32 to vector<8x128xf32>
    %586 = arith.cmpf ogt, %572, %585 : vector<8x128xf32>
    %587 = arith.extui %586 : vector<8x128xi1> to vector<8x128xi32>
    %588 = arith.sitofp %587 : vector<8x128xi32> to vector<8x128xf32>
    %589 = arith.addf %572, %584 : vector<8x128xf32>
    %590 = arith.subf %589, %588 : vector<8x128xf32>
    %cst_204 = arith.constant 1.000000e+00 : f32
    %591 = vector.broadcast %cst_204 : f32 to vector<8x128xf32>
    %592 = arith.cmpf ogt, %590, %591 : vector<8x128xf32>
    %593 = arith.extui %592 : vector<8x128xi1> to vector<8x128xi32>
    %594 = arith.sitofp %593 : vector<8x128xi32> to vector<8x128xf32>
    %595 = arith.index_cast %582 : i32 to index
    %c0_205 = arith.constant 0 : index
    %596 = vector.load %arg5[%595, %c0_205] : memref<200x128xf32, #tpu.memory_space<vmem>>, vector<8x128xf32>
    tpu.vector_store %arg5[%595, %c0_205], %594 {strides = array<i32>} : memref<200x128xf32, #tpu.memory_space<vmem>>, vector<8x128xf32>,
    %597 = arith.index_cast %582 : i32 to index
    %c0_206 = arith.constant 0 : index
    %598 = vector.load %arg6[%597, %c0_206] : memref<200x128xf32, #tpu.memory_space<vmem>>, vector<8x128xf32>
    tpu.vector_store %arg6[%597, %c0_206], %590 {strides = array<i32>} : memref<200x128xf32, #tpu.memory_space<vmem>>, vector<8x128xf32>,
    %c13_i32_207 = arith.constant 13 : i32
    %c8_i32_208 = arith.constant 8 : i32
    %599 = arith.muli %c13_i32_207, %c8_i32_208 : i32
    %600 = tpu.assume_multiple %599, 8 : i32
    %601 = arith.index_cast %600 : i32 to index
    %c0_209 = arith.constant 0 : index
    %602 = vector.load %arg8[%601, %c0_209] : memref<200x128xf32, #tpu.memory_space<vmem>>, vector<8x128xf32>
    %cst_210 = arith.constant 1.000000e+00 : f32
    %603 = vector.broadcast %cst_210 : f32 to vector<8x128xf32>
    %604 = arith.cmpf ogt, %590, %603 : vector<8x128xf32>
    %605 = arith.extui %604 : vector<8x128xi1> to vector<8x128xi32>
    %606 = arith.sitofp %605 : vector<8x128xi32> to vector<8x128xf32>
    %607 = arith.addf %590, %602 : vector<8x128xf32>
    %608 = arith.subf %607, %606 : vector<8x128xf32>
    %cst_211 = arith.constant 1.000000e+00 : f32
    %609 = vector.broadcast %cst_211 : f32 to vector<8x128xf32>
    %610 = arith.cmpf ogt, %608, %609 : vector<8x128xf32>
    %611 = arith.extui %610 : vector<8x128xi1> to vector<8x128xi32>
    %612 = arith.sitofp %611 : vector<8x128xi32> to vector<8x128xf32>
    %613 = arith.index_cast %600 : i32 to index
    %c0_212 = arith.constant 0 : index
    %614 = vector.load %arg5[%613, %c0_212] : memref<200x128xf32, #tpu.memory_space<vmem>>, vector<8x128xf32>
    tpu.vector_store %arg5[%613, %c0_212], %612 {strides = array<i32>} : memref<200x128xf32, #tpu.memory_space<vmem>>, vector<8x128xf32>,
    %615 = arith.index_cast %600 : i32 to index
    %c0_213 = arith.constant 0 : index
    %616 = vector.load %arg6[%615, %c0_213] : memref<200x128xf32, #tpu.memory_space<vmem>>, vector<8x128xf32>
    tpu.vector_store %arg6[%615, %c0_213], %608 {strides = array<i32>} : memref<200x128xf32, #tpu.memory_space<vmem>>, vector<8x128xf32>,
    %c14_i32_214 = arith.constant 14 : i32
    %c8_i32_215 = arith.constant 8 : i32
    %617 = arith.muli %c14_i32_214, %c8_i32_215 : i32
    %618 = tpu.assume_multiple %617, 8 : i32
    %619 = arith.index_cast %618 : i32 to index
    %c0_216 = arith.constant 0 : index
    %620 = vector.load %arg8[%619, %c0_216] : memref<200x128xf32, #tpu.memory_space<vmem>>, vector<8x128xf32>
    %cst_217 = arith.constant 1.000000e+00 : f32
    %621 = vector.broadcast %cst_217 : f32 to vector<8x128xf32>
    %622 = arith.cmpf ogt, %608, %621 : vector<8x128xf32>
    %623 = arith.extui %622 : vector<8x128xi1> to vector<8x128xi32>
    %624 = arith.sitofp %623 : vector<8x128xi32> to vector<8x128xf32>
    %625 = arith.addf %608, %620 : vector<8x128xf32>
    %626 = arith.subf %625, %624 : vector<8x128xf32>
    %cst_218 = arith.constant 1.000000e+00 : f32
    %627 = vector.broadcast %cst_218 : f32 to vector<8x128xf32>
    %628 = arith.cmpf ogt, %626, %627 : vector<8x128xf32>
    %629 = arith.extui %628 : vector<8x128xi1> to vector<8x128xi32>
    %630 = arith.sitofp %629 : vector<8x128xi32> to vector<8x128xf32>
    %631 = arith.index_cast %618 : i32 to index
    %c0_219 = arith.constant 0 : index
    %632 = vector.load %arg5[%631, %c0_219] : memref<200x128xf32, #tpu.memory_space<vmem>>, vector<8x128xf32>
    tpu.vector_store %arg5[%631, %c0_219], %630 {strides = array<i32>} : memref<200x128xf32, #tpu.memory_space<vmem>>, vector<8x128xf32>,
    %633 = arith.index_cast %618 : i32 to index
    %c0_220 = arith.constant 0 : index
    %634 = vector.load %arg6[%633, %c0_220] : memref<200x128xf32, #tpu.memory_space<vmem>>, vector<8x128xf32>
    tpu.vector_store %arg6[%633, %c0_220], %626 {strides = array<i32>} : memref<200x128xf32, #tpu.memory_space<vmem>>, vector<8x128xf32>,
    %c15_i32_221 = arith.constant 15 : i32
    %c8_i32_222 = arith.constant 8 : i32
    %635 = arith.muli %c15_i32_221, %c8_i32_222 : i32
    %636 = tpu.assume_multiple %635, 8 : i32
    %637 = arith.index_cast %636 : i32 to index
    %c0_223 = arith.constant 0 : index
    %638 = vector.load %arg8[%637, %c0_223] : memref<200x128xf32, #tpu.memory_space<vmem>>, vector<8x128xf32>
    %cst_224 = arith.constant 1.000000e+00 : f32
    %639 = vector.broadcast %cst_224 : f32 to vector<8x128xf32>
    %640 = arith.cmpf ogt, %626, %639 : vector<8x128xf32>
    %641 = arith.extui %640 : vector<8x128xi1> to vector<8x128xi32>
    %642 = arith.sitofp %641 : vector<8x128xi32> to vector<8x128xf32>
    %643 = arith.addf %626, %638 : vector<8x128xf32>
    %644 = arith.subf %643, %642 : vector<8x128xf32>
    %cst_225 = arith.constant 1.000000e+00 : f32
    %645 = vector.broadcast %cst_225 : f32 to vector<8x128xf32>
    %646 = arith.cmpf ogt, %644, %645 : vector<8x128xf32>
    %647 = arith.extui %646 : vector<8x128xi1> to vector<8x128xi32>
    %648 = arith.sitofp %647 : vector<8x128xi32> to vector<8x128xf32>
    %649 = arith.index_cast %636 : i32 to index
    %c0_226 = arith.constant 0 : index
    %650 = vector.load %arg5[%649, %c0_226] : memref<200x128xf32, #tpu.memory_space<vmem>>, vector<8x128xf32>
    tpu.vector_store %arg5[%649, %c0_226], %648 {strides = array<i32>} : memref<200x128xf32, #tpu.memory_space<vmem>>, vector<8x128xf32>,
    %651 = arith.index_cast %636 : i32 to index
    %c0_227 = arith.constant 0 : index
    %652 = vector.load %arg6[%651, %c0_227] : memref<200x128xf32, #tpu.memory_space<vmem>>, vector<8x128xf32>
    tpu.vector_store %arg6[%651, %c0_227], %644 {strides = array<i32>} : memref<200x128xf32, #tpu.memory_space<vmem>>, vector<8x128xf32>,
    %c16_i32_228 = arith.constant 16 : i32
    %c8_i32_229 = arith.constant 8 : i32
    %653 = arith.muli %c16_i32_228, %c8_i32_229 : i32
    %654 = tpu.assume_multiple %653, 8 : i32
    %655 = arith.index_cast %654 : i32 to index
    %c0_230 = arith.constant 0 : index
    %656 = vector.load %arg8[%655, %c0_230] : memref<200x128xf32, #tpu.memory_space<vmem>>, vector<8x128xf32>
    %cst_231 = arith.constant 1.000000e+00 : f32
    %657 = vector.broadcast %cst_231 : f32 to vector<8x128xf32>
    %658 = arith.cmpf ogt, %644, %657 : vector<8x128xf32>
    %659 = arith.extui %658 : vector<8x128xi1> to vector<8x128xi32>
    %660 = arith.sitofp %659 : vector<8x128xi32> to vector<8x128xf32>
    %661 = arith.addf %644, %656 : vector<8x128xf32>
    %662 = arith.subf %661, %660 : vector<8x128xf32>
    %cst_232 = arith.constant 1.000000e+00 : f32
    %663 = vector.broadcast %cst_232 : f32 to vector<8x128xf32>
    %664 = arith.cmpf ogt, %662, %663 : vector<8x128xf32>
    %665 = arith.extui %664 : vector<8x128xi1> to vector<8x128xi32>
    %666 = arith.sitofp %665 : vector<8x128xi32> to vector<8x128xf32>
    %667 = arith.index_cast %654 : i32 to index
    %c0_233 = arith.constant 0 : index
    %668 = vector.load %arg5[%667, %c0_233] : memref<200x128xf32, #tpu.memory_space<vmem>>, vector<8x128xf32>
    tpu.vector_store %arg5[%667, %c0_233], %666 {strides = array<i32>} : memref<200x128xf32, #tpu.memory_space<vmem>>, vector<8x128xf32>,
    %669 = arith.index_cast %654 : i32 to index
    %c0_234 = arith.constant 0 : index
    %670 = vector.load %arg6[%669, %c0_234] : memref<200x128xf32, #tpu.memory_space<vmem>>, vector<8x128xf32>
    tpu.vector_store %arg6[%669, %c0_234], %662 {strides = array<i32>} : memref<200x128xf32, #tpu.memory_space<vmem>>, vector<8x128xf32>,
    %c17_i32_235 = arith.constant 17 : i32
    %c8_i32_236 = arith.constant 8 : i32
    %671 = arith.muli %c17_i32_235, %c8_i32_236 : i32
    %672 = tpu.assume_multiple %671, 8 : i32
    %673 = arith.index_cast %672 : i32 to index
    %c0_237 = arith.constant 0 : index
    %674 = vector.load %arg8[%673, %c0_237] : memref<200x128xf32, #tpu.memory_space<vmem>>, vector<8x128xf32>
    %cst_238 = arith.constant 1.000000e+00 : f32
    %675 = vector.broadcast %cst_238 : f32 to vector<8x128xf32>
    %676 = arith.cmpf ogt, %662, %675 : vector<8x128xf32>
    %677 = arith.extui %676 : vector<8x128xi1> to vector<8x128xi32>
    %678 = arith.sitofp %677 : vector<8x128xi32> to vector<8x128xf32>
    %679 = arith.addf %662, %674 : vector<8x128xf32>
    %680 = arith.subf %679, %678 : vector<8x128xf32>
    %cst_239 = arith.constant 1.000000e+00 : f32
    %681 = vector.broadcast %cst_239 : f32 to vector<8x128xf32>
    %682 = arith.cmpf ogt, %680, %681 : vector<8x128xf32>
    %683 = arith.extui %682 : vector<8x128xi1> to vector<8x128xi32>
    %684 = arith.sitofp %683 : vector<8x128xi32> to vector<8x128xf32>
    %685 = arith.index_cast %672 : i32 to index
    %c0_240 = arith.constant 0 : index
    %686 = vector.load %arg5[%685, %c0_240] : memref<200x128xf32, #tpu.memory_space<vmem>>, vector<8x128xf32>
    tpu.vector_store %arg5[%685, %c0_240], %684 {strides = array<i32>} : memref<200x128xf32, #tpu.memory_space<vmem>>, vector<8x128xf32>,
    %687 = arith.index_cast %672 : i32 to index
    %c0_241 = arith.constant 0 : index
    %688 = vector.load %arg6[%687, %c0_241] : memref<200x128xf32, #tpu.memory_space<vmem>>, vector<8x128xf32>
    tpu.vector_store %arg6[%687, %c0_241], %680 {strides = array<i32>} : memref<200x128xf32, #tpu.memory_space<vmem>>, vector<8x128xf32>,
    %c18_i32_242 = arith.constant 18 : i32
    %c8_i32_243 = arith.constant 8 : i32
    %689 = arith.muli %c18_i32_242, %c8_i32_243 : i32
    %690 = tpu.assume_multiple %689, 8 : i32
    %691 = arith.index_cast %690 : i32 to index
    %c0_244 = arith.constant 0 : index
    %692 = vector.load %arg8[%691, %c0_244] : memref<200x128xf32, #tpu.memory_space<vmem>>, vector<8x128xf32>
    %cst_245 = arith.constant 1.000000e+00 : f32
    %693 = vector.broadcast %cst_245 : f32 to vector<8x128xf32>
    %694 = arith.cmpf ogt, %680, %693 : vector<8x128xf32>
    %695 = arith.extui %694 : vector<8x128xi1> to vector<8x128xi32>
    %696 = arith.sitofp %695 : vector<8x128xi32> to vector<8x128xf32>
    %697 = arith.addf %680, %692 : vector<8x128xf32>
    %698 = arith.subf %697, %696 : vector<8x128xf32>
    %cst_246 = arith.constant 1.000000e+00 : f32
    %699 = vector.broadcast %cst_246 : f32 to vector<8x128xf32>
    %700 = arith.cmpf ogt, %698, %699 : vector<8x128xf32>
    %701 = arith.extui %700 : vector<8x128xi1> to vector<8x128xi32>
    %702 = arith.sitofp %701 : vector<8x128xi32> to vector<8x128xf32>
    %703 = arith.index_cast %690 : i32 to index
    %c0_247 = arith.constant 0 : index
    %704 = vector.load %arg5[%703, %c0_247] : memref<200x128xf32, #tpu.memory_space<vmem>>, vector<8x128xf32>
    tpu.vector_store %arg5[%703, %c0_247], %702 {strides = array<i32>} : memref<200x128xf32, #tpu.memory_space<vmem>>, vector<8x128xf32>,
    %705 = arith.index_cast %690 : i32 to index
    %c0_248 = arith.constant 0 : index
    %706 = vector.load %arg6[%705, %c0_248] : memref<200x128xf32, #tpu.memory_space<vmem>>, vector<8x128xf32>
    tpu.vector_store %arg6[%705, %c0_248], %698 {strides = array<i32>} : memref<200x128xf32, #tpu.memory_space<vmem>>, vector<8x128xf32>,
    %c19_i32_249 = arith.constant 19 : i32
    %c8_i32_250 = arith.constant 8 : i32
    %707 = arith.muli %c19_i32_249, %c8_i32_250 : i32
    %708 = tpu.assume_multiple %707, 8 : i32
    %709 = arith.index_cast %708 : i32 to index
    %c0_251 = arith.constant 0 : index
    %710 = vector.load %arg8[%709, %c0_251] : memref<200x128xf32, #tpu.memory_space<vmem>>, vector<8x128xf32>
    %cst_252 = arith.constant 1.000000e+00 : f32
    %711 = vector.broadcast %cst_252 : f32 to vector<8x128xf32>
    %712 = arith.cmpf ogt, %698, %711 : vector<8x128xf32>
    %713 = arith.extui %712 : vector<8x128xi1> to vector<8x128xi32>
    %714 = arith.sitofp %713 : vector<8x128xi32> to vector<8x128xf32>
    %715 = arith.addf %698, %710 : vector<8x128xf32>
    %716 = arith.subf %715, %714 : vector<8x128xf32>
    %cst_253 = arith.constant 1.000000e+00 : f32
    %717 = vector.broadcast %cst_253 : f32 to vector<8x128xf32>
    %718 = arith.cmpf ogt, %716, %717 : vector<8x128xf32>
    %719 = arith.extui %718 : vector<8x128xi1> to vector<8x128xi32>
    %720 = arith.sitofp %719 : vector<8x128xi32> to vector<8x128xf32>
    %721 = arith.index_cast %708 : i32 to index
    %c0_254 = arith.constant 0 : index
    %722 = vector.load %arg5[%721, %c0_254] : memref<200x128xf32, #tpu.memory_space<vmem>>, vector<8x128xf32>
    tpu.vector_store %arg5[%721, %c0_254], %720 {strides = array<i32>} : memref<200x128xf32, #tpu.memory_space<vmem>>, vector<8x128xf32>,
    %723 = arith.index_cast %708 : i32 to index
    %c0_255 = arith.constant 0 : index
    %724 = vector.load %arg6[%723, %c0_255] : memref<200x128xf32, #tpu.memory_space<vmem>>, vector<8x128xf32>
    tpu.vector_store %arg6[%723, %c0_255], %716 {strides = array<i32>} : memref<200x128xf32, #tpu.memory_space<vmem>>, vector<8x128xf32>,
    %c20_i32_256 = arith.constant 20 : i32
    %c8_i32_257 = arith.constant 8 : i32
    %725 = arith.muli %c20_i32_256, %c8_i32_257 : i32
    %726 = tpu.assume_multiple %725, 8 : i32
    %727 = arith.index_cast %726 : i32 to index
    %c0_258 = arith.constant 0 : index
    %728 = vector.load %arg8[%727, %c0_258] : memref<200x128xf32, #tpu.memory_space<vmem>>, vector<8x128xf32>
    %cst_259 = arith.constant 1.000000e+00 : f32
    %729 = vector.broadcast %cst_259 : f32 to vector<8x128xf32>
    %730 = arith.cmpf ogt, %716, %729 : vector<8x128xf32>
    %731 = arith.extui %730 : vector<8x128xi1> to vector<8x128xi32>
    %732 = arith.sitofp %731 : vector<8x128xi32> to vector<8x128xf32>
    %733 = arith.addf %716, %728 : vector<8x128xf32>
    %734 = arith.subf %733, %732 : vector<8x128xf32>
    %cst_260 = arith.constant 1.000000e+00 : f32
    %735 = vector.broadcast %cst_260 : f32 to vector<8x128xf32>
    %736 = arith.cmpf ogt, %734, %735 : vector<8x128xf32>
    %737 = arith.extui %736 : vector<8x128xi1> to vector<8x128xi32>
    %738 = arith.sitofp %737 : vector<8x128xi32> to vector<8x128xf32>
    %739 = arith.index_cast %726 : i32 to index
    %c0_261 = arith.constant 0 : index
    %740 = vector.load %arg5[%739, %c0_261] : memref<200x128xf32, #tpu.memory_space<vmem>>, vector<8x128xf32>
    tpu.vector_store %arg5[%739, %c0_261], %738 {strides = array<i32>} : memref<200x128xf32, #tpu.memory_space<vmem>>, vector<8x128xf32>,
    %741 = arith.index_cast %726 : i32 to index
    %c0_262 = arith.constant 0 : index
    %742 = vector.load %arg6[%741, %c0_262] : memref<200x128xf32, #tpu.memory_space<vmem>>, vector<8x128xf32>
    tpu.vector_store %arg6[%741, %c0_262], %734 {strides = array<i32>} : memref<200x128xf32, #tpu.memory_space<vmem>>, vector<8x128xf32>,
    %c21_i32_263 = arith.constant 21 : i32
    %c8_i32_264 = arith.constant 8 : i32
    %743 = arith.muli %c21_i32_263, %c8_i32_264 : i32
    %744 = tpu.assume_multiple %743, 8 : i32
    %745 = arith.index_cast %744 : i32 to index
    %c0_265 = arith.constant 0 : index
    %746 = vector.load %arg8[%745, %c0_265] : memref<200x128xf32, #tpu.memory_space<vmem>>, vector<8x128xf32>
    %cst_266 = arith.constant 1.000000e+00 : f32
    %747 = vector.broadcast %cst_266 : f32 to vector<8x128xf32>
    %748 = arith.cmpf ogt, %734, %747 : vector<8x128xf32>
    %749 = arith.extui %748 : vector<8x128xi1> to vector<8x128xi32>
    %750 = arith.sitofp %749 : vector<8x128xi32> to vector<8x128xf32>
    %751 = arith.addf %734, %746 : vector<8x128xf32>
    %752 = arith.subf %751, %750 : vector<8x128xf32>
    %cst_267 = arith.constant 1.000000e+00 : f32
    %753 = vector.broadcast %cst_267 : f32 to vector<8x128xf32>
    %754 = arith.cmpf ogt, %752, %753 : vector<8x128xf32>
    %755 = arith.extui %754 : vector<8x128xi1> to vector<8x128xi32>
    %756 = arith.sitofp %755 : vector<8x128xi32> to vector<8x128xf32>
    %757 = arith.index_cast %744 : i32 to index
    %c0_268 = arith.constant 0 : index
    %758 = vector.load %arg5[%757, %c0_268] : memref<200x128xf32, #tpu.memory_space<vmem>>, vector<8x128xf32>
    tpu.vector_store %arg5[%757, %c0_268], %756 {strides = array<i32>} : memref<200x128xf32, #tpu.memory_space<vmem>>, vector<8x128xf32>,
    %759 = arith.index_cast %744 : i32 to index
    %c0_269 = arith.constant 0 : index
    %760 = vector.load %arg6[%759, %c0_269] : memref<200x128xf32, #tpu.memory_space<vmem>>, vector<8x128xf32>
    tpu.vector_store %arg6[%759, %c0_269], %752 {strides = array<i32>} : memref<200x128xf32, #tpu.memory_space<vmem>>, vector<8x128xf32>,
    %c22_i32_270 = arith.constant 22 : i32
    %c8_i32_271 = arith.constant 8 : i32
    %761 = arith.muli %c22_i32_270, %c8_i32_271 : i32
    %762 = tpu.assume_multiple %761, 8 : i32
    %763 = arith.index_cast %762 : i32 to index
    %c0_272 = arith.constant 0 : index
    %764 = vector.load %arg8[%763, %c0_272] : memref<200x128xf32, #tpu.memory_space<vmem>>, vector<8x128xf32>
    %cst_273 = arith.constant 1.000000e+00 : f32
    %765 = vector.broadcast %cst_273 : f32 to vector<8x128xf32>
    %766 = arith.cmpf ogt, %752, %765 : vector<8x128xf32>
    %767 = arith.extui %766 : vector<8x128xi1> to vector<8x128xi32>
    %768 = arith.sitofp %767 : vector<8x128xi32> to vector<8x128xf32>
    %769 = arith.addf %752, %764 : vector<8x128xf32>
    %770 = arith.subf %769, %768 : vector<8x128xf32>
    %cst_274 = arith.constant 1.000000e+00 : f32
    %771 = vector.broadcast %cst_274 : f32 to vector<8x128xf32>
    %772 = arith.cmpf ogt, %770, %771 : vector<8x128xf32>
    %773 = arith.extui %772 : vector<8x128xi1> to vector<8x128xi32>
    %774 = arith.sitofp %773 : vector<8x128xi32> to vector<8x128xf32>
    %775 = arith.index_cast %762 : i32 to index
    %c0_275 = arith.constant 0 : index
    %776 = vector.load %arg5[%775, %c0_275] : memref<200x128xf32, #tpu.memory_space<vmem>>, vector<8x128xf32>
    tpu.vector_store %arg5[%775, %c0_275], %774 {strides = array<i32>} : memref<200x128xf32, #tpu.memory_space<vmem>>, vector<8x128xf32>,
    %777 = arith.index_cast %762 : i32 to index
    %c0_276 = arith.constant 0 : index
    %778 = vector.load %arg6[%777, %c0_276] : memref<200x128xf32, #tpu.memory_space<vmem>>, vector<8x128xf32>
    tpu.vector_store %arg6[%777, %c0_276], %770 {strides = array<i32>} : memref<200x128xf32, #tpu.memory_space<vmem>>, vector<8x128xf32>,
    %c23_i32_277 = arith.constant 23 : i32
    %c8_i32_278 = arith.constant 8 : i32
    %779 = arith.muli %c23_i32_277, %c8_i32_278 : i32
    %780 = tpu.assume_multiple %779, 8 : i32
    %781 = arith.index_cast %780 : i32 to index
    %c0_279 = arith.constant 0 : index
    %782 = vector.load %arg8[%781, %c0_279] : memref<200x128xf32, #tpu.memory_space<vmem>>, vector<8x128xf32>
    %cst_280 = arith.constant 1.000000e+00 : f32
    %783 = vector.broadcast %cst_280 : f32 to vector<8x128xf32>
    %784 = arith.cmpf ogt, %770, %783 : vector<8x128xf32>
    %785 = arith.extui %784 : vector<8x128xi1> to vector<8x128xi32>
    %786 = arith.sitofp %785 : vector<8x128xi32> to vector<8x128xf32>
    %787 = arith.addf %770, %782 : vector<8x128xf32>
    %788 = arith.subf %787, %786 : vector<8x128xf32>
    %cst_281 = arith.constant 1.000000e+00 : f32
    %789 = vector.broadcast %cst_281 : f32 to vector<8x128xf32>
    %790 = arith.cmpf ogt, %788, %789 : vector<8x128xf32>
    %791 = arith.extui %790 : vector<8x128xi1> to vector<8x128xi32>
    %792 = arith.sitofp %791 : vector<8x128xi32> to vector<8x128xf32>
    %793 = arith.index_cast %780 : i32 to index
    %c0_282 = arith.constant 0 : index
    %794 = vector.load %arg5[%793, %c0_282] : memref<200x128xf32, #tpu.memory_space<vmem>>, vector<8x128xf32>
    tpu.vector_store %arg5[%793, %c0_282], %792 {strides = array<i32>} : memref<200x128xf32, #tpu.memory_space<vmem>>, vector<8x128xf32>,
    %795 = arith.index_cast %780 : i32 to index
    %c0_283 = arith.constant 0 : index
    %796 = vector.load %arg6[%795, %c0_283] : memref<200x128xf32, #tpu.memory_space<vmem>>, vector<8x128xf32>
    tpu.vector_store %arg6[%795, %c0_283], %788 {strides = array<i32>} : memref<200x128xf32, #tpu.memory_space<vmem>>, vector<8x128xf32>,
    %c24_i32_284 = arith.constant 24 : i32
    %c8_i32_285 = arith.constant 8 : i32
    %797 = arith.muli %c24_i32_284, %c8_i32_285 : i32
    %798 = tpu.assume_multiple %797, 8 : i32
    %799 = arith.index_cast %798 : i32 to index
    %c0_286 = arith.constant 0 : index
    %800 = vector.load %arg8[%799, %c0_286] : memref<200x128xf32, #tpu.memory_space<vmem>>, vector<8x128xf32>
    %cst_287 = arith.constant 1.000000e+00 : f32
    %801 = vector.broadcast %cst_287 : f32 to vector<8x128xf32>
    %802 = arith.cmpf ogt, %788, %801 : vector<8x128xf32>
    %803 = arith.extui %802 : vector<8x128xi1> to vector<8x128xi32>
    %804 = arith.sitofp %803 : vector<8x128xi32> to vector<8x128xf32>
    %805 = arith.addf %788, %800 : vector<8x128xf32>
    %806 = arith.subf %805, %804 : vector<8x128xf32>
    %cst_288 = arith.constant 1.000000e+00 : f32
    %807 = vector.broadcast %cst_288 : f32 to vector<8x128xf32>
    %808 = arith.cmpf ogt, %806, %807 : vector<8x128xf32>
    %809 = arith.extui %808 : vector<8x128xi1> to vector<8x128xi32>
    %810 = arith.sitofp %809 : vector<8x128xi32> to vector<8x128xf32>
    %811 = arith.index_cast %798 : i32 to index
    %c0_289 = arith.constant 0 : index
    %812 = vector.load %arg5[%811, %c0_289] : memref<200x128xf32, #tpu.memory_space<vmem>>, vector<8x128xf32>
    tpu.vector_store %arg5[%811, %c0_289], %810 {strides = array<i32>} : memref<200x128xf32, #tpu.memory_space<vmem>>, vector<8x128xf32>,
    %813 = arith.index_cast %798 : i32 to index
    %c0_290 = arith.constant 0 : index
    %814 = vector.load %arg6[%813, %c0_290] : memref<200x128xf32, #tpu.memory_space<vmem>>, vector<8x128xf32>
    tpu.vector_store %arg6[%813, %c0_290], %806 {strides = array<i32>} : memref<200x128xf32, #tpu.memory_space<vmem>>, vector<8x128xf32>,
    %c25_i32_291 = arith.constant 25 : i32
    return
  }
}

</mosaic_0001>

<bundles_post_ra>
// kernel: tpu_custom_call.1
= control target key start
LH: loop header
LB: loop body
LE: loop exit
PB: predicated region body
PF: predicated region fallthrough
CT: control target
= control target key end

     0   :  { %12 = vsyncpa [#allocation5], 0  ;;  %s7588_s0 = inlined_call_operand.hbm [shape: f32[8,784], index: 0, kind: input, shape index: {}]   ;;  %s7589_s1 = inlined_call_operand.hbm [shape: f32[784,1024], index: 1, kind: input, shape index: {}]   ;;  %s7590_s2 = inlined_call_operand.hbm [shape: f32[1,1024], index: 2, kind: input, shape index: {}]   ;;  %s7591_s3 = inlined_call_operand.hbm [shape: f32[1024,128], index: 3, kind: input, shape index: {}]   ;;  %s7592_s4 = inlined_call_operand.hbm [shape: f32[1,128], index: 4, kind: input, shape index: {}]   ;;  %s7593_s5 = inlined_call_operand.hbm [shape: f32[200,128], index: 5, kind: output, shape index: {0}]   ;;  %s7594_s6 = inlined_call_operand.hbm [shape: f32[200,128], index: 6, kind: output, shape index: {1}]  }
   0x1   :  { %13 = vsyncpa [#allocation8], 0 }
   0x2   :  { %14 = vsyncpa [#allocation11], 0 }
   0x3   :  { %15 = vsyncpa [#allocation6], 0 }
   0x4   :  { %16 = vsyncpa [#allocation15], 0  ;;  %s5393_s21 = smov [#allocation7]  }
   0x5   :  { %s32_s22 = sshll.u32 %s5393_s21, 4  ;;  %s33_s22 = int_to_ptr.vmem [resolvable:$true] %s32_s22 }
   0x6   :  { %s5251_s23 = scalar_lea.vmem %s33_s22, 100352  ;;  %p5256_p1 = scmp.lt.s32.totalorder %s33_s22, %s33_s22 }
   0x7   :  { %p5252_p0 = scmp.ne.s32.totalorder %s33_s22, %s5251_s23  ;;  %p5257_p2 = scmp.lt.s32.totalorder %s5251_s23, %s5251_s23 }
   0x9   :  { %p5258_p3 = por %p5257_p2, %p5256_p1 }
   0xb   :  { %p5259_p4 = pnand %p5258_p3, %p5252_p0 }
   0xd   :  { %5262 = shalt.err (!%p5259_p4)
}
   0xe   :  { %s5394_s24 = smov 1024   ;;  %s5395_s25 = smov 64  }
   0xf   :  { %38 = dma.hbm_to_vmem [thread:$0]  %s7589_s1, 100352, %s33_s22, [#allocation8], %s5394_s24, %s5394_s24, %s5395_s25  }
  0x10   :  { %s5396_s28 = smov [#allocation10]  }
  0x11   :  { %s54_s29 = sshll.u32 %s5396_s28, 4  ;;  %s55_s29 = int_to_ptr.vmem [resolvable:$true] %s54_s29 }
  0x12   :  { %s5271_s30 = scalar_lea.vmem %s55_s29, 16384  ;;  %p5276_p6 = scmp.lt.s32.totalorder %s55_s29, %s55_s29 }
  0x13   :  { %p5272_p5 = scmp.ne.s32.totalorder %s55_s29, %s5271_s30  ;;  %p5277_p7 = scmp.lt.s32.totalorder %s5271_s30, %s5271_s30 }
  0x15   :  { %p5278_p8 = por %p5277_p7, %p5276_p6 }
  0x17   :  { %p5279_p9 = pnand %p5278_p8, %p5272_p5 }
  0x19   :  { %5282 = shalt.err (!%p5279_p9)
}
  0x1a   :  { %s5397_s7 = smov 128   ;;  %s5398_s8 = smov 8  }
  0x1b   :  { %60 = dma.hbm_to_vmem [thread:$0]  %s7591_s3, 16384, %s55_s29, [#allocation11], %s5397_s7, %s5397_s7, %s5398_s8  }
  0x1c   :  { %s5399_s1 = smov [#allocation4]   ;;  %s5400_s12 = smov [#allocation9]  }
  0x1d   :  { %s23_s11 = sshll.u32 %s5399_s1, 4  ;;  %s45_s13 = sshll.u32 %s5400_s12, 4  ;;  %s24_s11 = int_to_ptr.vmem [resolvable:$true] %s23_s11  ;;  %s46_s13 = int_to_ptr.vmem [resolvable:$true] %s45_s13 }
  0x1e   :  { %s5291_s14 = scalar_lea.vmem %s24_s11, 896  ;;  %p5296_p11 = scmp.lt.s32.totalorder %s24_s11, %s24_s11 }
  0x1f   :  { %p5292_p10 = scmp.ne.s32.totalorder %s24_s11, %s5291_s14  ;;  %p5297_p12 = scmp.lt.s32.totalorder %s5291_s14, %s5291_s14 }
  0x21   :  { %p5298_p13 = por %p5297_p12, %p5296_p11 }
  0x23   :  { %p5299_p0 = pnand %p5298_p13, %p5292_p10 }
  0x25   :  { %5302 = shalt.err (!%p5299_p0)
}
  0x26   :  { %26 = dma.hbm_to_vmem [thread:$0]  %s7588_s0, 896, %s24_s11, [#allocation5]  }
  0x27   :  { %s5311_s17 = scalar_lea.vmem %s46_s13, 128  ;;  %p5316_p2 = scmp.lt.s32.totalorder %s46_s13, %s46_s13 }
  0x28   :  { %p5312_p1 = scmp.ne.s32.totalorder %s46_s13, %s5311_s17  ;;  %p5317_p3 = scmp.lt.s32.totalorder %s5311_s17, %s5311_s17 }
  0x2a   :  { %p5318_p4 = por %p5317_p3, %p5316_p2 }
  0x2c   :  { %p5319_p5 = pnand %p5318_p4, %p5312_p1 }
  0x2e   :  { %5322 = shalt.err (!%p5319_p5)
}
  0x2f   :  { %48 = dma.hbm_to_vmem [thread:$0]  %s7590_s2, 128, %s46_s13, [#allocation8]  }
  0x30   :  { %s5401_s19 = smov [#allocation12]  }
  0x31   :  { %s67_s20 = sshll.u32 %s5401_s19, 4  ;;  %s68_s20 = int_to_ptr.vmem [resolvable:$true] %s67_s20 }
  0x32   :  { %s5331_s21 = scalar_lea.vmem %s68_s20, 16  ;;  %s5335_s22 = scalar_lea.vmem %s68_s20, 32 }
  0x33   :  { %p5332_p6 = scmp.ne.s32.totalorder %s68_s20, %s5331_s21  ;;  %p5336_p7 = scmp.lt.s32.totalorder %s68_s20, %s68_s20 }
  0x34   :  { %p5337_p8 = scmp.lt.s32.totalorder %s5335_s22, %s5331_s21 }
  0x36   :  { %p5338_p9 = por %p5337_p8, %p5336_p7 }
  0x38   :  { %p5339_p10 = pnand %p5338_p9, %p5332_p6 }
  0x3a   :  { %5342 = shalt.err (!%p5339_p10)
}
  0x3b   :  { %70 = dma.hbm_to_vmem [thread:$0]  %s7592_s4, 16, %s68_s20, [#allocation11]  }
  0x3c   :  { %5383 = dma.done.wait [#allocation5], 896  }
  0x3d   :  { %5384 = vsyncadd [#allocation5], 4294966400 }
  0x3e   :  { %5385 = dma.done.wait [#allocation8], 100480  }
  0x3f   :  { %5386 = vsyncadd [#allocation8], 4294866816 }
  0x40   :  { %5387 = dma.done.wait [#allocation11], 16400  }
  0x41   :  { %5388 = vsyncadd [#allocation11], 4294950896  ;;  %v214_v0 = vld [vmem:[#allocation7 + $0x3c8] sm:$0xff]  ;;  %v213_v2 = vld [vmem:[#allocation7 + $0x3c0] sm:$0xff]  ;;  %vm919_vm0 = vcmask 130048   ;;  %s5404_s2 = smov [#allocation14]  }
  0x42   :  { %v470_v1 = vld [vmem:[#allocation7 + $0xbc8] sm:$0xff]  ;;  %923 = vmatprep.subr.mxu0 %v214_v0  ;;  %v469_v3 = vld [vmem:[#allocation7 + $0xbc0] sm:$0xff]  ;;  %s4746_s4 = sshll.u32 %s5404_s2, 4  ;;  %s5405_s24 = smov [#allocation13]   ;;  %s4747_s4 = int_to_ptr.vmem [resolvable:$true] %s4746_s4 }
  0x43   :  { %994 = vmatprep.subr.mxu1 %v470_v1  ;;  %v206_v4 = vld [vmem:[#allocation7 + $0x388] sm:$0xff]  ;;  %924 = vmatpush1.msra.mxu0 %v213_v2  ;;  %v205_v6 = vld [vmem:[#allocation7 + $0x380] sm:$0xff]  ;;  %s4734_s25 = sshll.u32 %s5405_s24, 4  ;;  %s5343_s26 = scalar_lea.vmem %s4747_s4, 3200  ;;  %s4735_s25 = int_to_ptr.vmem [resolvable:$true] %s4734_s25 }
  0x44   :  { %v462_v5 = vld [vmem:[#allocation7 + $0xb88] sm:$0xff]  ;;  %995 = vmatpush1.msra.mxu1 %v469_v3  ;;  %v461_v7 = vld [vmem:[#allocation7 + $0xb80] sm:$0xff]  ;;  %925 = vmatprep.subr.mxu0 %v206_v4  ;;  %p5344_p11 = scmp.ne.s32.totalorder %s4747_s4, %s5343_s26  ;;  %p5348_p12 = scmp.lt.s32.totalorder %s4747_s4, %s4747_s4 }
  0x45   :  { %v198_v8 = vld [vmem:[#allocation7 + $0x348] sm:$0xff]  ;;  %996 = vmatprep.subr.mxu1 %v462_v5  ;;  %v197_v10 = vld [vmem:[#allocation7 + $0x340] sm:$0xff]  ;;  %926 = vmatpush1.msra.mxu0 %v205_v6  ;;  %p5349_p13 = scmp.lt.s32.totalorder %s5343_s26, %s5343_s26 }
  0x46   :  { %v454_v9 = vld [vmem:[#allocation7 + $0xb48] sm:$0xff]  ;;  %v453_v11 = vld [vmem:[#allocation7 + $0xb40] sm:$0xff]  ;;  %997 = vmatpush1.msra.mxu1 %v461_v7  ;;  %927 = vmatprep.subr.mxu0 %v198_v8 }
  0x47   :  { %v190_v12 = vld [vmem:[#allocation7 + $0x308] sm:$0xff]  ;;  %998 = vmatprep.subr.mxu1 %v454_v9  ;;  %v189_v14 = vld [vmem:[#allocation7 + $0x300] sm:$0xff]  ;;  %928 = vmatpush1.msra.mxu0 %v197_v10  ;;  %p5350_p0 = por %p5349_p13, %p5348_p12 }
  0x48   :  { %v446_v13 = vld [vmem:[#allocation7 + $0xb08] sm:$0xff]  ;;  %v445_v15 = vld [vmem:[#allocation7 + $0xb00] sm:$0xff]  ;;  %999 = vmatpush1.msra.mxu1 %v453_v11  ;;  %929 = vmatprep.subr.mxu0 %v190_v12 }
  0x49   :  { %v182_v16 = vld [vmem:[#allocation7 + $0x2c8] sm:$0xff]  ;;  %1000 = vmatprep.subr.mxu1 %v446_v13  ;;  %v181_v18 = vld [vmem:[#allocation7 + $0x2c0] sm:$0xff]  ;;  %930 = vmatpush1.msra.mxu0 %v189_v14  ;;  %p5351_p1 = pnand %p5350_p0, %p5344_p11 }
  0x4a   :  { %v438_v17 = vld [vmem:[#allocation7 + $0xac8] sm:$0xff]  ;;  %v437_v19 = vld [vmem:[#allocation7 + $0xac0] sm:$0xff]  ;;  %1001 = vmatpush1.msra.mxu1 %v445_v15  ;;  %931 = vmatprep.subr.mxu0 %v182_v16 }
  0x4b   :  { %v174_v20 = vld [vmem:[#allocation7 + $0x288] sm:$0xff]  ;;  %1002 = vmatprep.subr.mxu1 %v438_v17  ;;  %v173_v22 = vld [vmem:[#allocation7 + $0x280] sm:$0xff]  ;;  %932 = vmatpush1.msra.mxu0 %v181_v18 }
  0x4c   :  { %v430_v21 = vld [vmem:[#allocation7 + $0xa88] sm:$0xff]  ;;  %v429_v23 = vld [vmem:[#allocation7 + $0xa80] sm:$0xff]  ;;  %1003 = vmatpush1.msra.mxu1 %v437_v19  ;;  %933 = vmatprep.subr.mxu0 %v174_v20 }
  0x4d   :  { %v166_v24 = vld [vmem:[#allocation7 + $0x248] sm:$0xff]  ;;  %1004 = vmatprep.subr.mxu1 %v430_v21  ;;  %v165_v26 = vld [vmem:[#allocation7 + $0x240] sm:$0xff]  ;;  %934 = vmatpush1.msra.mxu0 %v173_v22 }
  0x4e   :  { %v422_v25 = vld [vmem:[#allocation7 + $0xa48] sm:$0xff]  ;;  %v421_v27 = vld [vmem:[#allocation7 + $0xa40] sm:$0xff]  ;;  %1005 = vmatpush1.msra.mxu1 %v429_v23  ;;  %935 = vmatprep.subr.mxu0 %v166_v24 }
  0x4f   :  { %v158_v28 = vld [vmem:[#allocation7 + $0x208] sm:$0xff]  ;;  %1006 = vmatprep.subr.mxu1 %v422_v25  ;;  %v157_v30 = vld [vmem:[#allocation7 + $0x200] sm:$0xff]  ;;  %936 = vmatpush1.msra.mxu0 %v165_v26 }
  0x50   :  { %v414_v29 = vld [vmem:[#allocation7 + $0xa08] sm:$0xff]  ;;  %v413_v31 = vld [vmem:[#allocation7 + $0xa00] sm:$0xff]  ;;  %1007 = vmatpush1.msra.mxu1 %v421_v27  ;;  %937 = vmatprep.subr.mxu0 %v158_v28 }
  0x51   :  { %v150_v32 = vld [vmem:[#allocation7 + $0x1c8] sm:$0xff]  ;;  %1008 = vmatprep.subr.mxu1 %v414_v29  ;;  %v149_v34 = vld [vmem:[#allocation7 + $0x1c0] sm:$0xff]  ;;  %938 = vmatpush1.msra.mxu0 %v157_v30 }
  0x52   :  { %v406_v33 = vld [vmem:[#allocation7 + $0x9c8] sm:$0xff]  ;;  %v405_v35 = vld [vmem:[#allocation7 + $0x9c0] sm:$0xff]  ;;  %1009 = vmatpush1.msra.mxu1 %v413_v31  ;;  %939 = vmatprep.subr.mxu0 %v150_v32 }
  0x53   :  { %v142_v36 = vld [vmem:[#allocation7 + $0x188] sm:$0xff]  ;;  %1010 = vmatprep.subr.mxu1 %v406_v33  ;;  %v141_v38 = vld [vmem:[#allocation7 + $0x180] sm:$0xff]  ;;  %940 = vmatpush1.msra.mxu0 %v149_v34 }
  0x54   :  { %v398_v37 = vld [vmem:[#allocation7 + $0x988] sm:$0xff]  ;;  %v397_v39 = vld [vmem:[#allocation7 + $0x980] sm:$0xff]  ;;  %1011 = vmatpush1.msra.mxu1 %v405_v35  ;;  %941 = vmatprep.subr.mxu0 %v142_v36 }
  0x55   :  { %v134_v40 = vld [vmem:[#allocation7 + $0x148] sm:$0xff]  ;;  %1012 = vmatprep.subr.mxu1 %v398_v37  ;;  %v133_v42 = vld [vmem:[#allocation7 + $0x140] sm:$0xff]  ;;  %942 = vmatpush1.msra.mxu0 %v141_v38 }
  0x56   :  { %v390_v41 = vld [vmem:[#allocation7 + $0x948] sm:$0xff]  ;;  %v389_v43 = vld [vmem:[#allocation7 + $0x940] sm:$0xff]  ;;  %1013 = vmatpush1.msra.mxu1 %v397_v39  ;;  %943 = vmatprep.subr.mxu0 %v134_v40 }
  0x57   :  { %v126_v44 = vld [vmem:[#allocation7 + $0x108] sm:$0xff]  ;;  %1014 = vmatprep.subr.mxu1 %v390_v41  ;;  %v125_v46 = vld [vmem:[#allocation7 + $0x100] sm:$0xff]  ;;  %944 = vmatpush1.msra.mxu0 %v133_v42 }
  0x58   :  { %v382_v45 = vld [vmem:[#allocation7 + $0x908] sm:$0xff]  ;;  %v381_v47 = vld [vmem:[#allocation7 + $0x900] sm:$0xff]  ;;  %1015 = vmatpush1.msra.mxu1 %v389_v43  ;;  %945 = vmatprep.subr.mxu0 %v126_v44 }
  0x59   :  { %v118_v48 = vld [vmem:[#allocation7 + $0xc8] sm:$0xff]  ;;  %1016 = vmatprep.subr.mxu1 %v382_v45  ;;  %v117_v50 = vld [vmem:[#allocation7 + $0xc0] sm:$0xff]  ;;  %946 = vmatpush1.msra.mxu0 %v125_v46 }
  0x5a   :  { %v374_v49 = vld [vmem:[#allocation7 + $0x8c8] sm:$0xff]  ;;  %v373_v51 = vld [vmem:[#allocation7 + $0x8c0] sm:$0xff]  ;;  %1017 = vmatpush1.msra.mxu1 %v381_v47  ;;  %947 = vmatprep.subr.mxu0 %v118_v48 }
  0x5b   :  { %v110_v52 = vld [vmem:[#allocation7 + $0x88] sm:$0xff]  ;;  %1018 = vmatprep.subr.mxu1 %v374_v49  ;;  %v109_v54 = vld [vmem:[#allocation7 + $0x80] sm:$0xff]  ;;  %948 = vmatpush1.msra.mxu0 %v117_v50 }
  0x5c   :  { %v366_v53 = vld [vmem:[#allocation7 + $0x888] sm:$0xff]  ;;  %v365_v55 = vld [vmem:[#allocation7 + $0x880] sm:$0xff]  ;;  %1019 = vmatpush1.msra.mxu1 %v373_v51  ;;  %949 = vmatprep.subr.mxu0 %v110_v52 }
  0x5d   :  { %v102_v56 = vld [vmem:[#allocation7 + $0x48] sm:$0xff]  ;;  %1020 = vmatprep.subr.mxu1 %v366_v53  ;;  %v101_v58 = vld [vmem:[#allocation7 + $0x40] sm:$0xff]  ;;  %950 = vmatpush1.msra.mxu0 %v109_v54 }
  0x5e   :  { %v358_v57 = vld [vmem:[#allocation7 + $0x848] sm:$0xff]  ;;  %v357_v59 = vld [vmem:[#allocation7 + $0x840] sm:$0xff]  ;;  %1021 = vmatpush1.msra.mxu1 %v365_v55  ;;  %951 = vmatprep.subr.mxu0 %v102_v56 }
  0x5f   :  { %v94_v60 = vld [vmem:[#allocation7 + $0x8] sm:$0xff]  ;;  %1022 = vmatprep.subr.mxu1 %v358_v57  ;;  %v93_v62 = vld [vmem:[#allocation7] sm:$0xff]  ;;  %952 = vmatpush1.msra.mxu0 %v101_v58 }
  0x60   :  { %v350_v61 = vld [vmem:[#allocation7 + $0x808] sm:$0xff]  ;;  %v349_v63 = vld [vmem:[#allocation7 + $0x800] sm:$0xff]  ;;  %1023 = vmatpush1.msra.mxu1 %v357_v59  ;;  %953 = vmatprep.subr.mxu0 %v94_v60 }
  0x61   :  { %v342_v0 = vld [vmem:[#allocation7 + $0x7c8] sm:$0xff]  ;;  %1024 = vmatprep.subr.mxu1 %v350_v61  ;;  %v341_v2 = vld [vmem:[#allocation7 + $0x7c0] sm:$0xff]  ;;  %954 = vmatpush1.msra.mxu0 %v93_v62 }
  0x62   :  { %v598_v1 = vld [vmem:[#allocation7 + $0xfc8] sm:$0xff]  ;;  %v597_v3 = vld [vmem:[#allocation7 + $0xfc0] sm:$0xff]  ;;  %1025 = vmatpush1.msra.mxu1 %v349_v63  ;;  %955 = vmatprep.subr.mxu0 %v342_v0  ;;  %v5459_v63 = vld [vmem:[#allocation4 + $0x8] sm:$0xff] }
  0x63   :  { %v334_v4 = vld [vmem:[#allocation7 + $0x788] sm:$0xff]  ;;  %1026 = vmatprep.subr.mxu1 %v598_v1  ;;  %v333_v6 = vld [vmem:[#allocation7 + $0x780] sm:$0xff]  ;;  %956 = vmatpush2.msra.mxu0 %v341_v2 }
  0x64   :  { %v590_v5 = vld [vmem:[#allocation7 + $0xf88] sm:$0xff]  ;;  %v589_v7 = vld [vmem:[#allocation7 + $0xf80] sm:$0xff]  ;;  %1027 = vmatpush2.msra.mxu1 %v597_v3  ;;  %957 = vmatprep.subr.mxu0 %v334_v4  ;;  %v88_v3 = vld [vmem:[#allocation4 + $0x10] sm:$0xff] }
  0x65   :  { %v326_v8 = vld [vmem:[#allocation7 + $0x748] sm:$0xff]  ;;  %1028 = vmatprep.subr.mxu1 %v590_v5  ;;  %v325_v10 = vld [vmem:[#allocation7 + $0x740] sm:$0xff]  ;;  %958 = vmatpush2.msra.mxu0 %v333_v6 }
  0x66   :  { %v582_v9 = vld [vmem:[#allocation7 + $0xf48] sm:$0xff]  ;;  %v581_v11 = vld [vmem:[#allocation7 + $0xf40] sm:$0xff]  ;;  %1029 = vmatpush2.msra.mxu1 %v589_v7  ;;  %959 = vmatprep.subr.mxu0 %v326_v8 }
  0x67   :  { %v318_v12 = vld [vmem:[#allocation7 + $0x708] sm:$0xff]  ;;  %1030 = vmatprep.subr.mxu1 %v582_v9  ;;  %v317_v14 = vld [vmem:[#allocation7 + $0x700] sm:$0xff]  ;;  %960 = vmatpush2.msra.mxu0 %v325_v10 }
  0x68   :  { %v574_v13 = vld [vmem:[#allocation7 + $0xf08] sm:$0xff]  ;;  %v573_v15 = vld [vmem:[#allocation7 + $0xf00] sm:$0xff]  ;;  %1031 = vmatpush2.msra.mxu1 %v581_v11  ;;  %961 = vmatprep.subr.mxu0 %v318_v12 }
  0x69   :  { %v310_v16 = vld [vmem:[#allocation7 + $0x6c8] sm:$0xff]  ;;  %1032 = vmatprep.subr.mxu1 %v574_v13  ;;  %v309_v18 = vld [vmem:[#allocation7 + $0x6c0] sm:$0xff]  ;;  %962 = vmatpush2.msra.mxu0 %v317_v14  ;;  %v92_v13 = vld [vmem:[#allocation4 + $0x30] sm:$0xff] }
  0x6a   :  { %v566_v17 = vld [vmem:[#allocation7 + $0xec8] sm:$0xff]  ;;  %v565_v19 = vld [vmem:[#allocation7 + $0xec0] sm:$0xff]  ;;  %1033 = vmatpush2.msra.mxu1 %v573_v15  ;;  %963 = vmatprep.subr.mxu0 %v310_v16  ;;  %v216_v14 = vld [vmem:[#allocation7 + $0x3d8] sm:$0xff] }
  0x6b   :  { %v302_v20 = vld [vmem:[#allocation7 + $0x688] sm:$0xff]  ;;  %1034 = vmatprep.subr.mxu1 %v566_v17  ;;  %v301_v22 = vld [vmem:[#allocation7 + $0x680] sm:$0xff]  ;;  %964 = vmatpush2.msra.mxu0 %v309_v18  ;;  %v215_v16 = vld [vmem:[#allocation7 + $0x3d0] sm:$0xff]  ;;  %v5402_v17 = vmov 0.0  }
  0x6c   :  { %v558_v21 = vld [vmem:[#allocation7 + $0xe88] sm:$0xff]  ;;  %v557_v23 = vld [vmem:[#allocation7 + $0xe80] sm:$0xff]  ;;  %1035 = vmatpush2.msra.mxu1 %v565_v19  ;;  %965 = vmatprep.subr.mxu0 %v302_v20  ;;  %v208_v19 = vld [vmem:[#allocation7 + $0x398] sm:$0xff] }
  0x6d   :  { %v294_v24 = vld [vmem:[#allocation7 + $0x648] sm:$0xff]  ;;  %1036 = vmatprep.subr.mxu1 %v558_v21  ;;  %v293_v26 = vld [vmem:[#allocation7 + $0x640] sm:$0xff]  ;;  %966 = vmatpush2.msra.mxu0 %v301_v22  ;;  %v207_v21 = vld [vmem:[#allocation7 + $0x390] sm:$0xff] }
  0x6e   :  { %v550_v25 = vld [vmem:[#allocation7 + $0xe48] sm:$0xff]  ;;  %v549_v27 = vld [vmem:[#allocation7 + $0xe40] sm:$0xff]  ;;  %1037 = vmatpush2.msra.mxu1 %v557_v23  ;;  %967 = vmatprep.subr.mxu0 %v294_v24  ;;  %v200_v23 = vld [vmem:[#allocation7 + $0x358] sm:$0xff] }
  0x6f   :  { %v286_v28 = vld [vmem:[#allocation7 + $0x608] sm:$0xff]  ;;  %1038 = vmatprep.subr.mxu1 %v550_v25  ;;  %v285_v30 = vld [vmem:[#allocation7 + $0x600] sm:$0xff]  ;;  %968 = vmatpush2.msra.mxu0 %v293_v26  ;;  %v199_v25 = vld [vmem:[#allocation7 + $0x350] sm:$0xff] }
  0x70   :  { %v542_v29 = vld [vmem:[#allocation7 + $0xe08] sm:$0xff]  ;;  %v541_v31 = vld [vmem:[#allocation7 + $0xe00] sm:$0xff]  ;;  %1039 = vmatpush2.msra.mxu1 %v549_v27  ;;  %969 = vmatprep.subr.mxu0 %v286_v28  ;;  %v192_v27 = vld [vmem:[#allocation7 + $0x318] sm:$0xff] }
  0x71   :  { %v278_v32 = vld [vmem:[#allocation7 + $0x5c8] sm:$0xff]  ;;  %1040 = vmatprep.subr.mxu1 %v542_v29  ;;  %v277_v34 = vld [vmem:[#allocation7 + $0x5c0] sm:$0xff]  ;;  %970 = vmatpush2.msra.mxu0 %v285_v30  ;;  %v191_v29 = vld [vmem:[#allocation7 + $0x310] sm:$0xff] }
  0x72   :  { %v534_v33 = vld [vmem:[#allocation7 + $0xdc8] sm:$0xff]  ;;  %v533_v35 = vld [vmem:[#allocation7 + $0xdc0] sm:$0xff]  ;;  %1041 = vmatpush2.msra.mxu1 %v541_v31  ;;  %971 = vmatprep.subr.mxu0 %v278_v32  ;;  %v184_v31 = vld [vmem:[#allocation7 + $0x2d8] sm:$0xff] }
  0x73   :  { %v270_v36 = vld [vmem:[#allocation7 + $0x588] sm:$0xff]  ;;  %1042 = vmatprep.subr.mxu1 %v534_v33  ;;  %v269_v38 = vld [vmem:[#allocation7 + $0x580] sm:$0xff]  ;;  %972 = vmatpush2.msra.mxu0 %v277_v34  ;;  %v183_v33 = vld [vmem:[#allocation7 + $0x2d0] sm:$0xff] }
  0x74   :  { %v526_v37 = vld [vmem:[#allocation7 + $0xd88] sm:$0xff]  ;;  %v525_v39 = vld [vmem:[#allocation7 + $0xd80] sm:$0xff]  ;;  %1043 = vmatpush2.msra.mxu1 %v533_v35  ;;  %973 = vmatprep.subr.mxu0 %v270_v36  ;;  %v176_v35 = vld [vmem:[#allocation7 + $0x298] sm:$0xff] }
  0x75   :  { %v262_v40 = vld [vmem:[#allocation7 + $0x548] sm:$0xff]  ;;  %1044 = vmatprep.subr.mxu1 %v526_v37  ;;  %v261_v42 = vld [vmem:[#allocation7 + $0x540] sm:$0xff]  ;;  %974 = vmatpush2.msra.mxu0 %v269_v38  ;;  %v175_v37 = vld [vmem:[#allocation7 + $0x290] sm:$0xff] }
  0x76   :  { %v518_v41 = vld [vmem:[#allocation7 + $0xd48] sm:$0xff]  ;;  %v517_v43 = vld [vmem:[#allocation7 + $0xd40] sm:$0xff]  ;;  %1045 = vmatpush2.msra.mxu1 %v525_v39  ;;  %975 = vmatprep.subr.mxu0 %v262_v40  ;;  %v168_v39 = vld [vmem:[#allocation7 + $0x258] sm:$0xff] }
  0x77   :  { %v254_v44 = vld [vmem:[#allocation7 + $0x508] sm:$0xff]  ;;  %1046 = vmatprep.subr.mxu1 %v518_v41  ;;  %v253_v46 = vld [vmem:[#allocation7 + $0x500] sm:$0xff]  ;;  %976 = vmatpush2.msra.mxu0 %v261_v42  ;;  %v167_v41 = vld [vmem:[#allocation7 + $0x250] sm:$0xff] }
  0x78   :  { %v510_v45 = vld [vmem:[#allocation7 + $0xd08] sm:$0xff]  ;;  %v509_v47 = vld [vmem:[#allocation7 + $0xd00] sm:$0xff]  ;;  %1047 = vmatpush2.msra.mxu1 %v517_v43  ;;  %977 = vmatprep.subr.mxu0 %v254_v44  ;;  %v160_v43 = vld [vmem:[#allocation7 + $0x218] sm:$0xff] }
  0x79   :  { %v246_v48 = vld [vmem:[#allocation7 + $0x4c8] sm:$0xff]  ;;  %1048 = vmatprep.subr.mxu1 %v510_v45  ;;  %v245_v50 = vld [vmem:[#allocation7 + $0x4c0] sm:$0xff]  ;;  %978 = vmatpush2.msra.mxu0 %v253_v46  ;;  %v159_v45 = vld [vmem:[#allocation7 + $0x210] sm:$0xff] }
  0x7a   :  { %v502_v49 = vld [vmem:[#allocation7 + $0xcc8] sm:$0xff]  ;;  %v501_v51 = vld [vmem:[#allocation7 + $0xcc0] sm:$0xff]  ;;  %1049 = vmatpush2.msra.mxu1 %v509_v47  ;;  %979 = vmatprep.subr.mxu0 %v246_v48  ;;  %v152_v47 = vld [vmem:[#allocation7 + $0x1d8] sm:$0xff] }
  0x7b   :  { %v238_v52 = vld [vmem:[#allocation7 + $0x488] sm:$0xff]  ;;  %1050 = vmatprep.subr.mxu1 %v502_v49  ;;  %v237_v54 = vld [vmem:[#allocation7 + $0x480] sm:$0xff]  ;;  %980 = vmatpush2.msra.mxu0 %v245_v50  ;;  %v151_v49 = vld [vmem:[#allocation7 + $0x1d0] sm:$0xff] }
  0x7c   :  { %v494_v53 = vld [vmem:[#allocation7 + $0xc88] sm:$0xff]  ;;  %v493_v55 = vld [vmem:[#allocation7 + $0xc80] sm:$0xff]  ;;  %1051 = vmatpush2.msra.mxu1 %v501_v51  ;;  %981 = vmatprep.subr.mxu0 %v238_v52  ;;  %v144_v51 = vld [vmem:[#allocation7 + $0x198] sm:$0xff] }
  0x7d   :  { %v230_v56 = vld [vmem:[#allocation7 + $0x448] sm:$0xff]  ;;  %1052 = vmatprep.subr.mxu1 %v494_v53  ;;  %v229_v58 = vld [vmem:[#allocation7 + $0x440] sm:$0xff]  ;;  %982 = vmatpush2.msra.mxu0 %v237_v54  ;;  %v143_v53 = vld [vmem:[#allocation7 + $0x190] sm:$0xff] }
  0x7e   :  { %v486_v57 = vld [vmem:[#allocation7 + $0xc48] sm:$0xff]  ;;  %v485_v59 = vld [vmem:[#allocation7 + $0xc40] sm:$0xff]  ;;  %1053 = vmatpush2.msra.mxu1 %v493_v55  ;;  %983 = vmatprep.subr.mxu0 %v230_v56  ;;  %v136_v55 = vld [vmem:[#allocation7 + $0x158] sm:$0xff] }
  0x7f   :  { %v222_v60 = vld [vmem:[#allocation7 + $0x408] sm:$0xff]  ;;  %1054 = vmatprep.subr.mxu1 %v486_v57  ;;  %v221_v62 = vld [vmem:[#allocation7 + $0x400] sm:$0xff]  ;;  %984 = vmatpush2.msra.mxu0 %v229_v58  ;;  %v135_v57 = vld [vmem:[#allocation7 + $0x150] sm:$0xff] }
  0x80   :  { %v478_v61 = vld [vmem:[#allocation7 + $0xc08] sm:$0xff]  ;;  %1055 = vmatpush2.msra.mxu1 %v485_v59  ;;  %v477_v0 = vld [vmem:[#allocation7 + $0xc00] sm:$0xff]  ;;  %985 = vmatprep.subr.mxu0 %v222_v60  ;;  %v128_v59 = vld [vmem:[#allocation7 + $0x118] sm:$0xff] }
  0x81   :  { %v89_v1 = vld [vmem:[#allocation4 + $0x18] sm:$0xff]  ;;  %1056 = vmatprep.subr.mxu1 %v478_v61  ;;  %v5461_v2 = vld [vmem:[#allocation4] sm:$0xff]  ;;  %986 = vmatpush2.msra.mxu0 %v221_v62  ;;  %v127_v61 = vld [vmem:[#allocation7 + $0x110] sm:$0xff] }
  0x82   :  { %987 = vmatprep.mubr.f32.mxu0 %v5459_v63  ;;  %v726_v4 = vld [vmem:[#allocation7 + $0x13c8] sm:$0xff]  ;;  %1057 = vmatpush2.msra.mxu1 %v477_v0  ;;  %v725_v6 = vld [vmem:[#allocation7 + $0x13c0] sm:$0xff]  ;;  %v120_v0 = vld [vmem:[#allocation7 + $0xd8] sm:$0xff] }
  0x83   :  { %v870_v5 = vld [vmem:[#allocation7 + $0x1848] sm:$0xff]  ;;  %1058 = vmatprep.mubr.f32.mxu1 %v89_v1  ;;  %v869_v7 = vld [vmem:[#allocation7 + $0x1840] sm:$0xff]  ;;  %988 = vmatmul.mubr.f32.vlgmr.msra.gmra.mxu0 %v5461_v2 }
  0x84   :  { %1059 = vmatmul.mubr.f32.vlgmr.msra.gmra.mxu1 %v88_v3  ;;  %v718_v8 = vld [vmem:[#allocation7 + $0x1388] sm:$0xff]  ;;  %1065 = vmatprep.subr.mxu0 %v726_v4  ;;  %v717_v10 = vld [vmem:[#allocation7 + $0x1380] sm:$0xff]  ;;  %v119_v3 = vld [vmem:[#allocation7 + $0xd0] sm:$0xff] }
  0x85   :  { %v862_v9 = vld [vmem:[#allocation7 + $0x1808] sm:$0xff]  ;;  %1164 = vmatprep.subr.mxu1 %v870_v5  ;;  %v861_v11 = vld [vmem:[#allocation7 + $0x1800] sm:$0xff]  ;;  %1066 = vmatpush1.msra.mxu0 %v725_v6  ;;  %v112_v5 = vld [vmem:[#allocation7 + $0x98] sm:$0xff] }
  0x86   :  { %1165 = vmatpush1.msra.mxu1 %v869_v7  ;;  %v710_v12 = vld [vmem:[#allocation7 + $0x1348] sm:$0xff]  ;;  %1067 = vmatprep.subr.mxu0 %v718_v8  ;;  %v709_v15 = vld [vmem:[#allocation7 + $0x1340] sm:$0xff]  ;;  %v111_v7 = vld [vmem:[#allocation7 + $0x90] sm:$0xff] }
  0x87   :  { %1166 = vmatprep.subr.mxu1 %v862_v9  ;;  %1068 = vmatpush1.msra.mxu0 %v717_v10  ;;  %v702_v18 = vld [vmem:[#allocation7 + $0x1308] sm:$0xff]  ;;  %v701_v20 = vld [vmem:[#allocation7 + $0x1300] sm:$0xff]  ;;  %v104_v9 = vld [vmem:[#allocation7 + $0x58] sm:$0xff] }
  0x88   :  { %1167 = vmatpush1.msra.mxu1 %v861_v11  ;;  %1200 = vmatprep.mubr.f32.mxu1 %v5402_v17  ;;  %v694_v22 = vld [vmem:[#allocation7 + $0x12c8] sm:$0xff]  ;;  %v693_v24 = vld [vmem:[#allocation7 + $0x12c0] sm:$0xff]  ;;  %v103_v11 = vld [vmem:[#allocation7 + $0x50] sm:$0xff] }
  0x89   :  { %1069 = vmatprep.subr.mxu0 %v710_v12  ;;  %4788 = vmatmul.mubr.msk.f32.vlgmr.msra.gmra.mxu1 %vm919_vm0, %v92_v13  ;;  %v686_v26 = vld [vmem:[#allocation7 + $0x1288] sm:$0xff]  ;;  %v685_v28 = vld [vmem:[#allocation7 + $0x1280] sm:$0xff]  ;;  %v96_v13 = vld [vmem:[#allocation7 + $0x18] sm:$0xff] }
  0x8a   :  { %1207 = vmatprep.subr.mxu1 %v216_v14  ;;  %1070 = vmatpush1.msra.mxu0 %v709_v15  ;;  %v678_v30 = vld [vmem:[#allocation7 + $0x1248] sm:$0xff]  ;;  %v677_v32 = vld [vmem:[#allocation7 + $0x1240] sm:$0xff]  ;;  %v95_v15 = vld [vmem:[#allocation7 + $0x10] sm:$0xff] }
  0x8b   :  { %1208 = vmatpush1.msra.mxu1 %v215_v16  ;;  %1071 = vmatprep.subr.mxu0 %v702_v18  ;;  %v670_v34 = vld [vmem:[#allocation7 + $0x1208] sm:$0xff]  ;;  %v669_v36 = vld [vmem:[#allocation7 + $0x1200] sm:$0xff]  ;;  %v344_v18 = vld [vmem:[#allocation7 + $0x7d8] sm:$0xff] }
  0x8c   :  { %1209 = vmatprep.subr.mxu1 %v208_v19  ;;  %1072 = vmatpush1.msra.mxu0 %v701_v20  ;;  %v662_v38 = vld [vmem:[#allocation7 + $0x11c8] sm:$0xff]  ;;  %v661_v40 = vld [vmem:[#allocation7 + $0x11c0] sm:$0xff]  ;;  %v343_v20 = vld [vmem:[#allocation7 + $0x7d0] sm:$0xff] }
  0x8d   :  { %1210 = vmatpush1.msra.mxu1 %v207_v21  ;;  %1073 = vmatprep.subr.mxu0 %v694_v22  ;;  %v654_v42 = vld [vmem:[#allocation7 + $0x1188] sm:$0xff]  ;;  %v653_v44 = vld [vmem:[#allocation7 + $0x1180] sm:$0xff]  ;;  %v336_v22 = vld [vmem:[#allocation7 + $0x798] sm:$0xff] }
  0x8e   :  { %1211 = vmatprep.subr.mxu1 %v200_v23  ;;  %1074 = vmatpush1.msra.mxu0 %v693_v24  ;;  %v646_v46 = vld [vmem:[#allocation7 + $0x1148] sm:$0xff]  ;;  %v645_v48 = vld [vmem:[#allocation7 + $0x1140] sm:$0xff]  ;;  %v335_v24 = vld [vmem:[#allocation7 + $0x790] sm:$0xff] }
  0x8f   :  { %1212 = vmatpush1.msra.mxu1 %v199_v25  ;;  %1075 = vmatprep.subr.mxu0 %v686_v26  ;;  %v638_v50 = vld [vmem:[#allocation7 + $0x1108] sm:$0xff]  ;;  %v637_v52 = vld [vmem:[#allocation7 + $0x1100] sm:$0xff]  ;;  %v328_v26 = vld [vmem:[#allocation7 + $0x758] sm:$0xff] }
  0x90   :  { %1213 = vmatprep.subr.mxu1 %v192_v27  ;;  %1076 = vmatpush1.msra.mxu0 %v685_v28  ;;  %v630_v54 = vld [vmem:[#allocation7 + $0x10c8] sm:$0xff]  ;;  %v629_v56 = vld [vmem:[#allocation7 + $0x10c0] sm:$0xff]  ;;  %v327_v28 = vld [vmem:[#allocation7 + $0x750] sm:$0xff] }
  0x91   :  { %1214 = vmatpush1.msra.mxu1 %v191_v29  ;;  %1077 = vmatprep.subr.mxu0 %v678_v30  ;;  %v622_v58 = vld [vmem:[#allocation7 + $0x1088] sm:$0xff]  ;;  %v621_v60 = vld [vmem:[#allocation7 + $0x1080] sm:$0xff]  ;;  %v320_v30 = vld [vmem:[#allocation7 + $0x718] sm:$0xff] }
  0x92   :  { %1215 = vmatprep.subr.mxu1 %v184_v31  ;;  %1078 = vmatpush1.msra.mxu0 %v677_v32  ;;  %v614_v62 = vld [vmem:[#allocation7 + $0x1048] sm:$0xff]  ;;  %v613_v1 = vld [vmem:[#allocation7 + $0x1040] sm:$0xff]  ;;  %v319_v32 = vld [vmem:[#allocation7 + $0x710] sm:$0xff] }
  0x93   :  { %1216 = vmatpush1.msra.mxu1 %v183_v33  ;;  %1079 = vmatprep.subr.mxu0 %v670_v34  ;;  %v606_v4 = vld [vmem:[#allocation7 + $0x1008] sm:$0xff]  ;;  %v605_v6 = vld [vmem:[#allocation7 + $0x1000] sm:$0xff]  ;;  %v312_v34 = vld [vmem:[#allocation7 + $0x6d8] sm:$0xff] }
  0x94   :  { %1217 = vmatprep.subr.mxu1 %v176_v35  ;;  %1080 = vmatpush1.msra.mxu0 %v669_v36  ;;  %v854_v8 = vld [vmem:[#allocation7 + $0x17c8] sm:$0xff]  ;;  %v853_v10 = vld [vmem:[#allocation7 + $0x17c0] sm:$0xff]  ;;  %v311_v36 = vld [vmem:[#allocation7 + $0x6d0] sm:$0xff] }
  0x95   :  { %1218 = vmatpush1.msra.mxu1 %v175_v37  ;;  %1081 = vmatprep.subr.mxu0 %v662_v38  ;;  %v846_v12 = vld [vmem:[#allocation7 + $0x1788] sm:$0xff]  ;;  %v845_v14 = vld [vmem:[#allocation7 + $0x1780] sm:$0xff]  ;;  %v304_v38 = vld [vmem:[#allocation7 + $0x698] sm:$0xff] }
  0x96   :  { %1219 = vmatprep.subr.mxu1 %v168_v39  ;;  %1082 = vmatpush1.msra.mxu0 %v661_v40  ;;  %v838_v16 = vld [vmem:[#allocation7 + $0x1748] sm:$0xff]  ;;  %v837_v19 = vld [vmem:[#allocation7 + $0x1740] sm:$0xff]  ;;  %v303_v40 = vld [vmem:[#allocation7 + $0x690] sm:$0xff] }
  0x97   :  { %1220 = vmatpush1.msra.mxu1 %v167_v41  ;;  %1083 = vmatprep.subr.mxu0 %v654_v42  ;;  %v830_v21 = vld [vmem:[#allocation7 + $0x1708] sm:$0xff]  ;;  %v829_v23 = vld [vmem:[#allocation7 + $0x1700] sm:$0xff]  ;;  %v296_v42 = vld [vmem:[#allocation7 + $0x658] sm:$0xff] }
  0x98   :  { %1221 = vmatprep.subr.mxu1 %v160_v43  ;;  %1084 = vmatpush1.msra.mxu0 %v653_v44  ;;  %v822_v25 = vld [vmem:[#allocation7 + $0x16c8] sm:$0xff]  ;;  %v821_v27 = vld [vmem:[#allocation7 + $0x16c0] sm:$0xff]  ;;  %v295_v44 = vld [vmem:[#allocation7 + $0x650] sm:$0xff] }
  0x99   :  { %1222 = vmatpush1.msra.mxu1 %v159_v45  ;;  %1085 = vmatprep.subr.mxu0 %v646_v46  ;;  %v814_v29 = vld [vmem:[#allocation7 + $0x1688] sm:$0xff]  ;;  %v813_v31 = vld [vmem:[#allocation7 + $0x1680] sm:$0xff]  ;;  %v288_v46 = vld [vmem:[#allocation7 + $0x618] sm:$0xff] }
  0x9a   :  { %1223 = vmatprep.subr.mxu1 %v152_v47  ;;  %1086 = vmatpush1.msra.mxu0 %v645_v48  ;;  %v806_v33 = vld [vmem:[#allocation7 + $0x1648] sm:$0xff]  ;;  %v805_v35 = vld [vmem:[#allocation7 + $0x1640] sm:$0xff]  ;;  %v287_v48 = vld [vmem:[#allocation7 + $0x610] sm:$0xff] }
  0x9b   :  { %1224 = vmatpush1.msra.mxu1 %v151_v49  ;;  %1087 = vmatprep.subr.mxu0 %v638_v50  ;;  %v798_v37 = vld [vmem:[#allocation7 + $0x1608] sm:$0xff]  ;;  %v797_v39 = vld [vmem:[#allocation7 + $0x1600] sm:$0xff]  ;;  %v280_v50 = vld [vmem:[#allocation7 + $0x5d8] sm:$0xff] }
  0x9c   :  { %1225 = vmatprep.subr.mxu1 %v144_v51  ;;  %1088 = vmatpush1.msra.mxu0 %v637_v52  ;;  %v790_v41 = vld [vmem:[#allocation7 + $0x15c8] sm:$0xff]  ;;  %v789_v43 = vld [vmem:[#allocation7 + $0x15c0] sm:$0xff]  ;;  %v279_v52 = vld [vmem:[#allocation7 + $0x5d0] sm:$0xff] }
  0x9d   :  { %1226 = vmatpush1.msra.mxu1 %v143_v53  ;;  %1089 = vmatprep.subr.mxu0 %v630_v54  ;;  %v782_v45 = vld [vmem:[#allocation7 + $0x1588] sm:$0xff]  ;;  %v781_v47 = vld [vmem:[#allocation7 + $0x1580] sm:$0xff]  ;;  %v272_v54 = vld [vmem:[#allocation7 + $0x598] sm:$0xff] }
  0x9e   :  { %1227 = vmatprep.subr.mxu1 %v136_v55  ;;  %1090 = vmatpush1.msra.mxu0 %v629_v56  ;;  %v774_v49 = vld [vmem:[#allocation7 + $0x1548] sm:$0xff]  ;;  %v773_v51 = vld [vmem:[#allocation7 + $0x1540] sm:$0xff]  ;;  %v271_v56 = vld [vmem:[#allocation7 + $0x590] sm:$0xff] }
  0x9f   :  { %1228 = vmatpush1.msra.mxu1 %v135_v57  ;;  %1091 = vmatprep.subr.mxu0 %v622_v58  ;;  %v766_v53 = vld [vmem:[#allocation7 + $0x1508] sm:$0xff]  ;;  %v765_v55 = vld [vmem:[#allocation7 + $0x1500] sm:$0xff]  ;;  %v264_v58 = vld [vmem:[#allocation7 + $0x558] sm:$0xff] }
  0xa0   :  { %1229 = vmatprep.subr.mxu1 %v128_v59  ;;  %1092 = vmatpush1.msra.mxu0 %v621_v60  ;;  %v758_v57 = vld [vmem:[#allocation7 + $0x14c8] sm:$0xff]  ;;  %v757_v59 = vld [vmem:[#allocation7 + $0x14c0] sm:$0xff]  ;;  %v263_v60 = vld [vmem:[#allocation7 + $0x550] sm:$0xff] }
  0xa1   :  { %1230 = vmatpush1.msra.mxu1 %v127_v61  ;;  %1093 = vmatprep.subr.mxu0 %v614_v62  ;;  %v750_v61 = vld [vmem:[#allocation7 + $0x1488] sm:$0xff]  ;;  %v256_v62 = vld [vmem:[#allocation7 + $0x518] sm:$0xff] }
  0xa2   :  { %1231 = vmatprep.subr.mxu1 %v120_v0  ;;  %1094 = vmatpush1.msra.mxu0 %v613_v1  ;;  %v749_v0 = vld [vmem:[#allocation7 + $0x1480] sm:$0xff]  ;;  %v255_v1 = vld [vmem:[#allocation7 + $0x510] sm:$0xff] }
  0xa3   :  { %1232 = vmatpush1.msra.mxu1 %v119_v3  ;;  %1095 = vmatprep.subr.mxu0 %v606_v4  ;;  %v742_v3 = vld [vmem:[#allocation7 + $0x1448] sm:$0xff]  ;;  %v248_v4 = vld [vmem:[#allocation7 + $0x4d8] sm:$0xff] }
  0xa4   :  { %1233 = vmatprep.subr.mxu1 %v112_v5  ;;  %1096 = vmatpush1.msra.mxu0 %v605_v6  ;;  %v741_v5 = vld [vmem:[#allocation7 + $0x1440] sm:$0xff]  ;;  %v247_v6 = vld [vmem:[#allocation7 + $0x4d0] sm:$0xff] }
  0xa5   :  { %1234 = vmatpush1.msra.mxu1 %v111_v7  ;;  %1097 = vmatprep.subr.mxu0 %v854_v8  ;;  %v734_v7 = vld [vmem:[#allocation7 + $0x1408] sm:$0xff]  ;;  %v240_v8 = vld [vmem:[#allocation7 + $0x498] sm:$0xff] }
  0xa6   :  { %1235 = vmatprep.subr.mxu1 %v104_v9  ;;  %1098 = vmatpush2.msra.mxu0 %v853_v10  ;;  %v733_v9 = vld [vmem:[#allocation7 + $0x1400] sm:$0xff]  ;;  %v5467_v10 = vld [vmem:[#allocation4 + $0x28] sm:$0xff] }
  0xa7   :  { %1236 = vmatpush1.msra.mxu1 %v103_v11  ;;  %1099 = vmatprep.subr.mxu0 %v846_v12  ;;  %v239_v11 = vld [vmem:[#allocation7 + $0x490] sm:$0xff]  ;;  %v5469_v12 = vld [vmem:[#allocation4 + $0x20] sm:$0xff] }
  0xa8   :  { %1237 = vmatprep.subr.mxu1 %v96_v13  ;;  %1100 = vmatpush2.msra.mxu0 %v845_v14  ;;  %v232_v13 = vld [vmem:[#allocation7 + $0x458] sm:$0xff] }
  0xa9   :  { %1238 = vmatpush1.msra.mxu1 %v95_v15  ;;  %1101 = vmatprep.subr.mxu0 %v838_v16  ;;  %v472_v14 = vld [vmem:[#allocation7 + $0xbd8] sm:$0xff]  ;;  %v231_v15 = vld [vmem:[#allocation7 + $0x450] sm:$0xff] }
  0xaa   :  { %1239 = vmatprep.subr.mxu1 %v344_v18  ;;  %1102 = vmatpush2.msra.mxu0 %v837_v19  ;;  %v471_v16 = vld [vmem:[#allocation7 + $0xbd0] sm:$0xff]  ;;  %v224_v18 = vld [vmem:[#allocation7 + $0x418] sm:$0xff] }
  0xab   :  { %1240 = vmatpush2.msra.mxu1 %v343_v20  ;;  %1103 = vmatprep.subr.mxu0 %v830_v21  ;;  %v464_v19 = vld [vmem:[#allocation7 + $0xb98] sm:$0xff]  ;;  %v223_v20 = vld [vmem:[#allocation7 + $0x410] sm:$0xff] }
  0xac   :  { %1241 = vmatprep.subr.mxu1 %v336_v22  ;;  %1104 = vmatpush2.msra.mxu0 %v829_v23  ;;  %v463_v21 = vld [vmem:[#allocation7 + $0xb90] sm:$0xff]  ;;  %v456_v22 = vld [vmem:[#allocation7 + $0xb58] sm:$0xff] }
  0xad   :  { %1242 = vmatpush2.msra.mxu1 %v335_v24  ;;  %1105 = vmatprep.subr.mxu0 %v822_v25  ;;  %v728_v23 = vld [vmem:[#allocation7 + $0x13d8] sm:$0xff]  ;;  %v455_v24 = vld [vmem:[#allocation7 + $0xb50] sm:$0xff] }
  0xae   :  { %1243 = vmatprep.subr.mxu1 %v328_v26  ;;  %1106 = vmatpush2.msra.mxu0 %v821_v27  ;;  %v727_v25 = vld [vmem:[#allocation7 + $0x13d0] sm:$0xff]  ;;  %v448_v26 = vld [vmem:[#allocation7 + $0xb18] sm:$0xff] }
  0xaf   :  { %1244 = vmatpush2.msra.mxu1 %v327_v28  ;;  %1107 = vmatprep.subr.mxu0 %v814_v29  ;;  %v720_v27 = vld [vmem:[#allocation7 + $0x1398] sm:$0xff]  ;;  %v447_v28 = vld [vmem:[#allocation7 + $0xb10] sm:$0xff] }
  0xb0   :  { %1245 = vmatprep.subr.mxu1 %v320_v30  ;;  %1108 = vmatpush2.msra.mxu0 %v813_v31  ;;  %v719_v29 = vld [vmem:[#allocation7 + $0x1390] sm:$0xff]  ;;  %v440_v30 = vld [vmem:[#allocation7 + $0xad8] sm:$0xff] }
  0xb1   :  { %1246 = vmatpush2.msra.mxu1 %v319_v32  ;;  %1109 = vmatprep.subr.mxu0 %v806_v33  ;;  %v712_v31 = vld [vmem:[#allocation7 + $0x1358] sm:$0xff]  ;;  %v439_v32 = vld [vmem:[#allocation7 + $0xad0] sm:$0xff] }
  0xb2   :  { %1247 = vmatprep.subr.mxu1 %v312_v34  ;;  %1110 = vmatpush2.msra.mxu0 %v805_v35  ;;  %v711_v33 = vld [vmem:[#allocation7 + $0x1350] sm:$0xff]  ;;  %v704_v34 = vld [vmem:[#allocation7 + $0x1318] sm:$0xff] }
  0xb3   :  { %1248 = vmatpush2.msra.mxu1 %v311_v36  ;;  %1111 = vmatprep.subr.mxu0 %v798_v37  ;;  %v703_v35 = vld [vmem:[#allocation7 + $0x1310] sm:$0xff]  ;;  %v424_v36 = vld [vmem:[#allocation7 + $0xa58] sm:$0xff] }
  0xb4   :  { %1249 = vmatprep.subr.mxu1 %v304_v38  ;;  %1112 = vmatpush2.msra.mxu0 %v797_v39  ;;  %v696_v37 = vld [vmem:[#allocation7 + $0x12d8] sm:$0xff]  ;;  %v423_v38 = vld [vmem:[#allocation7 + $0xa50] sm:$0xff] }
  0xb5   :  { %1250 = vmatpush2.msra.mxu1 %v303_v40  ;;  %1113 = vmatprep.subr.mxu0 %v790_v41  ;;  %v695_v39 = vld [vmem:[#allocation7 + $0x12d0] sm:$0xff]  ;;  %v416_v40 = vld [vmem:[#allocation7 + $0xa18] sm:$0xff] }
  0xb6   :  { %1251 = vmatprep.subr.mxu1 %v296_v42  ;;  %1114 = vmatpush2.msra.mxu0 %v789_v43  ;;  %v688_v41 = vld [vmem:[#allocation7 + $0x1298] sm:$0xff]  ;;  %v415_v42 = vld [vmem:[#allocation7 + $0xa10] sm:$0xff] }
  0xb7   :  { %1252 = vmatpush2.msra.mxu1 %v295_v44  ;;  %1115 = vmatprep.subr.mxu0 %v782_v45  ;;  %v687_v43 = vld [vmem:[#allocation7 + $0x1290] sm:$0xff]  ;;  %v408_v44 = vld [vmem:[#allocation7 + $0x9d8] sm:$0xff] }
  0xb8   :  { %1253 = vmatprep.subr.mxu1 %v288_v46  ;;  %1116 = vmatpush2.msra.mxu0 %v781_v47  ;;  %v680_v45 = vld [vmem:[#allocation7 + $0x1258] sm:$0xff]  ;;  %v407_v46 = vld [vmem:[#allocation7 + $0x9d0] sm:$0xff] }
  0xb9   :  { %1254 = vmatpush2.msra.mxu1 %v287_v48  ;;  %1117 = vmatprep.subr.mxu0 %v774_v49  ;;  %v679_v47 = vld [vmem:[#allocation7 + $0x1250] sm:$0xff]  ;;  %v400_v48 = vld [vmem:[#allocation7 + $0x998] sm:$0xff] }
  0xba   :  { %1255 = vmatprep.subr.mxu1 %v280_v50  ;;  %1118 = vmatpush2.msra.mxu0 %v773_v51  ;;  %v672_v49 = vld [vmem:[#allocation7 + $0x1218] sm:$0xff]  ;;  %v399_v50 = vld [vmem:[#allocation7 + $0x990] sm:$0xff] }
  0xbb   :  { %1256 = vmatpush2.msra.mxu1 %v279_v52  ;;  %1119 = vmatprep.subr.mxu0 %v766_v53  ;;  %v671_v51 = vld [vmem:[#allocation7 + $0x1210] sm:$0xff]  ;;  %v392_v52 = vld [vmem:[#allocation7 + $0x958] sm:$0xff] }
  0xbc   :  { %1257 = vmatprep.subr.mxu1 %v272_v54  ;;  %1120 = vmatpush2.msra.mxu0 %v765_v55  ;;  %v664_v53 = vld [vmem:[#allocation7 + $0x11d8] sm:$0xff]  ;;  %v391_v54 = vld [vmem:[#allocation7 + $0x950] sm:$0xff] }
  0xbd   :  { %1258 = vmatpush2.msra.mxu1 %v271_v56  ;;  %1121 = vmatprep.subr.mxu0 %v758_v57  ;;  %v663_v55 = vld [vmem:[#allocation7 + $0x11d0] sm:$0xff]  ;;  %v384_v56 = vld [vmem:[#allocation7 + $0x918] sm:$0xff] }
  0xbe   :  { %1259 = vmatprep.subr.mxu1 %v264_v58  ;;  %1122 = vmatpush2.msra.mxu0 %v757_v59  ;;  %v656_v57 = vld [vmem:[#allocation7 + $0x1198] sm:$0xff]  ;;  %v383_v58 = vld [vmem:[#allocation7 + $0x910] sm:$0xff] }
  0xbf   :  { %1260 = vmatpush2.msra.mxu1 %v263_v60  ;;  %1123 = vmatprep.subr.mxu0 %v750_v61  ;;  %v655_v59 = vld [vmem:[#allocation7 + $0x1190] sm:$0xff]  ;;  %v376_v60 = vld [vmem:[#allocation7 + $0x8d8] sm:$0xff] }
  0xc0   :  { %1261 = vmatprep.subr.mxu1 %v256_v62  ;;  %1124 = vmatpush2.msra.mxu0 %v749_v0  ;;  %v648_v61 = vld [vmem:[#allocation7 + $0x1158] sm:$0xff]  ;;  %v375_v62 = vld [vmem:[#allocation7 + $0x8d0] sm:$0xff] }
  0xc1   :  { %1262 = vmatpush2.msra.mxu1 %v255_v1  ;;  %1125 = vmatprep.subr.mxu0 %v742_v3  ;;  %v647_v0 = vld [vmem:[#allocation7 + $0x1150] sm:$0xff]  ;;  %v368_v1 = vld [vmem:[#allocation7 + $0x898] sm:$0xff] }
  0xc2   :  { %1263 = vmatprep.subr.mxu1 %v248_v4  ;;  %1126 = vmatpush2.msra.mxu0 %v741_v5  ;;  %v640_v3 = vld [vmem:[#allocation7 + $0x1118] sm:$0xff]  ;;  %v367_v4 = vld [vmem:[#allocation7 + $0x890] sm:$0xff] }
  0xc3   :  { %1264 = vmatpush2.msra.mxu1 %v247_v6  ;;  %1127 = vmatprep.subr.mxu0 %v734_v7  ;;  %v639_v5 = vld [vmem:[#allocation7 + $0x1110] sm:$0xff]  ;;  %v360_v6 = vld [vmem:[#allocation7 + $0x858] sm:$0xff] }
  0xc4   :  { %1265 = vmatprep.subr.mxu1 %v240_v8  ;;  %1128 = vmatpush2.msra.mxu0 %v733_v9  ;;  %v632_v7 = vld [vmem:[#allocation7 + $0x10d8] sm:$0xff]  ;;  %v359_v8 = vld [vmem:[#allocation7 + $0x850] sm:$0xff] }
  0xc5   :  { %1129 = vmatprep.mubr.f32.mxu0 %v5467_v10  ;;  %1266 = vmatpush2.msra.mxu1 %v239_v11  ;;  %v631_v9 = vld [vmem:[#allocation7 + $0x10d0] sm:$0xff]  ;;  %v352_v11 = vld [vmem:[#allocation7 + $0x818] sm:$0xff] }
  0xc6   :  { %1130 = vmatmul.mubr.f32.vlgmr.msra.gmra.mxu0 %v5469_v12  ;;  %1267 = vmatprep.subr.mxu1 %v232_v13  ;;  %v624_v13 = vld [vmem:[#allocation7 + $0x1098] sm:$0xff] }
  0xc7   :  { %1278 = vmatprep.subr.mxu0 %v472_v14  ;;  %1268 = vmatpush2.msra.mxu1 %v231_v15  ;;  %v351_v14 = vld [vmem:[#allocation7 + $0x810] sm:$0xff] }
  0xc8   :  { %1279 = vmatpush1.msra.mxu0 %v471_v16  ;;  %1269 = vmatprep.subr.mxu1 %v224_v18  ;;  %v623_v15 = vld [vmem:[#allocation7 + $0x1090] sm:$0xff]  ;;  %v600_v16 = vld [vmem:[#allocation7 + $0xfd8] sm:$0xff] }
  0xc9   :  { %1280 = vmatprep.subr.mxu0 %v464_v19  ;;  %1270 = vmatpush2.msra.mxu1 %v223_v20  ;;  %v616_v18 = vld [vmem:[#allocation7 + $0x1058] sm:$0xff]  ;;  %v599_v19 = vld [vmem:[#allocation7 + $0xfd0] sm:$0xff] }
  0xca   :  { %1271 = vmatprep.mubr.f32.mxu1 %v5459_v63  ;;  %1281 = vmatpush1.msra.mxu0 %v463_v21  ;;  %v432_v63 = vld [vmem:[#allocation7 + $0xa98] sm:$0xff]  ;;  %v615_v20 = vld [vmem:[#allocation7 + $0x1050] sm:$0xff] }
  0xcb   :  { %1272 = vmatmul.mubr.f32.vlgmr.msra.gmra.mxu1 %v5461_v2  ;;  %1282 = vmatprep.subr.mxu0 %v456_v22  ;;  %v431_v2 = vld [vmem:[#allocation7 + $0xa90] sm:$0xff]  ;;  %v592_v21 = vld [vmem:[#allocation7 + $0xf98] sm:$0xff] }
  0xcc   :  { %1349 = vmatprep.subr.mxu1 %v728_v23  ;;  %1283 = vmatpush1.msra.mxu0 %v455_v24  ;;  %v608_v22 = vld [vmem:[#allocation7 + $0x1018] sm:$0xff]  ;;  %v591_v23 = vld [vmem:[#allocation7 + $0xf90] sm:$0xff] }
  0xcd   :  { %1350 = vmatpush1.msra.mxu1 %v727_v25  ;;  %1284 = vmatprep.subr.mxu0 %v448_v26  ;;  %v607_v24 = vld [vmem:[#allocation7 + $0x1010] sm:$0xff]  ;;  %v584_v25 = vld [vmem:[#allocation7 + $0xf58] sm:$0xff] }
  0xce   :  { %1351 = vmatprep.subr.mxu1 %v720_v27  ;;  %1285 = vmatpush1.msra.mxu0 %v447_v28  ;;  %v856_v26 = vld [vmem:[#allocation7 + $0x17d8] sm:$0xff]  ;;  %v583_v27 = vld [vmem:[#allocation7 + $0xf50] sm:$0xff] }
  0xcf   :  { %1352 = vmatpush1.msra.mxu1 %v719_v29  ;;  %1286 = vmatprep.subr.mxu0 %v440_v30  ;;  %v855_v28 = vld [vmem:[#allocation7 + $0x17d0] sm:$0xff]  ;;  %v576_v29 = vld [vmem:[#allocation7 + $0xf18] sm:$0xff] }
  0xd0   :  { %1353 = vmatprep.subr.mxu1 %v712_v31  ;;  %1287 = vmatpush1.msra.mxu0 %v439_v32  ;;  %v848_v30 = vld [vmem:[#allocation7 + $0x1798] sm:$0xff]  ;;  %v575_v31 = vld [vmem:[#allocation7 + $0xf10] sm:$0xff] }
  0xd1   :  { %1354 = vmatpush1.msra.mxu1 %v711_v33  ;;  %1288 = vmatprep.subr.mxu0 %v432_v63  ;;  %v847_v32 = vld [vmem:[#allocation7 + $0x1790] sm:$0xff]  ;;  %v568_v33 = vld [vmem:[#allocation7 + $0xed8] sm:$0xff] }
  0xd2   :  { %1355 = vmatprep.subr.mxu1 %v704_v34  ;;  %1289 = vmatpush1.msra.mxu0 %v431_v2  ;;  %v840_v63 = vld [vmem:[#allocation7 + $0x1758] sm:$0xff]  ;;  %v567_v34 = vld [vmem:[#allocation7 + $0xed0] sm:$0xff] }
  0xd3   :  { %1356 = vmatpush1.msra.mxu1 %v703_v35  ;;  %1290 = vmatprep.subr.mxu0 %v424_v36  ;;  %v839_v2 = vld [vmem:[#allocation7 + $0x1750] sm:$0xff]  ;;  %v560_v35 = vld [vmem:[#allocation7 + $0xe98] sm:$0xff] }
  0xd4   :  { %1357 = vmatprep.subr.mxu1 %v696_v37  ;;  %1291 = vmatpush1.msra.mxu0 %v423_v38  ;;  %v832_v36 = vld [vmem:[#allocation7 + $0x1718] sm:$0xff]  ;;  %v559_v37 = vld [vmem:[#allocation7 + $0xe90] sm:$0xff] }
  0xd5   :  { %1358 = vmatpush1.msra.mxu1 %v695_v39  ;;  %1292 = vmatprep.subr.mxu0 %v416_v40  ;;  %v831_v38 = vld [vmem:[#allocation7 + $0x1710] sm:$0xff]  ;;  %v552_v39 = vld [vmem:[#allocation7 + $0xe58] sm:$0xff] }
  0xd6   :  { %1359 = vmatprep.subr.mxu1 %v688_v41  ;;  %1293 = vmatpush1.msra.mxu0 %v415_v42  ;;  %v824_v40 = vld [vmem:[#allocation7 + $0x16d8] sm:$0xff]  ;;  %v551_v41 = vld [vmem:[#allocation7 + $0xe50] sm:$0xff] }
  0xd7   :  { %1360 = vmatpush1.msra.mxu1 %v687_v43  ;;  %1294 = vmatprep.subr.mxu0 %v408_v44  ;;  %v823_v42 = vld [vmem:[#allocation7 + $0x16d0] sm:$0xff]  ;;  %v544_v43 = vld [vmem:[#allocation7 + $0xe18] sm:$0xff] }
  0xd8   :  { %1361 = vmatprep.subr.mxu1 %v680_v45  ;;  %1295 = vmatpush1.msra.mxu0 %v407_v46  ;;  %v816_v44 = vld [vmem:[#allocation7 + $0x1698] sm:$0xff]  ;;  %v543_v45 = vld [vmem:[#allocation7 + $0xe10] sm:$0xff] }
  0xd9   :  { %1362 = vmatpush1.msra.mxu1 %v679_v47  ;;  %1296 = vmatprep.subr.mxu0 %v400_v48  ;;  %v815_v46 = vld [vmem:[#allocation7 + $0x1690] sm:$0xff]  ;;  %v536_v47 = vld [vmem:[#allocation7 + $0xdd8] sm:$0xff] }
  0xda   :  { %1363 = vmatprep.subr.mxu1 %v672_v49  ;;  %1297 = vmatpush1.msra.mxu0 %v399_v50  ;;  %v808_v48 = vld [vmem:[#allocation7 + $0x1658] sm:$0xff]  ;;  %v535_v49 = vld [vmem:[#allocation7 + $0xdd0] sm:$0xff] }
  0xdb   :  { %1364 = vmatpush1.msra.mxu1 %v671_v51  ;;  %1298 = vmatprep.subr.mxu0 %v392_v52  ;;  %v807_v50 = vld [vmem:[#allocation7 + $0x1650] sm:$0xff]  ;;  %v528_v51 = vld [vmem:[#allocation7 + $0xd98] sm:$0xff] }
  0xdc   :  { %1365 = vmatprep.subr.mxu1 %v664_v53  ;;  %1299 = vmatpush1.msra.mxu0 %v391_v54  ;;  %v800_v52 = vld [vmem:[#allocation7 + $0x1618] sm:$0xff]  ;;  %v527_v53 = vld [vmem:[#allocation7 + $0xd90] sm:$0xff] }
  0xdd   :  { %1366 = vmatpush1.msra.mxu1 %v663_v55  ;;  %1300 = vmatprep.subr.mxu0 %v384_v56  ;;  %v799_v54 = vld [vmem:[#allocation7 + $0x1610] sm:$0xff]  ;;  %v520_v55 = vld [vmem:[#allocation7 + $0xd58] sm:$0xff] }
  0xde   :  { %1367 = vmatprep.subr.mxu1 %v656_v57  ;;  %1301 = vmatpush1.msra.mxu0 %v383_v58  ;;  %v792_v56 = vld [vmem:[#allocation7 + $0x15d8] sm:$0xff]  ;;  %v519_v57 = vld [vmem:[#allocation7 + $0xd50] sm:$0xff] }
  0xdf   :  { %1368 = vmatpush1.msra.mxu1 %v655_v59  ;;  %1302 = vmatprep.subr.mxu0 %v376_v60  ;;  %v791_v58 = vld [vmem:[#allocation7 + $0x15d0] sm:$0xff]  ;;  %v512_v59 = vld [vmem:[#allocation7 + $0xd18] sm:$0xff] }
  0xe0   :  { %1369 = vmatprep.subr.mxu1 %v648_v61  ;;  %1303 = vmatpush1.msra.mxu0 %v375_v62  ;;  %v784_v60 = vld [vmem:[#allocation7 + $0x1598] sm:$0xff]  ;;  %v511_v61 = vld [vmem:[#allocation7 + $0xd10] sm:$0xff] }
  0xe1   :  { %1370 = vmatpush1.msra.mxu1 %v647_v0  ;;  %1304 = vmatprep.subr.mxu0 %v368_v1  ;;  %v783_v62 = vld [vmem:[#allocation7 + $0x1590] sm:$0xff]  ;;  %v504_v0 = vld [vmem:[#allocation7 + $0xcd8] sm:$0xff] }
  0xe2   :  { %1371 = vmatprep.subr.mxu1 %v640_v3  ;;  %1305 = vmatpush1.msra.mxu0 %v367_v4  ;;  %v776_v1 = vld [vmem:[#allocation7 + $0x1558] sm:$0xff]  ;;  %v503_v3 = vld [vmem:[#allocation7 + $0xcd0] sm:$0xff] }
  0xe3   :  { %1372 = vmatpush1.msra.mxu1 %v639_v5  ;;  %1306 = vmatprep.subr.mxu0 %v360_v6  ;;  %v775_v4 = vld [vmem:[#allocation7 + $0x1550] sm:$0xff]  ;;  %v496_v5 = vld [vmem:[#allocation7 + $0xc98] sm:$0xff] }
  0xe4   :  { %1373 = vmatprep.subr.mxu1 %v632_v7  ;;  %1307 = vmatpush1.msra.mxu0 %v359_v8  ;;  %v768_v6 = vld [vmem:[#allocation7 + $0x1518] sm:$0xff]  ;;  %v495_v7 = vld [vmem:[#allocation7 + $0xc90] sm:$0xff] }
  0xe5   :  { %1374 = vmatpush1.msra.mxu1 %v631_v9  ;;  %1308 = vmatprep.subr.mxu0 %v352_v11  ;;  %v767_v8 = vld [vmem:[#allocation7 + $0x1510] sm:$0xff]  ;;  %v488_v9 = vld [vmem:[#allocation7 + $0xc58] sm:$0xff] }
  0xe6   :  { %1375 = vmatprep.subr.mxu1 %v624_v13  ;;  %1309 = vmatpush1.msra.mxu0 %v351_v14  ;;  %v760_v11 = vld [vmem:[#allocation7 + $0x14d8] sm:$0xff]  ;;  %v487_v13 = vld [vmem:[#allocation7 + $0xc50] sm:$0xff] }
  0xe7   :  { %1376 = vmatpush1.msra.mxu1 %v623_v15  ;;  %1310 = vmatprep.subr.mxu0 %v600_v16  ;;  %v759_v14 = vld [vmem:[#allocation7 + $0x14d0] sm:$0xff]  ;;  %v480_v15 = vld [vmem:[#allocation7 + $0xc18] sm:$0xff] }
  0xe8   :  { %1377 = vmatprep.subr.mxu1 %v616_v18  ;;  %1311 = vmatpush2.msra.mxu0 %v599_v19  ;;  %v752_v16 = vld [vmem:[#allocation7 + $0x1498] sm:$0xff]  ;;  %v479_v18 = vld [vmem:[#allocation7 + $0xc10] sm:$0xff] }
  0xe9   :  { %1378 = vmatpush1.msra.mxu1 %v615_v20  ;;  %1312 = vmatprep.subr.mxu0 %v592_v21  ;;  %v751_v19 = vld [vmem:[#allocation7 + $0x1490] sm:$0xff]  ;;  %v744_v20 = vld [vmem:[#allocation7 + $0x1458] sm:$0xff] }
  0xea   :  { %1379 = vmatprep.subr.mxu1 %v608_v22  ;;  %1313 = vmatpush2.msra.mxu0 %v591_v23  ;;  %v872_v21 = vld [vmem:[#allocation7 + $0x1858] sm:$0xff]  ;;  %v5475_v22 = vld [vmem:[#allocation4 + $0x18] sm:$0xff]  ;;  %v743_v23 = vld [vmem:[#allocation7 + $0x1450] sm:$0xff] }
  0xeb   :  { %1380 = vmatpush1.msra.mxu1 %v607_v24  ;;  %1314 = vmatprep.subr.mxu0 %v584_v25  ;;  %v871_v24 = vld [vmem:[#allocation7 + $0x1850] sm:$0xff]  ;;  %v5478_v25 = vld [vmem:[#allocation4 + $0x10] sm:$0xff] }
  0xec   :  { %1381 = vmatprep.subr.mxu1 %v856_v26  ;;  %1315 = vmatpush2.msra.mxu0 %v583_v27  ;;  %v736_v26 = vld [vmem:[#allocation7 + $0x1418] sm:$0xff] }
  0xed   :  { %1382 = vmatpush2.msra.mxu1 %v855_v28  ;;  %1316 = vmatprep.subr.mxu0 %v576_v29  ;;  %v864_v27 = vld [vmem:[#allocation7 + $0x1818] sm:$0xff]  ;;  %v735_v28 = vld [vmem:[#allocation7 + $0x1410] sm:$0xff] }
  0xee   :  { %1383 = vmatprep.subr.mxu1 %v848_v30  ;;  %1317 = vmatpush2.msra.mxu0 %v575_v31  ;;  %v863_v29 = vld [vmem:[#allocation7 + $0x1810] sm:$0xff]  ;;  %v218_v30 = vld [vmem:[#allocation7 + $0x3e8] sm:$0xff] }
  0xef   :  { %1384 = vmatpush2.msra.mxu1 %v847_v32  ;;  %1318 = vmatprep.subr.mxu0 %v568_v33  ;;  %v474_v31 = vld [vmem:[#allocation7 + $0xbe8] sm:$0xff]  ;;  %v217_v32 = vld [vmem:[#allocation7 + $0x3e0] sm:$0xff] }
  0xf0   :  { %1385 = vmatprep.subr.mxu1 %v840_v63  ;;  %1319 = vmatpush2.msra.mxu0 %v567_v34  ;;  %v473_v33 = vld [vmem:[#allocation7 + $0xbe0] sm:$0xff]  ;;  %v5484_v63 = vld [vmem:[#allocation4 + $0x30] sm:$0xff]  ;;  %v210_v34 = vld [vmem:[#allocation7 + $0x3a8] sm:$0xff] }
  0xf1   :  { %1386 = vmatpush2.msra.mxu1 %v839_v2  ;;  %1320 = vmatprep.subr.mxu0 %v560_v35  ;;  %v466_v2 = vld [vmem:[#allocation7 + $0xba8] sm:$0xff]  ;;  %v209_v35 = vld [vmem:[#allocation7 + $0x3a0] sm:$0xff] }
  0xf2   :  { %1387 = vmatprep.subr.mxu1 %v832_v36  ;;  %1321 = vmatpush2.msra.mxu0 %v559_v37  ;;  %v202_v36 = vld [vmem:[#allocation7 + $0x368] sm:$0xff] }
  0xf3   :  { %1388 = vmatpush2.msra.mxu1 %v831_v38  ;;  %1322 = vmatprep.subr.mxu0 %v552_v39  ;;  %v458_v37 = vld [vmem:[#allocation7 + $0xb68] sm:$0xff]  ;;  %v201_v38 = vld [vmem:[#allocation7 + $0x360] sm:$0xff] }
  0xf4   :  { %1389 = vmatprep.subr.mxu1 %v824_v40  ;;  %1323 = vmatpush2.msra.mxu0 %v551_v41  ;;  %v457_v39 = vld [vmem:[#allocation7 + $0xb60] sm:$0xff]  ;;  %v450_v40 = vld [vmem:[#allocation7 + $0xb28] sm:$0xff] }
  0xf5   :  { %1390 = vmatpush2.msra.mxu1 %v823_v42  ;;  %1324 = vmatprep.subr.mxu0 %v544_v43  ;;  %v193_v41 = vld [vmem:[#allocation7 + $0x320] sm:$0xff]  ;;  %v186_v43 = vld [vmem:[#allocation7 + $0x2e8] sm:$0xff] }
  0xf6   :  { %1391 = vmatprep.subr.mxu1 %v816_v44  ;;  %1325 = vmatpush2.msra.mxu0 %v543_v45  ;;  %v449_v42 = vld [vmem:[#allocation7 + $0xb20] sm:$0xff]  ;;  %v442_v44 = vld [vmem:[#allocation7 + $0xae8] sm:$0xff] }
  0xf7   :  { %1392 = vmatpush2.msra.mxu1 %v815_v46  ;;  %1326 = vmatprep.subr.mxu0 %v536_v47  ;;  %v185_v45 = vld [vmem:[#allocation7 + $0x2e0] sm:$0xff]  ;;  %v178_v47 = vld [vmem:[#allocation7 + $0x2a8] sm:$0xff] }
  0xf8   :  { %1393 = vmatprep.subr.mxu1 %v808_v48  ;;  %1327 = vmatpush2.msra.mxu0 %v535_v49  ;;  %v441_v46 = vld [vmem:[#allocation7 + $0xae0] sm:$0xff]  ;;  %v434_v48 = vld [vmem:[#allocation7 + $0xaa8] sm:$0xff] }
  0xf9   :  { %1394 = vmatpush2.msra.mxu1 %v807_v50  ;;  %1328 = vmatprep.subr.mxu0 %v528_v51  ;;  %v177_v49 = vld [vmem:[#allocation7 + $0x2a0] sm:$0xff]  ;;  %v170_v51 = vld [vmem:[#allocation7 + $0x268] sm:$0xff] }
  0xfa   :  { %1395 = vmatprep.subr.mxu1 %v800_v52  ;;  %1329 = vmatpush2.msra.mxu0 %v527_v53  ;;  %v433_v50 = vld [vmem:[#allocation7 + $0xaa0] sm:$0xff]  ;;  %v426_v52 = vld [vmem:[#allocation7 + $0xa68] sm:$0xff] }
  0xfb   :  { %1396 = vmatpush2.msra.mxu1 %v799_v54  ;;  %1330 = vmatprep.subr.mxu0 %v520_v55  ;;  %v169_v53 = vld [vmem:[#allocation7 + $0x260] sm:$0xff]  ;;  %v162_v55 = vld [vmem:[#allocation7 + $0x228] sm:$0xff] }
  0xfc   :  { %1397 = vmatprep.subr.mxu1 %v792_v56  ;;  %1331 = vmatpush2.msra.mxu0 %v519_v57  ;;  %v425_v54 = vld [vmem:[#allocation7 + $0xa60] sm:$0xff]  ;;  %v418_v56 = vld [vmem:[#allocation7 + $0xa28] sm:$0xff] }
  0xfd   :  { %1398 = vmatpush2.msra.mxu1 %v791_v58  ;;  %1332 = vmatprep.subr.mxu0 %v512_v59  ;;  %v161_v57 = vld [vmem:[#allocation7 + $0x220] sm:$0xff]  ;;  %v154_v59 = vld [vmem:[#allocation7 + $0x1e8] sm:$0xff] }
  0xfe   :  { %1399 = vmatprep.subr.mxu1 %v784_v60  ;;  %1333 = vmatpush2.msra.mxu0 %v511_v61  ;;  %v417_v58 = vld [vmem:[#allocation7 + $0xa20] sm:$0xff]  ;;  %v410_v60 = vld [vmem:[#allocation7 + $0x9e8] sm:$0xff] }
  0xff   :  { %1400 = vmatpush2.msra.mxu1 %v783_v62  ;;  %1334 = vmatprep.subr.mxu0 %v504_v0  ;;  %v153_v61 = vld [vmem:[#allocation7 + $0x1e0] sm:$0xff]  ;;  %v146_v0 = vld [vmem:[#allocation7 + $0x1a8] sm:$0xff] }
 0x100   :  { %1401 = vmatprep.subr.mxu1 %v776_v1  ;;  %1335 = vmatpush2.msra.mxu0 %v503_v3  ;;  %v409_v62 = vld [vmem:[#allocation7 + $0x9e0] sm:$0xff]  ;;  %v402_v1 = vld [vmem:[#allocation7 + $0x9a8] sm:$0xff] }
 0x101   :  { %1402 = vmatpush2.msra.mxu1 %v775_v4  ;;  %1336 = vmatprep.subr.mxu0 %v496_v5  ;;  %v145_v3 = vld [vmem:[#allocation7 + $0x1a0] sm:$0xff]  ;;  %v138_v5 = vld [vmem:[#allocation7 + $0x168] sm:$0xff] }
 0x102   :  { %1403 = vmatprep.subr.mxu1 %v768_v6  ;;  %1337 = vmatpush2.msra.mxu0 %v495_v7  ;;  %v401_v4 = vld [vmem:[#allocation7 + $0x9a0] sm:$0xff]  ;;  %v394_v6 = vld [vmem:[#allocation7 + $0x968] sm:$0xff] }
 0x103   :  { %1404 = vmatpush2.msra.mxu1 %v767_v8  ;;  %1338 = vmatprep.subr.mxu0 %v488_v9  ;;  %v137_v7 = vld [vmem:[#allocation7 + $0x160] sm:$0xff]  ;;  %v130_v9 = vld [vmem:[#allocation7 + $0x128] sm:$0xff] }
 0x104   :  { %1405 = vmatprep.subr.mxu1 %v760_v11  ;;  %1339 = vmatpush2.msra.mxu0 %v487_v13  ;;  %v393_v8 = vld [vmem:[#allocation7 + $0x960] sm:$0xff]  ;;  %v386_v11 = vld [vmem:[#allocation7 + $0x928] sm:$0xff] }
 0x105   :  { %1406 = vmatpush2.msra.mxu1 %v759_v14  ;;  %1340 = vmatprep.subr.mxu0 %v480_v15  ;;  %v129_v13 = vld [vmem:[#allocation7 + $0x120] sm:$0xff]  ;;  %v122_v15 = vld [vmem:[#allocation7 + $0xe8] sm:$0xff] }
 0x106   :  { %1407 = vmatprep.subr.mxu1 %v752_v16  ;;  %1341 = vmatpush2.msra.mxu0 %v479_v18  ;;  %v385_v14 = vld [vmem:[#allocation7 + $0x920] sm:$0xff]  ;;  %v378_v16 = vld [vmem:[#allocation7 + $0x8e8] sm:$0xff] }
 0x107   :  { %1342 = vmatprep.mubr.f32.mxu0 %v5475_v22  ;;  %1408 = vmatpush2.msra.mxu1 %v751_v19  ;;  %v121_v18 = vld [vmem:[#allocation7 + $0xe0] sm:$0xff] }
 0x108   :  { %1343 = vmatmul.mubr.f32.vlgmr.msra.gmra.mxu0 %v5478_v25  ;;  %1409 = vmatprep.subr.mxu1 %v744_v20  ;;  %v377_v19 = vld [vmem:[#allocation7 + $0x8e0] sm:$0xff]  ;;  %v114_v20 = vld [vmem:[#allocation7 + $0xa8] sm:$0xff] }
 0x109   :  { %1448 = vmatprep.subr.mxu0 %v872_v21  ;;  %1410 = vmatpush2.msra.mxu1 %v743_v23  ;;  %v370_v21 = vld [vmem:[#allocation7 + $0x8a8] sm:$0xff]  ;;  %v113_v23 = vld [vmem:[#allocation7 + $0xa0] sm:$0xff] }
 0x10a   :  { %1449 = vmatpush1.msra.mxu0 %v871_v24  ;;  %1411 = vmatprep.subr.mxu1 %v736_v26  ;;  %v369_v24 = vld [vmem:[#allocation7 + $0x8a0] sm:$0xff]  ;;  %v106_v26 = vld [vmem:[#allocation7 + $0x68] sm:$0xff] }
 0x10b   :  { %1450 = vmatprep.subr.mxu0 %v864_v27  ;;  %1412 = vmatpush2.msra.mxu1 %v735_v28  ;;  %v362_v27 = vld [vmem:[#allocation7 + $0x868] sm:$0xff]  ;;  %v105_v28 = vld [vmem:[#allocation7 + $0x60] sm:$0xff] }
 0x10c   :  { %1413 = vmatprep.mubr.f32.mxu1 %v5467_v10  ;;  %1451 = vmatpush1.msra.mxu0 %v863_v29  ;;  %v465_v10 = vld [vmem:[#allocation7 + $0xba0] sm:$0xff] }
 0x10d   :  { %1484 = vmatprep.mubr.f32.mxu0 %v5402_v17  ;;  %1414 = vmatmul.mubr.f32.vlgmr.msra.gmra.mxu1 %v5469_v12  ;;  %v194_v12 = vld [vmem:[#allocation7 + $0x328] sm:$0xff]  ;;  %v361_v29 = vld [vmem:[#allocation7 + $0x860] sm:$0xff] }
 0x10e   :  { %4789 = vmatmul.mubr.msk.f32.vlgmr.msra.gmra.mxu0 %vm919_vm0, %v5484_v63  ;;  %1491 = vmatprep.subr.mxu0 %v218_v30  ;;  %v98_v30 = vld [vmem:[#allocation7 + $0x28] sm:$0xff] }
 0x10f   :  { %1562 = vmatprep.subr.mxu1 %v474_v31  ;;  %1492 = vmatpush1.msra.mxu0 %v217_v32  ;;  %v354_v31 = vld [vmem:[#allocation7 + $0x828] sm:$0xff]  ;;  %v97_v32 = vld [vmem:[#allocation7 + $0x20] sm:$0xff] }
 0x110   :  { %1563 = vmatpush1.msra.mxu1 %v473_v33  ;;  %1493 = vmatprep.subr.mxu0 %v210_v34  ;;  %v353_v33 = vld [vmem:[#allocation7 + $0x820] sm:$0xff]  ;;  %v346_v34 = vld [vmem:[#allocation7 + $0x7e8] sm:$0xff] }
 0x111   :  { %1564 = vmatprep.subr.mxu1 %v466_v2  ;;  %1494 = vmatpush1.msra.mxu0 %v209_v35  ;;  %v602_v2 = vld [vmem:[#allocation7 + $0xfe8] sm:$0xff]  ;;  %v345_v35 = vld [vmem:[#allocation7 + $0x7e0] sm:$0xff] }
 0x112   :  { %1565 = vmatpush1.msra.mxu1 %v465_v10  ;;  %1495 = vmatprep.subr.mxu0 %v202_v36  ;;  %v601_v10 = vld [vmem:[#allocation7 + $0xfe0] sm:$0xff]  ;;  %v338_v36 = vld [vmem:[#allocation7 + $0x7a8] sm:$0xff] }
 0x113   :  { %1566 = vmatprep.subr.mxu1 %v458_v37  ;;  %1496 = vmatpush1.msra.mxu0 %v201_v38  ;;  %v594_v37 = vld [vmem:[#allocation7 + $0xfa8] sm:$0xff]  ;;  %v337_v38 = vld [vmem:[#allocation7 + $0x7a0] sm:$0xff] }
 0x114   :  { %1567 = vmatpush1.msra.mxu1 %v457_v39  ;;  %1497 = vmatprep.subr.mxu0 %v194_v12  ;;  %v593_v39 = vld [vmem:[#allocation7 + $0xfa0] sm:$0xff]  ;;  %v330_v12 = vld [vmem:[#allocation7 + $0x768] sm:$0xff] }
 0x115   :  { %1568 = vmatprep.subr.mxu1 %v450_v40  ;;  %1498 = vmatpush1.msra.mxu0 %v193_v41  ;;  %v586_v40 = vld [vmem:[#allocation7 + $0xf68] sm:$0xff]  ;;  %v329_v41 = vld [vmem:[#allocation7 + $0x760] sm:$0xff] }
 0x116   :  { %1569 = vmatpush1.msra.mxu1 %v449_v42  ;;  %1499 = vmatprep.subr.mxu0 %v186_v43  ;;  %v585_v42 = vld [vmem:[#allocation7 + $0xf60] sm:$0xff]  ;;  %v322_v43 = vld [vmem:[#allocation7 + $0x728] sm:$0xff] }
 0x117   :  { %1570 = vmatprep.subr.mxu1 %v442_v44  ;;  %1500 = vmatpush1.msra.mxu0 %v185_v45  ;;  %v578_v44 = vld [vmem:[#allocation7 + $0xf28] sm:$0xff]  ;;  %v321_v45 = vld [vmem:[#allocation7 + $0x720] sm:$0xff] }
 0x118   :  { %1571 = vmatpush1.msra.mxu1 %v441_v46  ;;  %1501 = vmatprep.subr.mxu0 %v178_v47  ;;  %v577_v46 = vld [vmem:[#allocation7 + $0xf20] sm:$0xff]  ;;  %v314_v47 = vld [vmem:[#allocation7 + $0x6e8] sm:$0xff] }
 0x119   :  { %1572 = vmatprep.subr.mxu1 %v434_v48  ;;  %1502 = vmatpush1.msra.mxu0 %v177_v49  ;;  %v570_v48 = vld [vmem:[#allocation7 + $0xee8] sm:$0xff]  ;;  %v313_v49 = vld [vmem:[#allocation7 + $0x6e0] sm:$0xff] }
 0x11a   :  { %1573 = vmatpush1.msra.mxu1 %v433_v50  ;;  %1503 = vmatprep.subr.mxu0 %v170_v51  ;;  %v569_v50 = vld [vmem:[#allocation7 + $0xee0] sm:$0xff]  ;;  %v879_v51 = vlaneseq }
 0x11b   :  { %1574 = vmatprep.subr.mxu1 %v426_v52  ;;  %1504 = vmatpush1.msra.mxu0 %v169_v53  ;;  %v306_v52 = vld [vmem:[#allocation7 + $0x6a8] sm:$0xff] }
 0x11c   :  { %1575 = vmatpush1.msra.mxu1 %v425_v54  ;;  %1505 = vmatprep.subr.mxu0 %v162_v55  ;;  %v562_v53 = vld [vmem:[#allocation7 + $0xea8] sm:$0xff]  ;;  %v305_v54 = vld [vmem:[#allocation7 + $0x6a0] sm:$0xff] }
 0x11d   :  { %1576 = vmatprep.subr.mxu1 %v418_v56  ;;  %1506 = vmatpush1.msra.mxu0 %v161_v57  ;;  %v561_v55 = vld [vmem:[#allocation7 + $0xea0] sm:$0xff]  ;;  %v298_v56 = vld [vmem:[#allocation7 + $0x668] sm:$0xff] }
 0x11e   :  { %1577 = vmatpush1.msra.mxu1 %v417_v58  ;;  %1507 = vmatprep.subr.mxu0 %v154_v59  ;;  %v554_v57 = vld [vmem:[#allocation7 + $0xe68] sm:$0xff]  ;;  %v297_v58 = vld [vmem:[#allocation7 + $0x660] sm:$0xff] }
 0x11f   :  { %1578 = vmatprep.subr.mxu1 %v410_v60  ;;  %1508 = vmatpush1.msra.mxu0 %v153_v61  ;;  %v553_v59 = vld [vmem:[#allocation7 + $0xe60] sm:$0xff]  ;;  %v5488_v60 = vshrl.u32 %v879_v51, 7  ;;  %v290_v61 = vld [vmem:[#allocation7 + $0x628] sm:$0xff] }
 0x120   :  { %1579 = vmatpush1.msra.mxu1 %v409_v62  ;;  %1509 = vmatprep.subr.mxu0 %v146_v0  ;;  %v546_v62 = vld [vmem:[#allocation7 + $0xe28] sm:$0xff]  ;;  %v289_v0 = vld [vmem:[#allocation7 + $0x620] sm:$0xff] }
 0x121   :  { %1580 = vmatprep.subr.mxu1 %v402_v1  ;;  %1510 = vmatpush1.msra.mxu0 %v145_v3  ;;  %v545_v1 = vld [vmem:[#allocation7 + $0xe20] sm:$0xff]  ;;  %v282_v3 = vld [vmem:[#allocation7 + $0x5e8] sm:$0xff] }
 0x122   :  { %1581 = vmatpush1.msra.mxu1 %v401_v4  ;;  %1511 = vmatprep.subr.mxu0 %v138_v5  ;;  %v538_v4 = vld [vmem:[#allocation7 + $0xde8] sm:$0xff]  ;;  %v281_v5 = vld [vmem:[#allocation7 + $0x5e0] sm:$0xff] }
 0x123   :  { %1582 = vmatprep.subr.mxu1 %v394_v6  ;;  %1512 = vmatpush1.msra.mxu0 %v137_v7  ;;  %v537_v6 = vld [vmem:[#allocation7 + $0xde0] sm:$0xff]  ;;  %v881_v7 = vsub.s32 0, %v5488_v60  ;;  %v866_v51 = vld [vmem:[#allocation7 + $0x1828] sm:$0xff] }
 0x124   :  { %1583 = vmatpush1.msra.mxu1 %v393_v8  ;;  %1513 = vmatprep.subr.mxu0 %v130_v9  ;;  %v274_v8 = vld [vmem:[#allocation7 + $0x5a8] sm:$0xff] }
 0x125   :  { %1584 = vmatprep.subr.mxu1 %v386_v11  ;;  %1514 = vmatpush1.msra.mxu0 %v129_v13  ;;  %v530_v9 = vld [vmem:[#allocation7 + $0xda8] sm:$0xff]  ;;  %v5491_v11 = vld [vmem:[#allocation9] sm:$0xff] }
 0x126   :  { %1585 = vmatpush1.msra.mxu1 %v385_v14  ;;  %1515 = vmatprep.subr.mxu0 %v122_v15  ;;  %v273_v13 = vld [vmem:[#allocation7 + $0x5a0] sm:$0xff]  ;;  %v266_v15 = vld [vmem:[#allocation7 + $0x568] sm:$0xff] }
 0x127   :  { %1586 = vmatprep.subr.mxu1 %v378_v16  ;;  %1516 = vmatpush1.msra.mxu0 %v121_v18  ;;  %v529_v14 = vld [vmem:[#allocation7 + $0xda0] sm:$0xff]  ;;  %v522_v16 = vld [vmem:[#allocation7 + $0xd68] sm:$0xff] }
 0x128   :  { %1587 = vmatpush1.msra.mxu1 %v377_v19  ;;  %1517 = vmatprep.subr.mxu0 %v114_v20  ;;  %v265_v18 = vld [vmem:[#allocation7 + $0x560] sm:$0xff]  ;;  %v882_v20 = vrot.slane %v5491_v11, %v881_v7  ;;  %v188_v7 = vld [vmem:[#allocation7 + $0x2f8] sm:$0xff] }
 0x129   :  { %1588 = vmatprep.subr.mxu1 %v370_v21  ;;  %1518 = vmatpush1.msra.mxu0 %v113_v23  ;;  %v521_v19 = vld [vmem:[#allocation7 + $0xd60] sm:$0xff]  ;;  %v258_v21 = vld [vmem:[#allocation7 + $0x528] sm:$0xff] }
 0x12a   :  { %1589 = vmatpush1.msra.mxu1 %v369_v24  ;;  %1519 = vmatprep.subr.mxu0 %v106_v26  ;;  %v514_v23 = vld [vmem:[#allocation7 + $0xd28] sm:$0xff]  ;;  %v257_v24 = vld [vmem:[#allocation7 + $0x520] sm:$0xff] }
 0x12b   :  { %1590 = vmatprep.subr.mxu1 %v362_v27  ;;  %1520 = vmatpush1.msra.mxu0 %v105_v28  ;;  %v513_v26 = vld [vmem:[#allocation7 + $0xd20] sm:$0xff]  ;;  %v250_v27 = vld [vmem:[#allocation7 + $0x4e8] sm:$0xff] }
 0x12c   :  { %1591 = vmatpush1.msra.mxu1 %v361_v29  ;;  %1521 = vmatprep.subr.mxu0 %v98_v30  ;;  %v506_v28 = vld [vmem:[#allocation7 + $0xce8] sm:$0xff]  ;;  %v249_v30 = vld [vmem:[#allocation7 + $0x4e0] sm:$0xff] }
 0x12d   :  { %1592 = vmatprep.subr.mxu1 %v354_v31  ;;  %1522 = vmatpush1.msra.mxu0 %v97_v32  ;;  %v505_v31 = vld [vmem:[#allocation7 + $0xce0] sm:$0xff] }
 0x12e   :  { %1593 = vmatpush1.msra.mxu1 %v353_v33  ;;  %1523 = vmatprep.subr.mxu0 %v346_v34  ;;  %v242_v33 = vld [vmem:[#allocation7 + $0x4a8] sm:$0xff] }
 0x12f   :  { %1594 = vmatprep.subr.mxu1 %v602_v2  ;;  %1524 = vmatpush2.msra.mxu0 %v345_v35  ;;  %v498_v34 = vld [vmem:[#allocation7 + $0xca8] sm:$0xff]  ;;  %v241_v35 = vld [vmem:[#allocation7 + $0x4a0] sm:$0xff] }
 0x130   :  { %1595 = vmatpush2.msra.mxu1 %v601_v10  ;;  %1525 = vmatprep.subr.mxu0 %v338_v36  ;;  %v497_v10 = vld [vmem:[#allocation7 + $0xca0] sm:$0xff] }
 0x131   :  { %1596 = vmatprep.subr.mxu1 %v594_v37  ;;  %1526 = vmatpush2.msra.mxu0 %v337_v38  ;;  %v234_v37 = vld [vmem:[#allocation7 + $0x468] sm:$0xff] }
 0x132   :  { %1597 = vmatpush2.msra.mxu1 %v593_v39  ;;  %1527 = vmatprep.subr.mxu0 %v330_v12  ;;  %v490_v38 = vld [vmem:[#allocation7 + $0xc68] sm:$0xff]  ;;  %v233_v39 = vld [vmem:[#allocation7 + $0x460] sm:$0xff] }
 0x133   :  { %1598 = vmatprep.subr.mxu1 %v586_v40  ;;  %1528 = vmatpush2.msra.mxu0 %v329_v41  ;;  %v489_v12 = vld [vmem:[#allocation7 + $0xc60] sm:$0xff]  ;;  %v226_v40 = vld [vmem:[#allocation7 + $0x428] sm:$0xff] }
 0x134   :  { %1599 = vmatpush2.msra.mxu1 %v585_v42  ;;  %1529 = vmatprep.subr.mxu0 %v322_v43  ;;  %v482_v41 = vld [vmem:[#allocation7 + $0xc28] sm:$0xff]  ;;  %v225_v42 = vld [vmem:[#allocation7 + $0x420] sm:$0xff] }
 0x135   :  { %1600 = vmatprep.subr.mxu1 %v578_v44  ;;  %1530 = vmatpush2.msra.mxu0 %v321_v45  ;;  %v481_v43 = vld [vmem:[#allocation7 + $0xc20] sm:$0xff]  ;;  %v5496_v44 = vld [vmem:[#allocation4 + $0x8] sm:$0xff]  ;;  %v730_v45 = vld [vmem:[#allocation7 + $0x13e8] sm:$0xff] }
 0x136   :  { %1601 = vmatpush2.msra.mxu1 %v577_v46  ;;  %1531 = vmatprep.subr.mxu0 %v314_v47  ;;  %v874_v46 = vld [vmem:[#allocation7 + $0x1868] sm:$0xff]  ;;  %v729_v47 = vld [vmem:[#allocation7 + $0x13e0] sm:$0xff] }
 0x137   :  { %1602 = vmatprep.subr.mxu1 %v570_v48  ;;  %1532 = vmatpush2.msra.mxu0 %v313_v49  ;;  %v873_v48 = vld [vmem:[#allocation7 + $0x1860] sm:$0xff]  ;;  %v5500_v49 = vld [vmem:[#allocation4] sm:$0xff] }
 0x138   :  { %1603 = vmatpush2.msra.mxu1 %v569_v50  ;;  %1533 = vmatprep.subr.mxu0 %v306_v52  ;;  %v722_v50 = vld [vmem:[#allocation7 + $0x13a8] sm:$0xff]  ;;  %v721_v52 = vld [vmem:[#allocation7 + $0x13a0] sm:$0xff] }
 0x139   :  { %1604 = vmatprep.subr.mxu1 %v562_v53  ;;  %1534 = vmatpush2.msra.mxu0 %v305_v54  ;;  %v865_v53 = vld [vmem:[#allocation7 + $0x1820] sm:$0xff]  ;;  %v714_v54 = vld [vmem:[#allocation7 + $0x1368] sm:$0xff] }
 0x13a   :  { %1605 = vmatpush2.msra.mxu1 %v561_v55  ;;  %1535 = vmatprep.subr.mxu0 %v298_v56  ;;  %v713_v55 = vld [vmem:[#allocation7 + $0x1360] sm:$0xff]  ;;  %v219_v56 = vld [vmem:[#allocation7 + $0x3f0] sm:$0xff] }
 0x13b   :  { %1606 = vmatprep.subr.mxu1 %v554_v57  ;;  %1536 = vmatpush2.msra.mxu0 %v297_v58  ;;  %v212_v57 = vld [vmem:[#allocation7 + $0x3b8] sm:$0xff]  ;;  %v705_v58 = vld [vmem:[#allocation7 + $0x1320] sm:$0xff] }
 0x13c   :  { %1607 = vmatpush2.msra.mxu1 %v553_v59  ;;  %1537 = vmatprep.subr.mxu0 %v290_v61  ;;  %v211_v59 = vld [vmem:[#allocation7 + $0x3b0] sm:$0xff]  ;;  %v698_v61 = vld [vmem:[#allocation7 + $0x12e8] sm:$0xff] }
 0x13d   :  { %1608 = vmatprep.subr.mxu1 %v546_v62  ;;  %1538 = vmatpush2.msra.mxu0 %v289_v0  ;;  %v204_v62 = vld [vmem:[#allocation7 + $0x378] sm:$0xff]  ;;  %v697_v0 = vld [vmem:[#allocation7 + $0x12e0] sm:$0xff] }
 0x13e   :  { %1609 = vmatpush2.msra.mxu1 %v545_v1  ;;  %1539 = vmatprep.subr.mxu0 %v282_v3  ;;  %v203_v1 = vld [vmem:[#allocation7 + $0x370] sm:$0xff]  ;;  %v690_v3 = vld [vmem:[#allocation7 + $0x12a8] sm:$0xff] }
 0x13f   :  { %1610 = vmatprep.subr.mxu1 %v538_v4  ;;  %1540 = vmatpush2.msra.mxu0 %v281_v5  ;;  %v196_v4 = vld [vmem:[#allocation7 + $0x338] sm:$0xff]  ;;  %v689_v5 = vld [vmem:[#allocation7 + $0x12a0] sm:$0xff] }
 0x140   :  { %1611 = vmatpush2.msra.mxu1 %v537_v6  ;;  %1541 = vmatprep.subr.mxu0 %v274_v8  ;;  %v195_v6 = vld [vmem:[#allocation7 + $0x330] sm:$0xff]  ;;  %v681_v8 = vld [vmem:[#allocation7 + $0x1260] sm:$0xff] }
 0x141   :  { %1612 = vmatprep.subr.mxu1 %v530_v9  ;;  %1542 = vmatpush2.msra.mxu0 %v273_v13  ;;  %v187_v9 = vld [vmem:[#allocation7 + $0x2f0] sm:$0xff]  ;;  %v674_v13 = vld [vmem:[#allocation7 + $0x1228] sm:$0xff] }
 0x142   :  { %1613 = vmatpush2.msra.mxu1 %v529_v14  ;;  %1543 = vmatprep.subr.mxu0 %v266_v15  ;;  %v180_v14 = vld [vmem:[#allocation7 + $0x2b8] sm:$0xff]  ;;  %v673_v15 = vld [vmem:[#allocation7 + $0x1220] sm:$0xff] }
 0x143   :  { %1614 = vmatprep.subr.mxu1 %v522_v16  ;;  %1544 = vmatpush2.msra.mxu0 %v265_v18  ;;  %v989_v29 = vpop.f32.mrf.mxu0  ;;  %v179_v16 = vld [vmem:[#allocation7 + $0x2b0] sm:$0xff]  ;;  %v666_v18 = vld [vmem:[#allocation7 + $0x11e8] sm:$0xff] }
 0x144   :  { %1615 = vmatpush2.msra.mxu1 %v521_v19  ;;  %1545 = vmatprep.subr.mxu0 %v258_v21  ;;  %v990_v32 = vadd.f32 %v989_v29, %v882_v20  ;;  %v1060_v2 = vpop.f32.mrf.mxu1  ;;  %v172_v19 = vld [vmem:[#allocation7 + $0x278] sm:$0xff]  ;;  %v665_v20 = vld [vmem:[#allocation7 + $0x11e0] sm:$0xff]  ;;  %v171_v21 = vld [vmem:[#allocation7 + $0x270] sm:$0xff] }
 0x145   :  { %1616 = vmatprep.subr.mxu1 %v514_v23  ;;  %1546 = vmatpush2.msra.mxu0 %v257_v24  ;;  %v658_v23 = vld [vmem:[#allocation7 + $0x11a8] sm:$0xff]  ;;  %v164_v24 = vld [vmem:[#allocation7 + $0x238] sm:$0xff] }
 0x146   :  { %1617 = vmatpush2.msra.mxu1 %v513_v26  ;;  %1547 = vmatprep.subr.mxu0 %v250_v27  ;;  %v5494_v36 = vadd.f32 %v1060_v2, %v990_v32  ;;  %v657_v26 = vld [vmem:[#allocation7 + $0x11a0] sm:$0xff]  ;;  %v163_v27 = vld [vmem:[#allocation7 + $0x230] sm:$0xff]  ;;  %v156_v29 = vld [vmem:[#allocation7 + $0x1f8] sm:$0xff] }
 0x147   :  { %1618 = vmatprep.subr.mxu1 %v506_v28  ;;  %1548 = vmatpush2.msra.mxu0 %v249_v30  ;;  %v650_v28 = vld [vmem:[#allocation7 + $0x1168] sm:$0xff]  ;;  %v649_v30 = vld [vmem:[#allocation7 + $0x1160] sm:$0xff]  ;;  %v147_v2 = vld [vmem:[#allocation7 + $0x1b0] sm:$0xff] }
 0x148   :  { %1619 = vmatpush2.msra.mxu1 %v505_v31  ;;  %1549 = vmatprep.subr.mxu0 %v242_v33  ;;  %v155_v31 = vld [vmem:[#allocation7 + $0x1f0] sm:$0xff]  ;;  %v642_v32 = vld [vmem:[#allocation7 + $0x1128] sm:$0xff]  ;;  %v148_v33 = vld [vmem:[#allocation7 + $0x1b8] sm:$0xff] }
 0x149   :  { %1620 = vmatprep.subr.mxu1 %v498_v34  ;;  %1550 = vmatpush2.msra.mxu0 %v241_v35  ;;  %v641_v34 = vld [vmem:[#allocation7 + $0x1120] sm:$0xff]  ;;  %v634_v35 = vld [vmem:[#allocation7 + $0x10e8] sm:$0xff] }
 0x14a   :  { %1621 = vmatpush2.msra.mxu1 %v497_v10  ;;  %1551 = vmatprep.subr.mxu0 %v234_v37  ;;  %v140_v10 = vld [vmem:[#allocation7 + $0x178] sm:$0xff]  ;;  %v633_v37 = vld [vmem:[#allocation7 + $0x10e0] sm:$0xff] }
 0x14b   :  { %1622 = vmatprep.subr.mxu1 %v490_v38  ;;  %1552 = vmatpush2.msra.mxu0 %v233_v39  ;;  %v139_v38 = vld [vmem:[#allocation7 + $0x170] sm:$0xff]  ;;  %v626_v39 = vld [vmem:[#allocation7 + $0x10a8] sm:$0xff] }
 0x14c   :  { %1623 = vmatpush2.msra.mxu1 %v489_v12  ;;  %1553 = vmatprep.subr.mxu0 %v226_v40  ;;  %v132_v12 = vld [vmem:[#allocation7 + $0x138] sm:$0xff]  ;;  %v625_v40 = vld [vmem:[#allocation7 + $0x10a0] sm:$0xff] }
 0x14d   :  { %1624 = vmatprep.subr.mxu1 %v482_v41  ;;  %1554 = vmatpush2.msra.mxu0 %v225_v42  ;;  %v131_v41 = vld [vmem:[#allocation7 + $0x130] sm:$0xff]  ;;  %v618_v42 = vld [vmem:[#allocation7 + $0x1068] sm:$0xff] }
 0x14e   :  { %1555 = vmatprep.mubr.f32.mxu0 %v5496_v44  ;;  %1625 = vmatpush2.msra.mxu1 %v481_v43  ;;  %v124_v43 = vld [vmem:[#allocation7 + $0xf8] sm:$0xff] }
 0x14f   :  { %1626 = vmatprep.mubr.f32.mxu1 %v5475_v22  ;;  %1556 = vmatmul.mubr.f32.vlgmr.msra.gmra.mxu0 %v5500_v49  ;;  %v220_v22 = vld [vmem:[#allocation7 + $0x3f8] sm:$0xff] }
 0x150   :  { %1627 = vmatmul.mubr.f32.vlgmr.msra.gmra.mxu1 %v5478_v25  ;;  %1633 = vmatprep.subr.mxu0 %v730_v45  ;;  %v706_v25 = vld [vmem:[#allocation7 + $0x1328] sm:$0xff]  ;;  %v617_v45 = vld [vmem:[#allocation7 + $0x1060] sm:$0xff] }
 0x151   :  { %1732 = vmatprep.subr.mxu1 %v874_v46  ;;  %1634 = vmatpush1.msra.mxu0 %v729_v47  ;;  %v123_v46 = vld [vmem:[#allocation7 + $0xf0] sm:$0xff]  ;;  %v610_v47 = vld [vmem:[#allocation7 + $0x1028] sm:$0xff] }
 0x152   :  { %1733 = vmatpush1.msra.mxu1 %v873_v48  ;;  %1635 = vmatprep.subr.mxu0 %v722_v50  ;;  %v116_v48 = vld [vmem:[#allocation7 + $0xb8] sm:$0xff]  ;;  %v609_v50 = vld [vmem:[#allocation7 + $0x1020] sm:$0xff] }
 0x153   :  { %1734 = vmatprep.subr.mxu1 %v866_v51  ;;  %1636 = vmatpush1.msra.mxu0 %v721_v52  ;;  %v115_v51 = vld [vmem:[#allocation7 + $0xb0] sm:$0xff]  ;;  %v858_v52 = vld [vmem:[#allocation7 + $0x17e8] sm:$0xff] }
 0x154   :  { %1735 = vmatpush1.msra.mxu1 %v865_v53  ;;  %1768 = vmatprep.mubr.f32.mxu1 %v5402_v17  ;;  %v108_v53 = vld [vmem:[#allocation7 + $0x78] sm:$0xff] }
 0x155   :  { %1637 = vmatprep.subr.mxu0 %v714_v54  ;;  %4790 = vmatmul.mubr.msk.f32.vlgmr.msra.gmra.mxu1 %vm919_vm0, %v5484_v63  ;;  %v682_v63 = vld [vmem:[#allocation7 + $0x1268] sm:$0xff]  ;;  %v857_v54 = vld [vmem:[#allocation7 + $0x17e0] sm:$0xff] }
 0x156   :  { %1775 = vmatprep.subr.mxu1 %v220_v22  ;;  %1638 = vmatpush1.msra.mxu0 %v713_v55  ;;  %v107_v22 = vld [vmem:[#allocation7 + $0x70] sm:$0xff]  ;;  %v850_v55 = vld [vmem:[#allocation7 + $0x17a8] sm:$0xff] }
 0x157   :  { %1776 = vmatpush1.msra.mxu1 %v219_v56  ;;  %1639 = vmatprep.subr.mxu0 %v706_v25  ;;  %v100_v56 = vld [vmem:[#allocation7 + $0x38] sm:$0xff]  ;;  %v849_v25 = vld [vmem:[#allocation7 + $0x17a0] sm:$0xff] }
 0x158   :  { %1777 = vmatprep.subr.mxu1 %v212_v57  ;;  %1640 = vmatpush1.msra.mxu0 %v705_v58  ;;  %v99_v57 = vld [vmem:[#allocation7 + $0x30] sm:$0xff]  ;;  %v842_v58 = vld [vmem:[#allocation7 + $0x1768] sm:$0xff] }
 0x159   :  { %1778 = vmatpush1.msra.mxu1 %v211_v59  ;;  %1641 = vmatprep.subr.mxu0 %v698_v61  ;;  %v348_v59 = vld [vmem:[#allocation7 + $0x7f8] sm:$0xff]  ;;  %v841_v61 = vld [vmem:[#allocation7 + $0x1760] sm:$0xff] }
 0x15a   :  { %1779 = vmatprep.subr.mxu1 %v204_v62  ;;  %1642 = vmatpush1.msra.mxu0 %v697_v0  ;;  %v347_v62 = vld [vmem:[#allocation7 + $0x7f0] sm:$0xff]  ;;  %v834_v0 = vld [vmem:[#allocation7 + $0x1728] sm:$0xff] }
 0x15b   :  { %1780 = vmatpush1.msra.mxu1 %v203_v1  ;;  %1643 = vmatprep.subr.mxu0 %v690_v3  ;;  %v340_v1 = vld [vmem:[#allocation7 + $0x7b8] sm:$0xff]  ;;  %v833_v3 = vld [vmem:[#allocation7 + $0x1720] sm:$0xff] }
 0x15c   :  { %1781 = vmatprep.subr.mxu1 %v196_v4  ;;  %1644 = vmatpush1.msra.mxu0 %v689_v5  ;;  %v339_v4 = vld [vmem:[#allocation7 + $0x7b0] sm:$0xff]  ;;  %v826_v5 = vld [vmem:[#allocation7 + $0x16e8] sm:$0xff] }
 0x15d   :  { %1782 = vmatpush1.msra.mxu1 %v195_v6  ;;  %1645 = vmatprep.subr.mxu0 %v682_v63  ;;  %v332_v6 = vld [vmem:[#allocation7 + $0x778] sm:$0xff]  ;;  %v825_v63 = vld [vmem:[#allocation7 + $0x16e0] sm:$0xff] }
 0x15e   :  { %1783 = vmatprep.subr.mxu1 %v188_v7  ;;  %1646 = vmatpush1.msra.mxu0 %v681_v8  ;;  %v331_v7 = vld [vmem:[#allocation7 + $0x770] sm:$0xff]  ;;  %v818_v8 = vld [vmem:[#allocation7 + $0x16a8] sm:$0xff] }
 0x15f   :  { %1784 = vmatpush1.msra.mxu1 %v187_v9  ;;  %1647 = vmatprep.subr.mxu0 %v674_v13  ;;  %v324_v9 = vld [vmem:[#allocation7 + $0x738] sm:$0xff]  ;;  %v817_v13 = vld [vmem:[#allocation7 + $0x16a0] sm:$0xff] }
 0x160   :  { %1785 = vmatprep.subr.mxu1 %v180_v14  ;;  %1648 = vmatpush1.msra.mxu0 %v673_v15  ;;  %v323_v14 = vld [vmem:[#allocation7 + $0x730] sm:$0xff]  ;;  %v885_v15 = vsub.s32 1, %v5488_v60 }
 0x161   :  { %1786 = vmatpush1.msra.mxu1 %v179_v16  ;;  %1649 = vmatprep.subr.mxu0 %v666_v18  ;;  %v810_v16 = vld [vmem:[#allocation7 + $0x1668] sm:$0xff]  ;;  %v316_v18 = vld [vmem:[#allocation7 + $0x6f8] sm:$0xff] }
 0x162   :  { %1787 = vmatprep.subr.mxu1 %v172_v19  ;;  %1650 = vmatpush1.msra.mxu0 %v665_v20  ;;  %v809_v19 = vld [vmem:[#allocation7 + $0x1660] sm:$0xff]  ;;  %v315_v20 = vld [vmem:[#allocation7 + $0x6f0] sm:$0xff] }
 0x163   :  { %1788 = vmatpush1.msra.mxu1 %v171_v21  ;;  %1651 = vmatprep.subr.mxu0 %v658_v23  ;;  %v802_v21 = vld [vmem:[#allocation7 + $0x1628] sm:$0xff]  ;;  %v308_v23 = vld [vmem:[#allocation7 + $0x6b8] sm:$0xff] }
 0x164   :  { %1789 = vmatprep.subr.mxu1 %v164_v24  ;;  %1652 = vmatpush1.msra.mxu0 %v657_v26  ;;  %v801_v24 = vld [vmem:[#allocation7 + $0x1620] sm:$0xff]  ;;  %v307_v26 = vld [vmem:[#allocation7 + $0x6b0] sm:$0xff] }
 0x165   :  { %1790 = vmatpush1.msra.mxu1 %v163_v27  ;;  %1653 = vmatprep.subr.mxu0 %v650_v28  ;;  %v886_v27 = vrot.slane %v5491_v11, %v885_v15  ;;  %v794_v28 = vld [vmem:[#allocation7 + $0x15e8] sm:$0xff]  ;;  %v476_v15 = vld [vmem:[#allocation7 + $0xbf8] sm:$0xff] }
 0x166   :  { %1791 = vmatprep.subr.mxu1 %v156_v29  ;;  %1654 = vmatpush1.msra.mxu0 %v649_v30  ;;  %v300_v29 = vld [vmem:[#allocation7 + $0x678] sm:$0xff]  ;;  %v991_v30 = vpop.f32.mrf.mxu0  ;;  %v778_v11 = vld [vmem:[#allocation7 + $0x1568] sm:$0xff] }
 0x167   :  { %1792 = vmatpush1.msra.mxu1 %v155_v31  ;;  %1655 = vmatprep.subr.mxu0 %v642_v32  ;;  %v793_v31 = vld [vmem:[#allocation7 + $0x15e0] sm:$0xff]  ;;  %v299_v32 = vld [vmem:[#allocation7 + $0x670] sm:$0xff] }
 0x168   :  { %1793 = vmatprep.subr.mxu1 %v148_v33  ;;  %1656 = vmatpush1.msra.mxu0 %v641_v34  ;;  %v786_v33 = vld [vmem:[#allocation7 + $0x15a8] sm:$0xff]  ;;  %v292_v34 = vld [vmem:[#allocation7 + $0x638] sm:$0xff] }
 0x169   :  { %1794 = vmatpush1.msra.mxu1 %v147_v2  ;;  %1657 = vmatprep.subr.mxu0 %v634_v35  ;;  %v1062_v2 = vpop.f32.mrf.mxu1  ;;  %v785_v35 = vld [vmem:[#allocation7 + $0x15a0] sm:$0xff] }
 0x16a   :  { %1795 = vmatprep.subr.mxu1 %v140_v10  ;;  %1658 = vmatpush1.msra.mxu0 %v633_v37  ;;  %v291_v10 = vld [vmem:[#allocation7 + $0x630] sm:$0xff]  ;;  %v992_v37 = vadd.f32 %v991_v30, %v886_v27  ;;  %v460_v30 = vld [vmem:[#allocation7 + $0xb78] sm:$0xff] }
 0x16b   :  { %1796 = vmatpush1.msra.mxu1 %v139_v38  ;;  %1659 = vmatprep.subr.mxu0 %v626_v39  ;;  %v284_v38 = vld [vmem:[#allocation7 + $0x5f8] sm:$0xff]  ;;  %v777_v39 = vld [vmem:[#allocation7 + $0x1560] sm:$0xff]  ;;  %v227_v27 = vld [vmem:[#allocation7 + $0x430] sm:$0xff] }
 0x16c   :  { %1797 = vmatprep.subr.mxu1 %v132_v12  ;;  %1660 = vmatpush1.msra.mxu0 %v625_v40  ;;  %v283_v12 = vld [vmem:[#allocation7 + $0x5f0] sm:$0xff]  ;;  %v770_v40 = vld [vmem:[#allocation7 + $0x1528] sm:$0xff] }
 0x16d   :  { %1798 = vmatpush1.msra.mxu1 %v131_v41  ;;  %1661 = vmatprep.subr.mxu0 %v618_v42  ;;  %v276_v41 = vld [vmem:[#allocation7 + $0x5b8] sm:$0xff]  ;;  %v1202_v42 = vpop.f32.mrf.mxu1 }
 0x16e   :  { %1799 = vmatprep.subr.mxu1 %v124_v43  ;;  %1662 = vmatpush1.msra.mxu0 %v617_v45  ;;  %v769_v43 = vld [vmem:[#allocation7 + $0x1520] sm:$0xff]  ;;  %v275_v45 = vld [vmem:[#allocation7 + $0x5b0] sm:$0xff] }
 0x16f   :  { %1800 = vmatpush1.msra.mxu1 %v123_v46  ;;  %1663 = vmatprep.subr.mxu0 %v610_v47  ;;  %v1063_v47 = vadd.f32 %v1062_v2, %v992_v37  ;;  %v452_v2 = vld [vmem:[#allocation7 + $0xb38] sm:$0xff]  ;;  %v723_v37 = vld [vmem:[#allocation7 + $0x13b0] sm:$0xff] }
 0x170   :  { %1801 = vmatprep.subr.mxu1 %v116_v48  ;;  %1664 = vmatpush1.msra.mxu0 %v609_v50  ;;  %v762_v48 = vld [vmem:[#allocation7 + $0x14e8] sm:$0xff]  ;;  %v268_v50 = vld [vmem:[#allocation7 + $0x578] sm:$0xff] }
 0x171   :  { %1802 = vmatpush1.msra.mxu1 %v115_v51  ;;  %1665 = vmatprep.subr.mxu0 %v858_v52  ;;  %v761_v52 = vld [vmem:[#allocation7 + $0x14e0] sm:$0xff] }
 0x172   :  { %1803 = vmatprep.subr.mxu1 %v108_v53  ;;  %1666 = vmatpush2.msra.mxu0 %v857_v54  ;;  %v267_v53 = vld [vmem:[#allocation7 + $0x570] sm:$0xff] }
 0x173   :  { %1804 = vmatpush1.msra.mxu1 %v107_v22  ;;  %1667 = vmatprep.subr.mxu0 %v850_v55  ;;  %v754_v22 = vld [vmem:[#allocation7 + $0x14a8] sm:$0xff]  ;;  %v260_v55 = vld [vmem:[#allocation7 + $0x538] sm:$0xff] }
 0x174   :  { %1805 = vmatprep.subr.mxu1 %v100_v56  ;;  %1668 = vmatpush2.msra.mxu0 %v849_v25 }
 0x175   :  { %1806 = vmatpush1.msra.mxu1 %v99_v57  ;;  %1669 = vmatprep.subr.mxu0 %v842_v58  ;;  %v1204_v57 = vpop.f32.mrf.mxu1  ;;  %v753_v58 = vld [vmem:[#allocation7 + $0x14a0] sm:$0xff] }
 0x176   :  { %1807 = vmatprep.subr.mxu1 %v348_v59  ;;  %1670 = vmatpush2.msra.mxu0 %v841_v61  ;;  %v259_v59 = vld [vmem:[#allocation7 + $0x530] sm:$0xff]  ;;  %v252_v61 = vld [vmem:[#allocation7 + $0x4f8] sm:$0xff] }
 0x177   :  { %1808 = vmatpush2.msra.mxu1 %v347_v62  ;;  %1671 = vmatprep.subr.mxu0 %v834_v0  ;;  %v745_v0 = vld [vmem:[#allocation7 + $0x1460] sm:$0xff] }
 0x178   :  { %1809 = vmatprep.subr.mxu1 %v340_v1  ;;  %1672 = vmatpush2.msra.mxu0 %v833_v3  ;;  %v251_v1 = vld [vmem:[#allocation7 + $0x4f0] sm:$0xff]  ;;  %v738_v3 = vld [vmem:[#allocation7 + $0x1428] sm:$0xff] }
 0x179   :  { %1810 = vmatpush2.msra.mxu1 %v339_v4  ;;  %1673 = vmatprep.subr.mxu0 %v826_v5  ;;  %v244_v4 = vld [vmem:[#allocation7 + $0x4b8] sm:$0xff] }
 0x17a   :  { %1811 = vmatprep.subr.mxu1 %v332_v6  ;;  %1674 = vmatpush2.msra.mxu0 %v825_v63  ;;  %v737_v6 = vld [vmem:[#allocation7 + $0x1420] sm:$0xff] }
 0x17b   :  { %1812 = vmatpush2.msra.mxu1 %v331_v7  ;;  %1675 = vmatprep.subr.mxu0 %v818_v8  ;;  %v243_v8 = vld [vmem:[#allocation7 + $0x4b0] sm:$0xff] }
 0x17c   :  { %1813 = vmatprep.subr.mxu1 %v324_v9  ;;  %1676 = vmatpush2.msra.mxu0 %v817_v13 }
 0x17d   :  { %1814 = vmatpush2.msra.mxu1 %v323_v14  ;;  %1677 = vmatprep.subr.mxu0 %v810_v16  ;;  %v236_v14 = vld [vmem:[#allocation7 + $0x478] sm:$0xff]  ;;  %v5528_v16 = vld [vmem:[#allocation4 + $0x28] sm:$0xff] }
 0x17e   :  { %1815 = vmatprep.subr.mxu1 %v316_v18  ;;  %1678 = vmatpush2.msra.mxu0 %v809_v19  ;;  %v235_v18 = vld [vmem:[#allocation7 + $0x470] sm:$0xff] }
 0x17f   :  { %1816 = vmatpush2.msra.mxu1 %v315_v20  ;;  %1679 = vmatprep.subr.mxu0 %v802_v21  ;;  %v475_v19 = vld [vmem:[#allocation7 + $0xbf0] sm:$0xff]  ;;  %v5532_v20 = vld [vmem:[#allocation4 + $0x20] sm:$0xff]  ;;  %v228_v21 = vld [vmem:[#allocation7 + $0x438] sm:$0xff] }
 0x180   :  { %1817 = vmatprep.subr.mxu1 %v308_v23  ;;  %1680 = vmatpush2.msra.mxu0 %v801_v24  ;;  %v468_v23 = vld [vmem:[#allocation7 + $0xbb8] sm:$0xff] }
 0x181   :  { %1818 = vmatpush2.msra.mxu1 %v307_v26  ;;  %1681 = vmatprep.subr.mxu0 %v794_v28 }
 0x182   :  { %1819 = vmatprep.subr.mxu1 %v300_v29  ;;  %1682 = vmatpush2.msra.mxu0 %v793_v31  ;;  %v467_v29 = vld [vmem:[#allocation7 + $0xbb0] sm:$0xff]  ;;  %v732_v31 = vld [vmem:[#allocation7 + $0x13f8] sm:$0xff] }
 0x183   :  { %1820 = vmatpush2.msra.mxu1 %v299_v32  ;;  %1683 = vmatprep.subr.mxu0 %v786_v33  ;;  %v459_v32 = vld [vmem:[#allocation7 + $0xb70] sm:$0xff] }
 0x184   :  { %1821 = vmatprep.subr.mxu1 %v292_v34  ;;  %1684 = vmatpush2.msra.mxu0 %v785_v35  ;;  %v731_v33 = vld [vmem:[#allocation7 + $0x13f0] sm:$0xff]  ;;  %v724_v35 = vld [vmem:[#allocation7 + $0x13b8] sm:$0xff] }
 0x185   :  { %1822 = vmatpush2.msra.mxu1 %v291_v10  ;;  %1685 = vmatprep.subr.mxu0 %v778_v11  ;;  %v451_v10 = vld [vmem:[#allocation7 + $0xb30] sm:$0xff] }
 0x186   :  { %1823 = vmatprep.subr.mxu1 %v284_v38  ;;  %v1131_v46 = vpop.f32.mrf.mxu0  ;;  %1686 = vmatpush2.msra.mxu0 %v777_v39  ;;  %v716_v38 = vld [vmem:[#allocation7 + $0x1378] sm:$0xff] }
 0x187   :  { %1824 = vmatpush2.msra.mxu1 %v283_v12  ;;  %v1132_v51 = vadd.f32 %v1131_v46, %v5494_v36  ;;  %1687 = vmatprep.subr.mxu0 %v770_v40  ;;  %v746_v36 = vld [vmem:[#allocation7 + $0x1468] sm:$0xff]  ;;  %v715_v12 = vld [vmem:[#allocation7 + $0x1370] sm:$0xff]  ;;  %v436_v40 = vld [vmem:[#allocation7 + $0xab8] sm:$0xff] }
 0x188   :  { %1825 = vmatprep.subr.mxu1 %v276_v41  ;;  %v1133_v54 = vpop.f32.mrf.mxu0  ;;  %1688 = vmatpush2.msra.mxu0 %v769_v43  ;;  %v708_v41 = vld [vmem:[#allocation7 + $0x1338] sm:$0xff]  ;;  %v707_v43 = vld [vmem:[#allocation7 + $0x1330] sm:$0xff] }
 0x189   :  { %1826 = vmatpush2.msra.mxu1 %v275_v45  ;;  %v5510_v56 = vadd.f32 %v1202_v42, %v1132_v51  ;;  %v1134_v25 = vadd.f32 %v1133_v54, %v1063_v47  ;;  %1689 = vmatprep.subr.mxu0 %v762_v48  ;;  %v435_v42 = vld [vmem:[#allocation7 + $0xab0] sm:$0xff]  ;;  %v428_v47 = vld [vmem:[#allocation7 + $0xa78] sm:$0xff] }
 0x18a   :  { %1827 = vmatprep.subr.mxu1 %v268_v50  ;;  %1690 = vmatpush2.msra.mxu0 %v761_v52  ;;  %v700_v48 = vld [vmem:[#allocation7 + $0x12f8] sm:$0xff]  ;;  %v427_v51 = vld [vmem:[#allocation7 + $0xa70] sm:$0xff] }
 0x18b   :  { %1828 = vmatpush2.msra.mxu1 %v267_v53  ;;  %v5512_v62 = vadd.f32 %v1204_v57, %v1134_v25  ;;  %1691 = vmatprep.subr.mxu0 %v754_v22  ;;  %vm2078_vm1 = vcmp.gt.f32.partialorder %v5510_v56, 1.0  ;;  %v2113_v7 = vadd.f32 %v5510_v56, %v5510_v56  ;;  %v699_v52 = vld [vmem:[#allocation7 + $0x12f0] sm:$0xff]  ;;  %v420_v53 = vld [vmem:[#allocation7 + $0xa38] sm:$0xff] }
 0x18c   :  { %1829 = vmatprep.subr.mxu1 %v260_v55  ;;  %1692 = vmatpush2.msra.mxu0 %v753_v58  ;;  %v4792_v13 = vsel %vm2078_vm1, 1.0, %v5402_v17  ;;  %v692_v54 = vld [vmem:[#allocation7 + $0x12b8] sm:$0xff]  ;;  %v419_v22 = vld [vmem:[#allocation7 + $0xa30] sm:$0xff] }
 0x18d   :  { %1830 = vmatpush2.msra.mxu1 %v259_v59  ;;  %vm2079_vm2 = vcmp.gt.f32.partialorder %v5512_v62, 1.0  ;;  %v2114_v5 = vadd.f32 %v5512_v62, %v5512_v62  ;;  %1693 = vmatprep.subr.mxu0 %v746_v36  ;;  %v5535_v24 = vsub.f32 %v2113_v7, %v4792_v13  ;;  %v691_v55 = vld [vmem:[#allocation7 + $0x12b0] sm:$0xff]  ;;  %v412_v57 = vld [vmem:[#allocation7 + $0x9f8] sm:$0xff] }
 0x18e   :  { %1831 = vmatprep.subr.mxu1 %v252_v61  ;;  %v4793_v63 = vsel %vm2079_vm2, 1.0, %v5402_v17  ;;  %1694 = vmatpush2.msra.mxu0 %v745_v0  ;;  %v684_v58 = vld [vmem:[#allocation7 + $0x1278] sm:$0xff]  ;;  %v411_v59 = vld [vmem:[#allocation7 + $0x9f0] sm:$0xff] }
 0x18f   :  { %1832 = vmatpush2.msra.mxu1 %v251_v1  ;;  %v5523_v9 = vsub.f32 %v2114_v5, %v4793_v63  ;;  %1695 = vmatprep.subr.mxu0 %v738_v3  ;;  %vm2129_vm4 = vcmp.gt.f32.partialorder %v5535_v24, 1.0  ;;  %v2164_v11 = vadd.f32 %v5535_v24, %v5510_v56  ;;  %v683_v36 = vld [vmem:[#allocation7 + $0x1270] sm:$0xff]  ;;  %v404_v0 = vld [vmem:[#allocation7 + $0x9b8] sm:$0xff] }
 0x190   :  { %1833 = vmatprep.subr.mxu1 %v244_v4  ;;  %1696 = vmatpush2.msra.mxu0 %v737_v6  ;;  %v4800_v39 = vsel %vm2129_vm4, 1.0, %v5402_v17  ;;  %v676_v1 = vld [vmem:[#allocation7 + $0x1238] sm:$0xff]  ;;  %v403_v4 = vld [vmem:[#allocation7 + $0x9b0] sm:$0xff] }
 0x191   :  { %1697 = vmatprep.mubr.f32.mxu0 %v5528_v16  ;;  %vm2130_vm3 = vcmp.gt.f32.partialorder %v5523_v9, 1.0  ;;  %1834 = vmatpush2.msra.mxu1 %v243_v8  ;;  %v2165_v26 = vadd.f32 %v5523_v9, %v5512_v62  ;;  %v5553_v45 = vsub.f32 %v2164_v11, %v4800_v39  ;;  %v675_v5 = vld [vmem:[#allocation7 + $0x1230] sm:$0xff]  ;;  %v396_v6 = vld [vmem:[#allocation7 + $0x978] sm:$0xff] }
 0x192   :  { %1698 = vmatmul.mubr.f32.vlgmr.msra.gmra.mxu0 %v5532_v20  ;;  %1835 = vmatprep.subr.mxu1 %v236_v14  ;;  %v4801_v28 = vsel %vm2130_vm3, 1.0, %v5402_v17  ;;  %v668_v63 = vld [vmem:[#allocation7 + $0x11f8] sm:$0xff]  ;;  %v395_v7 = vld [vmem:[#allocation7 + $0x970] sm:$0xff] }
 0x193   :  { %1846 = vmatprep.subr.mxu0 %v476_v15  ;;  %1836 = vmatpush2.msra.mxu1 %v235_v18  ;;  %v5544_v34 = vsub.f32 %v2165_v26, %v4801_v28  ;;  %vm2180_vm6 = vcmp.gt.f32.partialorder %v5553_v45, 1.0  ;;  %v2215_v61 = vadd.f32 %v5553_v45, %v5510_v56  ;;  %v667_v8 = vld [vmem:[#allocation7 + $0x11f0] sm:$0xff]  ;;  %v388_v15 = vld [vmem:[#allocation7 + $0x938] sm:$0xff] }
 0x194   :  { %1847 = vmatpush1.msra.mxu0 %v475_v19  ;;  %1837 = vmatprep.subr.mxu1 %v228_v21  ;;  %v4808_v3 = vsel %vm2180_vm6, 1.0, %v5402_v17  ;;  %v660_v18 = vld [vmem:[#allocation7 + $0x11b8] sm:$0xff]  ;;  %v387_v21 = vld [vmem:[#allocation7 + $0x930] sm:$0xff] }
 0x195   :  { %1848 = vmatprep.subr.mxu0 %v468_v23  ;;  %1838 = vmatpush2.msra.mxu1 %v227_v27  ;;  %vm2181_vm5 = vcmp.gt.f32.partialorder %v5544_v34, 1.0  ;;  %v2216_v46 = vadd.f32 %v5544_v34, %v5512_v62  ;;  %v5569_v13 = vsub.f32 %v2215_v61, %v4808_v3  ;;  %v659_v23 = vld [vmem:[#allocation7 + $0x11b0] sm:$0xff]  ;;  %v380_v26 = vld [vmem:[#allocation7 + $0x8f8] sm:$0xff] }
 0x196   :  { %1839 = vmatprep.mubr.f32.mxu1 %v5496_v44  ;;  %1849 = vmatpush1.msra.mxu0 %v467_v29  ;;  %v444_v44 = vld [vmem:[#allocation7 + $0xaf8] sm:$0xff]  ;;  %v4809_v50 = vsel %vm2181_vm5, 1.0, %v5402_v17  ;;  %v379_v28 = vld [vmem:[#allocation7 + $0x8f0] sm:$0xff] }
 0x197   :  { %1840 = vmatmul.mubr.f32.vlgmr.msra.gmra.mxu1 %v5500_v49  ;;  %1850 = vmatprep.subr.mxu0 %v460_v30  ;;  %v443_v49 = vld [vmem:[#allocation7 + $0xaf0] sm:$0xff]  ;;  %v5561_v25 = vsub.f32 %v2216_v46, %v4809_v50  ;;  %v652_v27 = vld [vmem:[#allocation7 + $0x1178] sm:$0xff]  ;;  %vm7604_vm8 = vcmp.gt.f32.partialorder %v5569_v13, 1.0 }
 0x198   :  { %1917 = vmatprep.subr.mxu1 %v732_v31  ;;  %1851 = vmatpush1.msra.mxu0 %v459_v32  ;;  %v651_v29 = vld [vmem:[#allocation7 + $0x1170] sm:$0xff]  ;;  %v372_v31 = vld [vmem:[#allocation7 + $0x8b8] sm:$0xff]  ;;  %v4816_v11 = vsel %vm7604_vm8, 1.0, %v5402_v17 }
 0x199   :  { %1918 = vmatpush1.msra.mxu1 %v731_v33  ;;  %1852 = vmatprep.subr.mxu0 %v452_v2  ;;  %vm2232_vm7 = vcmp.gt.f32.partialorder %v5561_v25, 1.0  ;;  %v2267_v14 = vadd.f32 %v5561_v25, %v5512_v62  ;;  %v644_v32 = vld [vmem:[#allocation7 + $0x1138] sm:$0xff]  ;;  %v371_v33 = vld [vmem:[#allocation7 + $0x8b0] sm:$0xff]  ;;  %v3613_v25 = vld [vmem:[#allocation10 + $0x260] sm:$0xff] }
 0x19a   :  { %1919 = vmatprep.subr.mxu1 %v724_v35  ;;  %1853 = vmatpush1.msra.mxu0 %v451_v10  ;;  %v4817_v19 = vsel %vm2232_vm7, 1.0, %v5402_v17  ;;  %v643_v2 = vld [vmem:[#allocation7 + $0x1130] sm:$0xff]  ;;  %v2266_v35 = vadd.f32 %v5569_v13, %v5510_v56  ;;  %v364_v10 = vld [vmem:[#allocation7 + $0x878] sm:$0xff] }
 0x19b   :  { %1920 = vmatpush1.msra.mxu1 %v723_v37  ;;  %1854 = vmatprep.subr.mxu0 %v444_v44  ;;  %v5577_v30 = vsub.f32 %v2267_v14, %v4817_v19  ;;  %v636_v37 = vld [vmem:[#allocation7 + $0x10f8] sm:$0xff]  ;;  %v363_v44 = vld [vmem:[#allocation7 + $0x870] sm:$0xff] }
 0x19c   :  { %1921 = vmatprep.subr.mxu1 %v716_v38  ;;  %1855 = vmatpush1.msra.mxu0 %v443_v49  ;;  %v635_v38 = vld [vmem:[#allocation7 + $0x10f0] sm:$0xff]  ;;  %v356_v39 = vld [vmem:[#allocation7 + $0x838] sm:$0xff] }
 0x19d   :  { %1922 = vmatpush1.msra.mxu1 %v715_v12  ;;  %1856 = vmatprep.subr.mxu0 %v436_v40  ;;  %vm7603_vm9 = vcmp.gt.f32.partialorder %v5577_v30, 1.0  ;;  %v628_v49 = vld [vmem:[#allocation7 + $0x10b8] sm:$0xff]  ;;  %v355_v12 = vld [vmem:[#allocation7 + $0x830] sm:$0xff] }
 0x19e   :  { %1923 = vmatprep.subr.mxu1 %v708_v41  ;;  %1857 = vmatpush1.msra.mxu0 %v435_v42  ;;  %v627_v40 = vld [vmem:[#allocation7 + $0x10b0] sm:$0xff]  ;;  %v5585_v41 = vsub.f32 %v2266_v35, %v4816_v11  ;;  %v2318_v42 = vadd.f32 %v5577_v30, %v5512_v62  ;;  %v620_v46 = vld [vmem:[#allocation7 + $0x1078] sm:$0xff] }
 0x19f   :  { %1924 = vmatpush1.msra.mxu1 %v707_v43  ;;  %1858 = vmatprep.subr.mxu0 %v428_v47  ;;  %v604_v43 = vld [vmem:[#allocation7 + $0xff8] sm:$0xff]  ;;  %v4825_v47 = vsel %vm7603_vm9, 1.0, %v5402_v17  ;;  %v619_v50 = vld [vmem:[#allocation7 + $0x1070] sm:$0xff] }
 0x1a0   :  { %1925 = vmatprep.subr.mxu1 %v700_v48  ;;  %1859 = vmatpush1.msra.mxu0 %v427_v51  ;;  %v603_v48 = vld [vmem:[#allocation7 + $0xff0] sm:$0xff]  ;;  %v596_v51 = vld [vmem:[#allocation7 + $0xfb8] sm:$0xff]  ;;  %vm7601_vm10 = vcmp.gt.f32.partialorder %v5585_v41, 1.0 }
 0x1a1   :  { %1926 = vmatpush1.msra.mxu1 %v699_v52  ;;  %1860 = vmatprep.subr.mxu0 %v420_v53  ;;  %v612_v52 = vld [vmem:[#allocation7 + $0x1038] sm:$0xff]  ;;  %v595_v53 = vld [vmem:[#allocation7 + $0xfb0] sm:$0xff] }
 0x1a2   :  { %1927 = vmatprep.subr.mxu1 %v692_v54  ;;  %1861 = vmatpush1.msra.mxu0 %v419_v22  ;;  %v611_v54 = vld [vmem:[#allocation7 + $0x1030] sm:$0xff]  ;;  %v5593_v22 = vsub.f32 %v2318_v42, %v4825_v47  ;;  %v580_v61 = vld [vmem:[#allocation7 + $0xf38] sm:$0xff] }
 0x1a3   :  { %1928 = vmatpush1.msra.mxu1 %v691_v55  ;;  %1862 = vmatprep.subr.mxu0 %v412_v57  ;;  %v588_v55 = vld [vmem:[#allocation7 + $0xf78] sm:$0xff]  ;;  %v579_v3 = vld [vmem:[#allocation7 + $0xf30] sm:$0xff] }
 0x1a4   :  { %1929 = vmatprep.subr.mxu1 %v684_v58  ;;  %1863 = vmatpush1.msra.mxu0 %v411_v59  ;;  %v860_v57 = vld [vmem:[#allocation7 + $0x17f8] sm:$0xff]  ;;  %v587_v58 = vld [vmem:[#allocation7 + $0xf70] sm:$0xff]  ;;  %vm7599_vm11 = vcmp.gt.f32.partialorder %v5593_v22, 1.0  ;;  %v2369_v14 = vadd.f32 %v5593_v22, %v5512_v62 }
 0x1a5   :  { %1930 = vmatpush1.msra.mxu1 %v683_v36  ;;  %1864 = vmatprep.subr.mxu0 %v404_v0  ;;  %v859_v59 = vld [vmem:[#allocation7 + $0x17f0] sm:$0xff]  ;;  %v2317_v36 = vadd.f32 %v5585_v41, %v5510_v56  ;;  %v852_v0 = vld [vmem:[#allocation7 + $0x17b8] sm:$0xff]  ;;  %v4833_v19 = vsel %vm7599_vm11, 1.0, %v5402_v17 }
 0x1a6   :  { %1931 = vmatprep.subr.mxu1 %v676_v1  ;;  %1865 = vmatpush1.msra.mxu0 %v403_v4  ;;  %v4824_v1 = vsel %vm7601_vm10, 1.0, %v5402_v17  ;;  %v851_v4 = vld [vmem:[#allocation7 + $0x17b0] sm:$0xff]  ;;  %v812_v11 = vld [vmem:[#allocation7 + $0x1678] sm:$0xff] }
 0x1a7   :  { %1932 = vmatpush1.msra.mxu1 %v675_v5  ;;  %1866 = vmatprep.subr.mxu0 %v396_v6  ;;  %v572_v5 = vld [vmem:[#allocation7 + $0xef8] sm:$0xff]  ;;  %v819_v35 = vld [vmem:[#allocation7 + $0x16b0] sm:$0xff] }
 0x1a8   :  { %1933 = vmatprep.subr.mxu1 %v668_v63  ;;  %1867 = vmatpush1.msra.mxu0 %v395_v7  ;;  %v844_v6 = vld [vmem:[#allocation7 + $0x1778] sm:$0xff]  ;;  %v571_v63 = vld [vmem:[#allocation7 + $0xef0] sm:$0xff] }
 0x1a9   :  { %1934 = vmatpush1.msra.mxu1 %v667_v8  ;;  %1868 = vmatprep.subr.mxu0 %v388_v15  ;;  %v843_v7 = vld [vmem:[#allocation7 + $0x1770] sm:$0xff]  ;;  %v5601_v8 = vsub.f32 %v2317_v36, %v4824_v1  ;;  %v564_v15 = vld [vmem:[#allocation7 + $0xeb8] sm:$0xff] }
 0x1aa   :  { %1935 = vmatprep.subr.mxu1 %v660_v18  ;;  %1869 = vmatpush1.msra.mxu0 %v387_v21  ;;  %v836_v18 = vld [vmem:[#allocation7 + $0x1738] sm:$0xff]  ;;  %v563_v21 = vld [vmem:[#allocation7 + $0xeb0] sm:$0xff] }
 0x1ab   :  { %1936 = vmatpush1.msra.mxu1 %v659_v23  ;;  %1870 = vmatprep.subr.mxu0 %v380_v26  ;;  %v835_v23 = vld [vmem:[#allocation7 + $0x1730] sm:$0xff]  ;;  %v556_v26 = vld [vmem:[#allocation7 + $0xe78] sm:$0xff]  ;;  %vm7598_vm12 = vcmp.gt.f32.partialorder %v5601_v8, 1.0 }
 0x1ac   :  { %1937 = vmatprep.subr.mxu1 %v652_v27  ;;  %1871 = vmatpush1.msra.mxu0 %v379_v28  ;;  %v828_v27 = vld [vmem:[#allocation7 + $0x16f8] sm:$0xff]  ;;  %v555_v28 = vld [vmem:[#allocation7 + $0xe70] sm:$0xff] }
 0x1ad   :  { %1938 = vmatpush1.msra.mxu1 %v651_v29  ;;  %1872 = vmatprep.subr.mxu0 %v372_v31  ;;  %v827_v29 = vld [vmem:[#allocation7 + $0x16f0] sm:$0xff]  ;;  %v5609_v31 = vsub.f32 %v2369_v14, %v4833_v19  ;;  %v788_v36 = vld [vmem:[#allocation7 + $0x15b8] sm:$0xff] }
 0x1ae   :  { %1939 = vmatprep.subr.mxu1 %v644_v32  ;;  %1873 = vmatpush1.msra.mxu0 %v371_v33  ;;  %v548_v32 = vld [vmem:[#allocation7 + $0xe38] sm:$0xff]  ;;  %v531_v42 = vld [vmem:[#allocation7 + $0xdb0] sm:$0xff] }
 0x1af   :  { %1940 = vmatpush1.msra.mxu1 %v643_v2  ;;  %1874 = vmatprep.subr.mxu0 %v364_v10  ;;  %v820_v33 = vld [vmem:[#allocation7 + $0x16b8] sm:$0xff]  ;;  %v547_v2 = vld [vmem:[#allocation7 + $0xe30] sm:$0xff]  ;;  %v2368_v10 = vadd.f32 %v5601_v8, %v5510_v56  ;;  %vm7597_vm13 = vcmp.gt.f32.partialorder %v5609_v31, 1.0  ;;  %v2420_v47 = vadd.f32 %v5609_v31, %v5512_v62 }
 0x1b0   :  { %1941 = vmatprep.subr.mxu1 %v636_v37  ;;  %1875 = vmatpush1.msra.mxu0 %v363_v44  ;;  %v540_v37 = vld [vmem:[#allocation7 + $0xdf8] sm:$0xff]  ;;  %v4832_v44 = vsel %vm7598_vm12, 1.0, %v5402_v17  ;;  %v779_v14 = vld [vmem:[#allocation7 + $0x1570] sm:$0xff] }
 0x1b1   :  { %1942 = vmatpush1.msra.mxu1 %v635_v38  ;;  %1876 = vmatprep.subr.mxu0 %v356_v39  ;;  %v539_v38 = vld [vmem:[#allocation7 + $0xdf0] sm:$0xff] }
 0x1b2   :  { %1943 = vmatprep.subr.mxu1 %v628_v49  ;;  %1877 = vmatpush1.msra.mxu0 %v355_v12  ;;  %v811_v39 = vld [vmem:[#allocation7 + $0x1670] sm:$0xff]  ;;  %v889_v49 = vsub.s32 2, %v5488_v60  ;;  %v532_v12 = vld [vmem:[#allocation7 + $0xdb8] sm:$0xff] }
 0x1b3   :  { %1944 = vmatpush1.msra.mxu1 %v627_v40  ;;  %1878 = vmatprep.subr.mxu0 %v604_v43  ;;  %v804_v40 = vld [vmem:[#allocation7 + $0x1638] sm:$0xff]  ;;  %v803_v43 = vld [vmem:[#allocation7 + $0x1630] sm:$0xff] }
 0x1b4   :  { %1945 = vmatprep.subr.mxu1 %v620_v46  ;;  %1879 = vmatpush2.msra.mxu0 %v603_v48  ;;  %v5618_v46 = vsub.f32 %v2368_v10, %v4832_v44  ;;  %v893_v48 = vsub.s32 3, %v5488_v60  ;;  %v763_v10 = vld [vmem:[#allocation7 + $0x14f0] sm:$0xff] }
 0x1b5   :  { %1946 = vmatpush1.msra.mxu1 %v619_v50  ;;  %1880 = vmatprep.subr.mxu0 %v596_v51  ;;  %v524_v50 = vld [vmem:[#allocation7 + $0xd78] sm:$0xff] }
 0x1b6   :  { %1947 = vmatprep.subr.mxu1 %v612_v52  ;;  %1881 = vmatpush2.msra.mxu0 %v595_v53  ;;  %v796_v51 = vld [vmem:[#allocation7 + $0x15f8] sm:$0xff]  ;;  %v4841_v52 = vsel %vm7597_vm13, 1.0, %v5402_v17  ;;  %v1273_v53 = vpop.f32.mrf.mxu1  ;;  %vm7595_vm14 = vcmp.gt.f32.partialorder %v5618_v46, 1.0 }
 0x1b7   :  { %1948 = vmatpush1.msra.mxu1 %v611_v54  ;;  %1882 = vmatprep.subr.mxu0 %v588_v55  ;;  %v523_v54 = vld [vmem:[#allocation7 + $0xd70] sm:$0xff] }
 0x1b8   :  { %1949 = vmatprep.subr.mxu1 %v860_v57  ;;  %1883 = vmatpush2.msra.mxu0 %v587_v58  ;;  %v795_v55 = vld [vmem:[#allocation7 + $0x15f0] sm:$0xff]  ;;  %v5238_v57 = vld [vmem:[#allocation9] sm:$0xff] }
 0x1b9   :  { %1950 = vmatpush2.msra.mxu1 %v859_v59  ;;  %1884 = vmatprep.subr.mxu0 %v580_v61  ;;  %v890_v58 = vrot.slane %v5238_v57, %v889_v49  ;;  %v516_v59 = vld [vmem:[#allocation7 + $0xd38] sm:$0xff]  ;;  %v515_v61 = vld [vmem:[#allocation7 + $0xd30] sm:$0xff] }
 0x1ba   :  { %1951 = vmatprep.subr.mxu1 %v852_v0  ;;  %1885 = vmatpush2.msra.mxu0 %v579_v3  ;;  %v787_v0 = vld [vmem:[#allocation7 + $0x15b0] sm:$0xff]  ;;  %v5627_v3 = vsub.f32 %v2420_v47, %v4841_v52  ;;  %v484_v49 = vld [vmem:[#allocation7 + $0xc38] sm:$0xff] }
 0x1bb   :  { %1952 = vmatpush2.msra.mxu1 %v851_v4  ;;  %1886 = vmatprep.subr.mxu0 %v572_v5  ;;  %v894_v4 = vrot.slane %v5238_v57, %v893_v48  ;;  %v508_v5 = vld [vmem:[#allocation7 + $0xcf8] sm:$0xff]  ;;  %v1274_v19 = vadd.f32 %v1273_v53, %v890_v58  ;;  %v5239_v57 = vld [vmem:[#allocation4 + $0x18] sm:$0xff]  ;;  %v747_v58 = vld [vmem:[#allocation7 + $0x1470] sm:$0xff] }
 0x1bc   :  { %1953 = vmatprep.subr.mxu1 %v844_v6  ;;  %1887 = vmatpush2.msra.mxu0 %v571_v63  ;;  %v780_v6 = vld [vmem:[#allocation7 + $0x1578] sm:$0xff]  ;;  %v1275_v63 = vpop.f32.mrf.mxu1  ;;  %vm7596_vm15 = vcmp.gt.f32.partialorder %v5627_v3, 1.0 }
 0x1bd   :  { %1954 = vmatpush2.msra.mxu1 %v843_v7  ;;  %1888 = vmatprep.subr.mxu0 %v564_v15  ;;  %v507_v7 = vld [vmem:[#allocation7 + $0xcf0] sm:$0xff]  ;;  %v748_v53 = vld [vmem:[#allocation7 + $0x1478] sm:$0xff] }
 0x1be   :  { %1955 = vmatprep.subr.mxu1 %v836_v18  ;;  %1889 = vmatpush2.msra.mxu0 %v563_v21  ;;  %v2419_v18 = vadd.f32 %v5618_v46, %v5510_v56  ;;  %v500_v21 = vld [vmem:[#allocation7 + $0xcb8] sm:$0xff] }
 0x1bf   :  { %1956 = vmatpush2.msra.mxu1 %v835_v23  ;;  %1890 = vmatprep.subr.mxu0 %v556_v26  ;;  %v772_v23 = vld [vmem:[#allocation7 + $0x1538] sm:$0xff]  ;;  %v4840_v26 = vsel %vm7595_vm14, 1.0, %v5402_v17 }
 0x1c0   :  { %1957 = vmatprep.subr.mxu1 %v828_v27  ;;  %1891 = vmatpush2.msra.mxu0 %v555_v28  ;;  %v499_v27 = vld [vmem:[#allocation7 + $0xcb0] sm:$0xff]  ;;  %v5635_v44 = vsub.f32 %v2419_v18, %v4840_v26 }
 0x1c1   :  { %1958 = vmatpush2.msra.mxu1 %v827_v29  ;;  %1892 = vmatprep.subr.mxu0 %v548_v32  ;;  %v771_v28 = vld [vmem:[#allocation7 + $0x1530] sm:$0xff]  ;;  %v1276_v29 = vadd.f32 %v1275_v63, %v894_v4  ;;  %v868_v4 = vld [vmem:[#allocation7 + $0x1838] sm:$0xff] }
 0x1c2   :  { %1959 = vmatprep.subr.mxu1 %v820_v33  ;;  %1893 = vmatpush2.msra.mxu0 %v547_v2  ;;  %v492_v33 = vld [vmem:[#allocation7 + $0xc78] sm:$0xff]  ;;  %vm7600_vm14 = vcmp.gt.f32.partialorder %v5635_v44, 1.0  ;;  %v739_v63 = vld [vmem:[#allocation7 + $0x1430] sm:$0xff] }
 0x1c3   :  { %1960 = vmatpush2.msra.mxu1 %v819_v35  ;;  %1894 = vmatprep.subr.mxu0 %v540_v37  ;;  %v764_v2 = vld [vmem:[#allocation7 + $0x14f8] sm:$0xff]  ;;  %v491_v35 = vld [vmem:[#allocation7 + $0xc70] sm:$0xff] }
 0x1c4   :  { %1961 = vmatprep.subr.mxu1 %v812_v11  ;;  %1895 = vmatpush2.msra.mxu0 %v539_v38  ;;  %v2471_v38 = vadd.f32 %v5627_v3, %v5512_v62  ;;  %v867_v18 = vld [vmem:[#allocation7 + $0x1830] sm:$0xff] }
 0x1c5   :  { %1962 = vmatpush2.msra.mxu1 %v811_v39  ;;  %1896 = vmatprep.subr.mxu0 %v532_v12  ;;  %v756_v12 = vld [vmem:[#allocation7 + $0x14b8] sm:$0xff] }
 0x1c6   :  { %1963 = vmatprep.subr.mxu1 %v804_v40  ;;  %1897 = vmatpush2.msra.mxu0 %v531_v42  ;;  %v4849_v42 = vsel %vm7596_vm15, 1.0, %v5402_v17 }
 0x1c7   :  { %1964 = vmatpush2.msra.mxu1 %v803_v43  ;;  %1898 = vmatprep.subr.mxu0 %v524_v50  ;;  %v483_v43 = vld [vmem:[#allocation7 + $0xc30] sm:$0xff] }
 0x1c8   :  { %1965 = vmatprep.subr.mxu1 %v796_v51  ;;  %v1344_v1 = vpop.f32.mrf.mxu0  ;;  %1899 = vmatpush2.msra.mxu0 %v523_v54  ;;  %v755_v50 = vld [vmem:[#allocation7 + $0x14b0] sm:$0xff]  ;;  %v876_v54 = vld [vmem:[#allocation7 + $0x1878] sm:$0xff] }
 0x1c9   :  { %1966 = vmatpush2.msra.mxu1 %v795_v55  ;;  %1900 = vmatprep.subr.mxu0 %v516_v59  ;;  %v1345_v32 = vadd.f32 %v1344_v1, %v1274_v19  ;;  %v5645_v55 = vsub.f32 %v2471_v38, %v4849_v42  ;;  %v875_v59 = vld [vmem:[#allocation7 + $0x1870] sm:$0xff]  ;;  %v740_v1 = vld [vmem:[#allocation7 + $0x1438] sm:$0xff]  ;;  %v7625_v38 = vmov 1.0  }
 0x1ca   :  { %1967 = vmatprep.subr.mxu1 %v788_v36  ;;  %v1346_v15 = vpop.f32.mrf.mxu0  ;;  %1901 = vmatpush2.msra.mxu0 %v515_v61 }
 0x1cb   :  { %1968 = vmatpush2.msra.mxu1 %v787_v0  ;;  %1902 = vmatprep.subr.mxu0 %v508_v5  ;;  %v1347_v39 = vadd.f32 %v1346_v15, %v1276_v29  ;;  %v5240_v0 = vld [vmem:[#allocation4 + $0x10] sm:$0xff]  ;;  %v4848_v15 = vsel %vm7600_vm14, 1.0, %v5402_v17  ;;  %vm7602_vm12 = vcmp.gt.f32.partialorder %v5645_v55, 1.0  ;;  %v3552_v29 = vld [vmem:[#allocation10 + $0x78] sm:$0xff] }
 0x1cc   :  { %1969 = vmatprep.subr.mxu1 %v780_v6  ;;  %1903 = vmatpush2.msra.mxu0 %v507_v7  ;;  %v2470_v6 = vadd.f32 %v5635_v44, %v5510_v56 }
 0x1cd   :  { %1970 = vmatpush2.msra.mxu1 %v779_v14  ;;  %1904 = vmatprep.subr.mxu0 %v500_v21  ;;  %v1415_v37 = vpop.f32.mrf.mxu1 }
 0x1ce   :  { %1971 = vmatprep.subr.mxu1 %v772_v23  ;;  %v1486_v11 = vpop.f32.mrf.mxu0  ;;  %1905 = vmatpush2.msra.mxu0 %v499_v27  ;;  %v1416_v40 = vadd.f32 %v1415_v37, %v1345_v32  ;;  %v5678_v27 = vsub.f32 %v2470_v6, %v4848_v15  ;;  %v3551_v37 = vld [vmem:[#allocation10 + $0x70] sm:$0xff] }
 0x1cf   :  { %1972 = vmatpush2.msra.mxu1 %v771_v28  ;;  %1906 = vmatprep.subr.mxu0 %v492_v33  ;;  %v1417_v47 = vpop.f32.mrf.mxu1  ;;  %v2522_v28 = vadd.f32 %v5645_v55, %v5512_v62 }
 0x1d0   :  { %1973 = vmatprep.subr.mxu1 %v764_v2  ;;  %v1488_v48 = vpop.f32.mrf.mxu0  ;;  %1907 = vmatpush2.msra.mxu0 %v491_v35  ;;  %v5642_v51 = vadd.f32 %v1486_v11, %v1416_v40  ;;  %v1418_v52 = vadd.f32 %v1417_v47, %v1347_v39  ;;  %v5241_v2 = vld [vmem:[#allocation4 + $0x30] sm:$0xff]  ;;  %v3584_v35 = vld [vmem:[#allocation10 + $0x178] sm:$0xff]  ;;  %v3582_v47 = vld [vmem:[#allocation10 + $0x168] sm:$0xff] }
 0x1d1   :  { %1974 = vmatpush2.msra.mxu1 %v763_v10  ;;  %1908 = vmatprep.subr.mxu0 %v484_v49  ;;  %v3583_v39 = vld [vmem:[#allocation10 + $0x170] sm:$0xff] }
 0x1d2   :  { %1975 = vmatprep.subr.mxu1 %v756_v12  ;;  %1909 = vmatpush2.msra.mxu0 %v483_v43  ;;  %v5647_v36 = vadd.f32 %v1488_v48, %v1418_v52  ;;  %vm2080_vm15 = vcmp.gt.f32.partialorder %v5642_v51, 1.0  ;;  %v2115_v61 = vadd.f32 %v5642_v51, %v5642_v51  ;;  %v3550_v43 = vld [vmem:[#allocation10 + $0x68] sm:$0xff] }
 0x1d3   :  { %1910 = vmatprep.mubr.f32.mxu0 %v5239_v57  ;;  %1976 = vmatpush2.msra.mxu1 %v755_v50  ;;  %v4794_v5 = vsel %vm2080_vm15, 1.0, %v5402_v17  ;;  %v2521_v50 = vadd.f32 %v5678_v27, %v5510_v56  ;;  %v3549_v57 = vld [vmem:[#allocation10 + $0x60] sm:$0xff] }
 0x1d4   :  { %1911 = vmatmul.mubr.f32.vlgmr.msra.gmra.mxu0 %v5240_v0  ;;  %1977 = vmatprep.subr.mxu1 %v748_v53  ;;  %vm2081_vm13 = vcmp.gt.f32.partialorder %v5647_v36, 1.0  ;;  %v2116_v7 = vadd.f32 %v5647_v36, %v5647_v36  ;;  %v5660_v14 = vsub.f32 %v2115_v61, %v4794_v5 }
 0x1d5   :  { %2016 = vmatprep.subr.mxu0 %v876_v54  ;;  %1978 = vmatpush2.msra.mxu1 %v747_v58  ;;  %v4795_v19 = vsel %vm2081_vm13, 1.0, %v5402_v17  ;;  %v3581_v58 = vld [vmem:[#allocation10 + $0x160] sm:$0xff] }
 0x1d6   :  { %2017 = vmatpush1.msra.mxu0 %v875_v59  ;;  %1979 = vmatprep.subr.mxu1 %v740_v1  ;;  %v5669_v21 = vsub.f32 %v2116_v7, %v4795_v19  ;;  %vm2131_vm11 = vcmp.gt.f32.partialorder %v5660_v14, 1.0  ;;  %v2166_v23 = vadd.f32 %v5660_v14, %v5642_v51  ;;  %v3548_v1 = vld [vmem:[#allocation10 + $0x58] sm:$0xff]  ;;  %v3547_v19 = vld [vmem:[#allocation10 + $0x50] sm:$0xff] }
 0x1d7   :  { %2018 = vmatprep.subr.mxu0 %v868_v4  ;;  %1980 = vmatpush2.msra.mxu1 %v739_v63  ;;  %v4802_v26 = vsel %vm2131_vm11, 1.0, %v5402_v17  ;;  %v3580_v4 = vld [vmem:[#allocation10 + $0x158] sm:$0xff] }
 0x1d8   :  { %1981 = vmatprep.mubr.f32.mxu1 %v5528_v16  ;;  %2019 = vmatpush1.msra.mxu0 %v867_v18  ;;  %vm2132_vm14 = vcmp.gt.f32.partialorder %v5669_v21, 1.0  ;;  %v2167_v32 = vadd.f32 %v5669_v21, %v5647_v36  ;;  %v5686_v33 = vsub.f32 %v2166_v23, %v4802_v26  ;;  %v4857_v16 = vsel %vm7602_vm12, 1.0, %v5402_v17  ;;  %v3579_v23 = vld [vmem:[#allocation10 + $0x150] sm:$0xff] }
 0x1d9   :  { %2052 = vmatprep.mubr.f32.mxu0 %v5402_v17  ;;  %1982 = vmatmul.mubr.f32.vlgmr.msra.gmra.mxu1 %v5532_v20  ;;  %v4803_v10 = vsel %vm2132_vm14, 1.0, %v5402_v17  ;;  %v5710_v12 = vsub.f32 %v2522_v28, %v4857_v16  ;;  %v3578_v16 = vld [vmem:[#allocation10 + $0x148] sm:$0xff]  ;;  %v3615_v21 = vld [vmem:[#allocation10 + $0x270] sm:$0xff] }
 0x1da   :  { %4791 = vmatmul.mubr.msk.f32.vlgmr.msra.gmra.mxu0 %vm919_vm0, %v5241_v2  ;;  %3672 = vmatprep.subr.mxu0 %v5402_v17  ;;  %v5698_v11 = vsub.f32 %v2167_v32, %v4803_v10  ;;  %vm2182_vm10 = vcmp.gt.f32.partialorder %v5686_v33, 1.0  ;;  %v2217_v20 = vadd.f32 %v5686_v33, %v5642_v51  ;;  %vm7605_vm0 = vcmp.gt.f32.partialorder %v5678_v27, 1.0  ;;  %v3546_v32 = vld [vmem:[#allocation10 + $0x48] sm:$0xff] }
 0x1db   :  { %3862 = vmatprep.subr.mxu1 %v5402_v17  ;;  %3673 = vmatpush1.msra.mxu0 %v3552_v29  ;;  %v4810_v49 = vsel %vm2182_vm10, 1.0, %v5402_v17  ;;  %v4856_v54 = vsel %vm7605_vm0, 1.0, %v5402_v17  ;;  %vm7606_vm9 = vcmp.gt.f32.partialorder %v5710_v12, 1.0  ;;  %v2573_v63 = vadd.f32 %v5710_v12, %v5512_v62 }
 0x1dc   :  { %5018 = vmatprep.mubr.msk.f32.mxu0 %vm2079_vm2, %v7625_v38  ;;  %3863 = vmatpush1.msra.mxu1 %v3584_v35  ;;  %vm2183_vm12 = vcmp.gt.f32.partialorder %v5698_v11, 1.0  ;;  %v2218_v40 = vadd.f32 %v5698_v11, %v5647_v36  ;;  %v5716_v42 = vsub.f32 %v2217_v20, %v4810_v49  ;;  %v5751_v6 = vsub.f32 %v2521_v50, %v4856_v54  ;;  %v3545_v20 = vld [vmem:[#allocation10 + $0x40] sm:$0xff]  ;;  %v3544_v50 = vld [vmem:[#allocation10 + $0x38] sm:$0xff] }
 0x1dd   :  { %3674 = vmatprep.subr.mxu0 %v5402_v17  ;;  %3864 = vmatprep.subr.mxu1 %v5402_v17  ;;  %v4811_v48 = vsel %vm2183_vm12, 1.0, %v5402_v17  ;;  %v4865_v18 = vsel %vm7606_vm9, 1.0, %v5402_v17 }
 0x1de   :  { %3675 = vmatpush1.msra.mxu0 %v3551_v37  ;;  %3865 = vmatpush1.msra.mxu1 %v3583_v39  ;;  %v5725_v52 = vsub.f32 %v2218_v40, %v4811_v48  ;;  %vm7610_vm2 = vcmp.gt.f32.partialorder %v5716_v42, 1.0  ;;  %v2268_v53 = vadd.f32 %v5716_v42, %v5642_v51  ;;  %vm7611_vm9 = vcmp.gt.f32.partialorder %v5751_v6, 1.0  ;;  %v3577_v39 = vld [vmem:[#allocation10 + $0x140] sm:$0xff] }
 0x1df   :  { %3676 = vmatprep.subr.mxu0 %v5402_v17  ;;  %3866 = vmatprep.subr.mxu1 %v5402_v17  ;;  %v4818_v59 = vsel %vm7610_vm2, 1.0, %v5402_v17  ;;  %v5779_v35 = vsub.f32 %v2573_v63, %v4865_v18  ;;  %v2572_v40 = vadd.f32 %v5751_v6, %v5510_v56  ;;  %v4864_v48 = vsel %vm7611_vm9, 1.0, %v5402_v17 }
 0x1e0   :  { %5068 = vmatprep.mubr.msk.f32.mxu1 %vm2081_vm13, %v7625_v38  ;;  %3677 = vmatpush1.msra.mxu0 %v3550_v43  ;;  %vm2234_vm8 = vcmp.gt.f32.partialorder %v5725_v52, 1.0  ;;  %v2269_v61 = vadd.f32 %v5725_v52, %v5647_v36  ;;  %v5744_v0 = vsub.f32 %v2268_v53, %v4818_v59  ;;  %v3576_v53 = vld [vmem:[#allocation10 + $0x138] sm:$0xff]  ;;  %v3543_v59 = vld [vmem:[#allocation10 + $0x30] sm:$0xff]  ;;  %v3645_v52 = vld [vmem:[#allocation10 + $0x360] sm:$0xff] }
 0x1e1   :  { %3867 = vmatpush1.msra.mxu1 %v3582_v47  ;;  %3678 = vmatprep.subr.mxu0 %v5402_v17  ;;  %v4819_v5 = vsel %vm2234_vm8, 1.0, %v5402_v17 }
 0x1e2   :  { %3868 = vmatprep.subr.mxu1 %v5402_v17  ;;  %3679 = vmatpush1.msra.mxu0 %v3549_v57  ;;  %v5755_v7 = vsub.f32 %v2269_v61, %v4819_v5  ;;  %vm7607_vm13 = vcmp.gt.f32.partialorder %v5744_v0, 1.0  ;;  %v2319_v15 = vadd.f32 %v5744_v0, %v5642_v51  ;;  %v3575_v61 = vld [vmem:[#allocation10 + $0x130] sm:$0xff]  ;;  %v2624_v5 = vadd.f32 %v5779_v35, %v5512_v62 }
 0x1e3   :  { %3869 = vmatpush1.msra.mxu1 %v3581_v58  ;;  %3680 = vmatprep.subr.mxu0 %v5402_v17  ;;  %v4826_v26 = vsel %vm7607_vm13, 1.0, %v5402_v17 }
 0x1e4   :  { %3870 = vmatprep.subr.mxu1 %v5402_v17  ;;  %3681 = vmatpush1.msra.mxu0 %v3548_v1  ;;  %vm7608_vm0 = vcmp.gt.f32.partialorder %v5755_v7, 1.0  ;;  %v2320_v28 = vadd.f32 %v5755_v7, %v5647_v36  ;;  %v5771_v29 = vsub.f32 %v2319_v15, %v4826_v26 }
 0x1e5   :  { %3871 = vmatpush1.msra.mxu1 %v3580_v4  ;;  %3682 = vmatprep.subr.mxu0 %v5402_v17  ;;  %v4827_v2 = vsel %vm7608_vm0, 1.0, %v5402_v17  ;;  %v5817_v4 = vsub.f32 %v2572_v40, %v4864_v48  ;;  %v3540_v40 = vld [vmem:[#allocation10 + $0x18] sm:$0xff] }
 0x1e6   :  { %3872 = vmatprep.subr.mxu1 %v5402_v17  ;;  %3683 = vmatpush1.msra.mxu0 %v3547_v19  ;;  %v5781_v10 = vsub.f32 %v2320_v28, %v4827_v2  ;;  %vm7609_vm13 = vcmp.gt.f32.partialorder %v5771_v29, 1.0  ;;  %v2370_v37 = vadd.f32 %v5771_v29, %v5642_v51  ;;  %v3542_v19 = vld [vmem:[#allocation10 + $0x28] sm:$0xff]  ;;  %v3573_v2 = vld [vmem:[#allocation10 + $0x120] sm:$0xff] }
 0x1e7   :  { %3873 = vmatpush1.msra.mxu1 %v3579_v23  ;;  %3684 = vmatprep.subr.mxu0 %v5402_v17  ;;  %v4834_v49 = vsel %vm7609_vm13, 1.0, %v5402_v17  ;;  %vm7613_vm13 = vcmp.gt.f32.partialorder %v5779_v35, 1.0  ;;  %v3574_v23 = vld [vmem:[#allocation10 + $0x128] sm:$0xff] }
 0x1e8   :  { %3874 = vmatprep.subr.mxu1 %v5402_v17  ;;  %3685 = vmatpush1.msra.mxu0 %v3546_v32  ;;  %vm7617_vm0 = vcmp.gt.f32.partialorder %v5781_v10, 1.0  ;;  %v2371_v43 = vadd.f32 %v5781_v10, %v5647_v36  ;;  %v5796_v47 = vsub.f32 %v2370_v37, %v4834_v49  ;;  %v4873_v18 = vsel %vm7613_vm13, 1.0, %v5402_v17 }
 0x1e9   :  { %3875 = vmatpush1.msra.mxu1 %v3578_v16  ;;  %3686 = vmatprep.subr.mxu0 %v5402_v17  ;;  %v4835_v54 = vsel %vm7617_vm0, 1.0, %v5402_v17  ;;  %v3541_v16 = vld [vmem:[#allocation10 + $0x20] sm:$0xff]  ;;  %vm7618_vm13 = vcmp.gt.f32.partialorder %v5817_v4, 1.0 }
 0x1ea   :  { %3876 = vmatprep.subr.mxu1 %v5402_v17  ;;  %3687 = vmatpush1.msra.mxu0 %v3545_v20  ;;  %v5807_v57 = vsub.f32 %v2371_v43, %v4835_v54  ;;  %vm7612_vm2 = vcmp.gt.f32.partialorder %v5796_v47, 1.0  ;;  %v2421_v58 = vadd.f32 %v5796_v47, %v5642_v51  ;;  %v5845_v20 = vsub.f32 %v2624_v5, %v4873_v18  ;;  %v3572_v43 = vld [vmem:[#allocation10 + $0x118] sm:$0xff]  ;;  %v3538_v18 = vld [vmem:[#allocation10 + $0x8] sm:$0xff] }
 0x1eb   :  { %3877 = vmatpush1.msra.mxu1 %v3577_v39  ;;  %3688 = vmatprep.subr.mxu0 %v5402_v17  ;;  %v4842_v1 = vsel %vm7612_vm2, 1.0, %v5402_v17 }
 0x1ec   :  { %3878 = vmatprep.subr.mxu1 %v5402_v17  ;;  %3689 = vmatpush1.msra.mxu0 %v3544_v50  ;;  %vm7614_vm9 = vcmp.gt.f32.partialorder %v5807_v57, 1.0  ;;  %v2422_v63 = vadd.f32 %v5807_v57, %v5647_v36  ;;  %v5824_v15 = vsub.f32 %v2421_v58, %v4842_v1  ;;  %v2623_v50 = vadd.f32 %v5817_v4, %v5510_v56 }
 0x1ed   :  { %3879 = vmatpush1.msra.mxu1 %v3576_v53  ;;  %3690 = vmatprep.subr.mxu0 %v5402_v17  ;;  %v4843_v26 = vsel %vm7614_vm9, 1.0, %v5402_v17  ;;  %v4872_v58 = vsel %vm7618_vm13, 1.0, %v5402_v17 }
 0x1ee   :  { %3880 = vmatprep.subr.mxu1 %v5402_v17  ;;  %3691 = vmatpush1.msra.mxu0 %v3543_v59  ;;  %v5834_v28 = vsub.f32 %v2422_v63, %v4843_v26  ;;  %vm7615_vm2 = vcmp.gt.f32.partialorder %v5824_v15, 1.0  ;;  %v2472_v32 = vadd.f32 %v5824_v15, %v5642_v51  ;;  %v3539_v59 = vld [vmem:[#allocation10 + $0x10] sm:$0xff]  ;;  %v5883_v26 = vsub.f32 %v2623_v50, %v4872_v58  ;;  %v3600_v58 = vld [vmem:[#allocation10 + $0x1f8] sm:$0xff] }
 0x1ef   :  { %3881 = vmatpush1.msra.mxu1 %v3575_v61  ;;  %3692 = vmatprep.subr.mxu0 %v5402_v17  ;;  %v4850_v37 = vsel %vm7615_vm2, 1.0, %v5402_v17  ;;  %v3571_v61 = vld [vmem:[#allocation10 + $0x110] sm:$0xff] }
 0x1f0   :  { %3882 = vmatprep.subr.mxu1 %v5402_v17  ;;  %3693 = vmatpush1.msra.mxu0 %v3542_v19  ;;  %vm7616_vm9 = vcmp.gt.f32.partialorder %v5834_v28, 1.0  ;;  %v2473_v39 = vadd.f32 %v5834_v28, %v5647_v36  ;;  %v5850_v49 = vsub.f32 %v2472_v32, %v4850_v37  ;;  %v3570_v19 = vld [vmem:[#allocation10 + $0x108] sm:$0xff]  ;;  %7677 = vst [vmem:[#allocation21_spill] sm:$0xff] %v5883_v26 }
 0x1f1   :  { %3883 = vmatpush1.msra.mxu1 %v3574_v23  ;;  %3694 = vmatprep.subr.mxu0 %v5402_v17  ;;  %v4851_v48 = vsel %vm7616_vm9, 1.0, %v5402_v17  ;;  %vm7620_vm9 = vcmp.gt.f32.partialorder %v5845_v20, 1.0  ;;  %v2675_v32 = vadd.f32 %v5845_v20, %v5512_v62 }
 0x1f2   :  { %3884 = vmatprep.subr.mxu1 %v5402_v17  ;;  %3695 = vmatpush1.msra.mxu0 %v3541_v16  ;;  %v5859_v53 = vsub.f32 %v2473_v39, %v4851_v48  ;;  %vm7619_vm2 = vcmp.gt.f32.partialorder %v5850_v49, 1.0  ;;  %v2523_v54 = vadd.f32 %v5850_v49, %v5642_v51  ;;  %v4881_v37 = vsel %vm7620_vm9, 1.0, %v5402_v17  ;;  %v3537_v39 = vld [vmem:[#allocation10] sm:$0xff] }
 0x1f3   :  { %3885 = vmatpush1.msra.mxu1 %v3573_v2  ;;  %3696 = vmatprep.subr.mxu0 %v5402_v17  ;;  %v4858_v1 = vsel %vm7619_vm2, 1.0, %v5402_v17  ;;  %vm7624_vm9 = vcmp.gt.f32.partialorder %v5883_v26, 1.0 }
 0x1f4   :  { %3886 = vmatprep.subr.mxu1 %v5402_v17  ;;  %3697 = vmatpush1.msra.mxu0 %v3540_v40  ;;  %vm2489_vm0 = vcmp.gt.f32.partialorder %v5859_v53, 1.0  ;;  %v2524_v5 = vadd.f32 %v5859_v53, %v5647_v36  ;;  %v5876_v63 = vsub.f32 %v2523_v54, %v4858_v1  ;;  %v3569_v40 = vld [vmem:[#allocation10 + $0x100] sm:$0xff]  ;;  %v3568_v54 = vld [vmem:[#allocation10 + $0xf8] sm:$0xff] }
 0x1f5   :  { %3887 = vmatpush1.msra.mxu1 %v3572_v43  ;;  %3698 = vmatprep.subr.mxu0 %v5402_v17  ;;  %v4859_v23 = vsel %vm2489_vm0, 1.0, %v5402_v17  ;;  %v3640_v53 = vld [vmem:[#allocation10 + $0x338] sm:$0xff] }
 0x1f6   :  { %3888 = vmatprep.subr.mxu1 %v5402_v17  ;;  %3699 = vmatpush1.msra.mxu0 %v3539_v59  ;;  %v5887_v16 = vsub.f32 %v2524_v5, %v4859_v23  ;;  %vm7621_vm13 = vcmp.gt.f32.partialorder %v5876_v63, 1.0  ;;  %v2574_v2 = vadd.f32 %v5876_v63, %v5642_v51 }
 0x1f7   :  { %3889 = vmatpush1.msra.mxu1 %v3571_v61  ;;  %3700 = vmatprep.subr.mxu0 %v5402_v17  ;;  %v4866_v43 = vsel %vm7621_vm13, 1.0, %v5402_v17  ;;  %v5911_v61 = vsub.f32 %v2675_v32, %v4881_v37  ;;  %v2674_v32 = vadd.f32 %v5883_v26, %v5510_v56  ;;  %v4880_v37 = vsel %vm7624_vm9, 1.0, %v5402_v17  ;;  %v3593_v26 = vld [vmem:[#allocation10 + $0x1c0] sm:$0xff] }
 0x1f8   :  { %3890 = vmatprep.subr.mxu1 %v5402_v17  ;;  %3701 = vmatpush1.msra.mxu0 %v3538_v18  ;;  %vm7622_vm2 = vcmp.gt.f32.partialorder %v5887_v16, 1.0  ;;  %v2575_v48 = vadd.f32 %v5887_v16, %v5647_v36  ;;  %v5903_v50 = vsub.f32 %v2574_v2, %v4866_v43  ;;  %v3567_v18 = vld [vmem:[#allocation10 + $0xf0] sm:$0xff]  ;;  %v3598_v43 = vld [vmem:[#allocation10 + $0x1e8] sm:$0xff] }
 0x1f9   :  { %3891 = vmatpush1.msra.mxu1 %v3570_v19  ;;  %3702 = vmatprep.subr.mxu0 %v5402_v17  ;;  %v4867_v59 = vsel %vm7622_vm2, 1.0, %v5402_v17  ;;  %7678 = vst [vmem:[#allocation22_spill] sm:$0xff] %v5911_v61  ;;  %v3599_v19 = vld [vmem:[#allocation10 + $0x1f0] sm:$0xff]  ;;  %v5949_v38 = vsub.f32 %v2674_v32, %v4880_v37  ;;  %v3564_v32 = vld [vmem:[#allocation10 + $0xd8] sm:$0xff] }
 0x1fa   :  { %3892 = vmatprep.subr.mxu1 %v5402_v17  ;;  %3703 = vmatpush1.msra.mxu0 %v3537_v39  ;;  %v5913_v1 = vsub.f32 %v2575_v48, %v4867_v59  ;;  %vm7623_vm13 = vcmp.gt.f32.partialorder %v5903_v50, 1.0  ;;  %v2625_v5 = vadd.f32 %v5903_v50, %v5642_v51  ;;  %v3565_v59 = vld [vmem:[#allocation10 + $0xe0] sm:$0xff]  ;;  %v3596_v37 = vld [vmem:[#allocation10 + $0x1d8] sm:$0xff] }
 0x1fb   :  { %3893 = vmatpush1.msra.mxu1 %v3569_v40  ;;  %3704 = vmatprep.subr.mxu0 %v5402_v17  ;;  %v4874_v23 = vsel %vm7623_vm13, 1.0, %v5402_v17  ;;  %v3566_v40 = vld [vmem:[#allocation10 + $0xe8] sm:$0xff]  ;;  %vm7628_vm13 = vcmp.gt.f32.partialorder %v5911_v61, 1.0  ;;  %7680 = vst [vmem:[#allocation24_spill] sm:$0xff] %v5949_v38 }
 0x1fc   :  { %3894 = vmatprep.subr.mxu1 %v5402_v17  ;;  %3705 = vmatpush2.msra.mxu0 %v3568_v54  ;;  %vm7627_vm2 = vcmp.gt.f32.partialorder %v5913_v1, 1.0  ;;  %v2626_v2 = vadd.f32 %v5913_v1, %v5647_v36  ;;  %v5931_v39 = vsub.f32 %v2625_v5, %v4874_v23  ;;  %v3597_v5 = vld [vmem:[#allocation10 + $0x1e0] sm:$0xff] }
 0x1fd   :  { %3895 = vmatpush2.msra.mxu1 %v3600_v58  ;;  %3706 = vmatprep.subr.mxu0 %v5402_v17  ;;  %v4875_v48 = vsel %vm7627_vm2, 1.0, %v5402_v17 }
 0x1fe   :  { %7679 = vst [vmem:[#allocation23_spill] sm:$0xff] %v5931_v39  ;;  %3896 = vmatprep.subr.mxu1 %v5402_v17  ;;  %3707 = vmatpush2.msra.mxu0 %v3567_v18  ;;  %v5939_v54 = vsub.f32 %v2626_v2, %v4875_v48  ;;  %vm7629_vm9 = vcmp.gt.f32.partialorder %v5931_v39, 1.0  ;;  %v2676_v58 = vadd.f32 %v5931_v39, %v5642_v51 }
 0x1ff   :  { %3897 = vmatpush2.msra.mxu1 %v3599_v19  ;;  %3708 = vmatprep.subr.mxu0 %v5402_v17  ;;  %v4882_v23 = vsel %vm7629_vm9, 1.0, %v5402_v17  ;;  %v2726_v18 = vadd.f32 %v5911_v61, %v5512_v62  ;;  %v4889_v19 = vsel %vm7628_vm13, 1.0, %v5402_v17  ;;  %vm7637_vm9 = vcmp.gt.f32.partialorder %v5949_v38, 1.0 }
 0x200   :  { %3898 = vmatprep.subr.mxu1 %v5402_v17  ;;  %3709 = vmatpush2.msra.mxu0 %v3566_v40  ;;  %vm7632_vm2 = vcmp.gt.f32.partialorder %v5939_v54, 1.0  ;;  %v2677_v2 = vadd.f32 %v5939_v54, %v5647_v36  ;;  %v5959_v48 = vsub.f32 %v2676_v58, %v4882_v23  ;;  %v3563_v58 = vld [vmem:[#allocation10 + $0xd0] sm:$0xff] }
 0x201   :  { %3899 = vmatpush2.msra.mxu1 %v3598_v43  ;;  %3710 = vmatprep.subr.mxu0 %v5402_v17  ;;  %v4883_v40 = vsel %vm7632_vm2, 1.0, %v5402_v17  ;;  %v3595_v23 = vld [vmem:[#allocation10 + $0x1d0] sm:$0xff]  ;;  %v5972_v61 = vsub.f32 %v2726_v18, %v4889_v19  ;;  %v3562_v18 = vld [vmem:[#allocation10 + $0xc8] sm:$0xff] }
 0x202   :  { %7681 = vst [vmem:[#allocation25_spill] sm:$0xff] %v5959_v48  ;;  %3900 = vmatprep.subr.mxu1 %v5402_v17  ;;  %3711 = vmatpush2.msra.mxu0 %v3565_v59  ;;  %v5966_v43 = vsub.f32 %v2677_v2, %v4883_v40  ;;  %vm7635_vm13 = vcmp.gt.f32.partialorder %v5959_v48, 1.0  ;;  %v2727_v39 = vadd.f32 %v5959_v48, %v5642_v51  ;;  %v3594_v19 = vld [vmem:[#allocation10 + $0x1c8] sm:$0xff]  ;;  %v3561_v48 = vld [vmem:[#allocation10 + $0xc0] sm:$0xff] }
 0x203   :  { %3901 = vmatpush2.msra.mxu1 %v3597_v5  ;;  %3712 = vmatprep.subr.mxu0 %v5402_v17  ;;  %7683 = vst [vmem:[#allocation27_spill] sm:$0xff] %v5972_v61  ;;  %v4890_v59 = vsel %vm7635_vm13, 1.0, %v5402_v17  ;;  %vm7639_vm13 = vcmp.gt.f32.partialorder %v5972_v61, 1.0 }
 0x204   :  { %7682 = vst [vmem:[#allocation26_spill] sm:$0xff] %v5966_v43  ;;  %3902 = vmatprep.subr.mxu1 %v5402_v17  ;;  %3713 = vmatpush2.msra.mxu0 %v3564_v32  ;;  %vm7638_vm2 = vcmp.gt.f32.partialorder %v5966_v43, 1.0  ;;  %v2728_v5 = vadd.f32 %v5966_v43, %v5647_v36  ;;  %v2725_v32 = vadd.f32 %v5949_v38, %v5510_v56 }
 0x205   :  { %3903 = vmatpush2.msra.mxu1 %v3596_v37  ;;  %3714 = vmatprep.subr.mxu0 %v5402_v17  ;;  %v4891_v2 = vsel %vm7638_vm2, 1.0, %v5402_v17  ;;  %v4888_v37 = vsel %vm7637_vm9, 1.0, %v5402_v17  ;;  %v5997_v43 = vsub.f32 %v2727_v39, %v4890_v59  ;;  %v4897_v39 = vsel %vm7639_vm13, 1.0, %v5402_v17  ;;  %v3559_v59 = vld [vmem:[#allocation10 + $0xb0] sm:$0xff] }
 0x206   :  { %3904 = vmatprep.subr.mxu1 %v5402_v17  ;;  %3715 = vmatpush2.msra.mxu0 %v3563_v58  ;;  %v5992_v40 = vsub.f32 %v2728_v5, %v4891_v2  ;;  %v3560_v58 = vld [vmem:[#allocation10 + $0xb8] sm:$0xff]  ;;  %v6002_v5 = vsub.f32 %v2725_v32, %v4888_v37  ;;  %v2777_v2 = vadd.f32 %v5972_v61, %v5512_v62  ;;  %v3590_v32 = vld [vmem:[#allocation10 + $0x1a8] sm:$0xff] }
 0x207   :  { %3905 = vmatpush2.msra.mxu1 %v3595_v23  ;;  %3716 = vmatprep.subr.mxu0 %v5402_v17  ;;  %7685 = vst [vmem:[#allocation29_spill] sm:$0xff] %v5997_v43  ;;  %v3592_v23 = vld [vmem:[#allocation10 + $0x1b8] sm:$0xff]  ;;  %vm7643_vm2 = vcmp.gt.f32.partialorder %v5997_v43, 1.0  ;;  %v2778_v61 = vadd.f32 %v5997_v43, %v5642_v51 }
 0x208   :  { %7684 = vst [vmem:[#allocation28_spill] sm:$0xff] %v5992_v40  ;;  %3906 = vmatprep.subr.mxu1 %v5402_v17  ;;  %3717 = vmatpush2.msra.mxu0 %v3562_v18  ;;  %vm7646_vm9 = vcmp.gt.f32.partialorder %v5992_v40, 1.0  ;;  %v3591_v18 = vld [vmem:[#allocation10 + $0x1b0] sm:$0xff]  ;;  %vm7645_vm13 = vcmp.gt.f32.partialorder %v6002_v5, 1.0  ;;  %v6020_v37 = vsub.f32 %v2777_v2, %v4897_v39  ;;  %v2776_v2 = vadd.f32 %v6002_v5, %v5510_v56 }
 0x209   :  { %3907 = vmatpush2.msra.mxu1 %v3594_v19  ;;  %3718 = vmatprep.subr.mxu0 %v5402_v17  ;;  %v2779_v19 = vadd.f32 %v5992_v40, %v5647_v36  ;;  %v3589_v40 = vld [vmem:[#allocation10 + $0x1a0] sm:$0xff]  ;;  %v4896_v39 = vsel %vm7645_vm13, 1.0, %v5402_v17 }
 0x20a   :  { %3908 = vmatprep.subr.mxu1 %v5402_v17  ;;  %3719 = vmatpush2.msra.mxu0 %v3561_v48  ;;  %v3558_v48 = vld [vmem:[#allocation10 + $0xa8] sm:$0xff]  ;;  %7686 = vst [vmem:[#allocation30_spill] sm:$0xff] %v6020_v37 }
 0x20b   :  { %3909 = vmatpush2.msra.mxu1 %v3593_v26  ;;  %3720 = vmatprep.subr.mxu0 %v5402_v17  ;;  %v4899_v26 = vsel %vm7646_vm9, 1.0, %v5402_v17 }
 0x20c   :  { %3910 = vmatprep.subr.mxu1 %v5402_v17  ;;  %3721 = vmatpush2.msra.mxu0 %v3560_v58  ;;  %v4898_v58 = vsel %vm7643_vm2, 1.0, %v5402_v17  ;;  %v6029_v38 = vsub.f32 %v2779_v19, %v4899_v26  ;;  %vm7647_vm2 = vcmp.gt.f32.partialorder %v6020_v37, 1.0  ;;  %v3555_v19 = vld [vmem:[#allocation10 + $0x90] sm:$0xff] }
 0x20d   :  { %3911 = vmatpush2.msra.mxu1 %v3592_v23  ;;  %3722 = vmatprep.subr.mxu0 %v5402_v17  ;;  %v3557_v23 = vld [vmem:[#allocation10 + $0xa0] sm:$0xff]  ;;  %v6039_v43 = vsub.f32 %v2778_v61, %v4898_v58  ;;  %v3587_v26 = vld [vmem:[#allocation10 + $0x190] sm:$0xff]  ;;  %v4905_v61 = vsel %vm7647_vm2, 1.0, %v5402_v17  ;;  %v3586_v58 = vld [vmem:[#allocation10 + $0x188] sm:$0xff] }
 0x20e   :  { %3912 = vmatprep.subr.mxu1 %v5402_v17  ;;  %3723 = vmatpush2.msra.mxu0 %v3559_v59  ;;  %7687 = vst [vmem:[#allocation31_spill] sm:$0xff] %v6029_v38  ;;  %v3556_v59 = vld [vmem:[#allocation10 + $0x98] sm:$0xff]  ;;  %vm2795_vm13 = vcmp.gt.f32.partialorder %v6029_v38, 1.0 }
 0x20f   :  { %3913 = vmatpush2.msra.mxu1 %v3591_v18  ;;  %3724 = vmatprep.subr.mxu0 %v5402_v17  ;;  %v3588_v18 = vld [vmem:[#allocation10 + $0x198] sm:$0xff]  ;;  %vm7650_vm9 = vcmp.gt.f32.partialorder %v6039_v43, 1.0 }
 0x210   :  { %3914 = vmatprep.subr.mxu1 %v5402_v17  ;;  %3725 = vmatpush2.msra.mxu0 %v3558_v48  ;;  %v6044_v48 = vsub.f32 %v2776_v2, %v4896_v39  ;;  %v4907_v2 = vsel %vm2795_vm13, 1.0, %v5402_v17  ;;  %v3553_v39 = vld [vmem:[#allocation10 + $0x80] sm:$0xff] }
 0x211   :  { %3915 = vmatpush2.msra.mxu1 %v3590_v32  ;;  %3726 = vmatprep.subr.mxu0 %v5402_v17  ;;  %v2828_v32 = vadd.f32 %v6020_v37, %v5512_v62  ;;  %v2829_v37 = vadd.f32 %v6039_v43, %v5642_v51 }
 0x212   :  { %3916 = vmatprep.subr.mxu1 %v5402_v17  ;;  %3727 = vmatpush2.msra.mxu0 %v3557_v23  ;;  %v2830_v23 = vadd.f32 %v6029_v38, %v5647_v36  ;;  %vm2792_vm2 = vcmp.gt.f32.partialorder %v6044_v48, 1.0  ;;  %v2827_v38 = vadd.f32 %v6044_v48, %v5510_v56 }
 0x213   :  { %3917 = vmatpush2.msra.mxu1 %v3589_v40  ;;  %3728 = vmatprep.subr.mxu0 %v5402_v17  ;;  %v3554_v40 = vld [vmem:[#allocation10 + $0x88] sm:$0xff] }
 0x214   :  { %3918 = vmatprep.subr.mxu1 %v5402_v17  ;;  %3729 = vmatpush2.msra.mxu0 %v3556_v59  ;;  %v3585_v59 = vld [vmem:[#allocation10 + $0x180] sm:$0xff] }
 0x215   :  { %3919 = vmatpush2.msra.mxu1 %v3588_v18  ;;  %3730 = vmatprep.subr.mxu0 %v5402_v17  ;;  %v6062_v18 = vsub.f32 %v2828_v32, %v4905_v61  ;;  %v4904_v32 = vsel %vm2792_vm2, 1.0, %v5402_v17  ;;  %v7688_v61 = vmov 1.0  }
 0x216   :  { %3920 = vmatprep.subr.mxu1 %v5402_v17  ;;  %3731 = vmatpush2.msra.mxu0 %v3555_v19  ;;  %v4906_v19 = vsel %vm7650_vm9, 1.0, %v5402_v17 }
 0x217   :  { %3921 = vmatpush2.msra.mxu1 %v3587_v26  ;;  %3732 = vmatprep.subr.mxu0 %v5402_v17  ;;  %v6071_v26 = vsub.f32 %v2830_v23, %v4907_v2  ;;  %vm2844_vm9 = vcmp.gt.f32.partialorder %v6062_v18, 1.0  ;;  %v6085_v23 = vsub.f32 %v2829_v37, %v4906_v19  ;;  %v6096_v2 = vsub.f32 %v2827_v38, %v4904_v32  ;;  %v3647_v38 = vld [vmem:[#allocation10 + $0x370] sm:$0xff]  ;;  %v3646_v19 = vld [vmem:[#allocation10 + $0x368] sm:$0xff] }
 0x218   :  { %3922 = vmatprep.subr.mxu1 %v5402_v17  ;;  %3733 = vmatpush2.msra.mxu0 %v3554_v40  ;;  %v3616_v40 = vld [vmem:[#allocation10 + $0x278] sm:$0xff]  ;;  %v2879_v37 = vadd.f32 %v6062_v18, %v5512_v62  ;;  %v4913_v9 = vsel %vm2844_vm9, 1.0, %v5402_v17 }
 0x219   :  { %3923 = vmatpush2.msra.mxu1 %v3586_v58  ;;  %3734 = vmatprep.subr.mxu0 %v5402_v17  ;;  %v3648_v58 = vld [vmem:[#allocation10 + $0x378] sm:$0xff]  ;;  %v2880_v34 = vadd.f32 %v6085_v23, %v5642_v51 }
 0x21a   :  { %3924 = vmatprep.subr.mxu1 %v5402_v17  ;;  %3735 = vmatpush2.msra.mxu0 %v3553_v39  ;;  %v2881_v39 = vadd.f32 %v6071_v26, %v5647_v36  ;;  %v6124_v14 = vsub.f32 %v2879_v37, %v4913_v9  ;;  %v3644_v9 = vld [vmem:[#allocation10 + $0x358] sm:$0xff] }
 0x21b   :  { %3925 = vmatpush2.msra.mxu1 %v3585_v59  ;;  %5019 = vmatmul.mubr.msk.f32.vlgmr.msra.gmra.mxu0 %vm2078_vm1, %v7688_v61  ;;  %vm2846_vm1 = vcmp.gt.f32.partialorder %v6071_v26, 1.0  ;;  %v3614_v59 = vld [vmem:[#allocation10 + $0x268] sm:$0xff] }
 0x21c   :  { %5069 = vmatmul.mubr.msk.f32.vlgmr.msra.gmra.mxu1 %vm2080_vm15, %v7688_v61  ;;  %5020 = vmatprep.mubr.msk.f32.mxu0 %vm2130_vm3, %v7688_v61  ;;  %vm2845_vm3 = vcmp.gt.f32.partialorder %v6085_v23, 1.0  ;;  %v4915_v24 = vsel %vm2846_vm1, 1.0, %v5402_v17  ;;  %v2930_v37 = vadd.f32 %v6124_v14, %v5512_v62  ;;  %vm7694_vm15 = vcmp.gt.f32.partialorder %v5744_v0, 1.0 }
 0x21d   :  { %5070 = vmatprep.mubr.msk.f32.mxu1 %vm2132_vm14, %v7688_v61  ;;  %4052 = vmatprep.subr.mxu0 %v5402_v17  ;;  %v4914_v11 = vsel %vm2845_vm3, 1.0, %v5402_v17  ;;  %v6137_v32 = vsub.f32 %v2881_v39, %v4915_v24  ;;  %vm7693_vm14 = vcmp.gt.f32.partialorder %v5585_v41, 1.0  ;;  %v3643_v24 = vld [vmem:[#allocation10 + $0x350] sm:$0xff] }
 0x21e   :  { %4242 = vmatprep.subr.mxu1 %v5402_v17  ;;  %4053 = vmatpush1.msra.mxu0 %v3616_v40  ;;  %v2878_v40 = vadd.f32 %v6096_v2, %v5510_v56  ;;  %v6153_v33 = vsub.f32 %v2880_v34, %v4914_v11  ;;  %v3642_v11 = vld [vmem:[#allocation10 + $0x348] sm:$0xff] }
 0x21f   :  { %4243 = vmatpush1.msra.mxu1 %v3648_v58  ;;  %5021 = vmatmul.mubr.msk.f32.gmra.mxu0 %vm2129_vm4, %v7688_v61  ;;  %vm2843_vm4 = vcmp.gt.f32.partialorder %v6096_v2, 1.0 }
 0x220   :  { %5071 = vmatmul.mubr.msk.f32.gmra.mxu1 %vm2131_vm11, %v7688_v61  ;;  %5022 = vmatprep.mubr.msk.f32.mxu0 %vm2181_vm5, %v7688_v61  ;;  %v4912_v45 = vsel %vm2843_vm4, 1.0, %v5402_v17  ;;  %vm2895_vm5 = vcmp.gt.f32.partialorder %v6124_v14, 1.0  ;;  %vm7692_vm11 = vcmp.gt.f32.partialorder %v5755_v7, 1.0  ;;  %v3612_v7 = vld [vmem:[#allocation10 + $0x258] sm:$0xff] }
 0x221   :  { %5072 = vmatprep.mubr.msk.f32.mxu1 %vm2183_vm12, %v7688_v61  ;;  %4054 = vmatprep.subr.mxu0 %v5402_v17  ;;  %v6162_v58 = vsub.f32 %v2878_v40, %v4912_v45  ;;  %vm7651_vm12 = vcmp.gt.f32.partialorder %v6153_v33, 1.0  ;;  %v3641_v40 = vld [vmem:[#allocation10 + $0x340] sm:$0xff] }
 0x222   :  { %4244 = vmatprep.subr.mxu1 %v5402_v17  ;;  %4055 = vmatpush1.msra.mxu0 %v3615_v21  ;;  %v4922_v41 = vsel %vm7651_vm12, 1.0, %v5402_v17  ;;  %vm7703_vm12 = vcmp.gt.f32.partialorder %v5627_v3, 1.0 }
 0x223   :  { %4245 = vmatpush1.msra.mxu1 %v3647_v38  ;;  %5023 = vmatmul.mubr.msk.f32.gmra.mxu0 %vm2180_vm6, %v7688_v61  ;;  %vm7689_vm6 = vcmp.gt.f32.partialorder %v5569_v13, 1.0  ;;  %v4921_v13 = vsel %vm2895_vm5, 1.0, %v5402_v17  ;;  %v2931_v38 = vadd.f32 %v6153_v33, %v5642_v51  ;;  %v2929_v39 = vadd.f32 %v6162_v58, %v5510_v56 }
 0x224   :  { %5073 = vmatmul.mubr.msk.f32.gmra.mxu1 %vm2182_vm10, %v7688_v61  ;;  %5024 = vmatprep.mubr.msk.f32.mxu0 %vm2232_vm7, %v7688_v61  ;;  %vm7690_vm7 = vcmp.gt.f32.partialorder %v5716_v42, 1.0  ;;  %vm7691_vm10 = vcmp.gt.f32.partialorder %v5577_v30, 1.0  ;;  %v2932_v42 = vadd.f32 %v6137_v32, %v5647_v36  ;;  %v6190_v21 = vsub.f32 %v2930_v37, %v4921_v13  ;;  %v3639_v13 = vld [vmem:[#allocation10 + $0x330] sm:$0xff] }
 0x225   :  { %5074 = vmatprep.mubr.msk.f32.mxu1 %vm2234_vm8, %v7688_v61  ;;  %4056 = vmatprep.subr.mxu0 %v5402_v17  ;;  %vm2897_vm8 = vcmp.gt.f32.partialorder %v6137_v32, 1.0  ;;  %v6219_v34 = vsub.f32 %v2931_v38, %v4922_v41  ;;  %v897_v41 = vsub.s32 4, %v5488_v60 }
 0x226   :  { %4246 = vmatprep.subr.mxu1 %v5402_v17  ;;  %4057 = vmatpush1.msra.mxu0 %v3614_v59  ;;  %v4923_v30 = vsel %vm2897_vm8, 1.0, %v5402_v17 }
 0x227   :  { %4247 = vmatpush1.msra.mxu1 %v3646_v19  ;;  %5025 = vmatmul.mubr.msk.f32.gmra.mxu0 %vm7689_vm6, %v7688_v61  ;;  %vm2894_vm6 = vcmp.gt.f32.partialorder %v6162_v58, 1.0  ;;  %v6205_v0 = vsub.f32 %v2932_v42, %v4923_v30  ;;  %v2982_v3 = vadd.f32 %v6219_v34, %v5642_v51  ;;  %v3609_v19 = vld [vmem:[#allocation10 + $0x240] sm:$0xff] }
 0x228   :  { %5075 = vmatmul.mubr.msk.f32.gmra.mxu1 %vm7690_vm7, %v7688_v61  ;;  %5026 = vmatprep.mubr.msk.f32.mxu0 %vm7691_vm10, %v7688_v61  ;;  %vm7695_vm7 = vcmp.gt.f32.partialorder %v5593_v22, 1.0  ;;  %vm7696_vm10 = vcmp.gt.f32.partialorder %v5781_v10, 1.0  ;;  %v4920_v22 = vsel %vm2894_vm6, 1.0, %v5402_v17  ;;  %v3611_v10 = vld [vmem:[#allocation10 + $0x250] sm:$0xff] }
 0x229   :  { %5076 = vmatprep.mubr.msk.f32.mxu1 %vm7692_vm11, %v7688_v61  ;;  %4058 = vmatprep.subr.mxu0 %v5402_v17  ;;  %vm7697_vm11 = vcmp.gt.f32.partialorder %v5601_v8, 1.0  ;;  %v6230_v8 = vsub.f32 %v2929_v39, %v4920_v22  ;;  %v2983_v59 = vadd.f32 %v6205_v0, %v5647_v36  ;;  %v901_v39 = vsub.s32 5, %v5488_v60  ;;  %v7720_v22 = vld [vmem:[#allocation21_spill] sm:$0xff] }
 0x22a   :  { %4248 = vmatprep.subr.mxu1 %v5402_v17  ;;  %4059 = vmatpush1.msra.mxu0 %v3613_v25 }
 0x22b   :  { %4249 = vmatpush1.msra.mxu1 %v3645_v52  ;;  %5027 = vmatmul.mubr.msk.f32.gmra.mxu0 %vm7693_vm14, %v7688_v61  ;;  %vm7698_vm14 = vcmp.gt.f32.partialorder %v5771_v29, 1.0  ;;  %v2981_v29 = vadd.f32 %v6190_v21, %v5512_v62  ;;  %v2980_v25 = vadd.f32 %v6230_v8, %v5510_v56 }
 0x22c   :  { %5077 = vmatmul.mubr.msk.f32.gmra.mxu1 %vm7694_vm15, %v7688_v61  ;;  %5028 = vmatprep.mubr.msk.f32.mxu0 %vm7695_vm7, %v7688_v61  ;;  %vm7652_vm15 = vcmp.gt.f32.partialorder %v6190_v21, 1.0  ;;  %vm7699_vm7 = vcmp.gt.f32.partialorder %v5609_v31, 1.0 }
 0x22d   :  { %5078 = vmatprep.mubr.msk.f32.mxu1 %vm7696_vm10, %v7688_v61  ;;  %4060 = vmatprep.subr.mxu0 %v5402_v17  ;;  %vm7700_vm10 = vcmp.gt.f32.partialorder %v5807_v57, 1.0  ;;  %v4929_v31 = vsel %vm7652_vm15, 1.0, %v5402_v17  ;;  %v3610_v57 = vld [vmem:[#allocation10 + $0x248] sm:$0xff]  ;;  %vm7704_vm15 = vcmp.gt.f32.partialorder %v5834_v28, 1.0 }
 0x22e   :  { %4250 = vmatprep.subr.mxu1 %v5402_v17  ;;  %4061 = vmatpush1.msra.mxu0 %v3612_v7 }
 0x22f   :  { %4251 = vmatpush1.msra.mxu1 %v3644_v9  ;;  %5029 = vmatmul.mubr.msk.f32.gmra.mxu0 %vm7697_vm11, %v7688_v61  ;;  %vm2948_vm11 = vcmp.gt.f32.partialorder %v6205_v0, 1.0  ;;  %v3638_v9 = vld [vmem:[#allocation10 + $0x328] sm:$0xff] }
 0x230   :  { %5079 = vmatmul.mubr.msk.f32.gmra.mxu1 %vm7698_vm14, %v7688_v61  ;;  %5030 = vmatprep.mubr.msk.f32.mxu0 %vm7699_vm7, %v7688_v61  ;;  %vm7701_vm14 = vcmp.gt.f32.partialorder %v5618_v46, 1.0  ;;  %vm7702_vm7 = vcmp.gt.f32.partialorder %v5796_v47, 1.0  ;;  %v4931_v46 = vsel %vm2948_vm11, 1.0, %v5402_v17  ;;  %v6258_v47 = vsub.f32 %v2981_v29, %v4929_v31  ;;  %v3637_v29 = vld [vmem:[#allocation10 + $0x320] sm:$0xff] }
 0x231   :  { %5080 = vmatprep.mubr.msk.f32.mxu1 %vm7700_vm10, %v7688_v61  ;;  %4062 = vmatprep.subr.mxu0 %v5402_v17  ;;  %vm7653_vm10 = vcmp.gt.f32.partialorder %v6219_v34, 1.0  ;;  %v6271_v45 = vsub.f32 %v2983_v59, %v4931_v46  ;;  %v7724_v59 = vld [vmem:[#allocation22_spill] sm:$0xff] }
 0x232   :  { %4252 = vmatprep.subr.mxu1 %v5402_v17  ;;  %4063 = vmatpush1.msra.mxu0 %v3611_v10  ;;  %v4930_v28 = vsel %vm7653_vm10, 1.0, %v5402_v17  ;;  %v3032_v37 = vadd.f32 %v6258_v47, %v5512_v62  ;;  %vm7710_vm10 = vcmp.gt.f32.partialorder %v5710_v12, 1.0  ;;  %v7722_v10 = vld [vmem:[#allocation23_spill] sm:$0xff]  ;;  %v7726_v46 = vld [vmem:[#allocation26_spill] sm:$0xff] }
 0x233   :  { %4253 = vmatpush1.msra.mxu1 %v3643_v24  ;;  %5031 = vmatmul.mubr.msk.f32.gmra.mxu0 %vm7701_vm14, %v7688_v61  ;;  %vm2945_vm14 = vcmp.gt.f32.partialorder %v6230_v8, 1.0  ;;  %v3605_v24 = vld [vmem:[#allocation10 + $0x220] sm:$0xff] }
 0x234   :  { %5081 = vmatmul.mubr.msk.f32.gmra.mxu1 %vm7702_vm7, %v7688_v61  ;;  %5032 = vmatprep.mubr.msk.f32.mxu0 %vm7703_vm12, %v7688_v61  ;;  %vm7705_vm12 = vcmp.gt.f32.partialorder %v5635_v44, 1.0  ;;  %vm7707_vm7 = vcmp.gt.f32.partialorder %v5645_v55, 1.0  ;;  %v4928_v44 = vsel %vm2945_vm14, 1.0, %v5402_v17  ;;  %v3608_v55 = vld [vmem:[#allocation10 + $0x238] sm:$0xff] }
 0x235   :  { %5082 = vmatprep.mubr.msk.f32.mxu1 %vm7704_vm15, %v7688_v61  ;;  %4064 = vmatprep.subr.mxu0 %v5402_v17  ;;  %vm7706_vm15 = vcmp.gt.f32.partialorder %v5824_v15, 1.0  ;;  %v6287_v15 = vsub.f32 %v2982_v3, %v4930_v28  ;;  %v6296_v52 = vsub.f32 %v2980_v25, %v4928_v44  ;;  %v1628_v28 = vpop.f32.mrf.mxu1 }
 0x236   :  { %4254 = vmatprep.subr.mxu1 %v5402_v17  ;;  %4065 = vmatpush1.msra.mxu0 %v3610_v57  ;;  %v6382_v57 = vld [vmem:[#allocation9] sm:$0xff] }
 0x237   :  { %4255 = vmatpush1.msra.mxu1 %v3642_v11  ;;  %5033 = vmatmul.mubr.msk.f32.gmra.mxu0 %vm7705_vm12, %v7688_v61  ;;  %vm7654_vm12 = vcmp.gt.f32.partialorder %v6258_v47, 1.0  ;;  %v3033_v30 = vadd.f32 %v6287_v15, %v5642_v51  ;;  %v3031_v7 = vadd.f32 %v6296_v52, %v5510_v56  ;;  %v898_v11 = vrot.slane %v6382_v57, %v897_v41  ;;  %v7737_v41 = vld [vmem:[#allocation29_spill] sm:$0xff] }
 0x238   :  { %5083 = vmatmul.mubr.msk.f32.gmra.mxu1 %vm7706_vm15, %v7688_v61  ;;  %5034 = vmatprep.mubr.msk.f32.mxu0 %vm7707_vm7, %v7688_v61  ;;  %vm7708_vm15 = vcmp.gt.f32.partialorder %v5678_v27, 1.0  ;;  %vm7655_vm7 = vcmp.gt.f32.partialorder %v6271_v45, 1.0  ;;  %v4937_v27 = vsel %vm7654_vm12, 1.0, %v5402_v17  ;;  %vm7657_vm12 = vcmp.gt.f32.partialorder %v6296_v52, 1.0 }
 0x239   :  { %5084 = vmatprep.mubr.msk.f32.mxu1 %vm2489_vm0, %v7688_v61  ;;  %4066 = vmatprep.subr.mxu0 %v5402_v17  ;;  %vm7709_vm0 = vcmp.gt.f32.partialorder %v5850_v49, 1.0  ;;  %v3034_v49 = vadd.f32 %v6271_v45, %v5647_v36  ;;  %v4939_v12 = vsel %vm7655_vm7, 1.0, %v5402_v17  ;;  %v6324_v42 = vsub.f32 %v3032_v37, %v4937_v27  ;;  %v7730_v37 = vld [vmem:[#allocation25_spill] sm:$0xff] }
 0x23a   :  { %4256 = vmatprep.subr.mxu1 %v5402_v17  ;;  %4067 = vmatpush1.msra.mxu0 %v3609_v19  ;;  %vm7714_vm7 = vcmp.gt.f32.partialorder %v5779_v35, 1.0  ;;  %v4936_v35 = vsel %vm7657_vm12, 1.0, %v5402_v17  ;;  %vm7719_vm12 = vcmp.gt.f32.partialorder %v5939_v54, 1.0  ;;  %v1557_v54 = vpop.f32.mrf.mxu0  ;;  %v902_v25 = vrot.slane %v6382_v57, %v901_v39  ;;  %v3604_v27 = vld [vmem:[#allocation10 + $0x218] sm:$0xff]  ;;  %v3635_v39 = vld [vmem:[#allocation10 + $0x310] sm:$0xff] }
 0x23b   :  { %4257 = vmatpush1.msra.mxu1 %v3641_v40  ;;  %5035 = vmatmul.mubr.msk.f32.gmra.mxu0 %vm7708_vm15, %v7688_v61  ;;  %vm7711_vm15 = vcmp.gt.f32.partialorder %v5887_v16, 1.0  ;;  %v3607_v16 = vld [vmem:[#allocation10 + $0x230] sm:$0xff] }
 0x23c   :  { %5085 = vmatmul.mubr.msk.f32.gmra.mxu1 %vm7709_vm0, %v7688_v61  ;;  %5036 = vmatprep.mubr.msk.f32.mxu0 %vm7710_vm10, %v7688_v61  ;;  %vm7656_vm0 = vcmp.gt.f32.partialorder %v6287_v15, 1.0  ;;  %vm7712_vm10 = vcmp.gt.f32.partialorder %v5751_v6, 1.0 }
 0x23d   :  { %5086 = vmatprep.mubr.msk.f32.mxu1 %vm7711_vm15, %v7688_v61  ;;  %4068 = vmatprep.subr.mxu0 %v5402_v17  ;;  %vm7713_vm15 = vcmp.gt.f32.partialorder %v5876_v63, 1.0  ;;  %v4938_v6 = vsel %vm7656_vm0, 1.0, %v5402_v17  ;;  %v6339_v63 = vsub.f32 %v3034_v49, %v4939_v12  ;;  %vm7718_vm0 = vcmp.gt.f32.partialorder %v5845_v20, 1.0  ;;  %v3636_v49 = vld [vmem:[#allocation10 + $0x318] sm:$0xff] }
 0x23e   :  { %4258 = vmatprep.subr.mxu1 %v5402_v17  ;;  %4069 = vmatpush1.msra.mxu0 %v3608_v55  ;;  %v6353_v38 = vsub.f32 %v3033_v30, %v4938_v6  ;;  %v1559_v55 = vpop.f32.mrf.mxu0  ;;  %v7732_v30 = vld [vmem:[#allocation27_spill] sm:$0xff]  ;;  %v7734_v6 = vld [vmem:[#allocation28_spill] sm:$0xff] }
 0x23f   :  { %4259 = vmatpush1.msra.mxu1 %v3640_v53  ;;  %5037 = vmatmul.mubr.msk.f32.gmra.mxu0 %vm7712_vm10, %v7688_v61  ;;  %vm7715_vm10 = vcmp.gt.f32.partialorder %v5913_v1, 1.0  ;;  %v3606_v1 = vld [vmem:[#allocation10 + $0x228] sm:$0xff]  ;;  %v3085_v31 = vadd.f32 %v6339_v63, %v5647_v36 }
 0x240   :  { %5087 = vmatmul.mubr.msk.f32.gmra.mxu1 %vm7713_vm15, %v7688_v61  ;;  %5038 = vmatprep.mubr.msk.f32.mxu0 %vm7714_vm7, %v7688_v61  ;;  %vm7716_vm7 = vcmp.gt.f32.partialorder %v5817_v4, 1.0  ;;  %vm7717_vm15 = vcmp.gt.f32.partialorder %v5903_v50, 1.0  ;;  %v6365_v4 = vsub.f32 %v3031_v7, %v4936_v35  ;;  %v3083_v50 = vadd.f32 %v6324_v42, %v5512_v62  ;;  %v7728_v53 = vld [vmem:[#allocation24_spill] sm:$0xff]  ;;  %v1630_v35 = vpop.f32.mrf.mxu1 }
 0x241   :  { %5088 = vmatprep.mubr.msk.f32.mxu1 %vm7715_vm10, %v7688_v61  ;;  %4070 = vmatprep.subr.mxu0 %v5402_v17  ;;  %vm7658_vm10 = vcmp.gt.f32.partialorder %v6324_v42, 1.0  ;;  %v3084_v40 = vadd.f32 %v6353_v38, %v5642_v51 }
 0x242   :  { %4260 = vmatprep.subr.mxu1 %v5402_v17  ;;  %4071 = vmatpush1.msra.mxu0 %v3607_v16  ;;  %v4945_v20 = vsel %vm7658_vm10, 1.0, %v5402_v17  ;;  %vm7725_vm10 = vcmp.gt.f32.partialorder %v7724_v59, 1.0  ;;  %v3082_v16 = vadd.f32 %v6365_v4, %v5510_v56 }
 0x243   :  { %4261 = vmatpush1.msra.mxu1 %v3639_v13  ;;  %5039 = vmatmul.mubr.msk.f32.gmra.mxu0 %vm7716_vm7, %v7688_v61  ;;  %vm7660_vm7 = vcmp.gt.f32.partialorder %v6339_v63, 1.0  ;;  %v6397_v19 = vsub.f32 %v3083_v50, %v4945_v20  ;;  %v1558_v13 = vadd.f32 %v1557_v54, %v898_v11  ;;  %v3603_v50 = vld [vmem:[#allocation10 + $0x210] sm:$0xff] }
 0x244   :  { %5089 = vmatmul.mubr.msk.f32.gmra.mxu1 %vm7717_vm15, %v7688_v61  ;;  %5040 = vmatprep.mubr.msk.f32.mxu0 %vm7718_vm0, %v7688_v61  ;;  %vm7723_vm0 = vcmp.gt.f32.partialorder %v7722_v10, 1.0  ;;  %vm7659_vm15 = vcmp.gt.f32.partialorder %v6353_v38, 1.0  ;;  %v4947_v3 = vsel %vm7660_vm7, 1.0, %v5402_v17  ;;  %vm7735_vm7 = vcmp.gt.f32.partialorder %v7734_v6, 1.0  ;;  %v7739_v10 = vld [vmem:[#allocation30_spill] sm:$0xff] }
 0x245   :  { %5090 = vmatprep.mubr.msk.f32.mxu1 %vm7719_vm12, %v7688_v61  ;;  %4072 = vmatprep.subr.mxu0 %v5402_v17  ;;  %vm7721_vm12 = vcmp.gt.f32.partialorder %v7720_v22, 1.0  ;;  %v4946_v44 = vsel %vm7659_vm15, 1.0, %v5402_v17  ;;  %v6411_v12 = vsub.f32 %v3085_v31, %v4947_v3  ;;  %vm7733_vm15 = vcmp.gt.f32.partialorder %v7732_v30, 1.0  ;;  %v3633_v6 = vld [vmem:[#allocation10 + $0x300] sm:$0xff] }
 0x246   :  { %4262 = vmatprep.subr.mxu1 %v5402_v17  ;;  %4073 = vmatpush1.msra.mxu0 %v3606_v1  ;;  %v6427_v1 = vsub.f32 %v3084_v40, %v4946_v44  ;;  %v3134_v54 = vadd.f32 %v6397_v19, %v5512_v62  ;;  %v1629_v22 = vadd.f32 %v1628_v28, %v1558_v13  ;;  %v3602_v40 = vld [vmem:[#allocation10 + $0x208] sm:$0xff]  ;;  %v3601_v13 = vld [vmem:[#allocation10 + $0x200] sm:$0xff] }
 0x247   :  { %4263 = vmatpush1.msra.mxu1 %v3638_v9  ;;  %5041 = vmatmul.mubr.msk.f32.gmra.mxu0 %vm7721_vm12, %v7688_v61  ;;  %vm7727_vm12 = vcmp.gt.f32.partialorder %v7726_v46, 1.0  ;;  %v1560_v9 = vadd.f32 %v1559_v55, %v902_v25  ;;  %v3136_v11 = vadd.f32 %v6411_v12, %v5647_v36  ;;  %v3634_v44 = vld [vmem:[#allocation10 + $0x308] sm:$0xff] }
 0x248   :  { %5091 = vmatmul.mubr.msk.f32.gmra.mxu1 %vm7723_vm0, %v7688_v61  ;;  %5042 = vmatprep.mubr.msk.f32.mxu0 %vm7725_vm10, %v7688_v61  ;;  %vm7661_vm0 = vcmp.gt.f32.partialorder %v6365_v4, 1.0  ;;  %vm7729_vm10 = vcmp.gt.f32.partialorder %v7728_v53, 1.0  ;;  %v3135_v55 = vadd.f32 %v6427_v1, %v5642_v51 }
 0x249   :  { %5092 = vmatprep.mubr.msk.f32.mxu1 %vm7727_vm12, %v7688_v61  ;;  %4074 = vmatprep.subr.mxu0 %v5402_v17  ;;  %vm7731_vm12 = vcmp.gt.f32.partialorder %v7730_v37, 1.0  ;;  %v4944_v7 = vsel %vm7661_vm0, 1.0, %v5402_v17  ;;  %vm7740_vm0 = vcmp.gt.f32.partialorder %v7739_v10, 1.0  ;;  %v1631_v59 = vadd.f32 %v1630_v35, %v1560_v9 }
 0x24a   :  { %4264 = vmatprep.subr.mxu1 %v5402_v17  ;;  %4075 = vmatpush1.msra.mxu0 %v3605_v24  ;;  %v6436_v20 = vsub.f32 %v3082_v16, %v4944_v7 }
 0x24b   :  { %4265 = vmatpush1.msra.mxu1 %v3637_v29  ;;  %5043 = vmatmul.mubr.msk.f32.gmra.mxu0 %vm7729_vm10, %v7688_v61  ;;  %vm3099_vm10 = vcmp.gt.f32.partialorder %v6397_v19, 1.0  ;;  %v1770_v29 = vpop.f32.mrf.mxu1 }
 0x24c   :  { %5093 = vmatmul.mubr.msk.f32.gmra.mxu1 %vm7731_vm12, %v7688_v61  ;;  %5044 = vmatprep.mubr.msk.f32.mxu0 %vm7733_vm15, %v7688_v61  ;;  %vm7736_vm15 = vcmp.gt.f32.partialorder %v6002_v5, 1.0  ;;  %vm3101_vm12 = vcmp.gt.f32.partialorder %v6411_v12, 1.0  ;;  %v4953_v24 = vsel %vm3099_vm10, 1.0, %v5402_v17  ;;  %v3133_v18 = vadd.f32 %v6436_v20, %v5510_v56 }
 0x24d   :  { %5094 = vmatprep.mubr.msk.f32.mxu1 %vm7735_vm7, %v7688_v61  ;;  %4076 = vmatprep.subr.mxu0 %v5402_v17  ;;  %vm7738_vm7 = vcmp.gt.f32.partialorder %v7737_v41, 1.0  ;;  %v4955_v3 = vsel %vm3101_vm12, 1.0, %v5402_v17  ;;  %v6464_v25 = vsub.f32 %v3134_v54, %v4953_v24  ;;  %v1772_v37 = vpop.f32.mrf.mxu1 }
 0x24e   :  { %4266 = vmatprep.subr.mxu1 %v5402_v17  ;;  %4077 = vmatpush1.msra.mxu0 %v3604_v27  ;;  %v6481_v27 = vsub.f32 %v3136_v11, %v4955_v3 }
 0x24f   :  { %4267 = vmatpush1.msra.mxu1 %v3636_v49  ;;  %5045 = vmatmul.mubr.msk.f32.gmra.mxu0 %vm7736_vm15, %v7688_v61  ;;  %vm3100_vm15 = vcmp.gt.f32.partialorder %v6427_v1, 1.0  ;;  %v3185_v14 = vadd.f32 %v6464_v25, %v5512_v62  ;;  %v3625_v1 = vld [vmem:[#allocation10 + $0x2c0] sm:$0xff] }
 0x250   :  { %5095 = vmatmul.mubr.msk.f32.gmra.mxu1 %vm7738_vm7, %v7688_v61  ;;  %5046 = vmatprep.mubr.msk.f32.mxu0 %vm7740_vm0, %v7688_v61  ;;  %vm3098_vm0 = vcmp.gt.f32.partialorder %v6436_v20, 1.0  ;;  %v4954_v53 = vsel %vm3100_vm15, 1.0, %v5402_v17  ;;  %v3187_v54 = vadd.f32 %v6481_v27, %v5647_v36  ;;  %vm7744_vm7 = vcmp.gt.f32.partialorder %v6190_v21, 1.0 }
 0x251   :  { %5096 = vmatprep.mubr.msk.f32.mxu1 %vm2795_vm13, %v7688_v61  ;;  %4078 = vmatprep.subr.mxu0 %v5402_v17  ;;  %vm7742_vm13 = vcmp.gt.f32.partialorder %v6039_v43, 1.0  ;;  %v4952_v26 = vsel %vm3098_vm0, 1.0, %v5402_v17  ;;  %v6500_v30 = vsub.f32 %v3135_v55, %v4954_v53 }
 0x252   :  { %v1699_v31 = vpop.f32.mrf.mxu0  ;;  %4268 = vmatprep.subr.mxu1 %v5402_v17  ;;  %4079 = vmatpush1.msra.mxu0 %v3603_v50  ;;  %v6519_v35 = vsub.f32 %v3133_v18, %v4952_v26 }
 0x253   :  { %v1700_v46 = vadd.f32 %v1699_v31, %v1629_v22  ;;  %4269 = vmatpush1.msra.mxu1 %v3635_v39  ;;  %5047 = vmatmul.mubr.msk.f32.gmra.mxu0 %vm2792_vm2, %v7688_v61  ;;  %vm3150_vm2 = vcmp.gt.f32.partialorder %v6464_v25, 1.0  ;;  %v3632_v39 = vld [vmem:[#allocation10 + $0x2f8] sm:$0xff]  ;;  %v3186_v0 = vadd.f32 %v6500_v30, %v5642_v51 }
 0x254   :  { %5097 = vmatmul.mubr.msk.f32.gmra.mxu1 %vm7742_vm13, %v7688_v61  ;;  %v1701_v28 = vpop.f32.mrf.mxu0  ;;  %5048 = vmatprep.mubr.msk.f32.mxu0 %vm2844_vm9, %v7688_v61  ;;  %v4961_v9 = vsel %vm3150_vm2, 1.0, %v5402_v17  ;;  %v3664_v22 = vld [vmem:[#allocation10 + $0x3f8] sm:$0xff]  ;;  %vm3149_vm13 = vcmp.gt.f32.partialorder %v6519_v35, 1.0  ;;  %v3184_v3 = vadd.f32 %v6519_v35, %v5510_v56 }
 0x255   :  { %5098 = vmatprep.mubr.msk.f32.mxu1 %vm2846_vm1, %v7688_v61  ;;  %v6474_v43 = vadd.f32 %v1770_v29, %v1700_v46  ;;  %v1702_v48 = vadd.f32 %v1701_v28, %v1631_v59  ;;  %4080 = vmatprep.subr.mxu0 %v5402_v17  ;;  %v6562_v21 = vsub.f32 %v3185_v14, %v4961_v9  ;;  %v3631_v59 = vld [vmem:[#allocation10 + $0x2f0] sm:$0xff]  ;;  %v3628_v14 = vld [vmem:[#allocation10 + $0x2d8] sm:$0xff]  ;;  %v3662_v9 = vld [vmem:[#allocation10 + $0x3e8] sm:$0xff] }
 0x256   :  { %4270 = vmatprep.subr.mxu1 %v5402_v17  ;;  %4081 = vmatpush1.msra.mxu0 %v3602_v40  ;;  %v3663_v28 = vld [vmem:[#allocation10 + $0x3f0] sm:$0xff] }
 0x257   :  { %v6485_v49 = vadd.f32 %v1772_v37, %v1702_v48  ;;  %4271 = vmatpush1.msra.mxu1 %v3634_v44  ;;  %vm7668_vm9 = vcmp.gt.f32.partialorder %v6474_v43, 1.0  ;;  %v2117_v16 = vadd.f32 %v6474_v43, %v6474_v43  ;;  %5049 = vmatmul.mubr.msk.f32.gmra.mxu0 %vm2843_vm4, %v7688_v61  ;;  %v3236_v26 = vadd.f32 %v6562_v21, %v5512_v62 }
 0x258   :  { %5099 = vmatmul.mubr.msk.f32.gmra.mxu1 %vm2845_vm3, %v7688_v61  ;;  %v4796_v7 = vsel %vm7668_vm9, 1.0, %v5402_v17  ;;  %5050 = vmatprep.mubr.msk.f32.mxu0 %vm2895_vm5, %v7688_v61  ;;  %vm3152_vm3 = vcmp.gt.f32.partialorder %v6481_v27, 1.0  ;;  %vm7743_vm5 = vcmp.gt.f32.partialorder %v6153_v33, 1.0  ;;  %vm7753_vm9 = vcmp.gt.f32.partialorder %v6365_v4, 1.0  ;;  %v3627_v4 = vld [vmem:[#allocation10 + $0x2d0] sm:$0xff] }
 0x259   :  { %5100 = vmatprep.mubr.msk.f32.mxu1 %vm2897_vm8, %v7688_v61  ;;  %vm2083_vm1 = vcmp.gt.f32.partialorder %v6485_v49, 1.0  ;;  %v2118_v23 = vadd.f32 %v6485_v49, %v6485_v49  ;;  %v6514_v2 = vsub.f32 %v2117_v16, %v4796_v7  ;;  %4082 = vmatprep.subr.mxu0 %v5402_v17  ;;  %vm3151_vm8 = vcmp.gt.f32.partialorder %v6500_v30, 1.0 }
 0x25a   :  { %4272 = vmatprep.subr.mxu1 %v5402_v17  ;;  %v4797_v32 = vsel %vm2083_vm1, 1.0, %v5402_v17  ;;  %4083 = vmatpush1.msra.mxu0 %v3601_v13  ;;  %v4963_v33 = vsel %vm3152_vm3, 1.0, %v5402_v17  ;;  %v4962_v29 = vsel %vm3151_vm8, 1.0, %v5402_v17 }
 0x25b   :  { %4273 = vmatpush1.msra.mxu1 %v3633_v6  ;;  %v6529_v41 = vsub.f32 %v2118_v23, %v4797_v32  ;;  %vm7663_vm4 = vcmp.gt.f32.partialorder %v6514_v2, 1.0  ;;  %v2168_v50 = vadd.f32 %v6514_v2, %v6474_v43  ;;  %5051 = vmatmul.mubr.msk.f32.gmra.mxu0 %vm2894_vm6, %v7688_v61  ;;  %v6584_v46 = vsub.f32 %v3187_v54, %v4963_v33 }
 0x25c   :  { %5101 = vmatmul.mubr.msk.f32.gmra.mxu1 %vm7743_vm5, %v7688_v61  ;;  %v4804_v10 = vsel %vm7663_vm4, 1.0, %v5402_v17  ;;  %5052 = vmatprep.mubr.msk.f32.mxu0 %vm7744_vm7, %v7688_v61  ;;  %vm7745_vm5 = vcmp.gt.f32.partialorder %v6219_v34, 1.0  ;;  %vm7746_vm7 = vcmp.gt.f32.partialorder %v6258_v47, 1.0  ;;  %v4960_v34 = vsel %vm3149_vm13, 1.0, %v5402_v17 }
 0x25d   :  { %5102 = vmatprep.mubr.msk.f32.mxu1 %vm2948_vm11, %v7688_v61  ;;  %vm7665_vm6 = vcmp.gt.f32.partialorder %v6529_v41, 1.0  ;;  %v2169_v58 = vadd.f32 %v6529_v41, %v6485_v49  ;;  %v6558_v5 = vsub.f32 %v2168_v50, %v4804_v10  ;;  %4084 = vmatprep.subr.mxu0 %v5402_v17  ;;  %v6606_v55 = vsub.f32 %v3186_v0, %v4962_v29 }
 0x25e   :  { %4274 = vmatprep.subr.mxu1 %v5402_v17  ;;  %v4805_v24 = vsel %vm7665_vm6, 1.0, %v5402_v17  ;;  %4085 = vmatpush2.msra.mxu0 %v3632_v39  ;;  %vm7749_vm4 = vcmp.gt.f32.partialorder %v6287_v15, 1.0  ;;  %v6625_v37 = vsub.f32 %v3184_v3, %v4960_v34  ;;  %vm7750_vm6 = vcmp.gt.f32.partialorder %v6324_v42, 1.0  ;;  %v3624_v34 = vld [vmem:[#allocation10 + $0x2b8] sm:$0xff] }
 0x25f   :  { %4275 = vmatpush2.msra.mxu1 %v3664_v22  ;;  %v6573_v31 = vsub.f32 %v2169_v58, %v4805_v24  ;;  %vm7662_vm11 = vcmp.gt.f32.partialorder %v6558_v5, 1.0  ;;  %v2219_v11 = vadd.f32 %v6558_v5, %v6474_v43  ;;  %5053 = vmatmul.mubr.msk.f32.gmra.mxu0 %vm2945_vm14, %v7688_v61  ;;  %vm7747_vm14 = vcmp.gt.f32.partialorder %v6271_v45, 1.0  ;;  %v3630_v45 = vld [vmem:[#allocation10 + $0x2e8] sm:$0xff] }
 0x260   :  { %5103 = vmatmul.mubr.msk.f32.gmra.mxu1 %vm7745_vm5, %v7688_v61  ;;  %v4812_v40 = vsel %vm7662_vm11, 1.0, %v5402_v17  ;;  %5054 = vmatprep.mubr.msk.f32.mxu0 %vm7746_vm7, %v7688_v61  ;;  %vm3201_vm7 = vcmp.gt.f32.partialorder %v6562_v21, 1.0  ;;  %vm7748_vm11 = vcmp.gt.f32.partialorder %v6296_v52, 1.0  ;;  %v3629_v52 = vld [vmem:[#allocation10 + $0x2e0] sm:$0xff]  ;;  %v3238_v13 = vadd.f32 %v6584_v46, %v5647_v36  ;;  %v3626_v24 = vld [vmem:[#allocation10 + $0x2c8] sm:$0xff] }
 0x261   :  { %5104 = vmatprep.mubr.msk.f32.mxu1 %vm7747_vm14, %v7688_v61  ;;  %vm7664_vm5 = vcmp.gt.f32.partialorder %v6573_v31, 1.0  ;;  %v2220_v8 = vadd.f32 %v6573_v31, %v6485_v49  ;;  %v6603_v44 = vsub.f32 %v2219_v11, %v4812_v40  ;;  %4086 = vmatprep.subr.mxu0 %v5402_v17  ;;  %v4969_v42 = vsel %vm3201_vm7, 1.0, %v5402_v17 }
 0x262   :  { %4276 = vmatprep.subr.mxu1 %v5402_v17  ;;  %v4813_v47 = vsel %vm7664_vm5, 1.0, %v5402_v17  ;;  %4087 = vmatpush2.msra.mxu0 %v3631_v59  ;;  %vm3203_vm5 = vcmp.gt.f32.partialorder %v6584_v46, 1.0  ;;  %v3237_v32 = vadd.f32 %v6606_v55, %v5642_v51  ;;  %v6690_v22 = vsub.f32 %v3236_v26, %v4969_v42 }
 0x263   :  { %4277 = vmatpush2.msra.mxu1 %v3663_v28  ;;  %v6613_v48 = vsub.f32 %v2220_v8, %v4813_v47  ;;  %vm7666_vm14 = vcmp.gt.f32.partialorder %v6603_v44, 1.0  ;;  %v2270_v53 = vadd.f32 %v6603_v44, %v6474_v43  ;;  %5055 = vmatmul.mubr.msk.f32.gmra.mxu0 %vm7748_vm11, %v7688_v61  ;;  %vm7751_vm11 = vcmp.gt.f32.partialorder %v6339_v63, 1.0 }
 0x264   :  { %5105 = vmatmul.mubr.msk.f32.gmra.mxu1 %vm7749_vm4, %v7688_v61  ;;  %v4820_v18 = vsel %vm7666_vm14, 1.0, %v5402_v17  ;;  %4088 = vmatprep.subr.mxu0 %v5402_v17  ;;  %v4971_v63 = vsel %vm3203_vm5, 1.0, %v5402_v17  ;;  %vm7752_vm14 = vcmp.gt.f32.partialorder %v6353_v38, 1.0  ;;  %v3235_v33 = vadd.f32 %v6625_v37, %v5510_v56 }
 0x265   :  { %5056 = vmatprep.mubr.msk.f32.mxu0 %vm7750_vm6, %v7688_v61  ;;  %vm7667_vm4 = vcmp.gt.f32.partialorder %v6613_v48, 1.0  ;;  %v2271_v15 = vadd.f32 %v6613_v48, %v6485_v49  ;;  %v6639_v16 = vsub.f32 %v2270_v53, %v4820_v18  ;;  %5106 = vmatprep.mubr.msk.f32.mxu1 %vm7751_vm11, %v7688_v61  ;;  %vm3202_vm6 = vcmp.gt.f32.partialorder %v6606_v55, 1.0 }
 0x266   :  { %4089 = vmatpush2.msra.mxu0 %v3630_v45  ;;  %v4821_v6 = vsel %vm7667_vm4, 1.0, %v5402_v17  ;;  %4278 = vmatprep.subr.mxu1 %v5402_v17  ;;  %vm3200_vm4 = vcmp.gt.f32.partialorder %v6625_v37, 1.0  ;;  %v4970_v38 = vsel %vm3202_vm6, 1.0, %v5402_v17  ;;  %v6692_v10 = vsub.f32 %v3238_v13, %v4971_v63 }
 0x267   :  { %4090 = vmatprep.subr.mxu0 %v5402_v17  ;;  %v6658_v7 = vsub.f32 %v2271_v15, %v4821_v6  ;;  %vm2286_vm11 = vcmp.gt.f32.partialorder %v6639_v16, 1.0  ;;  %v2321_v23 = vadd.f32 %v6639_v16, %v6474_v43  ;;  %5057 = vmatmul.mubr.msk.f32.gmra.mxu0 %vm7753_vm9, %v7688_v61  ;;  %v4968_v19 = vsel %vm3200_vm4, 1.0, %v5402_v17  ;;  %v3621_v6 = vld [vmem:[#allocation10 + $0x2a0] sm:$0xff] }
 0x268   :  { %4091 = vmatpush2.msra.mxu0 %v3629_v52  ;;  %5107 = vmatmul.mubr.msk.f32.gmra.mxu1 %vm7752_vm14, %v7688_v61  ;;  %v4828_v50 = vsel %vm2286_vm11, 1.0, %v5402_v17  ;;  %v6711_v29 = vsub.f32 %v3237_v32, %v4970_v38  ;;  %v6729_v28 = vsub.f32 %v3235_v33, %v4968_v19  ;;  %vm3252_vm9 = vcmp.gt.f32.partialorder %v6690_v22, 1.0  ;;  %v3618_v19 = vld [vmem:[#allocation10 + $0x288] sm:$0xff] }
 0x269   :  { %4092 = vmatprep.subr.mxu0 %v5402_v17  ;;  %vm2287_vm14 = vcmp.gt.f32.partialorder %v6658_v7, 1.0  ;;  %v2322_v39 = vadd.f32 %v6658_v7, %v6485_v49  ;;  %v6682_v54 = vsub.f32 %v2321_v23, %v4828_v50  ;;  %5058 = vmatprep.mubr.msk.f32.mxu0 %vm3099_vm10, %v7688_v61  ;;  %v3289_v25 = vadd.f32 %v6692_v10, %v5647_v36  ;;  %v3623_v36 = vld [vmem:[#allocation10 + $0x2b0] sm:$0xff] }
 0x26a   :  { %5108 = vmatprep.mubr.msk.f32.mxu1 %vm3101_vm12, %v7688_v61  ;;  %v4829_v58 = vsel %vm2287_vm14, 1.0, %v5402_v17  ;;  %4093 = vmatpush2.msra.mxu0 %v3628_v14  ;;  %v4977_v46 = vsel %vm3252_vm9, 1.0, %v5402_v17  ;;  %v3287_v53 = vadd.f32 %v6690_v22, %v5512_v62  ;;  %v3288_v35 = vadd.f32 %v6711_v29, %v5642_v51  ;;  %v3622_v62 = vld [vmem:[#allocation10 + $0x2a8] sm:$0xff]  ;;  %v3619_v22 = vld [vmem:[#allocation10 + $0x290] sm:$0xff] }
 0x26b   :  { %4279 = vmatpush2.msra.mxu1 %v3662_v9  ;;  %v6702_v12 = vsub.f32 %v2322_v39, %v4829_v58  ;;  %vm2337_vm10 = vcmp.gt.f32.partialorder %v6682_v54, 1.0  ;;  %v2372_v0 = vadd.f32 %v6682_v54, %v6474_v43  ;;  %4094 = vmatprep.subr.mxu0 %v5402_v17  ;;  %v3286_v42 = vadd.f32 %v6729_v28, %v5510_v56  ;;  %v3620_v9 = vld [vmem:[#allocation10 + $0x298] sm:$0xff]  ;;  %v3651_v7 = vld [vmem:[#allocation10 + $0x390] sm:$0xff] }
 0x26c   :  { %5109 = vmatmul.mubr.msk.f32.gmra.mxu1 %vm3100_vm15, %v7688_v61  ;;  %v4836_v11 = vsel %vm2337_vm10, 1.0, %v5402_v17  ;;  %4095 = vmatpush2.msra.mxu0 %v3627_v4  ;;  %vm3254_vm15 = vcmp.gt.f32.partialorder %v6692_v10, 1.0  ;;  %v3295_v23 = vsub.f32 %v3287_v53, %v4977_v46 }
 0x26d   :  { %5110 = vmatprep.mubr.msk.f32.mxu1 %vm3152_vm3, %v7688_v61  ;;  %vm2338_vm12 = vcmp.gt.f32.partialorder %v6702_v12, 1.0  ;;  %v2373_v59 = vadd.f32 %v6702_v12, %v6485_v49  ;;  %v6722_v3 = vsub.f32 %v2372_v0, %v4836_v11  ;;  %5059 = vmatmul.mubr.msk.f32.gmra.mxu0 %vm3098_vm0, %v7688_v61  ;;  %vm3253_vm3 = vcmp.gt.f32.partialorder %v6711_v29, 1.0 }
 0x26e   :  { %4096 = vmatprep.subr.mxu0 %v5402_v17  ;;  %v4837_v27 = vsel %vm2338_vm12, 1.0, %v5402_v17  ;;  %5060 = vmatprep.mubr.msk.f32.mxu0 %vm3150_vm2, %v7688_v61  ;;  %v4979_v30 = vsel %vm3254_vm15, 1.0, %v5402_v17  ;;  %v4978_v21 = vsel %vm3253_vm3, 1.0, %v5402_v17 }
 0x26f   :  { %4097 = vmatpush2.msra.mxu0 %v3626_v24  ;;  %v6738_v20 = vsub.f32 %v2373_v59, %v4837_v27  ;;  %vm2388_vm0 = vcmp.gt.f32.partialorder %v6722_v3, 1.0  ;;  %v2423_v40 = vadd.f32 %v6722_v3, %v6474_v43  ;;  %v3297_v15 = vsub.f32 %v3289_v25, %v4979_v30  ;;  %4280 = vmatprep.subr.mxu1 %v5402_v17  ;;  %v3661_v24 = vld [vmem:[#allocation10 + $0x3e0] sm:$0xff]  ;;  %v3659_v25 = vld [vmem:[#allocation10 + $0x3d0] sm:$0xff] }
 0x270   :  { %4098 = vmatprep.subr.mxu0 %v5402_v17  ;;  %5111 = vmatmul.mubr.msk.f32.gmra.mxu1 %vm3151_vm8, %v7688_v61  ;;  %v4844_v8 = vsel %vm2388_vm0, 1.0, %v5402_v17  ;;  %vm3251_vm8 = vcmp.gt.f32.partialorder %v6729_v28, 1.0  ;;  %v3296_v14 = vsub.f32 %v3288_v35, %v4978_v21  ;;  %v3617_v59 = vld [vmem:[#allocation10 + $0x280] sm:$0xff]  ;;  %v3660_v28 = vld [vmem:[#allocation10 + $0x3d8] sm:$0xff] }
 0x271   :  { %4099 = vmatpush2.msra.mxu0 %v3625_v1  ;;  %5112 = vmatprep.mubr.msk.f32.mxu1 %vm3203_vm5, %v7688_v61  ;;  %vm2389_vm2 = vcmp.gt.f32.partialorder %v6738_v20, 1.0  ;;  %v2424_v47 = vadd.f32 %v6738_v20, %v6485_v49  ;;  %v6762_v45 = vsub.f32 %v2423_v40, %v4844_v8  ;;  %v4976_v63 = vsel %vm3251_vm8, 1.0, %v5402_v17  ;;  %v3657_v35 = vld [vmem:[#allocation10 + $0x3c0] sm:$0xff]  ;;  %v3656_v21 = vld [vmem:[#allocation10 + $0x3b8] sm:$0xff] }
 0x272   :  { %5061 = vmatmul.mubr.msk.f32.gmra.mxu0 %vm3149_vm13, %v7688_v61  ;;  %4100 = vmatprep.subr.mxu0 %v5402_v17  ;;  %v4845_v18 = vsel %vm2389_vm2, 1.0, %v5402_v17  ;;  %v3294_v38 = vsub.f32 %v3286_v42, %v4976_v63  ;;  %v3655_v42 = vld [vmem:[#allocation10 + $0x3b0] sm:$0xff]  ;;  %v3654_v63 = vld [vmem:[#allocation10 + $0x3a8] sm:$0xff] }
 0x273   :  { %5062 = vmatprep.mubr.msk.f32.mxu0 %vm3201_vm7, %v7688_v61  ;;  %4101 = vmatpush2.msra.mxu0 %v3624_v34  ;;  %v6782_v52 = vsub.f32 %v2424_v47, %v4845_v18  ;;  %vm2439_vm13 = vcmp.gt.f32.partialorder %v6762_v45, 1.0  ;;  %v2474_v26 = vadd.f32 %v6762_v45, %v6474_v43 }
 0x274   :  { %4102 = vmatprep.subr.mxu0 %v5402_v17  ;;  %5113 = vmatmul.mubr.msk.f32.gmra.mxu1 %vm3202_vm6, %v7688_v61  ;;  %v4852_v51 = vsel %vm2439_vm13, 1.0, %v5402_v17 }
 0x275   :  { %4103 = vmatpush2.msra.mxu0 %v3623_v36  ;;  %5114 = vmatprep.mubr.msk.f32.mxu1 %vm3254_vm15, %v7688_v61  ;;  %vm2440_vm5 = vcmp.gt.f32.partialorder %v6782_v52, 1.0  ;;  %v2475_v55 = vadd.f32 %v6782_v52, %v6485_v49  ;;  %v6805_v13 = vsub.f32 %v2474_v26, %v4852_v51  ;;  %vm3303_vm15 = vcmp.gt.f32.partialorder %v3295_v23, 1.0  ;;  %v3658_v36 = vld [vmem:[#allocation10 + $0x3c8] sm:$0xff] }
 0x276   :  { %5063 = vmatmul.mubr.msk.f32.gmra.mxu0 %vm3200_vm4, %v7688_v61  ;;  %4104 = vmatprep.subr.mxu0 %v5402_v17  ;;  %v4853_v56 = vsel %vm2440_vm5, 1.0, %v5402_v17  ;;  %vm3305_vm4 = vcmp.gt.f32.partialorder %v3297_v15, 1.0 }
 0x277   :  { %5064 = vmatprep.mubr.msk.f32.mxu0 %vm3252_vm9, %v7688_v61  ;;  %4105 = vmatpush2.msra.mxu0 %v3622_v62  ;;  %v6820_v37 = vsub.f32 %v2475_v55, %v4853_v56  ;;  %vm2490_vm7 = vcmp.gt.f32.partialorder %v6805_v13, 1.0  ;;  %v2525_v32 = vadd.f32 %v6805_v13, %v6474_v43  ;;  %vm3304_vm9 = vcmp.gt.f32.partialorder %v3296_v14, 1.0  ;;  %v3653_v14 = vld [vmem:[#allocation10 + $0x3a0] sm:$0xff] }
 0x278   :  { %4106 = vmatprep.subr.mxu0 %v5402_v17  ;;  %5115 = vmatmul.mubr.msk.f32.gmra.mxu1 %vm3253_vm3, %v7688_v61  ;;  %v4860_v50 = vsel %vm2490_vm7, 1.0, %v5402_v17 }
 0x279   :  { %4107 = vmatpush2.msra.mxu0 %v3621_v6  ;;  %5116 = vmatprep.mubr.msk.f32.mxu1 %vm3305_vm4, %v7688_v61  ;;  %vm2491_vm6 = vcmp.gt.f32.partialorder %v6820_v37, 1.0  ;;  %v2526_v39 = vadd.f32 %v6820_v37, %v6485_v49  ;;  %v6836_v4 = vsub.f32 %v2525_v32, %v4860_v50  ;;  %v905_v50 = vsub.s32 6, %v5488_v60 }
 0x27a   :  { %5065 = vmatmul.mubr.msk.f32.gmra.mxu0 %vm3251_vm8, %v7688_v61  ;;  %4108 = vmatprep.subr.mxu0 %v5402_v17  ;;  %v4861_v10 = vsel %vm2491_vm6, 1.0, %v5402_v17  ;;  %vm3302_vm8 = vcmp.gt.f32.partialorder %v3294_v38, 1.0  ;;  %v3652_v38 = vld [vmem:[#allocation10 + $0x398] sm:$0xff] }
 0x27b   :  { %5066 = vmatprep.mubr.msk.f32.mxu0 %vm3303_vm15, %v7688_v61  ;;  %4109 = vmatpush2.msra.mxu0 %v3620_v9  ;;  %v6846_v33 = vsub.f32 %v2526_v39, %v4861_v10  ;;  %vm2541_vm3 = vcmp.gt.f32.partialorder %v6836_v4, 1.0  ;;  %v2576_v58 = vadd.f32 %v6836_v4, %v6474_v43 }
 0x27c   :  { %4110 = vmatprep.subr.mxu0 %v5402_v17  ;;  %5117 = vmatmul.mubr.msk.f32.gmra.mxu1 %vm3304_vm9, %v7688_v61  ;;  %v4868_v0 = vsel %vm2541_vm3, 1.0, %v5402_v17  ;;  %vm7754_vm9 = vcmp.gt.f32.partialorder %v6474_v43, 1.0 }
 0x27d   :  { %4111 = vmatpush2.msra.mxu0 %v3619_v22  ;;  %vm2542_vm4 = vcmp.gt.f32.partialorder %v6846_v33, 1.0  ;;  %v2577_v29 = vadd.f32 %v6846_v33, %v6485_v49  ;;  %v6860_v11 = vsub.f32 %v2576_v58, %v4868_v0  ;;  %4281 = vmatpush2.msra.mxu1 %v3661_v24  ;;  %v909_v22 = vsub.s32 7, %v5488_v60  ;;  %v1841_v58 = vpop.f32.mrf.mxu1 }
 0x27e   :  { %5067 = vmatmul.mubr.msk.f32.gmra.mxu0 %vm3302_vm8, %v7688_v61  ;;  %4112 = vmatprep.subr.mxu0 %v5402_v17  ;;  %v4869_v1 = vsel %vm2542_vm4, 1.0, %v5402_v17  ;;  %vm7755_vm8 = vcmp.gt.f32.partialorder %v6529_v41, 1.0  ;;  %v906_v24 = vrot.slane %v6382_v57, %v905_v50 }
 0x27f   :  { %4113 = vmatpush2.msra.mxu0 %v3618_v19  ;;  %5118 = vmatprep.mubr.msk.f32.mxu0 %vm2083_vm1, %v7688_v61  ;;  %v6870_v27 = vsub.f32 %v2577_v29, %v4869_v1  ;;  %vm7669_vm15 = vcmp.gt.f32.partialorder %v6860_v11, 1.0  ;;  %v2627_v40 = vadd.f32 %v6860_v11, %v6474_v43  ;;  %v3650_v29 = vld [vmem:[#allocation10 + $0x388] sm:$0xff]  ;;  %v910_v1 = vrot.slane %v6382_v57, %v909_v22  ;;  %v1843_v12 = vpop.f32.mrf.mxu1 }
 0x280   :  { %4114 = vmatprep.subr.mxu0 %v5402_v17  ;;  %v4876_v34 = vsel %vm7669_vm15, 1.0, %v5402_v17  ;;  %4282 = vmatprep.subr.mxu1 %v5402_v17 }
 0x281   :  { %4115 = vmatpush2.msra.mxu0 %v3617_v59  ;;  %vm7671_vm1 = vcmp.gt.f32.partialorder %v6870_v27, 1.0  ;;  %v2628_v8 = vadd.f32 %v6870_v27, %v6485_v49  ;;  %v6883_v30 = vsub.f32 %v2627_v40, %v4876_v34  ;;  %4283 = vmatpush2.msra.mxu1 %v3660_v28  ;;  %v3649_v34 = vld [vmem:[#allocation10 + $0x380] sm:$0xff] }
 0x282   :  { %5119 = vmatmul.mubr.msk.f32.vlgmr.msra.gmra.mxu0 %vm7754_vm9, %v7688_v61  ;;  %v4877_v47 = vsel %vm7671_vm1, 1.0, %v5402_v17  ;;  %4284 = vmatprep.subr.mxu1 %v5402_v17 }
 0x283   :  { %5120 = vmatprep.mubr.msk.f32.mxu0 %vm7755_vm8, %v7688_v61  ;;  %v6895_v46 = vsub.f32 %v2628_v8, %v4877_v47  ;;  %vm7670_vm15 = vcmp.gt.f32.partialorder %v6883_v30, 1.0  ;;  %v2678_v53 = vadd.f32 %v6883_v30, %v6474_v43  ;;  %4285 = vmatpush2.msra.mxu1 %v3659_v25  ;;  %vm7756_vm8 = vcmp.gt.f32.partialorder %v6514_v2, 1.0 }
 0x284   :  { %v4884_v18 = vsel %vm7670_vm15, 1.0, %v5402_v17  ;;  %4286 = vmatprep.subr.mxu1 %v5402_v17  ;;  %vm7757_vm15 = vcmp.gt.f32.partialorder %v6573_v31, 1.0 }
 0x285   :  { %vm7673_vm9 = vcmp.gt.f32.partialorder %v6895_v46, 1.0  ;;  %v2679_v41 = vadd.f32 %v6895_v46, %v6485_v49  ;;  %v6907_v26 = vsub.f32 %v2678_v53, %v4884_v18  ;;  %4287 = vmatpush2.msra.mxu1 %v3658_v36  ;;  %v1842_v36 = vadd.f32 %v1841_v58, %v906_v24 }
 0x286   :  { %5121 = vmatmul.mubr.msk.f32.gmra.mxu0 %vm7756_vm8, %v7688_v61  ;;  %v4885_v62 = vsel %vm7673_vm9, 1.0, %v5402_v17  ;;  %4288 = vmatprep.subr.mxu1 %v5402_v17  ;;  %vm7758_vm8 = vcmp.gt.f32.partialorder %v6558_v5, 1.0  ;;  %v1844_v18 = vadd.f32 %v1843_v12, %v910_v1 }
 0x287   :  { %5122 = vmatprep.mubr.msk.f32.mxu0 %vm7757_vm15, %v7688_v61  ;;  %v6919_v15 = vsub.f32 %v2679_v41, %v4885_v62  ;;  %vm7672_vm1 = vcmp.gt.f32.partialorder %v6907_v26, 1.0  ;;  %v2729_v2 = vadd.f32 %v6907_v26, %v6474_v43  ;;  %4289 = vmatpush2.msra.mxu1 %v3657_v35 }
 0x288   :  { %v4892_v51 = vsel %vm7672_vm1, 1.0, %v5402_v17  ;;  %4290 = vmatprep.subr.mxu1 %v5402_v17  ;;  %vm7759_vm1 = vcmp.gt.f32.partialorder %v6613_v48, 1.0 }
 0x289   :  { %vm2695_vm15 = vcmp.gt.f32.partialorder %v6919_v15, 1.0  ;;  %v2730_v31 = vadd.f32 %v6919_v15, %v6485_v49  ;;  %v6931_v55 = vsub.f32 %v2729_v2, %v4892_v51  ;;  %4291 = vmatpush2.msra.mxu1 %v3656_v21 }
 0x28a   :  { %5123 = vmatmul.mubr.msk.f32.gmra.mxu0 %vm7758_vm8, %v7688_v61  ;;  %v4893_v6 = vsel %vm2695_vm15, 1.0, %v5402_v17  ;;  %4292 = vmatprep.subr.mxu1 %v5402_v17  ;;  %vm7760_vm8 = vcmp.gt.f32.partialorder %v6603_v44, 1.0 }
 0x28b   :  { %5124 = vmatprep.mubr.msk.f32.mxu0 %vm7759_vm1, %v7688_v61  ;;  %v6943_v23 = vsub.f32 %v2730_v31, %v4893_v6  ;;  %vm7674_vm9 = vcmp.gt.f32.partialorder %v6931_v55, 1.0  ;;  %v2780_v5 = vadd.f32 %v6931_v55, %v6474_v43  ;;  %4293 = vmatpush2.msra.mxu1 %v3655_v42 }
 0x28c   :  { %v4900_v56 = vsel %vm7674_vm9, 1.0, %v5402_v17  ;;  %4294 = vmatprep.subr.mxu1 %v5402_v17 }
 0x28d   :  { %vm2746_vm1 = vcmp.gt.f32.partialorder %v6943_v23, 1.0  ;;  %v2781_v48 = vadd.f32 %v6943_v23, %v6485_v49  ;;  %v6955_v32 = vsub.f32 %v2780_v5, %v4900_v56  ;;  %4295 = vmatpush2.msra.mxu1 %v3654_v63 }
 0x28e   :  { %5125 = vmatmul.mubr.msk.f32.gmra.mxu0 %vm7760_vm8, %v7688_v61  ;;  %v4901_v9 = vsel %vm2746_vm1, 1.0, %v5402_v17  ;;  %4296 = vmatprep.subr.mxu1 %v5402_v17 }
 0x28f   :  { %5126 = vmatprep.mubr.msk.f32.mxu0 %vm2287_vm14, %v7688_v61  ;;  %v6968_v39 = vsub.f32 %v2781_v48, %v4901_v9  ;;  %vm2796_vm9 = vcmp.gt.f32.partialorder %v6955_v32, 1.0  ;;  %v2831_v44 = vadd.f32 %v6955_v32, %v6474_v43  ;;  %4297 = vmatpush2.msra.mxu1 %v3653_v14 }
 0x290   :  { %v4908_v10 = vsel %vm2796_vm9, 1.0, %v5402_v17  ;;  %4298 = vmatprep.subr.mxu1 %v5402_v17 }
 0x291   :  { %vm2797_vm14 = vcmp.gt.f32.partialorder %v6968_v39, 1.0  ;;  %v2832_v19 = vadd.f32 %v6968_v39, %v6485_v49  ;;  %v6981_v0 = vsub.f32 %v2831_v44, %v4908_v10  ;;  %4299 = vmatpush2.msra.mxu1 %v3652_v38 }
 0x292   :  { %5127 = vmatmul.mubr.msk.f32.gmra.mxu0 %vm2286_vm11, %v7688_v61  ;;  %v4909_v60 = vsel %vm2797_vm14, 1.0, %v5402_v17  ;;  %4300 = vmatprep.subr.mxu1 %v5402_v17 }
 0x293   :  { %5128 = vmatprep.mubr.msk.f32.mxu0 %vm2338_vm12, %v7688_v61  ;;  %v6994_v59 = vsub.f32 %v2832_v19, %v4909_v60  ;;  %vm2847_vm8 = vcmp.gt.f32.partialorder %v6981_v0, 1.0  ;;  %v2882_v16 = vadd.f32 %v6981_v0, %v6474_v43  ;;  %4301 = vmatpush2.msra.mxu1 %v3651_v7 }
 0x294   :  { %v1912_v28 = vpop.f32.mrf.mxu0  ;;  %v4916_v40 = vsel %vm2847_vm8, 1.0, %v5402_v17  ;;  %4302 = vmatprep.subr.mxu1 %v5402_v17 }
 0x295   :  { %vm2848_vm11 = vcmp.gt.f32.partialorder %v6994_v59, 1.0  ;;  %v2883_v25 = vadd.f32 %v6994_v59, %v6485_v49  ;;  %v7007_v8 = vsub.f32 %v2882_v16, %v4916_v40  ;;  %4303 = vmatpush2.msra.mxu1 %v3650_v29  ;;  %v1913_v41 = vadd.f32 %v1912_v28, %v1842_v36 }
 0x296   :  { %5129 = vmatmul.mubr.msk.f32.gmra.mxu0 %vm2337_vm10, %v7688_v61  ;;  %v1914_v57 = vpop.f32.mrf.mxu0  ;;  %v4917_v47 = vsel %vm2848_vm11, 1.0, %v5402_v17  ;;  %4304 = vmatprep.subr.mxu1 %v5402_v17 }
 0x297   :  { %5130 = vmatprep.mubr.msk.f32.mxu0 %vm2389_vm2, %v7688_v61  ;;  %v7019_v53 = vsub.f32 %v2883_v25, %v4917_v47  ;;  %vm2898_vm12 = vcmp.gt.f32.partialorder %v7007_v8, 1.0  ;;  %v2933_v54 = vadd.f32 %v7007_v8, %v6474_v43  ;;  %4305 = vmatpush2.msra.mxu1 %v3649_v34  ;;  %v1915_v42 = vadd.f32 %v1914_v57, %v1844_v18 }
 0x298   :  { %v4924_v35 = vsel %vm2898_vm12, 1.0, %v5402_v17 }
 0x299   :  { %vm2899_vm10 = vcmp.gt.f32.partialorder %v7019_v53, 1.0  ;;  %v2934_v20 = vadd.f32 %v7019_v53, %v6485_v49  ;;  %v7030_v62 = vsub.f32 %v2933_v54, %v4924_v35  ;;  %v1983_v21 = vpop.f32.mrf.mxu1 }
 0x29a   :  { %5131 = vmatmul.mubr.msk.f32.gmra.mxu0 %vm2388_vm0, %v7688_v61  ;;  %v2054_v2 = vpop.f32.mrf.mxu0  ;;  %v4925_v51 = vsel %vm2899_vm10, 1.0, %v5402_v17  ;;  %v1984_v31 = vadd.f32 %v1983_v21, %v1913_v41 }
 0x29b   :  { %5132 = vmatprep.mubr.msk.f32.mxu0 %vm2440_vm5, %v7688_v61  ;;  %v7041_v6 = vsub.f32 %v2934_v20, %v4925_v51  ;;  %vm7675_vm2 = vcmp.gt.f32.partialorder %v7030_v62, 1.0  ;;  %v1985_v63 = vpop.f32.mrf.mxu1  ;;  %v2984_v5 = vadd.f32 %v7030_v62, %v6474_v43 }
 0x29c   :  { %v4932_v3 = vsel %vm7675_vm2, 1.0, %v5402_v17  ;;  %v7049_v56 = vadd.f32 %v2054_v2, %v1984_v31  ;;  %v1986_v14 = vadd.f32 %v1985_v63, %v1915_v42  ;;  %v2056_v48 = vpop.f32.mrf.mxu0 }
 0x29d   :  { %vm2950_vm0 = vcmp.gt.f32.partialorder %v7041_v6, 1.0  ;;  %v2985_v52 = vadd.f32 %v7041_v6, %v6485_v49  ;;  %v7071_v22 = vsub.f32 %v2984_v5, %v4932_v3 }
 0x29e   :  { %5133 = vmatmul.mubr.msk.f32.gmra.mxu0 %vm2439_vm13, %v7688_v61  ;;  %v4933_v9 = vsel %vm2950_vm0, 1.0, %v5402_v17  ;;  %v7063_v50 = vadd.f32 %v2056_v48, %v1986_v14  ;;  %vm2084_vm5 = vcmp.gt.f32.partialorder %v7049_v56, 1.0  ;;  %v2119_v38 = vadd.f32 %v7049_v56, %v7049_v56 }
 0x29f   :  { %5134 = vmatprep.mubr.msk.f32.mxu0 %vm2491_vm6, %v7688_v61  ;;  %v7068_v44 = vsub.f32 %v2985_v52, %v4933_v9  ;;  %v4798_v45 = vsel %vm2084_vm5, 1.0, %v5402_v17  ;;  %v3035_v1 = vadd.f32 %v7071_v22, %v6474_v43 }
 0x2a0   :  { %vm2085_vm13 = vcmp.gt.f32.partialorder %v7063_v50, 1.0  ;;  %v2120_v10 = vadd.f32 %v7063_v50, %v7063_v50  ;;  %v2127_v37 = vsub.f32 %v2119_v38, %v4798_v45 }
 0x2a1   :  { %v4799_v58 = vsel %vm2085_vm13, 1.0, %v5402_v17  ;;  %5168 = vmatprep.mubr.msk.f32.mxu1 %vm2085_vm13, %v7688_v61  ;;  %vm3001_vm6 = vcmp.gt.f32.partialorder %v7068_v44, 1.0  ;;  %v3036_v13 = vadd.f32 %v7068_v44, %v6485_v49 }
 0x2a2   :  { %5135 = vmatmul.mubr.msk.f32.gmra.mxu0 %vm2490_vm7, %v7688_v61  ;;  %5169 = vmatmul.mubr.msk.f32.vlgmr.msra.gmra.mxu1 %vm2084_vm5, %v7688_v61  ;;  %v2128_v7 = vsub.f32 %v2120_v10, %v4799_v58  ;;  %vm2135_vm2 = vcmp.gt.f32.partialorder %v2127_v37, 1.0  ;;  %v2170_v19 = vadd.f32 %v2127_v37, %v7049_v56  ;;  %vm7676_vm7 = vcmp.gt.f32.partialorder %v7071_v22, 1.0 }
 0x2a3   :  { %5136 = vmatprep.mubr.msk.f32.mxu0 %vm2542_vm4, %v7688_v61  ;;  %v4806_v60 = vsel %vm2135_vm2, 1.0, %v5402_v17  ;;  %v4941_v33 = vsel %vm3001_vm6, 1.0, %v5402_v17  ;;  %vm7761_vm4 = vcmp.gt.f32.partialorder %v6870_v27, 1.0  ;;  %v4940_v4 = vsel %vm7676_vm7, 1.0, %v5402_v17 }
 0x2a4   :  { %vm2136_vm13 = vcmp.gt.f32.partialorder %v2128_v7, 1.0  ;;  %v2171_v24 = vadd.f32 %v2128_v7, %v7063_v50  ;;  %v2178_v29 = vsub.f32 %v2170_v19, %v4806_v60  ;;  %v7111_v34 = vsub.f32 %v3036_v13, %v4941_v33 }
 0x2a5   :  { %v4807_v16 = vsel %vm2136_vm13, 1.0, %v5402_v17  ;;  %5170 = vmatprep.mubr.msk.f32.mxu1 %vm2136_vm13, %v7688_v61  ;;  %vm7762_vm13 = vcmp.gt.f32.partialorder %v6860_v11, 1.0  ;;  %v7119_v47 = vsub.f32 %v3035_v1, %v4940_v4 }
 0x2a6   :  { %5137 = vmatmul.mubr.msk.f32.gmra.mxu0 %vm2541_vm3, %v7688_v61  ;;  %5171 = vmatmul.mubr.msk.f32.gmra.mxu1 %vm2135_vm2, %v7688_v61  ;;  %v2179_v28 = vsub.f32 %v2171_v24, %v4807_v16  ;;  %vm2186_vm5 = vcmp.gt.f32.partialorder %v2178_v29, 1.0  ;;  %v2221_v40 = vadd.f32 %v2178_v29, %v7049_v56  ;;  %vm7763_vm2 = vcmp.gt.f32.partialorder %v6895_v46, 1.0 }
 0x2a7   :  { %5138 = vmatprep.mubr.msk.f32.mxu0 %vm7761_vm4, %v7688_v61  ;;  %v4814_v12 = vsel %vm2186_vm5, 1.0, %v5402_v17  ;;  %v3087_v41 = vadd.f32 %v7111_v34, %v6485_v49  ;;  %v3086_v51 = vadd.f32 %v7119_v47, %v6474_v43 }
 0x2a8   :  { %vm2187_vm3 = vcmp.gt.f32.partialorder %v2179_v28, 1.0  ;;  %v2222_v25 = vadd.f32 %v2179_v28, %v7063_v50  ;;  %v2229_v57 = vsub.f32 %v2221_v40, %v4814_v12 }
 0x2a9   :  { %v4815_v27 = vsel %vm2187_vm3, 1.0, %v5402_v17  ;;  %5172 = vmatprep.mubr.msk.f32.mxu1 %vm2187_vm3, %v7688_v61  ;;  %vm7764_vm3 = vcmp.gt.f32.partialorder %v6883_v30, 1.0 }
 0x2aa   :  { %5139 = vmatmul.mubr.msk.f32.gmra.mxu0 %vm7762_vm13, %v7688_v61  ;;  %5173 = vmatmul.mubr.msk.f32.gmra.mxu1 %vm2186_vm5, %v7688_v61  ;;  %v2230_v36 = vsub.f32 %v2222_v25, %v4815_v27  ;;  %vm2237_vm4 = vcmp.gt.f32.partialorder %v2229_v57, 1.0  ;;  %v2272_v54 = vadd.f32 %v2229_v57, %v7049_v56  ;;  %vm3052_vm13 = vcmp.gt.f32.partialorder %v7111_v34, 1.0 }
 0x2ab   :  { %5140 = vmatprep.mubr.msk.f32.mxu0 %vm7763_vm2, %v7688_v61  ;;  %v4822_v18 = vsel %vm2237_vm4, 1.0, %v5402_v17  ;;  %vm3051_vm5 = vcmp.gt.f32.partialorder %v7119_v47, 1.0  ;;  %v4949_v21 = vsel %vm3052_vm13, 1.0, %v5402_v17 }
 0x2ac   :  { %vm2238_vm7 = vcmp.gt.f32.partialorder %v2230_v36, 1.0  ;;  %v2273_v11 = vadd.f32 %v2230_v36, %v7063_v50  ;;  %v2280_v35 = vsub.f32 %v2272_v54, %v4822_v18  ;;  %v4948_v31 = vsel %vm3051_vm5, 1.0, %v5402_v17 }
 0x2ad   :  { %v4823_v46 = vsel %vm2238_vm7, 1.0, %v5402_v17  ;;  %5174 = vmatprep.mubr.msk.f32.mxu1 %vm2238_vm7, %v7688_v61  ;;  %v7157_v3 = vsub.f32 %v3087_v41, %v4949_v21 }
 0x2ae   :  { %5141 = vmatmul.mubr.msk.f32.gmra.mxu0 %vm7764_vm3, %v7688_v61  ;;  %5175 = vmatmul.mubr.msk.f32.gmra.mxu1 %vm2237_vm4, %v7688_v61  ;;  %v2281_v20 = vsub.f32 %v2273_v11, %v4823_v46  ;;  %vm2288_vm2 = vcmp.gt.f32.partialorder %v2280_v35, 1.0  ;;  %v2323_v30 = vadd.f32 %v2280_v35, %v7049_v56 }
 0x2af   :  { %5142 = vmatprep.mubr.msk.f32.mxu0 %vm2695_vm15, %v7688_v61  ;;  %v4830_v2 = vsel %vm2288_vm2, 1.0, %v5402_v17  ;;  %vm7765_vm15 = vcmp.gt.f32.partialorder %v6907_v26, 1.0  ;;  %v7165_v26 = vsub.f32 %v3086_v51, %v4948_v31 }
 0x2b0   :  { %vm2289_vm7 = vcmp.gt.f32.partialorder %v2281_v20, 1.0  ;;  %v2324_v42 = vadd.f32 %v2281_v20, %v7063_v50  ;;  %v2331_v15 = vsub.f32 %v2323_v30, %v4830_v2 }
 0x2b1   :  { %v4831_v63 = vsel %vm2289_vm7, 1.0, %v5402_v17  ;;  %5176 = vmatprep.mubr.msk.f32.mxu1 %vm2289_vm7, %v7688_v61  ;;  %vm7766_vm7 = vcmp.gt.f32.partialorder %v6931_v55, 1.0  ;;  %v3138_v55 = vadd.f32 %v7157_v3, %v6485_v49  ;;  %v3137_v19 = vadd.f32 %v7165_v26, %v6474_v43 }
 0x2b2   :  { %5143 = vmatmul.mubr.msk.f32.gmra.mxu0 %vm7765_vm15, %v7688_v61  ;;  %5177 = vmatmul.mubr.msk.f32.gmra.mxu1 %vm2288_vm2, %v7688_v61  ;;  %v2332_v5 = vsub.f32 %v2324_v42, %v4831_v63  ;;  %vm2339_vm4 = vcmp.gt.f32.partialorder %v2331_v15, 1.0  ;;  %v2374_v14 = vadd.f32 %v2331_v15, %v7049_v56  ;;  %vm3102_vm15 = vcmp.gt.f32.partialorder %v7165_v26, 1.0 }
 0x2b3   :  { %5144 = vmatprep.mubr.msk.f32.mxu0 %vm2746_vm1, %v7688_v61  ;;  %v4838_v52 = vsel %vm2339_vm4, 1.0, %v5402_v17  ;;  %vm3103_vm1 = vcmp.gt.f32.partialorder %v7157_v3, 1.0  ;;  %v4956_v32 = vsel %vm3102_vm15, 1.0, %v5402_v17 }
 0x2b4   :  { %vm2340_vm3 = vcmp.gt.f32.partialorder %v2332_v5, 1.0  ;;  %v2375_v48 = vadd.f32 %v2332_v5, %v7063_v50  ;;  %v2382_v9 = vsub.f32 %v2374_v14, %v4838_v52  ;;  %v4957_v39 = vsel %vm3103_vm1, 1.0, %v5402_v17 }
 0x2b5   :  { %v4839_v23 = vsel %vm2340_vm3, 1.0, %v5402_v17  ;;  %5178 = vmatprep.mubr.msk.f32.mxu1 %vm2340_vm3, %v7688_v61  ;;  %v7203_v29 = vsub.f32 %v3138_v55, %v4957_v39  ;;  %v7211_v1 = vsub.f32 %v3137_v19, %v4956_v32 }
 0x2b6   :  { %5145 = vmatmul.mubr.msk.f32.gmra.mxu0 %vm7766_vm7, %v7688_v61  ;;  %5179 = vmatmul.mubr.msk.f32.gmra.mxu1 %vm2339_vm4, %v7688_v61  ;;  %v2383_v38 = vsub.f32 %v2375_v48, %v4839_v23  ;;  %vm2390_vm2 = vcmp.gt.f32.partialorder %v2382_v9, 1.0  ;;  %v2425_v45 = vadd.f32 %v2382_v9, %v7049_v56 }
 0x2b7   :  { %5146 = vmatprep.mubr.msk.f32.mxu0 %vm2797_vm14, %v7688_v61  ;;  %v4846_v10 = vsel %vm2390_vm2, 1.0, %v5402_v17  ;;  %v3189_v25 = vadd.f32 %v7203_v29, %v6485_v49  ;;  %v3188_v54 = vadd.f32 %v7211_v1, %v6474_v43 }
 0x2b8   :  { %vm2391_vm3 = vcmp.gt.f32.partialorder %v2383_v38, 1.0  ;;  %v2426_v37 = vadd.f32 %v2383_v38, %v7063_v50  ;;  %v2433_v58 = vsub.f32 %v2425_v45, %v4846_v10 }
 0x2b9   :  { %v4847_v7 = vsel %vm2391_vm3, 1.0, %v5402_v17  ;;  %5180 = vmatprep.mubr.msk.f32.mxu1 %vm2391_vm3, %v7688_v61 }
 0x2ba   :  { %5147 = vmatmul.mubr.msk.f32.gmra.mxu0 %vm2796_vm9, %v7688_v61  ;;  %5181 = vmatmul.mubr.msk.f32.gmra.mxu1 %vm2390_vm2, %v7688_v61  ;;  %v2434_v60 = vsub.f32 %v2426_v37, %v4847_v7  ;;  %vm2441_vm14 = vcmp.gt.f32.partialorder %v2433_v58, 1.0  ;;  %v2476_v13 = vadd.f32 %v2433_v58, %v7049_v56 }
 0x2bb   :  { %5148 = vmatprep.mubr.msk.f32.mxu0 %vm2848_vm11, %v7688_v61  ;;  %v4854_v24 = vsel %vm2441_vm14, 1.0, %v5402_v17 }
 0x2bc   :  { %vm2442_vm9 = vcmp.gt.f32.partialorder %v2434_v60, 1.0  ;;  %v2477_v33 = vadd.f32 %v2434_v60, %v7063_v50  ;;  %v2484_v16 = vsub.f32 %v2476_v13, %v4854_v24 }
 0x2bd   :  { %v4855_v59 = vsel %vm2442_vm9, 1.0, %v5402_v17  ;;  %5182 = vmatprep.mubr.msk.f32.mxu1 %vm2442_vm9, %v7688_v61 }
 0x2be   :  { %5149 = vmatmul.mubr.msk.f32.gmra.mxu0 %vm2847_vm8, %v7688_v61  ;;  %5183 = vmatmul.mubr.msk.f32.gmra.mxu1 %vm2441_vm14, %v7688_v61  ;;  %v2485_v28 = vsub.f32 %v2477_v33, %v4855_v59  ;;  %vm2492_vm11 = vcmp.gt.f32.partialorder %v2484_v16, 1.0  ;;  %v2527_v40 = vadd.f32 %v2484_v16, %v7049_v56  ;;  %vm3154_vm8 = vcmp.gt.f32.partialorder %v7203_v29, 1.0  ;;  %v7323_v59 = vld [vmem:[#allocation12] ss:$0 sm:$0xff] }
 0x2bf   :  { %5150 = vmatprep.mubr.msk.f32.mxu0 %vm2899_vm10, %v7688_v61  ;;  %v4862_v4 = vsel %vm2492_vm11, 1.0, %v5402_v17  ;;  %vm3153_vm10 = vcmp.gt.f32.partialorder %v7211_v1, 1.0  ;;  %v4965_v27 = vsel %vm3154_vm8, 1.0, %v5402_v17  ;;  %vm7768_vm14 = vcmp.gt.f32.partialorder %v7071_v22, 1.0 }
 0x2c0   :  { %vm2493_vm4 = vcmp.gt.f32.partialorder %v2485_v28, 1.0  ;;  %v2528_v0 = vadd.f32 %v2485_v28, %v7063_v50  ;;  %v2535_v12 = vsub.f32 %v2527_v40, %v4862_v4  ;;  %v4964_v11 = vsel %vm3153_vm10, 1.0, %v5402_v17 }
 0x2c1   :  { %v4863_v53 = vsel %vm2493_vm4, 1.0, %v5402_v17  ;;  %5184 = vmatprep.mubr.msk.f32.mxu1 %vm2493_vm4, %v7688_v61  ;;  %v3197_v46 = vsub.f32 %v3189_v25, %v4965_v27  ;;  %v7255_v21 = vsub.f32 %v3188_v54, %v4964_v11 }
 0x2c2   :  { %5151 = vmatmul.mubr.msk.f32.gmra.mxu0 %vm2898_vm12, %v7688_v61  ;;  %5185 = vmatmul.mubr.msk.f32.gmra.mxu1 %vm2492_vm11, %v7688_v61  ;;  %v2536_v57 = vsub.f32 %v2528_v0, %v4863_v53  ;;  %vm2543_vm7 = vcmp.gt.f32.partialorder %v2535_v12, 1.0  ;;  %v2578_v8 = vadd.f32 %v2535_v12, %v7049_v56 }
 0x2c3   :  { %5152 = vmatprep.mubr.msk.f32.mxu0 %vm2950_vm0, %v7688_v61  ;;  %v4870_v36 = vsel %vm2543_vm7, 1.0, %v5402_v17  ;;  %vm7767_vm0 = vcmp.gt.f32.partialorder %v7030_v62, 1.0  ;;  %vm3204_vm11 = vcmp.gt.f32.partialorder %v7255_v21, 1.0  ;;  %v3240_v22 = vadd.f32 %v3197_v46, %v6485_v49 }
 0x2c4   :  { %vm2544_vm12 = vcmp.gt.f32.partialorder %v2536_v57, 1.0  ;;  %v2579_v18 = vadd.f32 %v2536_v57, %v7063_v50  ;;  %v2586_v6 = vsub.f32 %v2578_v8, %v4870_v36  ;;  %v3239_v14 = vadd.f32 %v7255_v21, %v6474_v43 }
 0x2c5   :  { %v4871_v35 = vsel %vm2544_vm12, 1.0, %v5402_v17  ;;  %5186 = vmatprep.mubr.msk.f32.mxu1 %vm2544_vm12, %v7688_v61  ;;  %v4972_v47 = vsel %vm3204_vm11, 1.0, %v5402_v17 }
 0x2c6   :  { %5153 = vmatmul.mubr.msk.f32.gmra.mxu0 %vm7767_vm0, %v7688_v61  ;;  %5187 = vmatmul.mubr.msk.f32.gmra.mxu1 %vm2543_vm7, %v7688_v61  ;;  %v2587_v41 = vsub.f32 %v2579_v18, %v4871_v35  ;;  %vm2594_vm2 = vcmp.gt.f32.partialorder %v2586_v6, 1.0  ;;  %v2629_v20 = vadd.f32 %v2586_v6, %v7049_v56  ;;  %v3247_v10 = vsub.f32 %v3239_v14, %v4972_v47 }
 0x2c7   :  { %5154 = vmatprep.mubr.msk.f32.mxu0 %vm3001_vm6, %v7688_v61  ;;  %v4878_v30 = vsel %vm2594_vm2, 1.0, %v5402_v17  ;;  %vm3205_vm6 = vcmp.gt.f32.partialorder %v3197_v46, 1.0 }
 0x2c8   :  { %vm2595_vm3 = vcmp.gt.f32.partialorder %v2587_v41, 1.0  ;;  %v2630_v62 = vadd.f32 %v2587_v41, %v7063_v50  ;;  %v2637_v2 = vsub.f32 %v2629_v20, %v4878_v30  ;;  %v4973_v63 = vsel %vm3205_vm6, 1.0, %v5402_v17 }
 0x2c9   :  { %v4879_v44 = vsel %vm2595_vm3, 1.0, %v5402_v17  ;;  %5188 = vmatprep.mubr.msk.f32.mxu1 %vm2595_vm3, %v7688_v61  ;;  %v3248_v23 = vsub.f32 %v3240_v22, %v4973_v63  ;;  %v3290_v24 = vadd.f32 %v3247_v10, %v6474_v43 }
 0x2ca   :  { %5155 = vmatmul.mubr.msk.f32.gmra.mxu0 %vm7768_vm14, %v7688_v61  ;;  %5189 = vmatmul.mubr.msk.f32.gmra.mxu1 %vm2594_vm2, %v7688_v61  ;;  %v2638_v51 = vsub.f32 %v2630_v62, %v4879_v44  ;;  %vm2645_vm9 = vcmp.gt.f32.partialorder %v2637_v2, 1.0  ;;  %v2680_v42 = vadd.f32 %v2637_v2, %v7049_v56 }
 0x2cb   :  { %5156 = vmatprep.mubr.msk.f32.mxu0 %vm3052_vm13, %v7688_v61  ;;  %v4886_v15 = vsel %vm2645_vm9, 1.0, %v5402_v17  ;;  %vm3256_vm7 = vcmp.gt.f32.partialorder %v3248_v23, 1.0  ;;  %v3291_v19 = vadd.f32 %v3248_v23, %v6485_v49 }
 0x2cc   :  { %vm2646_vm4 = vcmp.gt.f32.partialorder %v2638_v51, 1.0  ;;  %v2681_v31 = vadd.f32 %v2638_v51, %v7063_v50  ;;  %v2688_v34 = vsub.f32 %v2680_v42, %v4886_v15  ;;  %v4981_v60 = vsel %vm3256_vm7, 1.0, %v5402_v17 }
 0x2cd   :  { %v4887_v5 = vsel %vm2646_vm4, 1.0, %v5402_v17  ;;  %5190 = vmatprep.mubr.msk.f32.mxu1 %vm2646_vm4, %v7688_v61  ;;  %v3299_v43 = vsub.f32 %v3291_v19, %v4981_v60 }
 0x2ce   :  { %5157 = vmatmul.mubr.msk.f32.gmra.mxu0 %vm3051_vm5, %v7688_v61  ;;  %5191 = vmatmul.mubr.msk.f32.gmra.mxu1 %vm2645_vm9, %v7688_v61  ;;  %v2689_v52 = vsub.f32 %v2681_v31, %v4887_v5  ;;  %vm2696_vm13 = vcmp.gt.f32.partialorder %v2688_v34, 1.0  ;;  %v2731_v48 = vadd.f32 %v2688_v34, %v7049_v56 }
 0x2cf   :  { %5158 = vmatprep.mubr.msk.f32.mxu0 %vm3103_vm1, %v7688_v61  ;;  %v4894_v9 = vsel %vm2696_vm13, 1.0, %v5402_v17  ;;  %vm3307_vm3 = vcmp.gt.f32.partialorder %v3299_v43, 1.0 }
 0x2d0   :  { %vm2697_vm5 = vcmp.gt.f32.partialorder %v2689_v52, 1.0  ;;  %v2732_v38 = vadd.f32 %v2689_v52, %v7063_v50  ;;  %v2739_v45 = vsub.f32 %v2731_v48, %v4894_v9 }
 0x2d1   :  { %v4895_v3 = vsel %vm2697_vm5, 1.0, %v5402_v17  ;;  %5192 = vmatprep.mubr.msk.f32.mxu1 %vm2697_vm5, %v7688_v61 }
 0x2d2   :  { %5159 = vmatmul.mubr.msk.f32.gmra.mxu0 %vm3102_vm15, %v7688_v61  ;;  %5193 = vmatmul.mubr.msk.f32.gmra.mxu1 %vm2696_vm13, %v7688_v61  ;;  %v2740_v55 = vsub.f32 %v2732_v38, %v4895_v3  ;;  %vm2747_vm1 = vcmp.gt.f32.partialorder %v2739_v45, 1.0  ;;  %v2782_v37 = vadd.f32 %v2739_v45, %v7049_v56  ;;  %vm3255_vm15 = vcmp.gt.f32.partialorder %v3247_v10, 1.0 }
 0x2d3   :  { %5160 = vmatprep.mubr.msk.f32.mxu0 %vm3154_vm8, %v7688_v61  ;;  %v4902_v58 = vsel %vm2747_vm1, 1.0, %v5402_v17  ;;  %v4980_v33 = vsel %vm3255_vm15, 1.0, %v5402_v17 }
 0x2d4   :  { %vm2748_vm12 = vcmp.gt.f32.partialorder %v2740_v55, 1.0  ;;  %v2783_v26 = vadd.f32 %v2740_v55, %v7063_v50  ;;  %v2790_v39 = vsub.f32 %v2782_v37, %v4902_v58  ;;  %v3298_v12 = vsub.f32 %v3290_v24, %v4980_v33 }
 0x2d5   :  { %v4903_v7 = vsel %vm2748_vm12, 1.0, %v5402_v17  ;;  %5194 = vmatprep.mubr.msk.f32.mxu1 %vm2748_vm12, %v7688_v61 }
 0x2d6   :  { %5161 = vmatmul.mubr.msk.f32.gmra.mxu0 %vm3153_vm10, %v7688_v61  ;;  %5195 = vmatmul.mubr.msk.f32.gmra.mxu1 %vm2747_vm1, %v7688_v61  ;;  %v2791_v13 = vsub.f32 %v2783_v26, %v4903_v7  ;;  %vm2798_vm8 = vcmp.gt.f32.partialorder %v2790_v39, 1.0  ;;  %v2833_v32 = vadd.f32 %v2790_v39, %v7049_v56 }
 0x2d7   :  { %5162 = vmatprep.mubr.msk.f32.mxu0 %vm3205_vm6, %v7688_v61  ;;  %v4910_v29 = vsel %vm2798_vm8, 1.0, %v5402_v17  ;;  %vm3306_vm6 = vcmp.gt.f32.partialorder %v3298_v12, 1.0 }
 0x2d8   :  { %vm2799_vm10 = vcmp.gt.f32.partialorder %v2791_v13, 1.0  ;;  %v2834_v49 = vadd.f32 %v2791_v13, %v7063_v50  ;;  %v2841_v16 = vsub.f32 %v2833_v32, %v4910_v29 }
 0x2d9   :  { %v4911_v1 = vsel %vm2799_vm10, 1.0, %v5402_v17  ;;  %5196 = vmatprep.mubr.msk.f32.mxu1 %vm2799_vm10, %v7688_v61 }
 0x2da   :  { %5163 = vmatmul.mubr.msk.f32.gmra.mxu0 %vm3204_vm11, %v7688_v61  ;;  %5197 = vmatmul.mubr.msk.f32.gmra.mxu1 %vm2798_vm8, %v7688_v61  ;;  %v2842_v28 = vsub.f32 %v2834_v49, %v4911_v1  ;;  %vm2849_vm0 = vcmp.gt.f32.partialorder %v2841_v16, 1.0  ;;  %v2884_v40 = vadd.f32 %v2841_v16, %v7049_v56 }
 0x2db   :  { %5164 = vmatprep.mubr.msk.f32.mxu0 %vm3256_vm7, %v7688_v61  ;;  %v3738_v4 = vpop.f32.mrf.mxu0  ;;  %v4918_v53 = vsel %vm2849_vm0, 1.0, %v5402_v17 }
 0x2dc   :  { %v3928_v0 = vpop.f32.mrf.mxu1  ;;  %v3739_v25 = vadd.f32 %v7323_v59, %v3738_v4  ;;  %vm2850_vm2 = vcmp.gt.f32.partialorder %v2842_v28, 1.0  ;;  %v2885_v57 = vadd.f32 %v2842_v28, %v7063_v50  ;;  %v2892_v8 = vsub.f32 %v2884_v40, %v4918_v53 }
 0x2dd   :  { %v3740_v27 = vpop.f32.mrf.mxu0  ;;  %v4919_v54 = vsel %vm2850_vm2, 1.0, %v5402_v17  ;;  %5198 = vmatprep.mubr.msk.f32.mxu1 %vm2850_vm2, %v7688_v61 }
 0x2de   :  { %5165 = vmatmul.mubr.msk.f32.gmra.mxu0 %vm3255_vm15, %v7688_v61  ;;  %v3930_v36 = vpop.f32.mrf.mxu1  ;;  %v7339_v18 = vadd.f32 %v3928_v0, %v3739_v25  ;;  %5199 = vmatmul.mubr.msk.f32.gmra.mxu1 %vm2849_vm0, %v7688_v61  ;;  %v2893_v6 = vsub.f32 %v2885_v57, %v4919_v54  ;;  %vm2900_vm14 = vcmp.gt.f32.partialorder %v2892_v8, 1.0  ;;  %v2935_v11 = vadd.f32 %v2892_v8, %v7049_v56 }
 0x2df   :  { %5166 = vmatprep.mubr.msk.f32.mxu0 %vm3307_vm3, %v7688_v61  ;;  %v3743_v35 = vpop.f32.mrf.mxu0  ;;  %v4926_v41 = vsel %vm2900_vm14, 1.0, %v5402_v17 }
 0x2e0   :  { %v3933_v46 = vpop.f32.mrf.mxu1  ;;  %v3744_v20 = vadd.f32 %v7323_v59, %v3743_v35  ;;  %vm2901_vm9 = vcmp.gt.f32.partialorder %v2893_v6, 1.0  ;;  %v2936_v30 = vadd.f32 %v2893_v6, %v7063_v50  ;;  %v2943_v21 = vsub.f32 %v2935_v11, %v4926_v41 }
 0x2e1   :  { %v3745_v62 = vpop.f32.mrf.mxu0  ;;  %v4927_v44 = vsel %vm2901_vm9, 1.0, %v5402_v17  ;;  %5200 = vmatprep.mubr.msk.f32.mxu1 %vm2901_vm9, %v7688_v61 }
 0x2e2   :  { %5167 = vmatmul.mubr.msk.f32.gmra.mxu0 %vm3306_vm6, %v7688_v61  ;;  %v3935_v2 = vpop.f32.mrf.mxu1  ;;  %v7352_v51 = vadd.f32 %v3933_v46, %v3744_v20  ;;  %5201 = vmatmul.mubr.msk.f32.gmra.mxu1 %vm2900_vm14, %v7688_v61  ;;  %v2944_v42 = vsub.f32 %v2936_v30, %v4927_v44  ;;  %vm2951_vm11 = vcmp.gt.f32.partialorder %v2943_v21, 1.0  ;;  %v2986_v15 = vadd.f32 %v2943_v21, %v7049_v56 }
 0x2e3   :  { %v3748_v22 = vpop.f32.mrf.mxu0  ;;  %v4934_v63 = vsel %vm2951_vm11, 1.0, %v5402_v17 }
 0x2e4   :  { %v3938_v31 = vpop.f32.mrf.mxu1  ;;  %v3749_v34 = vadd.f32 %v7323_v59, %v3748_v22  ;;  %vm2952_vm4 = vcmp.gt.f32.partialorder %v2944_v42, 1.0  ;;  %v2987_v5 = vadd.f32 %v2944_v42, %v7063_v50  ;;  %v2994_v14 = vsub.f32 %v2986_v15, %v4934_v63 }
 0x2e5   :  { %v3750_v52 = vpop.f32.mrf.mxu0  ;;  %v4935_v48 = vsel %vm2952_vm4, 1.0, %v5402_v17  ;;  %5202 = vmatprep.mubr.msk.f32.mxu1 %vm2952_vm4, %v7688_v61 }
 0x2e6   :  { %v3940_v47 = vpop.f32.mrf.mxu1  ;;  %v7362_v9 = vadd.f32 %v3938_v31, %v3749_v34  ;;  %5203 = vmatmul.mubr.msk.f32.gmra.mxu1 %vm2951_vm11, %v7688_v61  ;;  %v2995_v23 = vsub.f32 %v2987_v5, %v4935_v48  ;;  %vm3002_vm13 = vcmp.gt.f32.partialorder %v2994_v14, 1.0  ;;  %v3037_v38 = vadd.f32 %v2994_v14, %v7049_v56 }
 0x2e7   :  { %v3753_v45 = vpop.f32.mrf.mxu0  ;;  %v4942_v10 = vsel %vm3002_vm13, 1.0, %v5402_v17 }
 0x2e8   :  { %v3943_v3 = vpop.f32.mrf.mxu1  ;;  %v3754_v55 = vadd.f32 %v7323_v59, %v3753_v45  ;;  %vm3003_vm5 = vcmp.gt.f32.partialorder %v2995_v23, 1.0  ;;  %v3038_v37 = vadd.f32 %v2995_v23, %v7063_v50  ;;  %v3045_v58 = vsub.f32 %v3037_v38, %v4942_v10 }
 0x2e9   :  { %v3755_v26 = vpop.f32.mrf.mxu0  ;;  %v4943_v7 = vsel %vm3003_vm5, 1.0, %v5402_v17  ;;  %5204 = vmatprep.mubr.msk.f32.mxu1 %vm3003_vm5, %v7688_v61 }
 0x2ea   :  { %v3945_v39 = vpop.f32.mrf.mxu1  ;;  %v7371_v19 = vadd.f32 %v3943_v3, %v3754_v55  ;;  %5205 = vmatmul.mubr.msk.f32.gmra.mxu1 %vm3002_vm13, %v7688_v61  ;;  %v3046_v60 = vsub.f32 %v3038_v37, %v4943_v7  ;;  %vm3053_vm1 = vcmp.gt.f32.partialorder %v3045_v58, 1.0  ;;  %v3088_v13 = vadd.f32 %v3045_v58, %v7049_v56 }
 0x2eb   :  { %v3758_v32 = vpop.f32.mrf.mxu0  ;;  %v4950_v29 = vsel %vm3053_vm1, 1.0, %v5402_v17 }
 0x2ec   :  { %v3948_v24 = vpop.f32.mrf.mxu1  ;;  %v3759_v33 = vadd.f32 %v7323_v59, %v3758_v32  ;;  %vm3054_vm7 = vcmp.gt.f32.partialorder %v3046_v60, 1.0  ;;  %v3089_v49 = vadd.f32 %v3046_v60, %v7063_v50  ;;  %v3096_v16 = vsub.f32 %v3088_v13, %v4950_v29 }
 0x2ed   :  { %v3760_v1 = vpop.f32.mrf.mxu0  ;;  %v4951_v28 = vsel %vm3054_vm7, 1.0, %v5402_v17  ;;  %5206 = vmatprep.mubr.msk.f32.mxu1 %vm3054_vm7, %v7688_v61 }
 0x2ee   :  { %v3950_v43 = vpop.f32.mrf.mxu1  ;;  %v7380_v40 = vadd.f32 %v3948_v24, %v3759_v33  ;;  %5207 = vmatmul.mubr.msk.f32.gmra.mxu1 %vm3053_vm1, %v7688_v61  ;;  %v3097_v4 = vsub.f32 %v3089_v49, %v4951_v28  ;;  %vm3104_vm12 = vcmp.gt.f32.partialorder %v3096_v16, 1.0  ;;  %v3139_v0 = vadd.f32 %v3096_v16, %v7049_v56 }
 0x2ef   :  { %v3763_v12 = vpop.f32.mrf.mxu0  ;;  %v4958_v25 = vsel %vm3104_vm12, 1.0, %v5402_v17 }
 0x2f0   :  { %v3953_v53 = vpop.f32.mrf.mxu1  ;;  %v3764_v57 = vadd.f32 %v7323_v59, %v3763_v12  ;;  %vm3105_vm15 = vcmp.gt.f32.partialorder %v3097_v4, 1.0  ;;  %v3140_v8 = vadd.f32 %v3097_v4, %v7063_v50  ;;  %v3147_v27 = vsub.f32 %v3139_v0, %v4958_v25 }
 0x2f1   :  { %v3765_v36 = vpop.f32.mrf.mxu0  ;;  %v4959_v6 = vsel %vm3105_vm15, 1.0, %v5402_v17  ;;  %5208 = vmatprep.mubr.msk.f32.mxu1 %vm3105_vm15, %v7688_v61 }
 0x2f2   :  { %v3955_v54 = vpop.f32.mrf.mxu1  ;;  %v7389_v11 = vadd.f32 %v3953_v53, %v3764_v57  ;;  %5209 = vmatmul.mubr.msk.f32.gmra.mxu1 %vm3104_vm12, %v7688_v61  ;;  %v3148_v35 = vsub.f32 %v3140_v8, %v4959_v6  ;;  %vm3155_vm8 = vcmp.gt.f32.partialorder %v3147_v27, 1.0  ;;  %v3190_v46 = vadd.f32 %v3147_v27, %v7049_v56 }
 0x2f3   :  { %v3768_v41 = vpop.f32.mrf.mxu0  ;;  %v4966_v30 = vsel %vm3155_vm8, 1.0, %v5402_v17 }
 0x2f4   :  { %v3958_v20 = vpop.f32.mrf.mxu1  ;;  %v3769_v21 = vadd.f32 %v7323_v59, %v3768_v41  ;;  %vm3156_vm10 = vcmp.gt.f32.partialorder %v3148_v35, 1.0  ;;  %v3191_v62 = vadd.f32 %v3148_v35, %v7063_v50  ;;  %v3198_v2 = vsub.f32 %v3190_v46, %v4966_v30 }
 0x2f5   :  { %v3770_v44 = vpop.f32.mrf.mxu0  ;;  %v4967_v15 = vsel %vm3156_vm10, 1.0, %v5402_v17  ;;  %5210 = vmatprep.mubr.msk.f32.mxu1 %vm3156_vm10, %v7688_v61 }
 0x2f6   :  { %v3960_v42 = vpop.f32.mrf.mxu1  ;;  %v7398_v22 = vadd.f32 %v3958_v20, %v3769_v21  ;;  %5211 = vmatmul.mubr.msk.f32.gmra.mxu1 %vm3155_vm8, %v7688_v61  ;;  %v3199_v31 = vsub.f32 %v3191_v62, %v4967_v15  ;;  %vm3206_vm0 = vcmp.gt.f32.partialorder %v3198_v2, 1.0  ;;  %v3241_v63 = vadd.f32 %v3198_v2, %v7049_v56 }
 0x2f7   :  { %v3773_v34 = vpop.f32.mrf.mxu0  ;;  %v4974_v14 = vsel %vm3206_vm0, 1.0, %v5402_v17 }
 0x2f8   :  { %v3963_v5 = vpop.f32.mrf.mxu1  ;;  %v3774_v52 = vadd.f32 %v7323_v59, %v3773_v34  ;;  %vm3207_vm2 = vcmp.gt.f32.partialorder %v3199_v31, 1.0  ;;  %v3249_v47 = vsub.f32 %v3241_v63, %v4974_v14  ;;  %v3242_v48 = vadd.f32 %v3199_v31, %v7063_v50 }
 0x2f9   :  { %v3775_v23 = vpop.f32.mrf.mxu0  ;;  %v4975_v45 = vsel %vm3207_vm2, 1.0, %v5402_v17  ;;  %5212 = vmatprep.mubr.msk.f32.mxu1 %vm3207_vm2, %v7688_v61 }
 0x2fa   :  { %v3965_v38 = vpop.f32.mrf.mxu1  ;;  %v7407_v3 = vadd.f32 %v3963_v5, %v3774_v52  ;;  %v3292_v10 = vadd.f32 %v3249_v47, %v7049_v56  ;;  %5213 = vmatmul.mubr.msk.f32.gmra.mxu1 %vm3206_vm0, %v7688_v61  ;;  %v3250_v55 = vsub.f32 %v3242_v48, %v4975_v45  ;;  %vm3257_vm3 = vcmp.gt.f32.partialorder %v3249_v47, 1.0 }
 0x2fb   :  { %v3778_v37 = vpop.f32.mrf.mxu0  ;;  %v4982_v26 = vsel %vm3257_vm3, 1.0, %v5402_v17 }
 0x2fc   :  { %v3968_v58 = vpop.f32.mrf.mxu1  ;;  %v3779_v39 = vadd.f32 %v7323_v59, %v3778_v37  ;;  %vm3258_vm14 = vcmp.gt.f32.partialorder %v3250_v55, 1.0  ;;  %v3293_v7 = vadd.f32 %v3250_v55, %v7063_v50  ;;  %v3300_v56 = vsub.f32 %v3292_v10, %v4982_v26 }
 0x2fd   :  { %v3780_v60 = vpop.f32.mrf.mxu0  ;;  %v4983_v32 = vsel %vm3258_vm14, 1.0, %v5402_v17  ;;  %5214 = vmatprep.mubr.msk.f32.mxu1 %vm3258_vm14, %v7688_v61 }
 0x2fe   :  { %v3970_v13 = vpop.f32.mrf.mxu1  ;;  %v7416_v24 = vadd.f32 %v3968_v58, %v3779_v39  ;;  %5215 = vmatmul.mubr.msk.f32.gmra.mxu1 %vm3257_vm3, %v7688_v61  ;;  %v3301_v29 = vsub.f32 %v3293_v7, %v4983_v32  ;;  %vm3308_vm9 = vcmp.gt.f32.partialorder %v3300_v56, 1.0 }
 0x2ff   :  { %v3783_v33 = vpop.f32.mrf.mxu0 }
 0x300   :  { %v3973_v49 = vpop.f32.mrf.mxu1  ;;  %v3784_v16 = vadd.f32 %v7323_v59, %v3783_v33  ;;  %vm3309_vm6 = vcmp.gt.f32.partialorder %v3301_v29, 1.0 }
 0x301   :  { %v3785_v1 = vpop.f32.mrf.mxu0  ;;  %5216 = vmatprep.mubr.msk.f32.mxu1 %vm3309_vm6, %v7688_v61 }
 0x302   :  { %v3975_v43 = vpop.f32.mrf.mxu1  ;;  %v7421_v50 = vadd.f32 %v3973_v49, %v3784_v16  ;;  %5217 = vmatmul.mubr.msk.f32.gmra.mxu1 %vm3308_vm9, %v7688_v61 }
 0x303   :  { %v3788_v28 = vpop.f32.mrf.mxu0 }
 0x304   :  { %v3978_v4 = vpop.f32.mrf.mxu1  ;;  %v3789_v0 = vadd.f32 %v7323_v59, %v3788_v28 }
 0x305   :  { %v3790_v12 = vpop.f32.mrf.mxu0 }
 0x306   :  { %v3980_v53 = vpop.f32.mrf.mxu1  ;;  %v7425_v25 = vadd.f32 %v3978_v4, %v3789_v0 }
 0x307   :  { %v3793_v57 = vpop.f32.mrf.mxu0 }
 0x308   :  { %v3983_v8 = vpop.f32.mrf.mxu1  ;;  %v3794_v27 = vadd.f32 %v7323_v59, %v3793_v57 }
 0x309   :  { %v3795_v36 = vpop.f32.mrf.mxu0 }
 0x30a   :  { %v3985_v54 = vpop.f32.mrf.mxu1  ;;  %v7428_v6 = vadd.f32 %v3983_v8, %v3794_v27 }
 0x30b   :  { %v3798_v35 = vpop.f32.mrf.mxu0 }
 0x30c   :  { %v3988_v46 = vpop.f32.mrf.mxu1  ;;  %v3799_v61 = vadd.f32 %v7323_v59, %v3798_v35 }
 0x30d   :  { %v3800_v41 = vpop.f32.mrf.mxu0 }
 0x30e   :  { %v3990_v20 = vpop.f32.mrf.mxu1  ;;  %v7431_v30 = vadd.f32 %v3988_v46, %v3799_v61 }
 0x30f   :  { %v3803_v21 = vpop.f32.mrf.mxu0 }
 0x310   :  { %v3993_v62 = vpop.f32.mrf.mxu1  ;;  %v3804_v2 = vadd.f32 %v7323_v59, %v3803_v21 }
 0x311   :  { %v3805_v44 = vpop.f32.mrf.mxu0 }
 0x312   :  { %v3995_v42 = vpop.f32.mrf.mxu1  ;;  %v7434_v15 = vadd.f32 %v3993_v62, %v3804_v2 }
 0x313   :  { %v3808_v31 = vpop.f32.mrf.mxu0 }
 0x314   :  { %v3998_v63 = vpop.f32.mrf.mxu1  ;;  %v3809_v34 = vadd.f32 %v7323_v59, %v3808_v31 }
 0x315   :  { %v3810_v5 = vpop.f32.mrf.mxu0 }
 0x316   :  { %v4000_v14 = vpop.f32.mrf.mxu1  ;;  %v7437_v52 = vadd.f32 %v3998_v63, %v3809_v34 }
 0x317   :  { %v3813_v47 = vpop.f32.mrf.mxu0 }
 0x318   :  { %v4003_v48 = vpop.f32.mrf.mxu1  ;;  %v3814_v23 = vadd.f32 %v7323_v59, %v3813_v47 }
 0x319   :  { %v3815_v38 = vpop.f32.mrf.mxu0 }
 0x31a   :  { %v4005_v45 = vpop.f32.mrf.mxu1  ;;  %v7440_v10 = vadd.f32 %v4003_v48, %v3814_v23 }
 0x31b   :  { %v3818_v55 = vpop.f32.mrf.mxu0 }
 0x31c   :  { %v4008_v37 = vpop.f32.mrf.mxu1  ;;  %v3819_v58 = vadd.f32 %v7323_v59, %v3818_v55 }
 0x31d   :  { %v3820_v26 = vpop.f32.mrf.mxu0 }
 0x31e   :  { %v4010_v39 = vpop.f32.mrf.mxu1  ;;  %v7443_v7 = vadd.f32 %v4008_v37, %v3819_v58 }
 0x31f   :  { %v3823_v60 = vpop.f32.mrf.mxu0 }
 0x320   :  { %v4013_v13 = vpop.f32.mrf.mxu1  ;;  %v3824_v32 = vadd.f32 %v7323_v59, %v3823_v60 }
 0x321   :  { %v3825_v56 = vpop.f32.mrf.mxu0 }
 0x322   :  { %v4015_v29 = vpop.f32.mrf.mxu1  ;;  %v7446_v33 = vadd.f32 %v4013_v13, %v3824_v32 }
 0x323   :  { %v3828_v49 = vpop.f32.mrf.mxu0 }
 0x324   :  { %v4018_v16 = vpop.f32.mrf.mxu1  ;;  %v3829_v1 = vadd.f32 %v7323_v59, %v3828_v49 }
 0x325   :  { %v3830_v43 = vpop.f32.mrf.mxu0 }
 0x326   :  { %v4020_v28 = vpop.f32.mrf.mxu1  ;;  %v7449_v4 = vadd.f32 %v4018_v16, %v3829_v1 }
 0x327   :  { %v3833_v12 = vpop.f32.mrf.mxu0 }
 0x328   :  { %v4023_v0 = vpop.f32.mrf.mxu1  ;;  %v3834_v53 = vadd.f32 %v7323_v59, %v3833_v12 }
 0x329   :  { %v3835_v8 = vpop.f32.mrf.mxu0 }
 0x32a   :  { %v4025_v57 = vpop.f32.mrf.mxu1  ;;  %v7452_v27 = vadd.f32 %v4023_v0, %v3834_v53 }
 0x32c   :  { %v4028_v36 = vpop.f32.mrf.mxu1 }
 0x32d   :  { %v3838_v54 = vpop.f32.mrf.mxu0 }
 0x32e   :  { %v4030_v35 = vpop.f32.mrf.mxu1  ;;  %v3839_v46 = vadd.f32 %v7323_v59, %v3838_v54 }
 0x32f   :  { %v3840_v61 = vpop.f32.mrf.mxu0 }
 0x330   :  { %v4033_v41 = vpop.f32.mrf.mxu1  ;;  %v7455_v20 = vadd.f32 %v4028_v36, %v3839_v46 }
 0x332   :  { %v3843_v21 = vpop.f32.mrf.mxu0  ;;  %v4035_v62 = vpop.f32.mrf.mxu1 }
 0x333   :  { %v3844_v2 = vadd.f32 %v7323_v59, %v3843_v21 }
 0x334   :  { %v3845_v44 = vpop.f32.mrf.mxu0  ;;  %v4038_v42 = vpop.f32.mrf.mxu1 }
 0x335   :  { %v7458_v31 = vadd.f32 %v4033_v41, %v3844_v2 }
 0x336   :  { %v3848_v63 = vpop.f32.mrf.mxu0  ;;  %v4040_v34 = vpop.f32.mrf.mxu1 }
 0x337   :  { %v3849_v5 = vadd.f32 %v7323_v59, %v3848_v63 }
 0x338   :  { %v3850_v14 = vpop.f32.mrf.mxu0  ;;  %v4043_v47 = vpop.f32.mrf.mxu1 }
 0x339   :  { %v7461_v48 = vadd.f32 %v4038_v42, %v3849_v5 }
 0x33a   :  { %v3853_v23 = vpop.f32.mrf.mxu0  ;;  %v4045_v38 = vpop.f32.mrf.mxu1 }
 0x33b   :  { %v3854_v45 = vadd.f32 %v7323_v59, %v3853_v23 }
 0x33c   :  { %v3855_v55 = vpop.f32.mrf.mxu0  ;;  %v4048_v37 = vpop.f32.mrf.mxu1 }
 0x33d   :  { %v7464_v58 = vadd.f32 %v4043_v47, %v3854_v45 }
 0x33e   :  { %v3858_v26 = vpop.f32.mrf.mxu0  ;;  %v4050_v39 = vpop.f32.mrf.mxu1 }
 0x33f   :  { %v3859_v60 = vadd.f32 %v7323_v59, %v3858_v26 }
 0x340   :  { %v3860_v13 = vpop.f32.mrf.mxu0 }
 0x341   :  { %v7467_v32 = vadd.f32 %v4048_v37, %v3859_v60 }
 0x342   :  { %v4118_v56 = vpop.f32.mrf.mxu0 }
 0x343   :  { %v4119_v46 = vadd.f32 %v4118_v56, %v7339_v18 }
 0x344   :  { %v4120_v29 = vpop.f32.mrf.mxu0 }
 0x346   :  { %v4123_v49 = vpop.f32.mrf.mxu0 }
 0x347   :  { %v4124_v44 = vadd.f32 %v4123_v49, %v7352_v51 }
 0x348   :  { %v4125_v16 = vpop.f32.mrf.mxu0 }
 0x34a   :  { %v4128_v1 = vpop.f32.mrf.mxu0 }
 0x34b   :  { %v4129_v18 = vadd.f32 %v4128_v1, %v7362_v9 }
 0x34c   :  { %v4130_v43 = vpop.f32.mrf.mxu0 }
 0x34e   :  { %v4133_v28 = vpop.f32.mrf.mxu0 }
 0x34f   :  { %v4134_v39 = vadd.f32 %v4133_v28, %v7371_v19 }
 0x350   :  { %v4135_v0 = vpop.f32.mrf.mxu0 }
 0x352   :  { %v4138_v12 = vpop.f32.mrf.mxu0 }
 0x353   :  { %v4139_v43 = vadd.f32 %v4138_v12, %v7380_v40 }
 0x354   :  { %v4140_v53 = vpop.f32.mrf.mxu0 }
 0x356   :  { %v4143_v57 = vpop.f32.mrf.mxu0 }
 0x358   :  { %v4145_v8 = vpop.f32.mrf.mxu0 }
 0x35a   :  { %v7469_v36 = vpop.f32.mrf.mxu0 }
 0x35c   :  { %v4150_v54 = vpop.f32.mrf.mxu0 }
 0x35e   :  { %v7471_v35 = vpop.f32.mrf.mxu0 }
 0x360   :  { %v4155_v59 = vpop.f32.mrf.mxu0 }
 0x362   :  { %v7474_v61 = vpop.f32.mrf.mxu0  ;;  %v4308_v41 = vpop.f32.mrf.mxu1 }
 0x363   :  { %v4309_v62 = vadd.f32 %v4308_v41, %v4119_v46  ;;  %v4144_v41 = vadd.f32 %v4143_v57, %v7389_v11 }
 0x364   :  { %v4160_v21 = vpop.f32.mrf.mxu0  ;;  %v4310_v2 = vpop.f32.mrf.mxu1 }
 0x365   :  { %vm4460_vm11 = vcmp.gt.f32.partialorder %v4309_v62, 1.0  ;;  %4464 = vst [vmem:[#allocation14] sm:$0xff] %v4309_v62 }
 0x366   :  { %v7477_v42 = vpop.f32.mrf.mxu0  ;;  %v4993_v63 = vsel %vm4460_vm11, 1.0, %v5402_v17  ;;  %v4313_v34 = vpop.f32.mrf.mxu1 }
 0x367   :  { %4463 = vst [vmem:[#allocation13] sm:$0xff] %v4993_v63  ;;  %v4314_v14 = vadd.f32 %v4313_v34, %v4124_v44 }
 0x368   :  { %v4165_v5 = vpop.f32.mrf.mxu0  ;;  %v4315_v47 = vpop.f32.mrf.mxu1 }
 0x369   :  { %v4467_v38 = vadd.f32 %v4314_v14, %v4309_v62  ;;  %v4149_v5 = vadd.f32 %v7469_v36, %v7398_v22 }
 0x36a   :  { %v7481_v23 = vpop.f32.mrf.mxu0  ;;  %v4318_v45 = vpop.f32.mrf.mxu1 }
 0x36b   :  { %v4468_v55 = vsub.f32 %v4467_v38, %v4993_v63  ;;  %v4319_v51 = vadd.f32 %v4318_v45, %v4129_v18 }
 0x36c   :  { %v4170_v37 = vpop.f32.mrf.mxu0  ;;  %v4320_v26 = vpop.f32.mrf.mxu1 }
 0x36d   :  { %vm4469_vm4 = vcmp.gt.f32.partialorder %v4468_v55, 1.0  ;;  %4475 = vst [vmem:[#allocation14 + $0x8] sm:$0xff] %v4468_v55  ;;  %v4478_v13 = vadd.f32 %v4468_v55, %v4319_v51  ;;  %v4154_v37 = vadd.f32 %v7471_v35, %v7407_v3 }
 0x36e   :  { %v7484_v60 = vpop.f32.mrf.mxu0  ;;  %v4994_v56 = vsel %vm4469_vm4, 1.0, %v5402_v17  ;;  %v4323_v29 = vpop.f32.mrf.mxu1 }
 0x36f   :  { %4473 = vst [vmem:[#allocation13 + $0x8] sm:$0xff] %v4994_v56  ;;  %v4479_v9 = vsub.f32 %v4478_v13, %v4994_v56  ;;  %v4324_v16 = vadd.f32 %v4323_v29, %v4134_v39 }
 0x370   :  { %v4175_v49 = vpop.f32.mrf.mxu0  ;;  %v4325_v1 = vpop.f32.mrf.mxu1 }
 0x371   :  { %vm4480_vm13 = vcmp.gt.f32.partialorder %v4479_v9, 1.0  ;;  %4486 = vst [vmem:[#allocation14 + $0x10] sm:$0xff] %v4479_v9  ;;  %v4489_v19 = vadd.f32 %v4479_v9, %v4324_v16  ;;  %v4159_v9 = vadd.f32 %v7474_v61, %v7416_v24 }
 0x372   :  { %v7488_v0 = vpop.f32.mrf.mxu0  ;;  %v4995_v28 = vsel %vm4480_vm13, 1.0, %v5402_v17  ;;  %v4328_v53 = vpop.f32.mrf.mxu1 }
 0x373   :  { %4484 = vst [vmem:[#allocation13 + $0x10] sm:$0xff] %v4995_v28  ;;  %v4490_v8 = vsub.f32 %v4489_v19, %v4995_v28  ;;  %v4329_v59 = vadd.f32 %v4328_v53, %v4139_v43  ;;  %v4164_v53 = vadd.f32 %v7477_v42, %v7421_v50 }
 0x374   :  { %v4180_v54 = vpop.f32.mrf.mxu0  ;;  %v4330_v46 = vpop.f32.mrf.mxu1 }
 0x375   :  { %vm4491_vm5 = vcmp.gt.f32.partialorder %v4490_v8, 1.0  ;;  %4497 = vst [vmem:[#allocation14 + $0x18] sm:$0xff] %v4490_v8  ;;  %v4500_v40 = vadd.f32 %v4490_v8, %v4329_v59 }
 0x376   :  { %v7492_v21 = vpop.f32.mrf.mxu0  ;;  %v4996_v12 = vsel %vm4491_vm5, 1.0, %v5402_v17  ;;  %v4333_v62 = vpop.f32.mrf.mxu1 }
 0x377   :  { %4495 = vst [vmem:[#allocation13 + $0x18] sm:$0xff] %v4996_v12  ;;  %v4501_v2 = vsub.f32 %v4500_v40, %v4996_v12  ;;  %v4334_v63 = vadd.f32 %v4333_v62, %v4144_v41  ;;  %v4169_v12 = vadd.f32 %v7481_v23, %v7425_v25 }
 0x378   :  { %v4185_v44 = vpop.f32.mrf.mxu0  ;;  %v4335_v34 = vpop.f32.mrf.mxu1 }
 0x379   :  { %vm4502_vm1 = vcmp.gt.f32.partialorder %v4501_v2, 1.0  ;;  %4508 = vst [vmem:[#allocation14 + $0x20] sm:$0xff] %v4501_v2  ;;  %v4511_v11 = vadd.f32 %v4501_v2, %v4334_v63 }
 0x37a   :  { %v7497_v14 = vpop.f32.mrf.mxu0  ;;  %v4997_v57 = vsel %vm4502_vm1, 1.0, %v5402_v17  ;;  %v4338_v47 = vpop.f32.mrf.mxu1 }
 0x37b   :  { %4506 = vst [vmem:[#allocation13 + $0x20] sm:$0xff] %v4997_v57  ;;  %v4512_v18 = vsub.f32 %v4511_v11, %v4997_v57  ;;  %v4339_v45 = vadd.f32 %v4338_v47, %v4149_v5  ;;  %v4174_v11 = vadd.f32 %v7484_v60, %v7428_v6 }
 0x37c   :  { %v4190_v38 = vpop.f32.mrf.mxu0  ;;  %v4340_v55 = vpop.f32.mrf.mxu1 }
 0x37d   :  { %vm4513_vm7 = vcmp.gt.f32.partialorder %v4512_v18, 1.0  ;;  %4519 = vst [vmem:[#allocation14 + $0x28] sm:$0xff] %v4512_v18  ;;  %v4522_v22 = vadd.f32 %v4512_v18, %v4339_v45 }
 0x37e   :  { %v7502_v51 = vpop.f32.mrf.mxu0  ;;  %v4998_v36 = vsel %vm4513_vm7, 1.0, %v5402_v17  ;;  %v4343_v26 = vpop.f32.mrf.mxu1 }
 0x37f   :  { %4517 = vst [vmem:[#allocation13 + $0x28] sm:$0xff] %v4998_v36  ;;  %v4523_v39 = vsub.f32 %v4522_v22, %v4998_v36  ;;  %v4344_v56 = vadd.f32 %v4343_v26, %v4154_v37  ;;  %v4179_v37 = vadd.f32 %v7488_v0, %v7431_v30 }
 0x380   :  { %v4195_v13 = vpop.f32.mrf.mxu0  ;;  %v4345_v29 = vpop.f32.mrf.mxu1 }
 0x381   :  { %vm4524_vm12 = vcmp.gt.f32.partialorder %v4523_v39, 1.0  ;;  %4530 = vst [vmem:[#allocation14 + $0x30] sm:$0xff] %v4523_v39  ;;  %v4533_v3 = vadd.f32 %v4523_v39, %v4344_v56  ;;  %v4184_v29 = vadd.f32 %v7492_v21, %v7434_v15 }
 0x382   :  { %v7507_v49 = vpop.f32.mrf.mxu0  ;;  %v4999_v35 = vsel %vm4524_vm12, 1.0, %v5402_v17  ;;  %v4348_v16 = vpop.f32.mrf.mxu1 }
 0x383   :  { %4528 = vst [vmem:[#allocation13 + $0x30] sm:$0xff] %v4999_v35  ;;  %v4534_v1 = vsub.f32 %v4533_v3, %v4999_v35  ;;  %v4349_v19 = vadd.f32 %v4348_v16, %v4159_v9 }
 0x384   :  { %v4200_v43 = vpop.f32.mrf.mxu0  ;;  %v4350_v28 = vpop.f32.mrf.mxu1 }
 0x385   :  { %vm4535_vm15 = vcmp.gt.f32.partialorder %v4534_v1, 1.0  ;;  %4541 = vst [vmem:[#allocation14 + $0x38] sm:$0xff] %v4534_v1  ;;  %v4544_v24 = vadd.f32 %v4534_v1, %v4349_v19  ;;  %v4189_v19 = vadd.f32 %v7497_v14, %v7437_v52 }
 0x386   :  { %v7512_v8 = vpop.f32.mrf.mxu0  ;;  %v5000_v61 = vsel %vm4535_vm15, 1.0, %v5402_v17  ;;  %v4353_v54 = vpop.f32.mrf.mxu1 }
 0x387   :  { %4539 = vst [vmem:[#allocation13 + $0x38] sm:$0xff] %v5000_v61  ;;  %v4545_v59 = vsub.f32 %v4544_v24, %v5000_v61  ;;  %v4354_v41 = vadd.f32 %v4353_v54, %v4164_v53 }
 0x388   :  { %v4205_v46 = vpop.f32.mrf.mxu0  ;;  %v4355_v40 = vpop.f32.mrf.mxu1 }
 0x389   :  { %vm4546_vm8 = vcmp.gt.f32.partialorder %v4545_v59, 1.0  ;;  %4552 = vst [vmem:[#allocation14 + $0x40] sm:$0xff] %v4545_v59  ;;  %v4555_v50 = vadd.f32 %v4545_v59, %v4354_v41  ;;  %v4194_v46 = vadd.f32 %v7502_v51, %v7440_v10 }
 0x38a   :  { %v7517_v62 = vpop.f32.mrf.mxu0  ;;  %v5001_v42 = vsel %vm4546_vm8, 1.0, %v5402_v17  ;;  %v4358_v2 = vpop.f32.mrf.mxu1 }
 0x38b   :  { %4550 = vst [vmem:[#allocation13 + $0x40] sm:$0xff] %v5001_v42  ;;  %v4556_v44 = vsub.f32 %v4555_v50, %v5001_v42  ;;  %v4359_v34 = vadd.f32 %v4358_v2, %v4169_v12 }
 0x38c   :  { %v4210_v63 = vpop.f32.mrf.mxu0  ;;  %v4360_v5 = vpop.f32.mrf.mxu1 }
 0x38d   :  { %4563 = vst [vmem:[#allocation14 + $0x48] sm:$0xff] %v4556_v44  ;;  %vm4557_vm10 = vcmp.gt.f32.partialorder %v4556_v44, 1.0  ;;  %v4566_v25 = vadd.f32 %v4556_v44, %v4359_v34  ;;  %v4199_v44 = vadd.f32 %v7507_v49, %v7443_v7 }
 0x38e   :  { %v7522_v57 = vpop.f32.mrf.mxu0  ;;  %v5002_v23 = vsel %vm4557_vm10, 1.0, %v5402_v17  ;;  %v4363_v47 = vpop.f32.mrf.mxu1 }
 0x38f   :  { %v4567_v18 = vsub.f32 %v4566_v25, %v5002_v23  ;;  %4561 = vst [vmem:[#allocation13 + $0x48] sm:$0xff] %v5002_v23  ;;  %v4364_v45 = vadd.f32 %v4363_v47, %v4174_v11  ;;  %v4204_v47 = vadd.f32 %v7512_v8, %v7446_v33 }
 0x390   :  { %v4215_v38 = vpop.f32.mrf.mxu0  ;;  %v4365_v55 = vpop.f32.mrf.mxu1 }
 0x391   :  { %4574 = vst [vmem:[#allocation14 + $0x50] sm:$0xff] %v4567_v18  ;;  %vm4568_vm0 = vcmp.gt.f32.partialorder %v4567_v18, 1.0  ;;  %v4577_v6 = vadd.f32 %v4567_v18, %v4364_v45 }
 0x392   :  { %v7527_v22 = vpop.f32.mrf.mxu0  ;;  %v5003_v60 = vsel %vm4568_vm0, 1.0, %v5402_v17  ;;  %v4368_v36 = vpop.f32.mrf.mxu1 }
 0x393   :  { %4572 = vst [vmem:[#allocation13 + $0x50] sm:$0xff] %v5003_v60  ;;  %v4578_v26 = vsub.f32 %v4577_v6, %v5003_v60  ;;  %v4369_v13 = vadd.f32 %v4368_v36, %v4179_v37  ;;  %v4209_v37 = vadd.f32 %v7517_v62, %v7449_v4 }
 0x394   :  { %v4220_v39 = vpop.f32.mrf.mxu0  ;;  %v4370_v56 = vpop.f32.mrf.mxu1 }
 0x395   :  { %4585 = vst [vmem:[#allocation14 + $0x58] sm:$0xff] %v4578_v26  ;;  %vm4579_vm2 = vcmp.gt.f32.partialorder %v4578_v26, 1.0  ;;  %v4588_v30 = vadd.f32 %v4578_v26, %v4369_v13  ;;  %v4214_v39 = vadd.f32 %v7522_v57, %v7452_v27 }
 0x396   :  { %v7532_v9 = vpop.f32.mrf.mxu0  ;;  %v5004_v0 = vsel %vm4579_vm2, 1.0, %v5402_v17  ;;  %v4373_v3 = vpop.f32.mrf.mxu1 }
 0x397   :  { %4583 = vst [vmem:[#allocation13 + $0x58] sm:$0xff] %v5004_v0  ;;  %v4589_v35 = vsub.f32 %v4588_v30, %v5004_v0  ;;  %v4374_v1 = vadd.f32 %v4373_v3, %v4184_v29  ;;  %v4219_v0 = vadd.f32 %v7527_v22, %v7455_v20 }
 0x398   :  { %v4225_v16 = vpop.f32.mrf.mxu0  ;;  %v4375_v43 = vpop.f32.mrf.mxu1 }
 0x399   :  { %4596 = vst [vmem:[#allocation14 + $0x60] sm:$0xff] %v4589_v35  ;;  %vm4590_vm3 = vcmp.gt.f32.partialorder %v4589_v35, 1.0  ;;  %v4599_v15 = vadd.f32 %v4589_v35, %v4374_v1  ;;  %v4224_v43 = vadd.f32 %v7532_v9, %v7458_v31 }
 0x39a   :  { %v7537_v28 = vpop.f32.mrf.mxu0  ;;  %v5005_v21 = vsel %vm4590_vm3, 1.0, %v5402_v17  ;;  %v4378_v53 = vpop.f32.mrf.mxu1 }
 0x39b   :  { %4594 = vst [vmem:[#allocation13 + $0x60] sm:$0xff] %v5005_v21  ;;  %v4600_v24 = vsub.f32 %v4599_v15, %v5005_v21  ;;  %v4379_v54 = vadd.f32 %v4378_v53, %v4189_v19 }
 0x39c   :  { %v4230_v61 = vpop.f32.mrf.mxu0  ;;  %v4380_v59 = vpop.f32.mrf.mxu1 }
 0x39d   :  { %4607 = vst [vmem:[#allocation14 + $0x68] sm:$0xff] %v4600_v24  ;;  %vm4601_vm14 = vcmp.gt.f32.partialorder %v4600_v24, 1.0  ;;  %v4610_v52 = vadd.f32 %v4600_v24, %v4379_v54  ;;  %v4229_v24 = vadd.f32 %v7537_v28, %v7461_v48 }
 0x39e   :  { %v7542_v41 = vpop.f32.mrf.mxu0  ;;  %v5006_v14 = vsel %vm4601_vm14, 1.0, %v5402_v17  ;;  %v4383_v40 = vpop.f32.mrf.mxu1 }
 0x39f   :  { %4605 = vst [vmem:[#allocation13 + $0x68] sm:$0xff] %v5006_v14  ;;  %v4611_v12 = vsub.f32 %v4610_v52, %v5006_v14  ;;  %v4384_v42 = vadd.f32 %v4383_v40, %v4194_v46  ;;  %v4234_v52 = vadd.f32 %v7542_v41, %v7464_v58 }
 0x3a0   :  { %v4235_v50 = vpop.f32.mrf.mxu0  ;;  %v4385_v2 = vpop.f32.mrf.mxu1 }
 0x3a1   :  { %4618 = vst [vmem:[#allocation14 + $0x70] sm:$0xff] %v4611_v12  ;;  %vm4612_vm6 = vcmp.gt.f32.partialorder %v4611_v12, 1.0  ;;  %v4621_v10 = vadd.f32 %v4611_v12, %v4384_v42 }
 0x3a2   :  { %v7547_v63 = vpop.f32.mrf.mxu0  ;;  %v5007_v51 = vsel %vm4612_vm6, 1.0, %v5402_v17  ;;  %v4388_v34 = vpop.f32.mrf.mxu1 }
 0x3a3   :  { %4616 = vst [vmem:[#allocation13 + $0x70] sm:$0xff] %v5007_v51  ;;  %v4622_v5 = vsub.f32 %v4621_v10, %v5007_v51  ;;  %v4389_v25 = vadd.f32 %v4388_v34, %v4199_v44  ;;  %v4239_v42 = vadd.f32 %v7547_v63, %v7467_v32 }
 0x3a4   :  { %v4240_v11 = vpop.f32.mrf.mxu0  ;;  %v4390_v23 = vpop.f32.mrf.mxu1 }
 0x3a5   :  { %4629 = vst [vmem:[#allocation14 + $0x78] sm:$0xff] %v4622_v5  ;;  %vm4623_vm9 = vcmp.gt.f32.partialorder %v4622_v5, 1.0  ;;  %v4632_v18 = vadd.f32 %v4622_v5, %v4389_v25 }
 0x3a6   :  { %v5008_v7 = vsel %vm4623_vm9, 1.0, %v5402_v17  ;;  %v4393_v49 = vpop.f32.mrf.mxu1 }
 0x3a7   :  { %4627 = vst [vmem:[#allocation13 + $0x78] sm:$0xff] %v5008_v7  ;;  %v4633_v38 = vsub.f32 %v4632_v18, %v5008_v7  ;;  %v4394_v45 = vadd.f32 %v4393_v49, %v4204_v47 }
 0x3a8   :  { %v4395_v55 = vpop.f32.mrf.mxu1 }
 0x3a9   :  { %4640 = vst [vmem:[#allocation14 + $0x80] sm:$0xff] %v4633_v38  ;;  %vm4634_vm11 = vcmp.gt.f32.partialorder %v4633_v38, 1.0  ;;  %v4643_v6 = vadd.f32 %v4633_v38, %v4394_v45 }
 0x3aa   :  { %v5009_v60 = vsel %vm4634_vm11, 1.0, %v5402_v17  ;;  %v4398_v36 = vpop.f32.mrf.mxu1 }
 0x3ab   :  { %4638 = vst [vmem:[#allocation13 + $0x80] sm:$0xff] %v5009_v60  ;;  %v4644_v33 = vsub.f32 %v4643_v6, %v5009_v60  ;;  %v4399_v8 = vadd.f32 %v4398_v36, %v4209_v37 }
 0x3ac   :  { %v4400_v26 = vpop.f32.mrf.mxu1 }
 0x3ad   :  { %4651 = vst [vmem:[#allocation14 + $0x88] sm:$0xff] %v4644_v33  ;;  %vm4645_vm4 = vcmp.gt.f32.partialorder %v4644_v33, 1.0  ;;  %v4654_v13 = vadd.f32 %v4644_v33, %v4399_v8 }
 0x3ae   :  { %v5010_v56 = vsel %vm4645_vm4, 1.0, %v5402_v17  ;;  %v4403_v29 = vpop.f32.mrf.mxu1 }
 0x3af   :  { %4649 = vst [vmem:[#allocation13 + $0x88] sm:$0xff] %v5010_v56  ;;  %v4655_v4 = vsub.f32 %v4654_v13, %v5010_v56  ;;  %v4404_v62 = vadd.f32 %v4403_v29, %v4214_v39 }
 0x3b0   :  { %v4405_v30 = vpop.f32.mrf.mxu1 }
 0x3b1   :  { %4662 = vst [vmem:[#allocation14 + $0x90] sm:$0xff] %v4655_v4  ;;  %vm4656_vm13 = vcmp.gt.f32.partialorder %v4655_v4, 1.0  ;;  %v4665_v3 = vadd.f32 %v4655_v4, %v4404_v62 }
 0x3b2   :  { %v5011_v35 = vsel %vm4656_vm13, 1.0, %v5402_v17  ;;  %v4408_v16 = vpop.f32.mrf.mxu1 }
 0x3b3   :  { %4660 = vst [vmem:[#allocation13 + $0x90] sm:$0xff] %v5011_v35  ;;  %v4666_v27 = vsub.f32 %v4665_v3, %v5011_v35  ;;  %v4409_v57 = vadd.f32 %v4408_v16, %v4219_v0 }
 0x3b4   :  { %v4410_v1 = vpop.f32.mrf.mxu1 }
 0x3b5   :  { %4673 = vst [vmem:[#allocation14 + $0x98] sm:$0xff] %v4666_v27  ;;  %vm4667_vm5 = vcmp.gt.f32.partialorder %v4666_v27, 1.0  ;;  %v4676_v19 = vadd.f32 %v4666_v27, %v4409_v57 }
 0x3b6   :  { %v5012_v15 = vsel %vm4667_vm5, 1.0, %v5402_v17  ;;  %v4413_v21 = vpop.f32.mrf.mxu1 }
 0x3b7   :  { %4671 = vst [vmem:[#allocation13 + $0x98] sm:$0xff] %v5012_v15  ;;  %v4677_v20 = vsub.f32 %v4676_v19, %v5012_v15  ;;  %v4414_v22 = vadd.f32 %v4413_v21, %v4224_v43 }
 0x3b8   :  { %v4415_v53 = vpop.f32.mrf.mxu1 }
 0x3b9   :  { %4684 = vst [vmem:[#allocation14 + $0xa0] sm:$0xff] %v4677_v20  ;;  %vm4678_vm1 = vcmp.gt.f32.partialorder %v4677_v20, 1.0  ;;  %v4687_v61 = vadd.f32 %v4677_v20, %v4414_v22 }
 0x3ba   :  { %v5013_v54 = vsel %vm4678_vm1, 1.0, %v5402_v17  ;;  %v4418_v59 = vpop.f32.mrf.mxu1 }
 0x3bb   :  { %4682 = vst [vmem:[#allocation13 + $0xa0] sm:$0xff] %v5013_v54  ;;  %v4688_v31 = vsub.f32 %v4687_v61, %v5013_v54  ;;  %v4419_v9 = vadd.f32 %v4418_v59, %v4229_v24 }
 0x3bc   :  { %v4420_v46 = vpop.f32.mrf.mxu1 }
 0x3bd   :  { %4695 = vst [vmem:[#allocation14 + $0xa8] sm:$0xff] %v4688_v31  ;;  %vm4689_vm7 = vcmp.gt.f32.partialorder %v4688_v31, 1.0  ;;  %v4698_v14 = vadd.f32 %v4688_v31, %v4419_v9 }
 0x3be   :  { %v5014_v40 = vsel %vm4689_vm7, 1.0, %v5402_v17  ;;  %v4423_v12 = vpop.f32.mrf.mxu1 }
 0x3bf   :  { %4693 = vst [vmem:[#allocation13 + $0xa8] sm:$0xff] %v5014_v40  ;;  %v4699_v48 = vsub.f32 %v4698_v14, %v5014_v40  ;;  %v4424_v28 = vadd.f32 %v4423_v12, %v4234_v52 }
 0x3c0   :  { %v4425_v50 = vpop.f32.mrf.mxu1 }
 0x3c1   :  { %4706 = vst [vmem:[#allocation14 + $0xb0] sm:$0xff] %v4699_v48  ;;  %vm4700_vm12 = vcmp.gt.f32.partialorder %v4699_v48, 1.0  ;;  %v4709_v2 = vadd.f32 %v4699_v48, %v4424_v28 }
 0x3c2   :  { %v5015_v44 = vsel %vm4700_vm12, 1.0, %v5402_v17  ;;  %v4428_v10 = vpop.f32.mrf.mxu1 }
 0x3c3   :  { %4704 = vst [vmem:[#allocation13 + $0xb0] sm:$0xff] %v5015_v44  ;;  %v4710_v58 = vsub.f32 %v4709_v2, %v5015_v44  ;;  %v4429_v41 = vadd.f32 %v4428_v10, %v4239_v42 }
 0x3c4   :  { %v4430_v51 = vpop.f32.mrf.mxu1 }
 0x3c5   :  { %4717 = vst [vmem:[#allocation14 + $0xb8] sm:$0xff] %v4710_v58  ;;  %vm4711_vm15 = vcmp.gt.f32.partialorder %v4710_v58, 1.0  ;;  %v4720_v34 = vadd.f32 %v4710_v58, %v4429_v41 }
 0x3c6   :  { %v5016_v5 = vsel %vm4711_vm15, 1.0, %v5402_v17 }
 0x3c7   :  { %4715 = vst [vmem:[#allocation13 + $0xb8] sm:$0xff] %v5016_v5  ;;  %v4721_v32 = vsub.f32 %v4720_v34, %v5016_v5 }
 0x3c9   :  { %vm4722_vm8 = vcmp.gt.f32.partialorder %v4721_v32, 1.0  ;;  %4728 = vst [vmem:[#allocation14 + $0xc0] sm:$0xff] %v4721_v32 }
 0x3ca   :  { %v5017_v63 = vsel %vm4722_vm8, 1.0, %v5402_v17 }
 0x3cb   :  { %5354 = shalt.err (!%p5351_p1)
}
 0x3cc   :  { %4752 = dma.vmem_to_hbm [thread:$0]  %s4747_s4, 3200, %s7594_s6, [#allocation15], %s5397_s7, %s5397_s7, %s5398_s8   ;;  %4726 = vst [vmem:[#allocation13 + $0xc0] sm:$0xff] %v5017_v63 }
 0x3cd   :  { %s5363_s29 = scalar_lea.vmem %s4735_s25, 3200  ;;  %p5368_p3 = scmp.lt.s32.totalorder %s4735_s25, %s4735_s25 }
 0x3ce   :  { %p5364_p2 = scmp.ne.s32.totalorder %s4735_s25, %s5363_s29  ;;  %p5369_p4 = scmp.lt.s32.totalorder %s5363_s29, %s5363_s29 }
 0x3d0   :  { %p5370_p5 = por %p5369_p4, %p5368_p3 }
 0x3d2   :  { %p5371_p6 = pnand %p5370_p5, %p5364_p2 }
 0x3d4   :  { %5374 = shalt.err (!%p5371_p6)
}
 0x3d5   :  { %4740 = dma.vmem_to_hbm [thread:$0]  %s4735_s25, 3200, %s7593_s5, [#allocation6], %s5397_s7, %s5397_s7, %s5398_s8  }
 0x3d6   :  { %5389 = dma.done.wait [#allocation6], 3200  }
 0x3d7   :  { %5390 = vsyncadd [#allocation6], 4294964096 }
 0x3d8   :  { %5391 = dma.done.wait [#allocation15], 3200  }
 0x3d9   :  { %5392 = vsyncadd [#allocation15], 4294964096 }
 0x3da   :  { %4759 = vsyncpa [#allocation5], 1 }
 0x3db   :  { %4760 = vsyncpa [#allocation8], 1 }
 0x3dc   :  { %4761 = vsyncpa [#allocation11], 1 }
 0x3dd   :  { %4762 = vsyncpa [#allocation6], 1 }
 0x3de   :  { %4763 = vsyncpa [#allocation15], 1 }

</bundles_post_ra>
